<compile_context>
chip_gen: v6e
topology: v6e:2x2x1
jax: 0.10.0
libtpu: 0.0.40
codegen_flags: <defaults>
</compile_context>

<pallas_src>
import jax
import jax.numpy as jnp
from jax import lax
from jax.experimental import pallas as pl
from jax.experimental.pallas import tpu as pltpu


# Conv matmul operand dtype.  Set to jnp.float32 for bit-closer parity with the
# f32 PyTorch reference; bf16 gives ~3-4x MXU throughput on v6e/v7x.
_MXU_DTYPE = jnp.bfloat16


# -----------------------------------------------------------------------------
# Host-side (XLA wrapper) helpers: hoisted constants & weight preprocessing
# -----------------------------------------------------------------------------
def _standardize_weight(w, eps=1e-5):
    """WeightStandardizedConv2d: per-out-channel zero-mean / unit-var weights.
    HWIO layout; reduction over (KH, KW, Cin); torch.var(unbiased=False).
    Two-pass mean/var in f32 (avoids E[x^2]-E[x]^2 cancellation)."""
    mean = jnp.mean(w, axis=(0, 1, 2), keepdims=True)
    var = jnp.var(w, axis=(0, 1, 2), keepdims=True)
    return (w - mean) * lax.rsqrt(var + eps)


def _hwio_to_matmul(w):
    """(KH, KW, Cin, Cout) -> (KH*KW*Cin, Cout), tap-major row order that
    matches the in-kernel tap loop (row = kh*KW*Cin + kw*Cin + cin)."""
    KH, KW, Cin, Cout = w.shape
    return w.reshape(KH * KW * Cin, Cout)


def _input_im2col(x_nhwc):
    """Host-side im2col of the tiny-channel network input for the init conv:
    (N, H, W, Cin) -> (N, H*W, Kp) with Kp = 9*Cin rounded up to 8 (zero pad).
    Lets the init conv be a single K-dense matmul inside the kernel."""
    N, H, W, Cin = x_nhwc.shape
    xp = jnp.pad(x_nhwc, ((0, 0), (1, 1), (1, 1), (0, 0)))
    taps = [xp[:, kh:kh + H, kw:kw + W, :].reshape(N, H * W, Cin)
            for kh in range(3) for kw in range(3)]
    col = jnp.concatenate(taps, axis=-1)
    K = col.shape[-1]
    Kp = max(8, ((K + 7) // 8) * 8)
    if Kp > K:
        col = jnp.pad(col, ((0, 0), (0, 0), (0, Kp - K)))
    return col


def _group_indicator(C, groups):
    """(C, C) 0/1 same-group indicator for lane-dense GroupNorm reduction."""
    Cg = C // groups
    idx = jnp.arange(C)
    return (idx[:, None] // Cg == idx[None, :] // Cg).astype(jnp.float32)


def _stride2_select_matrix(H, W):
    """(M/4, M) one-hot matrix selecting the even-(row, col) positions of a
    flat (H*W, C) stride-1 conv output == the stride-2 conv output."""
    H2, W2 = H // 2, W // 2
    M, M2 = H * W, H2 * W2
    r = jnp.arange(M2)
    target = (r // W2) * (2 * W) + (r % W2) * 2
    return (jnp.arange(M)[None, :] == target[:, None]).astype(jnp.float32)


def _avgpool_matrix(H, W):
    """(M/4, M) 2x2 average-pool matrix.  Exact factor-2 bilinear downsample
    (align_corners=False) is identical to 2x2 average pooling."""
    H2, W2 = H // 2, W // 2
    M, M2 = H * W, H2 * W2
    r = jnp.arange(M2)
    base = (r // W2) * (2 * W) + (r % W2) * 2
    c = jnp.arange(M)[None, :]
    b = base[:, None]
    hit = (c == b) | (c == b + 1) | (c == b + W) | (c == b + W + 1)
    return jnp.where(hit, 0.25, 0.0).astype(jnp.float32)


def _const_spec(a):
    """BlockSpec for a small constant operand: full block, same block index
    every grid step (Pallas skips the re-DMA when the index is unchanged)."""
    assert a.ndim == 2
    return pl.BlockSpec(a.shape, lambda n: (0, 0))


# -----------------------------------------------------------------------------
# In-kernel building blocks (traced inline; shape arguments are Python ints)
# -----------------------------------------------------------------------------
def _store_padded(xp_ref, val_flat, H, W):
    """Write a flat (H*W, C) activation into the interior of the (H+2, W+2, C)
    zero-padded VMEM scratch.  Only the 1-element border is re-zeroed each
    step (cheap); a pid==0 one-time init would be wrong under megacore since
    the batch grid axis is 'parallel'."""
    C = xp_ref.shape[-1]
    xp_ref[1:H + 1, 1:W + 1, :] = val_flat.reshape(H, W, C)
    zrow = jnp.zeros((1, W + 2, C), jnp.float32)
    xp_ref[0:1, :, :] = zrow
    xp_ref[H + 1:H + 2, :, :] = zrow
    zcol = jnp.zeros((H, 1, C), jnp.float32)
    xp_ref[1:H + 1, 0:1, :] = zcol
    xp_ref[1:H + 1, W + 1:W + 2, :] = zcol


def _conv3x3_taps(xp_ref, w_ref, H, W, Cin):
    """Stride-1 3x3 conv over the zero-padded (H+2, W+2, Cin) scratch.

    w_ref: pre-standardized weight reshaped to (9*Cin, Cout) in bf16.  One
    image-level (H*W, Cin) @ (Cin, Cout) MXU matmul per tap, accumulated in
    registers (f32) -- no per-tap VMEM accumulator round-trips."""
    M = H * W
    acc = None
    t = 0
    for kh in range(3):
        for kw in range(3):
            xt = xp_ref[kh:kh + H, kw:kw + W, :].reshape(M, Cin)
            xt = xt.astype(w_ref.dtype)
            wt = w_ref[t * Cin:(t + 1) * Cin, :]
            c = jnp.dot(xt, wt, preferred_element_type=jnp.float32)
            acc = c if acc is None else acc + c
            t += 1
    return acc


def _group_norm(y, gamma, beta, G, *, groups, silu, eps=1e-5):
    """GroupNorm (+ optional SiLU) on a flat (M, C) image, all stats in f32.
    Per-channel sums reduce over sublanes; group reduce + broadcast-back is a
    (1, C) @ (C, C) matmul against the hoisted same-group indicator G."""
    M, C = y.shape
    inv_cnt = 1.0 / float(M * (C // groups))
    colsum = jnp.sum(y, axis=0, keepdims=True)                   # (1, C)
    colsq = jnp.sum(y * y, axis=0, keepdims=True)                # (1, C)
    mean_c = jnp.dot(colsum, G, preferred_element_type=jnp.float32) * inv_cnt
    ex2_c = jnp.dot(colsq, G, preferred_element_type=jnp.float32) * inv_cnt
    var_c = jnp.maximum(ex2_c - mean_c * mean_c, 0.0)
    inv_c = lax.rsqrt(var_c + eps)
    out = (y - mean_c) * (inv_c * gamma) + beta
    if silu:
        out = out * jax.nn.sigmoid(out)
    return out


# -----------------------------------------------------------------------------
# Single fused pallas_call for the whole ConditionEncoder forward
# -----------------------------------------------------------------------------
def condition_encoder_forward(params, x_nchw):
    x = jnp.transpose(x_nchw, (0, 2, 3, 1)).astype(jnp.float32)  # NCHW -> NHWC
    N, H0, W0, in_dim = x.shape

    pin = params["init"]
    dim = pin["w"].shape[-1]
    groups0 = pin["groups"]
    M0 = H0 * W0

    # ---- hoisted constants / preprocessed weights (plain XLA, tiny) --------
    x_col = _input_im2col(x)                                     # (N, M0, K0p)
    K0p = x_col.shape[-1]
    w0 = jnp.zeros((K0p, dim), jnp.float32)
    w0 = w0.at[:9 * in_dim].set(_hwio_to_matmul(pin["w"])).astype(_MXU_DTYPE)
    v0 = jnp.stack([pin["b"], pin["gamma"], pin["beta"],
                    jnp.zeros((dim,), jnp.float32)], axis=0)     # (4, dim)
    g0 = _group_indicator(dim, groups0)

    inputs = [x_col, w0, v0, g0]
    block_meta = []
    scratch_shapes = []
    bH, bW = H0, W0
    for d in params["downs"]:
        cin, cout = d["b1_w"].shape[2], d["b1_w"].shape[3]
        g = d["groups"]
        w1 = _hwio_to_matmul(_standardize_weight(d["b1_w"])).astype(_MXU_DTYPE)
        w2 = _hwio_to_matmul(_standardize_weight(d["b2_w"])).astype(_MXU_DTYPE)
        if "res_w" in d:
            wr = d["res_w"].reshape(cin, cout)
            rb = d["res_b"]
        else:                                  # res_conv == nn.Identity
            wr = jnp.eye(cin, cout, dtype=jnp.float32)
            rb = jnp.zeros((cout,), jnp.float32)
        wr = wr.astype(_MXU_DTYPE)
        v = jnp.stack([d["b1_b"], d["b1_gamma"], d["b1_beta"],
                       d["b2_b"], d["b2_gamma"], d["b2_beta"],
                       rb, jnp.zeros((cout,), jnp.float32)], axis=0)  # (8, cout)
        S = _stride2_select_matrix(bH, bW)
        P = _avgpool_matrix(bH, bW)
        G = _group_indicator(cout, g)
        inputs += [w1, w2, wr, v, S, P, G]
        block_meta.append((bH, bW, cin, cout, g))
        scratch_shapes += [pltpu.VMEM((bH + 2, bW + 2, cin), jnp.float32),
                           pltpu.VMEM((bH + 2, bW + 2, cout), jnp.float32)]
        bH, bW = bH // 2, bW // 2

    c_last = params["out"]["w"].shape[2]
    out_dim = params["out"]["w"].shape[3]
    wo = params["out"]["w"].reshape(c_last, out_dim).astype(_MXU_DTYPE)
    bo = params["out"]["b"].reshape(1, out_dim).astype(jnp.float32)
    inputs += [wo, bo]

    n_in = len(inputs)
    n_blocks = len(block_meta)
    Hf, Wf = bH, bW
    Mf = Hf * Wf

    def kernel(*refs):
        in_refs = list(refs[:n_in])
        o_ref = refs[n_in]
        scratch = refs[n_in + 1:]
        xc_ref, w0_ref, v0_ref, g0_ref = in_refs[:4]

        # ---- init_conv: 3x3 conv (host-built im2col, single K matmul)
        #      + bias + GroupNorm ------------------------------------------
        h = jnp.dot(xc_ref[0].astype(_MXU_DTYPE), w0_ref[...],
                    preferred_element_type=jnp.float32)
        h = h + v0_ref[0:1, :]
        h = _group_norm(h, v0_ref[1:2, :], v0_ref[2:3, :], g0_ref[...],
                        groups=groups0, silu=False)              # (M0, dim)

        # ---- ResnetDownsampleBlocks (time_emb is None -> no scale/shift) --
        for bi, (mH, mW, cin, cout, g) in enumerate(block_meta):
            (w1_ref, w2_ref, wr_ref, v_ref, s_ref, p_ref, g_ref) = \
                in_refs[4 + 7 * bi: 4 + 7 * (bi + 1)]
            xpa, xpb = scratch[2 * bi], scratch[2 * bi + 1]

            # block1: WSConv3x3(pad 1) -> GN(8) -> SiLU
            _store_padded(xpa, h, mH, mW)
            a1 = _conv3x3_taps(xpa, w1_ref, mH, mW, cin) + v_ref[0:1, :]
            t1 = _group_norm(a1, v_ref[1:2, :], v_ref[2:3, :], g_ref[...],
                             groups=g, silu=True)                # (M, cout)

            # block2: WSConv3x3(stride 2, pad 1) -> GN(8) -> SiLU.
            # Stride-2 = hoisted one-hot selection matmul on the stride-1 out.
            _store_padded(xpb, t1, mH, mW)
            a2 = _conv3x3_taps(xpb, w2_ref, mH, mW, cout)
            y2 = jnp.dot(s_ref[...], a2,
                         preferred_element_type=jnp.float32) + v_ref[3:4, :]
            t2 = _group_norm(y2, v_ref[4:5, :], v_ref[5:6, :], g_ref[...],
                             groups=g, silu=True)                # (M/4, cout)

            # residual: conv1x1(factor-2 bilinear downsample == 2x2 avg pool)
            pooled = jnp.dot(p_ref[...], h,
                             preferred_element_type=jnp.float32)  # (M/4, cin)
            res = jnp.dot(pooled.astype(_MXU_DTYPE), wr_ref[...],
                          preferred_element_type=jnp.float32) + v_ref[6:7, :]
            h = t2 + res

        # ---- out_conv (1x1) ------------------------------------------------
        wo_ref, bo_ref = in_refs[-2], in_refs[-1]
        y = jnp.dot(h.astype(_MXU_DTYPE), wo_ref[...],
                    preferred_element_type=jnp.float32) + bo_ref[...]
        o_ref[0] = y.astype(o_ref.dtype)

    in_specs = [pl.BlockSpec((1, M0, K0p), lambda n: (n, 0, 0))]
    in_specs += [_const_spec(a) for a in inputs[1:]]

    out = pl.pallas_call(
        kernel,
        out_shape=jax.ShapeDtypeStruct((N, Mf, out_dim), jnp.float32),
        grid=(N,),
        in_specs=in_specs,
        out_specs=pl.BlockSpec((1, Mf, out_dim), lambda n: (n, 0, 0)),
        scratch_shapes=scratch_shapes,
        compiler_params=pltpu.CompilerParams(
            dimension_semantics=("parallel",)),
    )(*inputs)

    y = out.reshape(N, Hf, Wf, out_dim)                          # free bitcast
    return jnp.transpose(y, (0, 3, 1, 2))                        # NHWC -> NCHW


# -----------------------------------------------------------------------------
# Deterministic parameter init (synthetic, matches module __init__ shapes).
# -----------------------------------------------------------------------------
def init_params(key, *, dim=32, down_dim_mults=(2, 4), in_dim=1, out_dim=32):
    keys = iter(jax.random.split(key, 64))

    def conv_init(k, kh, kw, cin, cout, scale=0.1):
        k1, k2 = jax.random.split(k)
        w = scale * jax.random.normal(k1, (kh, kw, cin, cout), jnp.float32)
        b = 0.05 * jax.random.normal(k2, (cout,), jnp.float32)
        return w, b

    def gn_init(k, c):
        k1, k2 = jax.random.split(k)
        gamma = 1.0 + 0.1 * jax.random.normal(k1, (c,), jnp.float32)
        beta = 0.1 * jax.random.normal(k2, (c,), jnp.float32)
        return gamma, beta

    params = {}
    w, b = conv_init(next(keys), 3, 3, in_dim, dim)
    gamma, beta = gn_init(next(keys), dim)
    params["init"] = dict(w=w, b=b, gamma=gamma, beta=beta,
                          groups=min(dim // 4, 8))

    in_mults = (1,) + tuple(down_dim_mults[:-1])
    downs = []
    for im, om in zip(in_mults, down_dim_mults):
        cin, cout = im * dim, om * dim
        w1, b1 = conv_init(next(keys), 3, 3, cin, cout)
        g1, be1 = gn_init(next(keys), cout)
        w2, b2 = conv_init(next(keys), 3, 3, cout, cout)
        g2, be2 = gn_init(next(keys), cout)
        blk = dict(b1_w=w1, b1_b=b1, b1_gamma=g1, b1_beta=be1,
                   b2_w=w2, b2_b=b2, b2_gamma=g2, b2_beta=be2, groups=8)
        if cin != cout:                       # module uses Identity otherwise
            wr, br = conv_init(next(keys), 1, 1, cin, cout)
            blk["res_w"], blk["res_b"] = wr, br
        downs.append(blk)
    params["downs"] = downs

    last = down_dim_mults[-1] * dim if len(down_dim_mults) >= 1 else dim
    wo, bo = conv_init(next(keys), 1, 1, last, out_dim)
    params["out"] = dict(w=wo, b=bo)
    return params


if __name__ == "__main__":
    key = jax.random.PRNGKey(0)
    kp, kx = jax.random.split(key)

    dim, down_dim_mults, in_dim, out_dim = 32, (2, 4), 1, 32
    params = init_params(kp, dim=dim, down_dim_mults=down_dim_mults,
                         in_dim=in_dim, out_dim=out_dim)

    # PyTorch-convention NCHW input: batch=2, channels=1, 16x16
    x = jax.random.normal(kx, (2, in_dim, 16, 16), dtype=jnp.float32)

    fwd = jax.jit(lambda inp: condition_encoder_forward(params, inp))
    y = jax.block_until_ready(fwd(x))

    assert y.shape == (2, out_dim, 16 // (2 ** len(down_dim_mults)),
                       16 // (2 ** len(down_dim_mults))), y.shape
    assert bool(jnp.all(jnp.isfinite(y)))
    print("KERNEL_OK")
</pallas_src>

<mosaic_0001>
module attributes {stable_mosaic.version = 11 : i64} {
  func.func @kernel(%arg0: i32, %arg1: memref<1x256x16xf32, #tpu.memory_space<vmem>>, %arg2: memref<16x32xbf16, #tpu.memory_space<vmem>>, %arg3: memref<4x32xf32, #tpu.memory_space<vmem>>, %arg4: memref<32x32xf32, #tpu.memory_space<vmem>>, %arg5: memref<288x64xbf16, #tpu.memory_space<vmem>>, %arg6: memref<576x64xbf16, #tpu.memory_space<vmem>>, %arg7: memref<32x64xbf16, #tpu.memory_space<vmem>>, %arg8: memref<8x64xf32, #tpu.memory_space<vmem>>, %arg9: memref<64x256xf32, #tpu.memory_space<vmem>>, %arg10: memref<64x256xf32, #tpu.memory_space<vmem>>, %arg11: memref<64x64xf32, #tpu.memory_space<vmem>>, %arg12: memref<576x128xbf16, #tpu.memory_space<vmem>>, %arg13: memref<1152x128xbf16, #tpu.memory_space<vmem>>, %arg14: memref<64x128xbf16, #tpu.memory_space<vmem>>, %arg15: memref<8x128xf32, #tpu.memory_space<vmem>>, %arg16: memref<16x64xf32, #tpu.memory_space<vmem>>, %arg17: memref<16x64xf32, #tpu.memory_space<vmem>>, %arg18: memref<128x128xf32, #tpu.memory_space<vmem>>, %arg19: memref<128x32xbf16, #tpu.memory_space<vmem>>, %arg20: memref<1x32xf32, #tpu.memory_space<vmem>>, %arg21: memref<1x16x32xf32, #tpu.memory_space<vmem>>, %arg22: memref<18x18x32xf32, #tpu.memory_space<vmem>>, %arg23: memref<18x18x64xf32, #tpu.memory_space<vmem>>, %arg24: memref<10x10x64xf32, #tpu.memory_space<vmem>>, %arg25: memref<10x10x128xf32, #tpu.memory_space<vmem>>) attributes {dimension_semantics = [#tpu.dimension_semantics<parallel>], iteration_bounds = array<i64: 2>, scalar_prefetch = 0 : i64, scratch_operands = 4 : i64, tpu.core_type = #tpu.core_type<tc>, window_params = [{transform_indices = @transform_0, window_bounds = array<i64: 1, 256, 16>}, {pipeline_mode = #tpu.pipeline_mode<synchronous>, transform_indices = @transform_1, window_bounds = array<i64: 16, 32>}, {pipeline_mode = #tpu.pipeline_mode<synchronous>, transform_indices = @transform_2, window_bounds = array<i64: 4, 32>}, {pipeline_mode = #tpu.pipeline_mode<synchronous>, transform_indices = @transform_3, window_bounds = array<i64: 32, 32>}, {pipeline_mode = #tpu.pipeline_mode<synchronous>, transform_indices = @transform_4, window_bounds = array<i64: 288, 64>}, {pipeline_mode = #tpu.pipeline_mode<synchronous>, transform_indices = @transform_5, window_bounds = array<i64: 576, 64>}, {pipeline_mode = #tpu.pipeline_mode<synchronous>, transform_indices = @transform_6, window_bounds = array<i64: 32, 64>}, {pipeline_mode = #tpu.pipeline_mode<synchronous>, transform_indices = @transform_7, window_bounds = array<i64: 8, 64>}, {pipeline_mode = #tpu.pipeline_mode<synchronous>, transform_indices = @transform_8, window_bounds = array<i64: 64, 256>}, {pipeline_mode = #tpu.pipeline_mode<synchronous>, transform_indices = @transform_9, window_bounds = array<i64: 64, 256>}, {pipeline_mode = #tpu.pipeline_mode<synchronous>, transform_indices = @transform_10, window_bounds = array<i64: 64, 64>}, {pipeline_mode = #tpu.pipeline_mode<synchronous>, transform_indices = @transform_11, window_bounds = array<i64: 576, 128>}, {pipeline_mode = #tpu.pipeline_mode<synchronous>, transform_indices = @transform_12, window_bounds = array<i64: 1152, 128>}, {pipeline_mode = #tpu.pipeline_mode<synchronous>, transform_indices = @transform_13, window_bounds = array<i64: 64, 128>}, {pipeline_mode = #tpu.pipeline_mode<synchronous>, transform_indices = @transform_14, window_bounds = array<i64: 8, 128>}, {pipeline_mode = #tpu.pipeline_mode<synchronous>, transform_indices = @transform_15, window_bounds = array<i64: 16, 64>}, {pipeline_mode = #tpu.pipeline_mode<synchronous>, transform_indices = @transform_16, window_bounds = array<i64: 16, 64>}, {pipeline_mode = #tpu.pipeline_mode<synchronous>, transform_indices = @transform_17, window_bounds = array<i64: 128, 128>}, {pipeline_mode = #tpu.pipeline_mode<synchronous>, transform_indices = @transform_18, window_bounds = array<i64: 128, 32>}, {pipeline_mode = #tpu.pipeline_mode<synchronous>, transform_indices = @transform_19, window_bounds = array<i64: 1, 32>}, {transform_indices = @transform_20, window_bounds = array<i64: 1, 16, 32>}]} {
    %c0 = arith.constant 0 : index
    %c0_0 = arith.constant 0 : index
    %c0_1 = arith.constant 0 : index
    %0 = vector.load %arg1[%c0, %c0_0, %c0_1] : memref<1x256x16xf32, #tpu.memory_space<vmem>>, vector<1x256x16xf32>
    %1 = vector.shape_cast %0 : vector<1x256x16xf32> to vector<256x16xf32>
    %2 = arith.truncf %1 : vector<256x16xf32> to vector<256x16xbf16>
    %c0_2 = arith.constant 0 : index
    %c0_3 = arith.constant 0 : index
    %3 = vector.load %arg2[%c0_2, %c0_3] : memref<16x32xbf16, #tpu.memory_space<vmem>>, vector<16x32xbf16>
    %cst = arith.constant dense<0.000000e+00> : vector<256x32xf32>
    %4 = tpu.matmul %2, %3, %cst {dimension_numbers = #tpu.dot_dimension_numbers<[1], [0], [0], [1], [0, 0, 1, 1], [], []>} : vector<256x16xbf16>, vector<16x32xbf16>, vector<256x32xf32> -> vector<256x32xf32>
    %c0_4 = arith.constant 0 : index
    %c0_5 = arith.constant 0 : index
    %5 = vector.load %arg3[%c0_4, %c0_5] : memref<4x32xf32, #tpu.memory_space<vmem>>, vector<1x32xf32>
    %6 = vector.broadcast %5 : vector<1x32xf32> to vector<256x32xf32>
    %7 = arith.addf %4, %6 : vector<256x32xf32>
    %c1 = arith.constant 1 : index
    %c0_6 = arith.constant 0 : index
    %8 = vector.load %arg3[%c1, %c0_6] : memref<4x32xf32, #tpu.memory_space<vmem>>, vector<1x32xf32>
    %c2 = arith.constant 2 : index
    %c0_7 = arith.constant 0 : index
    %9 = vector.load %arg3[%c2, %c0_7] : memref<4x32xf32, #tpu.memory_space<vmem>>, vector<1x32xf32>
    %c0_8 = arith.constant 0 : index
    %c0_9 = arith.constant 0 : index
    %10 = vector.load %arg4[%c0_8, %c0_9] : memref<32x32xf32, #tpu.memory_space<vmem>>, vector<32x32xf32>
    %cst_10 = arith.constant dense<0.000000e+00> : vector<32xf32>
    %11 = vector.multi_reduction <add>, %7, %cst_10 [0] : vector<256x32xf32> to vector<32xf32>
    %12 = vector.shape_cast %11 : vector<32xf32> to vector<1x32xf32>
    %13 = arith.mulf %7, %7 : vector<256x32xf32>
    %cst_11 = arith.constant dense<0.000000e+00> : vector<32xf32>
    %14 = vector.multi_reduction <add>, %13, %cst_11 [0] : vector<256x32xf32> to vector<32xf32>
    %15 = vector.shape_cast %14 : vector<32xf32> to vector<1x32xf32>
    %cst_12 = arith.constant dense<0.000000e+00> : vector<1x32xf32>
    %16 = tpu.matmul %12, %10, %cst_12 {dimension_numbers = #tpu.dot_dimension_numbers<[1], [0], [0], [1], [0, 0, 1, 1], [], []>} : vector<1x32xf32>, vector<32x32xf32>, vector<1x32xf32> -> vector<1x32xf32>
    %cst_13 = arith.constant 9.765625E-4 : f32
    %17 = vector.broadcast %cst_13 : f32 to vector<1x32xf32>
    %18 = arith.mulf %16, %17 : vector<1x32xf32>
    %cst_14 = arith.constant dense<0.000000e+00> : vector<1x32xf32>
    %19 = tpu.matmul %15, %10, %cst_14 {dimension_numbers = #tpu.dot_dimension_numbers<[1], [0], [0], [1], [0, 0, 1, 1], [], []>} : vector<1x32xf32>, vector<32x32xf32>, vector<1x32xf32> -> vector<1x32xf32>
    %cst_15 = arith.constant 9.765625E-4 : f32
    %20 = vector.broadcast %cst_15 : f32 to vector<1x32xf32>
    %21 = arith.mulf %19, %20 : vector<1x32xf32>
    %22 = arith.mulf %18, %18 : vector<1x32xf32>
    %23 = arith.subf %21, %22 : vector<1x32xf32>
    %cst_16 = arith.constant 0.000000e+00 : f32
    %24 = vector.broadcast %cst_16 : f32 to vector<1x32xf32>
    %25 = arith.maximumf %23, %24 : vector<1x32xf32>
    %cst_17 = arith.constant 9.99999974E-6 : f32
    %26 = vector.broadcast %cst_17 : f32 to vector<1x32xf32>
    %27 = arith.addf %25, %26 : vector<1x32xf32>
    %28 = math.rsqrt %27 : vector<1x32xf32>
    %29 = vector.broadcast %18 : vector<1x32xf32> to vector<256x32xf32>
    %30 = arith.subf %7, %29 : vector<256x32xf32>
    %31 = arith.mulf %28, %8 : vector<1x32xf32>
    %32 = vector.broadcast %31 : vector<1x32xf32> to vector<256x32xf32>
    %33 = arith.mulf %30, %32 : vector<256x32xf32>
    %34 = vector.broadcast %9 : vector<1x32xf32> to vector<256x32xf32>
    %35 = arith.addf %33, %34 : vector<256x32xf32>
    %36 = vector.shape_cast %35 : vector<256x32xf32> to vector<16x16x32xf32>
    %c1_18 = arith.constant 1 : index
    %c1_19 = arith.constant 1 : index
    %c0_20 = arith.constant 0 : index
    %37 = vector.load %arg22[%c1_18, %c1_19, %c0_20] : memref<18x18x32xf32, #tpu.memory_space<vmem>>, vector<16x16x32xf32>
    tpu.vector_store %arg22[%c1_18, %c1_19, %c0_20], %36 {strides = array<i32>} : memref<18x18x32xf32, #tpu.memory_space<vmem>>, vector<16x16x32xf32>,
    %cst_21 = arith.constant 0.000000e+00 : f32
    %38 = vector.broadcast %cst_21 : f32 to vector<1x18x32xf32>
    %c0_22 = arith.constant 0 : index
    %c0_23 = arith.constant 0 : index
    %c0_24 = arith.constant 0 : index
    %39 = vector.load %arg22[%c0_22, %c0_23, %c0_24] : memref<18x18x32xf32, #tpu.memory_space<vmem>>, vector<1x18x32xf32>
    tpu.vector_store %arg22[%c0_22, %c0_23, %c0_24], %38 {strides = array<i32>} : memref<18x18x32xf32, #tpu.memory_space<vmem>>, vector<1x18x32xf32>,
    %c17 = arith.constant 17 : index
    %c0_25 = arith.constant 0 : index
    %c0_26 = arith.constant 0 : index
    %40 = vector.load %arg22[%c17, %c0_25, %c0_26] : memref<18x18x32xf32, #tpu.memory_space<vmem>>, vector<1x18x32xf32>
    tpu.vector_store %arg22[%c17, %c0_25, %c0_26], %38 {strides = array<i32>} : memref<18x18x32xf32, #tpu.memory_space<vmem>>, vector<1x18x32xf32>,
    %cst_27 = arith.constant 0.000000e+00 : f32
    %41 = vector.broadcast %cst_27 : f32 to vector<16x1x32xf32>
    %c1_28 = arith.constant 1 : index
    %c0_29 = arith.constant 0 : index
    %c0_30 = arith.constant 0 : index
    %42 = vector.load %arg22[%c1_28, %c0_29, %c0_30] : memref<18x18x32xf32, #tpu.memory_space<vmem>>, vector<16x1x32xf32>
    tpu.vector_store %arg22[%c1_28, %c0_29, %c0_30], %41 {strides = array<i32>} : memref<18x18x32xf32, #tpu.memory_space<vmem>>, vector<16x1x32xf32>,
    %c1_31 = arith.constant 1 : index
    %c17_32 = arith.constant 17 : index
    %c0_33 = arith.constant 0 : index
    %43 = vector.load %arg22[%c1_31, %c17_32, %c0_33] : memref<18x18x32xf32, #tpu.memory_space<vmem>>, vector<16x1x32xf32>
    tpu.vector_store %arg22[%c1_31, %c17_32, %c0_33], %41 {strides = array<i32>} : memref<18x18x32xf32, #tpu.memory_space<vmem>>, vector<16x1x32xf32>,
    %c0_34 = arith.constant 0 : index
    %c0_35 = arith.constant 0 : index
    %c0_36 = arith.constant 0 : index
    %44 = vector.load %arg22[%c0_34, %c0_35, %c0_36] : memref<18x18x32xf32, #tpu.memory_space<vmem>>, vector<16x16x32xf32>
    %45 = vector.shape_cast %44 : vector<16x16x32xf32> to vector<256x32xf32>
    %46 = arith.truncf %45 : vector<256x32xf32> to vector<256x32xbf16>
    %c0_37 = arith.constant 0 : index
    %c0_38 = arith.constant 0 : index
    %47 = vector.load %arg5[%c0_37, %c0_38] : memref<288x64xbf16, #tpu.memory_space<vmem>>, vector<32x64xbf16>
    %cst_39 = arith.constant dense<0.000000e+00> : vector<256x64xf32>
    %48 = tpu.matmul %46, %47, %cst_39 {dimension_numbers = #tpu.dot_dimension_numbers<[1], [0], [0], [1], [0, 0, 1, 1], [], []>} : vector<256x32xbf16>, vector<32x64xbf16>, vector<256x64xf32> -> vector<256x64xf32>
    %c0_40 = arith.constant 0 : index
    %c1_41 = arith.constant 1 : index
    %c0_42 = arith.constant 0 : index
    %49 = vector.load %arg22[%c0_40, %c1_41, %c0_42] : memref<18x18x32xf32, #tpu.memory_space<vmem>>, vector<16x16x32xf32>
    %50 = vector.shape_cast %49 : vector<16x16x32xf32> to vector<256x32xf32>
    %51 = arith.truncf %50 : vector<256x32xf32> to vector<256x32xbf16>
    %c32 = arith.constant 32 : index
    %c0_43 = arith.constant 0 : index
    %52 = vector.load %arg5[%c32, %c0_43] : memref<288x64xbf16, #tpu.memory_space<vmem>>, vector<32x64xbf16>
    %cst_44 = arith.constant dense<0.000000e+00> : vector<256x64xf32>
    %53 = tpu.matmul %51, %52, %cst_44 {dimension_numbers = #tpu.dot_dimension_numbers<[1], [0], [0], [1], [0, 0, 1, 1], [], []>} : vector<256x32xbf16>, vector<32x64xbf16>, vector<256x64xf32> -> vector<256x64xf32>
    %54 = arith.addf %48, %53 : vector<256x64xf32>
    %c0_45 = arith.constant 0 : index
    %c2_46 = arith.constant 2 : index
    %c0_47 = arith.constant 0 : index
    %55 = vector.load %arg22[%c0_45, %c2_46, %c0_47] : memref<18x18x32xf32, #tpu.memory_space<vmem>>, vector<16x16x32xf32>
    %56 = vector.shape_cast %55 : vector<16x16x32xf32> to vector<256x32xf32>
    %57 = arith.truncf %56 : vector<256x32xf32> to vector<256x32xbf16>
    %c64 = arith.constant 64 : index
    %c0_48 = arith.constant 0 : index
    %58 = vector.load %arg5[%c64, %c0_48] : memref<288x64xbf16, #tpu.memory_space<vmem>>, vector<32x64xbf16>
    %cst_49 = arith.constant dense<0.000000e+00> : vector<256x64xf32>
    %59 = tpu.matmul %57, %58, %cst_49 {dimension_numbers = #tpu.dot_dimension_numbers<[1], [0], [0], [1], [0, 0, 1, 1], [], []>} : vector<256x32xbf16>, vector<32x64xbf16>, vector<256x64xf32> -> vector<256x64xf32>
    %60 = arith.addf %54, %59 : vector<256x64xf32>
    %c1_50 = arith.constant 1 : index
    %c0_51 = arith.constant 0 : index
    %c0_52 = arith.constant 0 : index
    %61 = vector.load %arg22[%c1_50, %c0_51, %c0_52] : memref<18x18x32xf32, #tpu.memory_space<vmem>>, vector<16x16x32xf32>
    %62 = vector.shape_cast %61 : vector<16x16x32xf32> to vector<256x32xf32>
    %63 = arith.truncf %62 : vector<256x32xf32> to vector<256x32xbf16>
    %c96 = arith.constant 96 : index
    %c0_53 = arith.constant 0 : index
    %64 = vector.load %arg5[%c96, %c0_53] : memref<288x64xbf16, #tpu.memory_space<vmem>>, vector<32x64xbf16>
    %cst_54 = arith.constant dense<0.000000e+00> : vector<256x64xf32>
    %65 = tpu.matmul %63, %64, %cst_54 {dimension_numbers = #tpu.dot_dimension_numbers<[1], [0], [0], [1], [0, 0, 1, 1], [], []>} : vector<256x32xbf16>, vector<32x64xbf16>, vector<256x64xf32> -> vector<256x64xf32>
    %66 = arith.addf %60, %65 : vector<256x64xf32>
    %c1_55 = arith.constant 1 : index
    %c1_56 = arith.constant 1 : index
    %c0_57 = arith.constant 0 : index
    %67 = vector.load %arg22[%c1_55, %c1_56, %c0_57] : memref<18x18x32xf32, #tpu.memory_space<vmem>>, vector<16x16x32xf32>
    %68 = vector.shape_cast %67 : vector<16x16x32xf32> to vector<256x32xf32>
    %69 = arith.truncf %68 : vector<256x32xf32> to vector<256x32xbf16>
    %c128 = arith.constant 128 : index
    %c0_58 = arith.constant 0 : index
    %70 = vector.load %arg5[%c128, %c0_58] : memref<288x64xbf16, #tpu.memory_space<vmem>>, vector<32x64xbf16>
    %cst_59 = arith.constant dense<0.000000e+00> : vector<256x64xf32>
    %71 = tpu.matmul %69, %70, %cst_59 {dimension_numbers = #tpu.dot_dimension_numbers<[1], [0], [0], [1], [0, 0, 1, 1], [], []>} : vector<256x32xbf16>, vector<32x64xbf16>, vector<256x64xf32> -> vector<256x64xf32>
    %72 = arith.addf %66, %71 : vector<256x64xf32>
    %c1_60 = arith.constant 1 : index
    %c2_61 = arith.constant 2 : index
    %c0_62 = arith.constant 0 : index
    %73 = vector.load %arg22[%c1_60, %c2_61, %c0_62] : memref<18x18x32xf32, #tpu.memory_space<vmem>>, vector<16x16x32xf32>
    %74 = vector.shape_cast %73 : vector<16x16x32xf32> to vector<256x32xf32>
    %75 = arith.truncf %74 : vector<256x32xf32> to vector<256x32xbf16>
    %c160 = arith.constant 160 : index
    %c0_63 = arith.constant 0 : index
    %76 = vector.load %arg5[%c160, %c0_63] : memref<288x64xbf16, #tpu.memory_space<vmem>>, vector<32x64xbf16>
    %cst_64 = arith.constant dense<0.000000e+00> : vector<256x64xf32>
    %77 = tpu.matmul %75, %76, %cst_64 {dimension_numbers = #tpu.dot_dimension_numbers<[1], [0], [0], [1], [0, 0, 1, 1], [], []>} : vector<256x32xbf16>, vector<32x64xbf16>, vector<256x64xf32> -> vector<256x64xf32>
    %78 = arith.addf %72, %77 : vector<256x64xf32>
    %c2_65 = arith.constant 2 : index
    %c0_66 = arith.constant 0 : index
    %c0_67 = arith.constant 0 : index
    %79 = vector.load %arg22[%c2_65, %c0_66, %c0_67] : memref<18x18x32xf32, #tpu.memory_space<vmem>>, vector<16x16x32xf32>
    %80 = vector.shape_cast %79 : vector<16x16x32xf32> to vector<256x32xf32>
    %81 = arith.truncf %80 : vector<256x32xf32> to vector<256x32xbf16>
    %c192 = arith.constant 192 : index
    %c0_68 = arith.constant 0 : index
    %82 = vector.load %arg5[%c192, %c0_68] : memref<288x64xbf16, #tpu.memory_space<vmem>>, vector<32x64xbf16>
    %cst_69 = arith.constant dense<0.000000e+00> : vector<256x64xf32>
    %83 = tpu.matmul %81, %82, %cst_69 {dimension_numbers = #tpu.dot_dimension_numbers<[1], [0], [0], [1], [0, 0, 1, 1], [], []>} : vector<256x32xbf16>, vector<32x64xbf16>, vector<256x64xf32> -> vector<256x64xf32>
    %84 = arith.addf %78, %83 : vector<256x64xf32>
    %c2_70 = arith.constant 2 : index
    %c1_71 = arith.constant 1 : index
    %c0_72 = arith.constant 0 : index
    %85 = vector.load %arg22[%c2_70, %c1_71, %c0_72] : memref<18x18x32xf32, #tpu.memory_space<vmem>>, vector<16x16x32xf32>
    %86 = vector.shape_cast %85 : vector<16x16x32xf32> to vector<256x32xf32>
    %87 = arith.truncf %86 : vector<256x32xf32> to vector<256x32xbf16>
    %c224 = arith.constant 224 : index
    %c0_73 = arith.constant 0 : index
    %88 = vector.load %arg5[%c224, %c0_73] : memref<288x64xbf16, #tpu.memory_space<vmem>>, vector<32x64xbf16>
    %cst_74 = arith.constant dense<0.000000e+00> : vector<256x64xf32>
    %89 = tpu.matmul %87, %88, %cst_74 {dimension_numbers = #tpu.dot_dimension_numbers<[1], [0], [0], [1], [0, 0, 1, 1], [], []>} : vector<256x32xbf16>, vector<32x64xbf16>, vector<256x64xf32> -> vector<256x64xf32>
    %90 = arith.addf %84, %89 : vector<256x64xf32>
    %c2_75 = arith.constant 2 : index
    %c2_76 = arith.constant 2 : index
    %c0_77 = arith.constant 0 : index
    %91 = vector.load %arg22[%c2_75, %c2_76, %c0_77] : memref<18x18x32xf32, #tpu.memory_space<vmem>>, vector<16x16x32xf32>
    %92 = vector.shape_cast %91 : vector<16x16x32xf32> to vector<256x32xf32>
    %93 = arith.truncf %92 : vector<256x32xf32> to vector<256x32xbf16>
    %c256 = arith.constant 256 : index
    %c0_78 = arith.constant 0 : index
    %94 = vector.load %arg5[%c256, %c0_78] : memref<288x64xbf16, #tpu.memory_space<vmem>>, vector<32x64xbf16>
    %cst_79 = arith.constant dense<0.000000e+00> : vector<256x64xf32>
    %95 = tpu.matmul %93, %94, %cst_79 {dimension_numbers = #tpu.dot_dimension_numbers<[1], [0], [0], [1], [0, 0, 1, 1], [], []>} : vector<256x32xbf16>, vector<32x64xbf16>, vector<256x64xf32> -> vector<256x64xf32>
    %96 = arith.addf %90, %95 : vector<256x64xf32>
    %c0_80 = arith.constant 0 : index
    %c0_81 = arith.constant 0 : index
    %97 = vector.load %arg8[%c0_80, %c0_81] : memref<8x64xf32, #tpu.memory_space<vmem>>, vector<1x64xf32>
    %98 = vector.broadcast %97 : vector<1x64xf32> to vector<256x64xf32>
    %99 = arith.addf %96, %98 : vector<256x64xf32>
    %c1_82 = arith.constant 1 : index
    %c0_83 = arith.constant 0 : index
    %100 = vector.load %arg8[%c1_82, %c0_83] : memref<8x64xf32, #tpu.memory_space<vmem>>, vector<1x64xf32>
    %c2_84 = arith.constant 2 : index
    %c0_85 = arith.constant 0 : index
    %101 = vector.load %arg8[%c2_84, %c0_85] : memref<8x64xf32, #tpu.memory_space<vmem>>, vector<1x64xf32>
    %c0_86 = arith.constant 0 : index
    %c0_87 = arith.constant 0 : index
    %102 = vector.load %arg11[%c0_86, %c0_87] : memref<64x64xf32, #tpu.memory_space<vmem>>, vector<64x64xf32>
    %cst_88 = arith.constant dense<0.000000e+00> : vector<64xf32>
    %103 = vector.multi_reduction <add>, %99, %cst_88 [0] : vector<256x64xf32> to vector<64xf32>
    %104 = vector.shape_cast %103 : vector<64xf32> to vector<1x64xf32>
    %105 = arith.mulf %99, %99 : vector<256x64xf32>
    %cst_89 = arith.constant dense<0.000000e+00> : vector<64xf32>
    %106 = vector.multi_reduction <add>, %105, %cst_89 [0] : vector<256x64xf32> to vector<64xf32>
    %107 = vector.shape_cast %106 : vector<64xf32> to vector<1x64xf32>
    %cst_90 = arith.constant dense<0.000000e+00> : vector<1x64xf32>
    %108 = tpu.matmul %104, %102, %cst_90 {dimension_numbers = #tpu.dot_dimension_numbers<[1], [0], [0], [1], [0, 0, 1, 1], [], []>} : vector<1x64xf32>, vector<64x64xf32>, vector<1x64xf32> -> vector<1x64xf32>
    %cst_91 = arith.constant 4.8828125E-4 : f32
    %109 = vector.broadcast %cst_91 : f32 to vector<1x64xf32>
    %110 = arith.mulf %108, %109 : vector<1x64xf32>
    %cst_92 = arith.constant dense<0.000000e+00> : vector<1x64xf32>
    %111 = tpu.matmul %107, %102, %cst_92 {dimension_numbers = #tpu.dot_dimension_numbers<[1], [0], [0], [1], [0, 0, 1, 1], [], []>} : vector<1x64xf32>, vector<64x64xf32>, vector<1x64xf32> -> vector<1x64xf32>
    %cst_93 = arith.constant 4.8828125E-4 : f32
    %112 = vector.broadcast %cst_93 : f32 to vector<1x64xf32>
    %113 = arith.mulf %111, %112 : vector<1x64xf32>
    %114 = arith.mulf %110, %110 : vector<1x64xf32>
    %115 = arith.subf %113, %114 : vector<1x64xf32>
    %cst_94 = arith.constant 0.000000e+00 : f32
    %116 = vector.broadcast %cst_94 : f32 to vector<1x64xf32>
    %117 = arith.maximumf %115, %116 : vector<1x64xf32>
    %cst_95 = arith.constant 9.99999974E-6 : f32
    %118 = vector.broadcast %cst_95 : f32 to vector<1x64xf32>
    %119 = arith.addf %117, %118 : vector<1x64xf32>
    %120 = math.rsqrt %119 : vector<1x64xf32>
    %121 = vector.broadcast %110 : vector<1x64xf32> to vector<256x64xf32>
    %122 = arith.subf %99, %121 : vector<256x64xf32>
    %123 = arith.mulf %120, %100 : vector<1x64xf32>
    %124 = vector.broadcast %123 : vector<1x64xf32> to vector<256x64xf32>
    %125 = arith.mulf %122, %124 : vector<256x64xf32>
    %126 = vector.broadcast %101 : vector<1x64xf32> to vector<256x64xf32>
    %127 = arith.addf %125, %126 : vector<256x64xf32>
    %128 = arith.negf %127 : vector<256x64xf32>
    %129 = math.exp %128 : vector<256x64xf32>
    %cst_96 = arith.constant 1.000000e+00 : f32
    %130 = vector.broadcast %cst_96 : f32 to vector<256x64xf32>
    %131 = arith.addf %130, %129 : vector<256x64xf32>
    %132 = arith.divf %130, %131 : vector<256x64xf32>
    %133 = arith.mulf %127, %132 : vector<256x64xf32>
    %134 = vector.shape_cast %133 : vector<256x64xf32> to vector<16x16x64xf32>
    %c1_97 = arith.constant 1 : index
    %c1_98 = arith.constant 1 : index
    %c0_99 = arith.constant 0 : index
    %135 = vector.load %arg23[%c1_97, %c1_98, %c0_99] : memref<18x18x64xf32, #tpu.memory_space<vmem>>, vector<16x16x64xf32>
    tpu.vector_store %arg23[%c1_97, %c1_98, %c0_99], %134 {strides = array<i32>} : memref<18x18x64xf32, #tpu.memory_space<vmem>>, vector<16x16x64xf32>,
    %cst_100 = arith.constant 0.000000e+00 : f32
    %136 = vector.broadcast %cst_100 : f32 to vector<1x18x64xf32>
    %c0_101 = arith.constant 0 : index
    %c0_102 = arith.constant 0 : index
    %c0_103 = arith.constant 0 : index
    %137 = vector.load %arg23[%c0_101, %c0_102, %c0_103] : memref<18x18x64xf32, #tpu.memory_space<vmem>>, vector<1x18x64xf32>
    tpu.vector_store %arg23[%c0_101, %c0_102, %c0_103], %136 {strides = array<i32>} : memref<18x18x64xf32, #tpu.memory_space<vmem>>, vector<1x18x64xf32>,
    %c17_104 = arith.constant 17 : index
    %c0_105 = arith.constant 0 : index
    %c0_106 = arith.constant 0 : index
    %138 = vector.load %arg23[%c17_104, %c0_105, %c0_106] : memref<18x18x64xf32, #tpu.memory_space<vmem>>, vector<1x18x64xf32>
    tpu.vector_store %arg23[%c17_104, %c0_105, %c0_106], %136 {strides = array<i32>} : memref<18x18x64xf32, #tpu.memory_space<vmem>>, vector<1x18x64xf32>,
    %cst_107 = arith.constant 0.000000e+00 : f32
    %139 = vector.broadcast %cst_107 : f32 to vector<16x1x64xf32>
    %c1_108 = arith.constant 1 : index
    %c0_109 = arith.constant 0 : index
    %c0_110 = arith.constant 0 : index
    %140 = vector.load %arg23[%c1_108, %c0_109, %c0_110] : memref<18x18x64xf32, #tpu.memory_space<vmem>>, vector<16x1x64xf32>
    tpu.vector_store %arg23[%c1_108, %c0_109, %c0_110], %139 {strides = array<i32>} : memref<18x18x64xf32, #tpu.memory_space<vmem>>, vector<16x1x64xf32>,
    %c1_111 = arith.constant 1 : index
    %c17_112 = arith.constant 17 : index
    %c0_113 = arith.constant 0 : index
    %141 = vector.load %arg23[%c1_111, %c17_112, %c0_113] : memref<18x18x64xf32, #tpu.memory_space<vmem>>, vector<16x1x64xf32>
    tpu.vector_store %arg23[%c1_111, %c17_112, %c0_113], %139 {strides = array<i32>} : memref<18x18x64xf32, #tpu.memory_space<vmem>>, vector<16x1x64xf32>,
    %c0_114 = arith.constant 0 : index
    %c0_115 = arith.constant 0 : index
    %c0_116 = arith.constant 0 : index
    %142 = vector.load %arg23[%c0_114, %c0_115, %c0_116] : memref<18x18x64xf32, #tpu.memory_space<vmem>>, vector<16x16x64xf32>
    %143 = vector.shape_cast %142 : vector<16x16x64xf32> to vector<256x64xf32>
    %144 = arith.truncf %143 : vector<256x64xf32> to vector<256x64xbf16>
    %c0_117 = arith.constant 0 : index
    %c0_118 = arith.constant 0 : index
    %145 = vector.load %arg6[%c0_117, %c0_118] : memref<576x64xbf16, #tpu.memory_space<vmem>>, vector<64x64xbf16>
    %cst_119 = arith.constant dense<0.000000e+00> : vector<256x64xf32>
    %146 = tpu.matmul %144, %145, %cst_119 {dimension_numbers = #tpu.dot_dimension_numbers<[1], [0], [0], [1], [0, 0, 1, 1], [], []>} : vector<256x64xbf16>, vector<64x64xbf16>, vector<256x64xf32> -> vector<256x64xf32>
    %c0_120 = arith.constant 0 : index
    %c1_121 = arith.constant 1 : index
    %c0_122 = arith.constant 0 : index
    %147 = vector.load %arg23[%c0_120, %c1_121, %c0_122] : memref<18x18x64xf32, #tpu.memory_space<vmem>>, vector<16x16x64xf32>
    %148 = vector.shape_cast %147 : vector<16x16x64xf32> to vector<256x64xf32>
    %149 = arith.truncf %148 : vector<256x64xf32> to vector<256x64xbf16>
    %c64_123 = arith.constant 64 : index
    %c0_124 = arith.constant 0 : index
    %150 = vector.load %arg6[%c64_123, %c0_124] : memref<576x64xbf16, #tpu.memory_space<vmem>>, vector<64x64xbf16>
    %cst_125 = arith.constant dense<0.000000e+00> : vector<256x64xf32>
    %151 = tpu.matmul %149, %150, %cst_125 {dimension_numbers = #tpu.dot_dimension_numbers<[1], [0], [0], [1], [0, 0, 1, 1], [], []>} : vector<256x64xbf16>, vector<64x64xbf16>, vector<256x64xf32> -> vector<256x64xf32>
    %152 = arith.addf %146, %151 : vector<256x64xf32>
    %c0_126 = arith.constant 0 : index
    %c2_127 = arith.constant 2 : index
    %c0_128 = arith.constant 0 : index
    %153 = vector.load %arg23[%c0_126, %c2_127, %c0_128] : memref<18x18x64xf32, #tpu.memory_space<vmem>>, vector<16x16x64xf32>
    %154 = vector.shape_cast %153 : vector<16x16x64xf32> to vector<256x64xf32>
    %155 = arith.truncf %154 : vector<256x64xf32> to vector<256x64xbf16>
    %c128_129 = arith.constant 128 : index
    %c0_130 = arith.constant 0 : index
    %156 = vector.load %arg6[%c128_129, %c0_130] : memref<576x64xbf16, #tpu.memory_space<vmem>>, vector<64x64xbf16>
    %cst_131 = arith.constant dense<0.000000e+00> : vector<256x64xf32>
    %157 = tpu.matmul %155, %156, %cst_131 {dimension_numbers = #tpu.dot_dimension_numbers<[1], [0], [0], [1], [0, 0, 1, 1], [], []>} : vector<256x64xbf16>, vector<64x64xbf16>, vector<256x64xf32> -> vector<256x64xf32>
    %158 = arith.addf %152, %157 : vector<256x64xf32>
    %c1_132 = arith.constant 1 : index
    %c0_133 = arith.constant 0 : index
    %c0_134 = arith.constant 0 : index
    %159 = vector.load %arg23[%c1_132, %c0_133, %c0_134] : memref<18x18x64xf32, #tpu.memory_space<vmem>>, vector<16x16x64xf32>
    %160 = vector.shape_cast %159 : vector<16x16x64xf32> to vector<256x64xf32>
    %161 = arith.truncf %160 : vector<256x64xf32> to vector<256x64xbf16>
    %c192_135 = arith.constant 192 : index
    %c0_136 = arith.constant 0 : index
    %162 = vector.load %arg6[%c192_135, %c0_136] : memref<576x64xbf16, #tpu.memory_space<vmem>>, vector<64x64xbf16>
    %cst_137 = arith.constant dense<0.000000e+00> : vector<256x64xf32>
    %163 = tpu.matmul %161, %162, %cst_137 {dimension_numbers = #tpu.dot_dimension_numbers<[1], [0], [0], [1], [0, 0, 1, 1], [], []>} : vector<256x64xbf16>, vector<64x64xbf16>, vector<256x64xf32> -> vector<256x64xf32>
    %164 = arith.addf %158, %163 : vector<256x64xf32>
    %c1_138 = arith.constant 1 : index
    %c1_139 = arith.constant 1 : index
    %c0_140 = arith.constant 0 : index
    %165 = vector.load %arg23[%c1_138, %c1_139, %c0_140] : memref<18x18x64xf32, #tpu.memory_space<vmem>>, vector<16x16x64xf32>
    %166 = vector.shape_cast %165 : vector<16x16x64xf32> to vector<256x64xf32>
    %167 = arith.truncf %166 : vector<256x64xf32> to vector<256x64xbf16>
    %c256_141 = arith.constant 256 : index
    %c0_142 = arith.constant 0 : index
    %168 = vector.load %arg6[%c256_141, %c0_142] : memref<576x64xbf16, #tpu.memory_space<vmem>>, vector<64x64xbf16>
    %cst_143 = arith.constant dense<0.000000e+00> : vector<256x64xf32>
    %169 = tpu.matmul %167, %168, %cst_143 {dimension_numbers = #tpu.dot_dimension_numbers<[1], [0], [0], [1], [0, 0, 1, 1], [], []>} : vector<256x64xbf16>, vector<64x64xbf16>, vector<256x64xf32> -> vector<256x64xf32>
    %170 = arith.addf %164, %169 : vector<256x64xf32>
    %c1_144 = arith.constant 1 : index
    %c2_145 = arith.constant 2 : index
    %c0_146 = arith.constant 0 : index
    %171 = vector.load %arg23[%c1_144, %c2_145, %c0_146] : memref<18x18x64xf32, #tpu.memory_space<vmem>>, vector<16x16x64xf32>
    %172 = vector.shape_cast %171 : vector<16x16x64xf32> to vector<256x64xf32>
    %173 = arith.truncf %172 : vector<256x64xf32> to vector<256x64xbf16>
    %c320 = arith.constant 320 : index
    %c0_147 = arith.constant 0 : index
    %174 = vector.load %arg6[%c320, %c0_147] : memref<576x64xbf16, #tpu.memory_space<vmem>>, vector<64x64xbf16>
    %cst_148 = arith.constant dense<0.000000e+00> : vector<256x64xf32>
    %175 = tpu.matmul %173, %174, %cst_148 {dimension_numbers = #tpu.dot_dimension_numbers<[1], [0], [0], [1], [0, 0, 1, 1], [], []>} : vector<256x64xbf16>, vector<64x64xbf16>, vector<256x64xf32> -> vector<256x64xf32>
    %176 = arith.addf %170, %175 : vector<256x64xf32>
    %c2_149 = arith.constant 2 : index
    %c0_150 = arith.constant 0 : index
    %c0_151 = arith.constant 0 : index
    %177 = vector.load %arg23[%c2_149, %c0_150, %c0_151] : memref<18x18x64xf32, #tpu.memory_space<vmem>>, vector<16x16x64xf32>
    %178 = vector.shape_cast %177 : vector<16x16x64xf32> to vector<256x64xf32>
    %179 = arith.truncf %178 : vector<256x64xf32> to vector<256x64xbf16>
    %c384 = arith.constant 384 : index
    %c0_152 = arith.constant 0 : index
    %180 = vector.load %arg6[%c384, %c0_152] : memref<576x64xbf16, #tpu.memory_space<vmem>>, vector<64x64xbf16>
    %cst_153 = arith.constant dense<0.000000e+00> : vector<256x64xf32>
    %181 = tpu.matmul %179, %180, %cst_153 {dimension_numbers = #tpu.dot_dimension_numbers<[1], [0], [0], [1], [0, 0, 1, 1], [], []>} : vector<256x64xbf16>, vector<64x64xbf16>, vector<256x64xf32> -> vector<256x64xf32>
    %182 = arith.addf %176, %181 : vector<256x64xf32>
    %c2_154 = arith.constant 2 : index
    %c1_155 = arith.constant 1 : index
    %c0_156 = arith.constant 0 : index
    %183 = vector.load %arg23[%c2_154, %c1_155, %c0_156] : memref<18x18x64xf32, #tpu.memory_space<vmem>>, vector<16x16x64xf32>
    %184 = vector.shape_cast %183 : vector<16x16x64xf32> to vector<256x64xf32>
    %185 = arith.truncf %184 : vector<256x64xf32> to vector<256x64xbf16>
    %c448 = arith.constant 448 : index
    %c0_157 = arith.constant 0 : index
    %186 = vector.load %arg6[%c448, %c0_157] : memref<576x64xbf16, #tpu.memory_space<vmem>>, vector<64x64xbf16>
    %cst_158 = arith.constant dense<0.000000e+00> : vector<256x64xf32>
    %187 = tpu.matmul %185, %186, %cst_158 {dimension_numbers = #tpu.dot_dimension_numbers<[1], [0], [0], [1], [0, 0, 1, 1], [], []>} : vector<256x64xbf16>, vector<64x64xbf16>, vector<256x64xf32> -> vector<256x64xf32>
    %188 = arith.addf %182, %187 : vector<256x64xf32>
    %c2_159 = arith.constant 2 : index
    %c2_160 = arith.constant 2 : index
    %c0_161 = arith.constant 0 : index
    %189 = vector.load %arg23[%c2_159, %c2_160, %c0_161] : memref<18x18x64xf32, #tpu.memory_space<vmem>>, vector<16x16x64xf32>
    %190 = vector.shape_cast %189 : vector<16x16x64xf32> to vector<256x64xf32>
    %191 = arith.truncf %190 : vector<256x64xf32> to vector<256x64xbf16>
    %c512 = arith.constant 512 : index
    %c0_162 = arith.constant 0 : index
    %192 = vector.load %arg6[%c512, %c0_162] : memref<576x64xbf16, #tpu.memory_space<vmem>>, vector<64x64xbf16>
    %cst_163 = arith.constant dense<0.000000e+00> : vector<256x64xf32>
    %193 = tpu.matmul %191, %192, %cst_163 {dimension_numbers = #tpu.dot_dimension_numbers<[1], [0], [0], [1], [0, 0, 1, 1], [], []>} : vector<256x64xbf16>, vector<64x64xbf16>, vector<256x64xf32> -> vector<256x64xf32>
    %194 = arith.addf %188, %193 : vector<256x64xf32>
    %c0_164 = arith.constant 0 : index
    %c0_165 = arith.constant 0 : index
    %195 = vector.load %arg9[%c0_164, %c0_165] : memref<64x256xf32, #tpu.memory_space<vmem>>, vector<64x256xf32>
    %cst_166 = arith.constant dense<0.000000e+00> : vector<64x64xf32>
    %196 = tpu.matmul %195, %194, %cst_166 {dimension_numbers = #tpu.dot_dimension_numbers<[1], [0], [0], [1], [0, 0, 1, 1], [], []>} : vector<64x256xf32>, vector<256x64xf32>, vector<64x64xf32> -> vector<64x64xf32>
    %c3 = arith.constant 3 : index
    %c0_167 = arith.constant 0 : index
    %197 = vector.load %arg8[%c3, %c0_167] : memref<8x64xf32, #tpu.memory_space<vmem>>, vector<1x64xf32>
    %198 = vector.broadcast %197 : vector<1x64xf32> to vector<64x64xf32>
    %199 = arith.addf %196, %198 : vector<64x64xf32>
    %c4 = arith.constant 4 : index
    %c0_168 = arith.constant 0 : index
    %200 = vector.load %arg8[%c4, %c0_168] : memref<8x64xf32, #tpu.memory_space<vmem>>, vector<1x64xf32>
    %c5 = arith.constant 5 : index
    %c0_169 = arith.constant 0 : index
    %201 = vector.load %arg8[%c5, %c0_169] : memref<8x64xf32, #tpu.memory_space<vmem>>, vector<1x64xf32>
    %c0_170 = arith.constant 0 : index
    %c0_171 = arith.constant 0 : index
    %202 = vector.load %arg11[%c0_170, %c0_171] : memref<64x64xf32, #tpu.memory_space<vmem>>, vector<64x64xf32>
    %cst_172 = arith.constant dense<0.000000e+00> : vector<64xf32>
    %203 = vector.multi_reduction <add>, %199, %cst_172 [0] : vector<64x64xf32> to vector<64xf32>
    %204 = vector.shape_cast %203 : vector<64xf32> to vector<1x64xf32>
    %205 = arith.mulf %199, %199 : vector<64x64xf32>
    %cst_173 = arith.constant dense<0.000000e+00> : vector<64xf32>
    %206 = vector.multi_reduction <add>, %205, %cst_173 [0] : vector<64x64xf32> to vector<64xf32>
    %207 = vector.shape_cast %206 : vector<64xf32> to vector<1x64xf32>
    %cst_174 = arith.constant dense<0.000000e+00> : vector<1x64xf32>
    %208 = tpu.matmul %204, %202, %cst_174 {dimension_numbers = #tpu.dot_dimension_numbers<[1], [0], [0], [1], [0, 0, 1, 1], [], []>} : vector<1x64xf32>, vector<64x64xf32>, vector<1x64xf32> -> vector<1x64xf32>
    %cst_175 = arith.constant 0.001953125 : f32
    %209 = vector.broadcast %cst_175 : f32 to vector<1x64xf32>
    %210 = arith.mulf %208, %209 : vector<1x64xf32>
    %cst_176 = arith.constant dense<0.000000e+00> : vector<1x64xf32>
    %211 = tpu.matmul %207, %202, %cst_176 {dimension_numbers = #tpu.dot_dimension_numbers<[1], [0], [0], [1], [0, 0, 1, 1], [], []>} : vector<1x64xf32>, vector<64x64xf32>, vector<1x64xf32> -> vector<1x64xf32>
    %cst_177 = arith.constant 0.001953125 : f32
    %212 = vector.broadcast %cst_177 : f32 to vector<1x64xf32>
    %213 = arith.mulf %211, %212 : vector<1x64xf32>
    %214 = arith.mulf %210, %210 : vector<1x64xf32>
    %215 = arith.subf %213, %214 : vector<1x64xf32>
    %cst_178 = arith.constant 0.000000e+00 : f32
    %216 = vector.broadcast %cst_178 : f32 to vector<1x64xf32>
    %217 = arith.maximumf %215, %216 : vector<1x64xf32>
    %cst_179 = arith.constant 9.99999974E-6 : f32
    %218 = vector.broadcast %cst_179 : f32 to vector<1x64xf32>
    %219 = arith.addf %217, %218 : vector<1x64xf32>
    %220 = math.rsqrt %219 : vector<1x64xf32>
    %221 = vector.broadcast %210 : vector<1x64xf32> to vector<64x64xf32>
    %222 = arith.subf %199, %221 : vector<64x64xf32>
    %223 = arith.mulf %220, %200 : vector<1x64xf32>
    %224 = vector.broadcast %223 : vector<1x64xf32> to vector<64x64xf32>
    %225 = arith.mulf %222, %224 : vector<64x64xf32>
    %226 = vector.broadcast %201 : vector<1x64xf32> to vector<64x64xf32>
    %227 = arith.addf %225, %226 : vector<64x64xf32>
    %228 = arith.negf %227 : vector<64x64xf32>
    %229 = math.exp %228 : vector<64x64xf32>
    %cst_180 = arith.constant 1.000000e+00 : f32
    %230 = vector.broadcast %cst_180 : f32 to vector<64x64xf32>
    %231 = arith.addf %230, %229 : vector<64x64xf32>
    %232 = arith.divf %230, %231 : vector<64x64xf32>
    %233 = arith.mulf %227, %232 : vector<64x64xf32>
    %c0_181 = arith.constant 0 : index
    %c0_182 = arith.constant 0 : index
    %234 = vector.load %arg10[%c0_181, %c0_182] : memref<64x256xf32, #tpu.memory_space<vmem>>, vector<64x256xf32>
    %cst_183 = arith.constant dense<0.000000e+00> : vector<64x32xf32>
    %235 = tpu.matmul %234, %35, %cst_183 {dimension_numbers = #tpu.dot_dimension_numbers<[1], [0], [0], [1], [0, 0, 1, 1], [], []>} : vector<64x256xf32>, vector<256x32xf32>, vector<64x32xf32> -> vector<64x32xf32>
    %236 = arith.truncf %235 : vector<64x32xf32> to vector<64x32xbf16>
    %c0_184 = arith.constant 0 : index
    %c0_185 = arith.constant 0 : index
    %237 = vector.load %arg7[%c0_184, %c0_185] : memref<32x64xbf16, #tpu.memory_space<vmem>>, vector<32x64xbf16>
    %cst_186 = arith.constant dense<0.000000e+00> : vector<64x64xf32>
    %238 = tpu.matmul %236, %237, %cst_186 {dimension_numbers = #tpu.dot_dimension_numbers<[1], [0], [0], [1], [0, 0, 1, 1], [], []>} : vector<64x32xbf16>, vector<32x64xbf16>, vector<64x64xf32> -> vector<64x64xf32>
    %c6 = arith.constant 6 : index
    %c0_187 = arith.constant 0 : index
    %239 = vector.load %arg8[%c6, %c0_187] : memref<8x64xf32, #tpu.memory_space<vmem>>, vector<1x64xf32>
    %240 = vector.broadcast %239 : vector<1x64xf32> to vector<64x64xf32>
    %241 = arith.addf %238, %240 : vector<64x64xf32>
    %242 = arith.addf %233, %241 : vector<64x64xf32>
    %243 = vector.shape_cast %242 : vector<64x64xf32> to vector<8x8x64xf32>
    %c1_188 = arith.constant 1 : index
    %c1_189 = arith.constant 1 : index
    %c0_190 = arith.constant 0 : index
    %244 = vector.load %arg24[%c1_188, %c1_189, %c0_190] : memref<10x10x64xf32, #tpu.memory_space<vmem>>, vector<8x8x64xf32>
    tpu.vector_store %arg24[%c1_188, %c1_189, %c0_190], %243 {strides = array<i32>} : memref<10x10x64xf32, #tpu.memory_space<vmem>>, vector<8x8x64xf32>,
    %cst_191 = arith.constant 0.000000e+00 : f32
    %245 = vector.broadcast %cst_191 : f32 to vector<1x10x64xf32>
    %c0_192 = arith.constant 0 : index
    %c0_193 = arith.constant 0 : index
    %c0_194 = arith.constant 0 : index
    %246 = vector.load %arg24[%c0_192, %c0_193, %c0_194] : memref<10x10x64xf32, #tpu.memory_space<vmem>>, vector<1x10x64xf32>
    tpu.vector_store %arg24[%c0_192, %c0_193, %c0_194], %245 {strides = array<i32>} : memref<10x10x64xf32, #tpu.memory_space<vmem>>, vector<1x10x64xf32>,
    %c9 = arith.constant 9 : index
    %c0_195 = arith.constant 0 : index
    %c0_196 = arith.constant 0 : index
    %247 = vector.load %arg24[%c9, %c0_195, %c0_196] : memref<10x10x64xf32, #tpu.memory_space<vmem>>, vector<1x10x64xf32>
    tpu.vector_store %arg24[%c9, %c0_195, %c0_196], %245 {strides = array<i32>} : memref<10x10x64xf32, #tpu.memory_space<vmem>>, vector<1x10x64xf32>,
    %cst_197 = arith.constant 0.000000e+00 : f32
    %248 = vector.broadcast %cst_197 : f32 to vector<8x1x64xf32>
    %c1_198 = arith.constant 1 : index
    %c0_199 = arith.constant 0 : index
    %c0_200 = arith.constant 0 : index
    %249 = vector.load %arg24[%c1_198, %c0_199, %c0_200] : memref<10x10x64xf32, #tpu.memory_space<vmem>>, vector<8x1x64xf32>
    tpu.vector_store %arg24[%c1_198, %c0_199, %c0_200], %248 {strides = array<i32>} : memref<10x10x64xf32, #tpu.memory_space<vmem>>, vector<8x1x64xf32>,
    %c1_201 = arith.constant 1 : index
    %c9_202 = arith.constant 9 : index
    %c0_203 = arith.constant 0 : index
    %250 = vector.load %arg24[%c1_201, %c9_202, %c0_203] : memref<10x10x64xf32, #tpu.memory_space<vmem>>, vector<8x1x64xf32>
    tpu.vector_store %arg24[%c1_201, %c9_202, %c0_203], %248 {strides = array<i32>} : memref<10x10x64xf32, #tpu.memory_space<vmem>>, vector<8x1x64xf32>,
    %c0_204 = arith.constant 0 : index
    %c0_205 = arith.constant 0 : index
    %c0_206 = arith.constant 0 : index
    %251 = vector.load %arg24[%c0_204, %c0_205, %c0_206] : memref<10x10x64xf32, #tpu.memory_space<vmem>>, vector<8x8x64xf32>
    %252 = vector.shape_cast %251 : vector<8x8x64xf32> to vector<64x64xf32>
    %253 = arith.truncf %252 : vector<64x64xf32> to vector<64x64xbf16>
    %c0_207 = arith.constant 0 : index
    %c0_208 = arith.constant 0 : index
    %254 = vector.load %arg12[%c0_207, %c0_208] : memref<576x128xbf16, #tpu.memory_space<vmem>>, vector<64x128xbf16>
    %cst_209 = arith.constant dense<0.000000e+00> : vector<64x128xf32>
    %255 = tpu.matmul %253, %254, %cst_209 {dimension_numbers = #tpu.dot_dimension_numbers<[1], [0], [0], [1], [0, 0, 1, 1], [], []>} : vector<64x64xbf16>, vector<64x128xbf16>, vector<64x128xf32> -> vector<64x128xf32>
    %c0_210 = arith.constant 0 : index
    %c1_211 = arith.constant 1 : index
    %c0_212 = arith.constant 0 : index
    %256 = vector.load %arg24[%c0_210, %c1_211, %c0_212] : memref<10x10x64xf32, #tpu.memory_space<vmem>>, vector<8x8x64xf32>
    %257 = vector.shape_cast %256 : vector<8x8x64xf32> to vector<64x64xf32>
    %258 = arith.truncf %257 : vector<64x64xf32> to vector<64x64xbf16>
    %c64_213 = arith.constant 64 : index
    %c0_214 = arith.constant 0 : index
    %259 = vector.load %arg12[%c64_213, %c0_214] : memref<576x128xbf16, #tpu.memory_space<vmem>>, vector<64x128xbf16>
    %cst_215 = arith.constant dense<0.000000e+00> : vector<64x128xf32>
    %260 = tpu.matmul %258, %259, %cst_215 {dimension_numbers = #tpu.dot_dimension_numbers<[1], [0], [0], [1], [0, 0, 1, 1], [], []>} : vector<64x64xbf16>, vector<64x128xbf16>, vector<64x128xf32> -> vector<64x128xf32>
    %261 = arith.addf %255, %260 : vector<64x128xf32>
    %c0_216 = arith.constant 0 : index
    %c2_217 = arith.constant 2 : index
    %c0_218 = arith.constant 0 : index
    %262 = vector.load %arg24[%c0_216, %c2_217, %c0_218] : memref<10x10x64xf32, #tpu.memory_space<vmem>>, vector<8x8x64xf32>
    %263 = vector.shape_cast %262 : vector<8x8x64xf32> to vector<64x64xf32>
    %264 = arith.truncf %263 : vector<64x64xf32> to vector<64x64xbf16>
    %c128_219 = arith.constant 128 : index
    %c0_220 = arith.constant 0 : index
    %265 = vector.load %arg12[%c128_219, %c0_220] : memref<576x128xbf16, #tpu.memory_space<vmem>>, vector<64x128xbf16>
    %cst_221 = arith.constant dense<0.000000e+00> : vector<64x128xf32>
    %266 = tpu.matmul %264, %265, %cst_221 {dimension_numbers = #tpu.dot_dimension_numbers<[1], [0], [0], [1], [0, 0, 1, 1], [], []>} : vector<64x64xbf16>, vector<64x128xbf16>, vector<64x128xf32> -> vector<64x128xf32>
    %267 = arith.addf %261, %266 : vector<64x128xf32>
    %c1_222 = arith.constant 1 : index
    %c0_223 = arith.constant 0 : index
    %c0_224 = arith.constant 0 : index
    %268 = vector.load %arg24[%c1_222, %c0_223, %c0_224] : memref<10x10x64xf32, #tpu.memory_space<vmem>>, vector<8x8x64xf32>
    %269 = vector.shape_cast %268 : vector<8x8x64xf32> to vector<64x64xf32>
    %270 = arith.truncf %269 : vector<64x64xf32> to vector<64x64xbf16>
    %c192_225 = arith.constant 192 : index
    %c0_226 = arith.constant 0 : index
    %271 = vector.load %arg12[%c192_225, %c0_226] : memref<576x128xbf16, #tpu.memory_space<vmem>>, vector<64x128xbf16>
    %cst_227 = arith.constant dense<0.000000e+00> : vector<64x128xf32>
    %272 = tpu.matmul %270, %271, %cst_227 {dimension_numbers = #tpu.dot_dimension_numbers<[1], [0], [0], [1], [0, 0, 1, 1], [], []>} : vector<64x64xbf16>, vector<64x128xbf16>, vector<64x128xf32> -> vector<64x128xf32>
    %273 = arith.addf %267, %272 : vector<64x128xf32>
    %c1_228 = arith.constant 1 : index
    %c1_229 = arith.constant 1 : index
    %c0_230 = arith.constant 0 : index
    %274 = vector.load %arg24[%c1_228, %c1_229, %c0_230] : memref<10x10x64xf32, #tpu.memory_space<vmem>>, vector<8x8x64xf32>
    %275 = vector.shape_cast %274 : vector<8x8x64xf32> to vector<64x64xf32>
    %276 = arith.truncf %275 : vector<64x64xf32> to vector<64x64xbf16>
    %c256_231 = arith.constant 256 : index
    %c0_232 = arith.constant 0 : index
    %277 = vector.load %arg12[%c256_231, %c0_232] : memref<576x128xbf16, #tpu.memory_space<vmem>>, vector<64x128xbf16>
    %cst_233 = arith.constant dense<0.000000e+00> : vector<64x128xf32>
    %278 = tpu.matmul %276, %277, %cst_233 {dimension_numbers = #tpu.dot_dimension_numbers<[1], [0], [0], [1], [0, 0, 1, 1], [], []>} : vector<64x64xbf16>, vector<64x128xbf16>, vector<64x128xf32> -> vector<64x128xf32>
    %279 = arith.addf %273, %278 : vector<64x128xf32>
    %c1_234 = arith.constant 1 : index
    %c2_235 = arith.constant 2 : index
    %c0_236 = arith.constant 0 : index
    %280 = vector.load %arg24[%c1_234, %c2_235, %c0_236] : memref<10x10x64xf32, #tpu.memory_space<vmem>>, vector<8x8x64xf32>
    %281 = vector.shape_cast %280 : vector<8x8x64xf32> to vector<64x64xf32>
    %282 = arith.truncf %281 : vector<64x64xf32> to vector<64x64xbf16>
    %c320_237 = arith.constant 320 : index
    %c0_238 = arith.constant 0 : index
    %283 = vector.load %arg12[%c320_237, %c0_238] : memref<576x128xbf16, #tpu.memory_space<vmem>>, vector<64x128xbf16>
    %cst_239 = arith.constant dense<0.000000e+00> : vector<64x128xf32>
    %284 = tpu.matmul %282, %283, %cst_239 {dimension_numbers = #tpu.dot_dimension_numbers<[1], [0], [0], [1], [0, 0, 1, 1], [], []>} : vector<64x64xbf16>, vector<64x128xbf16>, vector<64x128xf32> -> vector<64x128xf32>
    %285 = arith.addf %279, %284 : vector<64x128xf32>
    %c2_240 = arith.constant 2 : index
    %c0_241 = arith.constant 0 : index
    %c0_242 = arith.constant 0 : index
    %286 = vector.load %arg24[%c2_240, %c0_241, %c0_242] : memref<10x10x64xf32, #tpu.memory_space<vmem>>, vector<8x8x64xf32>
    %287 = vector.shape_cast %286 : vector<8x8x64xf32> to vector<64x64xf32>
    %288 = arith.truncf %287 : vector<64x64xf32> to vector<64x64xbf16>
    %c384_243 = arith.constant 384 : index
    %c0_244 = arith.constant 0 : index
    %289 = vector.load %arg12[%c384_243, %c0_244] : memref<576x128xbf16, #tpu.memory_space<vmem>>, vector<64x128xbf16>
    %cst_245 = arith.constant dense<0.000000e+00> : vector<64x128xf32>
    %290 = tpu.matmul %288, %289, %cst_245 {dimension_numbers = #tpu.dot_dimension_numbers<[1], [0], [0], [1], [0, 0, 1, 1], [], []>} : vector<64x64xbf16>, vector<64x128xbf16>, vector<64x128xf32> -> vector<64x128xf32>
    %291 = arith.addf %285, %290 : vector<64x128xf32>
    %c2_246 = arith.constant 2 : index
    %c1_247 = arith.constant 1 : index
    %c0_248 = arith.constant 0 : index
    %292 = vector.load %arg24[%c2_246, %c1_247, %c0_248] : memref<10x10x64xf32, #tpu.memory_space<vmem>>, vector<8x8x64xf32>
    %293 = vector.shape_cast %292 : vector<8x8x64xf32> to vector<64x64xf32>
    %294 = arith.truncf %293 : vector<64x64xf32> to vector<64x64xbf16>
    %c448_249 = arith.constant 448 : index
    %c0_250 = arith.constant 0 : index
    %295 = vector.load %arg12[%c448_249, %c0_250] : memref<576x128xbf16, #tpu.memory_space<vmem>>, vector<64x128xbf16>
    %cst_251 = arith.constant dense<0.000000e+00> : vector<64x128xf32>
    %296 = tpu.matmul %294, %295, %cst_251 {dimension_numbers = #tpu.dot_dimension_numbers<[1], [0], [0], [1], [0, 0, 1, 1], [], []>} : vector<64x64xbf16>, vector<64x128xbf16>, vector<64x128xf32> -> vector<64x128xf32>
    %297 = arith.addf %291, %296 : vector<64x128xf32>
    %c2_252 = arith.constant 2 : index
    %c2_253 = arith.constant 2 : index
    %c0_254 = arith.constant 0 : index
    %298 = vector.load %arg24[%c2_252, %c2_253, %c0_254] : memref<10x10x64xf32, #tpu.memory_space<vmem>>, vector<8x8x64xf32>
    %299 = vector.shape_cast %298 : vector<8x8x64xf32> to vector<64x64xf32>
    %300 = arith.truncf %299 : vector<64x64xf32> to vector<64x64xbf16>
    %c512_255 = arith.constant 512 : index
    %c0_256 = arith.constant 0 : index
    %301 = vector.load %arg12[%c512_255, %c0_256] : memref<576x128xbf16, #tpu.memory_space<vmem>>, vector<64x128xbf16>
    %cst_257 = arith.constant dense<0.000000e+00> : vector<64x128xf32>
    %302 = tpu.matmul %300, %301, %cst_257 {dimension_numbers = #tpu.dot_dimension_numbers<[1], [0], [0], [1], [0, 0, 1, 1], [], []>} : vector<64x64xbf16>, vector<64x128xbf16>, vector<64x128xf32> -> vector<64x128xf32>
    %303 = arith.addf %297, %302 : vector<64x128xf32>
    %c0_258 = arith.constant 0 : index
    %c0_259 = arith.constant 0 : index
    %304 = vector.load %arg15[%c0_258, %c0_259] : memref<8x128xf32, #tpu.memory_space<vmem>>, vector<1x128xf32>
    %305 = vector.broadcast %304 : vector<1x128xf32> to vector<64x128xf32>
    %306 = arith.addf %303, %305 : vector<64x128xf32>
    %c1_260 = arith.constant 1 : index
    %c0_261 = arith.constant 0 : index
    %307 = vector.load %arg15[%c1_260, %c0_261] : memref<8x128xf32, #tpu.memory_space<vmem>>, vector<1x128xf32>
    %c2_262 = arith.constant 2 : index
    %c0_263 = arith.constant 0 : index
    %308 = vector.load %arg15[%c2_262, %c0_263] : memref<8x128xf32, #tpu.memory_space<vmem>>, vector<1x128xf32>
    %c0_264 = arith.constant 0 : index
    %c0_265 = arith.constant 0 : index
    %309 = vector.load %arg18[%c0_264, %c0_265] : memref<128x128xf32, #tpu.memory_space<vmem>>, vector<128x128xf32>
    %cst_266 = arith.constant dense<0.000000e+00> : vector<128xf32>
    %310 = vector.multi_reduction <add>, %306, %cst_266 [0] : vector<64x128xf32> to vector<128xf32>
    %311 = vector.shape_cast %310 : vector<128xf32> to vector<1x128xf32>
    %312 = arith.mulf %306, %306 : vector<64x128xf32>
    %cst_267 = arith.constant dense<0.000000e+00> : vector<128xf32>
    %313 = vector.multi_reduction <add>, %312, %cst_267 [0] : vector<64x128xf32> to vector<128xf32>
    %314 = vector.shape_cast %313 : vector<128xf32> to vector<1x128xf32>
    %cst_268 = arith.constant dense<0.000000e+00> : vector<1x128xf32>
    %315 = tpu.matmul %311, %309, %cst_268 {dimension_numbers = #tpu.dot_dimension_numbers<[1], [0], [0], [1], [0, 0, 1, 1], [], []>} : vector<1x128xf32>, vector<128x128xf32>, vector<1x128xf32> -> vector<1x128xf32>
    %cst_269 = arith.constant 9.765625E-4 : f32
    %316 = vector.broadcast %cst_269 : f32 to vector<1x128xf32>
    %317 = arith.mulf %315, %316 : vector<1x128xf32>
    %cst_270 = arith.constant dense<0.000000e+00> : vector<1x128xf32>
    %318 = tpu.matmul %314, %309, %cst_270 {dimension_numbers = #tpu.dot_dimension_numbers<[1], [0], [0], [1], [0, 0, 1, 1], [], []>} : vector<1x128xf32>, vector<128x128xf32>, vector<1x128xf32> -> vector<1x128xf32>
    %cst_271 = arith.constant 9.765625E-4 : f32
    %319 = vector.broadcast %cst_271 : f32 to vector<1x128xf32>
    %320 = arith.mulf %318, %319 : vector<1x128xf32>
    %321 = arith.mulf %317, %317 : vector<1x128xf32>
    %322 = arith.subf %320, %321 : vector<1x128xf32>
    %cst_272 = arith.constant 0.000000e+00 : f32
    %323 = vector.broadcast %cst_272 : f32 to vector<1x128xf32>
    %324 = arith.maximumf %322, %323 : vector<1x128xf32>
    %cst_273 = arith.constant 9.99999974E-6 : f32
    %325 = vector.broadcast %cst_273 : f32 to vector<1x128xf32>
    %326 = arith.addf %324, %325 : vector<1x128xf32>
    %327 = math.rsqrt %326 : vector<1x128xf32>
    %328 = vector.broadcast %317 : vector<1x128xf32> to vector<64x128xf32>
    %329 = arith.subf %306, %328 : vector<64x128xf32>
    %330 = arith.mulf %327, %307 : vector<1x128xf32>
    %331 = vector.broadcast %330 : vector<1x128xf32> to vector<64x128xf32>
    %332 = arith.mulf %329, %331 : vector<64x128xf32>
    %333 = vector.broadcast %308 : vector<1x128xf32> to vector<64x128xf32>
    %334 = arith.addf %332, %333 : vector<64x128xf32>
    %335 = arith.negf %334 : vector<64x128xf32>
    %336 = math.exp %335 : vector<64x128xf32>
    %cst_274 = arith.constant 1.000000e+00 : f32
    %337 = vector.broadcast %cst_274 : f32 to vector<64x128xf32>
    %338 = arith.addf %337, %336 : vector<64x128xf32>
    %339 = arith.divf %337, %338 : vector<64x128xf32>
    %340 = arith.mulf %334, %339 : vector<64x128xf32>
    %341 = vector.shape_cast %340 : vector<64x128xf32> to vector<8x8x128xf32>
    %c1_275 = arith.constant 1 : index
    %c1_276 = arith.constant 1 : index
    %c0_277 = arith.constant 0 : index
    %342 = vector.load %arg25[%c1_275, %c1_276, %c0_277] : memref<10x10x128xf32, #tpu.memory_space<vmem>>, vector<8x8x128xf32>
    tpu.vector_store %arg25[%c1_275, %c1_276, %c0_277], %341 {strides = array<i32>} : memref<10x10x128xf32, #tpu.memory_space<vmem>>, vector<8x8x128xf32>,
    %cst_278 = arith.constant 0.000000e+00 : f32
    %343 = vector.broadcast %cst_278 : f32 to vector<1x10x128xf32>
    %c0_279 = arith.constant 0 : index
    %c0_280 = arith.constant 0 : index
    %c0_281 = arith.constant 0 : index
    %344 = vector.load %arg25[%c0_279, %c0_280, %c0_281] : memref<10x10x128xf32, #tpu.memory_space<vmem>>, vector<1x10x128xf32>
    tpu.vector_store %arg25[%c0_279, %c0_280, %c0_281], %343 {strides = array<i32>} : memref<10x10x128xf32, #tpu.memory_space<vmem>>, vector<1x10x128xf32>,
    %c9_282 = arith.constant 9 : index
    %c0_283 = arith.constant 0 : index
    %c0_284 = arith.constant 0 : index
    %345 = vector.load %arg25[%c9_282, %c0_283, %c0_284] : memref<10x10x128xf32, #tpu.memory_space<vmem>>, vector<1x10x128xf32>
    tpu.vector_store %arg25[%c9_282, %c0_283, %c0_284], %343 {strides = array<i32>} : memref<10x10x128xf32, #tpu.memory_space<vmem>>, vector<1x10x128xf32>,
    %cst_285 = arith.constant 0.000000e+00 : f32
    %346 = vector.broadcast %cst_285 : f32 to vector<8x1x128xf32>
    %c1_286 = arith.constant 1 : index
    %c0_287 = arith.constant 0 : index
    %c0_288 = arith.constant 0 : index
    %347 = vector.load %arg25[%c1_286, %c0_287, %c0_288] : memref<10x10x128xf32, #tpu.memory_space<vmem>>, vector<8x1x128xf32>
    tpu.vector_store %arg25[%c1_286, %c0_287, %c0_288], %346 {strides = array<i32>} : memref<10x10x128xf32, #tpu.memory_space<vmem>>, vector<8x1x128xf32>,
    %c1_289 = arith.constant 1 : index
    %c9_290 = arith.constant 9 : index
    %c0_291 = arith.constant 0 : index
    %348 = vector.load %arg25[%c1_289, %c9_290, %c0_291] : memref<10x10x128xf32, #tpu.memory_space<vmem>>, vector<8x1x128xf32>
    tpu.vector_store %arg25[%c1_289, %c9_290, %c0_291], %346 {strides = array<i32>} : memref<10x10x128xf32, #tpu.memory_space<vmem>>, vector<8x1x128xf32>,
    %c0_292 = arith.constant 0 : index
    %c0_293 = arith.constant 0 : index
    %c0_294 = arith.constant 0 : index
    %349 = vector.load %arg25[%c0_292, %c0_293, %c0_294] : memref<10x10x128xf32, #tpu.memory_space<vmem>>, vector<8x8x128xf32>
    %350 = vector.shape_cast %349 : vector<8x8x128xf32> to vector<64x128xf32>
    %351 = arith.truncf %350 : vector<64x128xf32> to vector<64x128xbf16>
    %c0_295 = arith.constant 0 : index
    %c0_296 = arith.constant 0 : index
    %352 = vector.load %arg13[%c0_295, %c0_296] : memref<1152x128xbf16, #tpu.memory_space<vmem>>, vector<128x128xbf16>
    %cst_297 = arith.constant dense<0.000000e+00> : vector<64x128xf32>
    %353 = tpu.matmul %351, %352, %cst_297 {dimension_numbers = #tpu.dot_dimension_numbers<[1], [0], [0], [1], [0, 0, 1, 1], [], []>} : vector<64x128xbf16>, vector<128x128xbf16>, vector<64x128xf32> -> vector<64x128xf32>
    %c0_298 = arith.constant 0 : index
    %c1_299 = arith.constant 1 : index
    %c0_300 = arith.constant 0 : index
    %354 = vector.load %arg25[%c0_298, %c1_299, %c0_300] : memref<10x10x128xf32, #tpu.memory_space<vmem>>, vector<8x8x128xf32>
    %355 = vector.shape_cast %354 : vector<8x8x128xf32> to vector<64x128xf32>
    %356 = arith.truncf %355 : vector<64x128xf32> to vector<64x128xbf16>
    %c128_301 = arith.constant 128 : index
    %c0_302 = arith.constant 0 : index
    %357 = vector.load %arg13[%c128_301, %c0_302] : memref<1152x128xbf16, #tpu.memory_space<vmem>>, vector<128x128xbf16>
    %cst_303 = arith.constant dense<0.000000e+00> : vector<64x128xf32>
    %358 = tpu.matmul %356, %357, %cst_303 {dimension_numbers = #tpu.dot_dimension_numbers<[1], [0], [0], [1], [0, 0, 1, 1], [], []>} : vector<64x128xbf16>, vector<128x128xbf16>, vector<64x128xf32> -> vector<64x128xf32>
    %359 = arith.addf %353, %358 : vector<64x128xf32>
    %c0_304 = arith.constant 0 : index
    %c2_305 = arith.constant 2 : index
    %c0_306 = arith.constant 0 : index
    %360 = vector.load %arg25[%c0_304, %c2_305, %c0_306] : memref<10x10x128xf32, #tpu.memory_space<vmem>>, vector<8x8x128xf32>
    %361 = vector.shape_cast %360 : vector<8x8x128xf32> to vector<64x128xf32>
    %362 = arith.truncf %361 : vector<64x128xf32> to vector<64x128xbf16>
    %c256_307 = arith.constant 256 : index
    %c0_308 = arith.constant 0 : index
    %363 = vector.load %arg13[%c256_307, %c0_308] : memref<1152x128xbf16, #tpu.memory_space<vmem>>, vector<128x128xbf16>
    %cst_309 = arith.constant dense<0.000000e+00> : vector<64x128xf32>
    %364 = tpu.matmul %362, %363, %cst_309 {dimension_numbers = #tpu.dot_dimension_numbers<[1], [0], [0], [1], [0, 0, 1, 1], [], []>} : vector<64x128xbf16>, vector<128x128xbf16>, vector<64x128xf32> -> vector<64x128xf32>
    %365 = arith.addf %359, %364 : vector<64x128xf32>
    %c1_310 = arith.constant 1 : index
    %c0_311 = arith.constant 0 : index
    %c0_312 = arith.constant 0 : index
    %366 = vector.load %arg25[%c1_310, %c0_311, %c0_312] : memref<10x10x128xf32, #tpu.memory_space<vmem>>, vector<8x8x128xf32>
    %367 = vector.shape_cast %366 : vector<8x8x128xf32> to vector<64x128xf32>
    %368 = arith.truncf %367 : vector<64x128xf32> to vector<64x128xbf16>
    %c384_313 = arith.constant 384 : index
    %c0_314 = arith.constant 0 : index
    %369 = vector.load %arg13[%c384_313, %c0_314] : memref<1152x128xbf16, #tpu.memory_space<vmem>>, vector<128x128xbf16>
    %cst_315 = arith.constant dense<0.000000e+00> : vector<64x128xf32>
    %370 = tpu.matmul %368, %369, %cst_315 {dimension_numbers = #tpu.dot_dimension_numbers<[1], [0], [0], [1], [0, 0, 1, 1], [], []>} : vector<64x128xbf16>, vector<128x128xbf16>, vector<64x128xf32> -> vector<64x128xf32>
    %371 = arith.addf %365, %370 : vector<64x128xf32>
    %c1_316 = arith.constant 1 : index
    %c1_317 = arith.constant 1 : index
    %c0_318 = arith.constant 0 : index
    %372 = vector.load %arg25[%c1_316, %c1_317, %c0_318] : memref<10x10x128xf32, #tpu.memory_space<vmem>>, vector<8x8x128xf32>
    %373 = vector.shape_cast %372 : vector<8x8x128xf32> to vector<64x128xf32>
    %374 = arith.truncf %373 : vector<64x128xf32> to vector<64x128xbf16>
    %c512_319 = arith.constant 512 : index
    %c0_320 = arith.constant 0 : index
    %375 = vector.load %arg13[%c512_319, %c0_320] : memref<1152x128xbf16, #tpu.memory_space<vmem>>, vector<128x128xbf16>
    %cst_321 = arith.constant dense<0.000000e+00> : vector<64x128xf32>
    %376 = tpu.matmul %374, %375, %cst_321 {dimension_numbers = #tpu.dot_dimension_numbers<[1], [0], [0], [1], [0, 0, 1, 1], [], []>} : vector<64x128xbf16>, vector<128x128xbf16>, vector<64x128xf32> -> vector<64x128xf32>
    %377 = arith.addf %371, %376 : vector<64x128xf32>
    %c1_322 = arith.constant 1 : index
    %c2_323 = arith.constant 2 : index
    %c0_324 = arith.constant 0 : index
    %378 = vector.load %arg25[%c1_322, %c2_323, %c0_324] : memref<10x10x128xf32, #tpu.memory_space<vmem>>, vector<8x8x128xf32>
    %379 = vector.shape_cast %378 : vector<8x8x128xf32> to vector<64x128xf32>
    %380 = arith.truncf %379 : vector<64x128xf32> to vector<64x128xbf16>
    %c640 = arith.constant 640 : index
    %c0_325 = arith.constant 0 : index
    %381 = vector.load %arg13[%c640, %c0_325] : memref<1152x128xbf16, #tpu.memory_space<vmem>>, vector<128x128xbf16>
    %cst_326 = arith.constant dense<0.000000e+00> : vector<64x128xf32>
    %382 = tpu.matmul %380, %381, %cst_326 {dimension_numbers = #tpu.dot_dimension_numbers<[1], [0], [0], [1], [0, 0, 1, 1], [], []>} : vector<64x128xbf16>, vector<128x128xbf16>, vector<64x128xf32> -> vector<64x128xf32>
    %383 = arith.addf %377, %382 : vector<64x128xf32>
    %c2_327 = arith.constant 2 : index
    %c0_328 = arith.constant 0 : index
    %c0_329 = arith.constant 0 : index
    %384 = vector.load %arg25[%c2_327, %c0_328, %c0_329] : memref<10x10x128xf32, #tpu.memory_space<vmem>>, vector<8x8x128xf32>
    %385 = vector.shape_cast %384 : vector<8x8x128xf32> to vector<64x128xf32>
    %386 = arith.truncf %385 : vector<64x128xf32> to vector<64x128xbf16>
    %c768 = arith.constant 768 : index
    %c0_330 = arith.constant 0 : index
    %387 = vector.load %arg13[%c768, %c0_330] : memref<1152x128xbf16, #tpu.memory_space<vmem>>, vector<128x128xbf16>
    %cst_331 = arith.constant dense<0.000000e+00> : vector<64x128xf32>
    %388 = tpu.matmul %386, %387, %cst_331 {dimension_numbers = #tpu.dot_dimension_numbers<[1], [0], [0], [1], [0, 0, 1, 1], [], []>} : vector<64x128xbf16>, vector<128x128xbf16>, vector<64x128xf32> -> vector<64x128xf32>
    %389 = arith.addf %383, %388 : vector<64x128xf32>
    %c2_332 = arith.constant 2 : index
    %c1_333 = arith.constant 1 : index
    %c0_334 = arith.constant 0 : index
    %390 = vector.load %arg25[%c2_332, %c1_333, %c0_334] : memref<10x10x128xf32, #tpu.memory_space<vmem>>, vector<8x8x128xf32>
    %391 = vector.shape_cast %390 : vector<8x8x128xf32> to vector<64x128xf32>
    %392 = arith.truncf %391 : vector<64x128xf32> to vector<64x128xbf16>
    %c896 = arith.constant 896 : index
    %c0_335 = arith.constant 0 : index
    %393 = vector.load %arg13[%c896, %c0_335] : memref<1152x128xbf16, #tpu.memory_space<vmem>>, vector<128x128xbf16>
    %cst_336 = arith.constant dense<0.000000e+00> : vector<64x128xf32>
    %394 = tpu.matmul %392, %393, %cst_336 {dimension_numbers = #tpu.dot_dimension_numbers<[1], [0], [0], [1], [0, 0, 1, 1], [], []>} : vector<64x128xbf16>, vector<128x128xbf16>, vector<64x128xf32> -> vector<64x128xf32>
    %395 = arith.addf %389, %394 : vector<64x128xf32>
    %c2_337 = arith.constant 2 : index
    %c2_338 = arith.constant 2 : index
    %c0_339 = arith.constant 0 : index
    %396 = vector.load %arg25[%c2_337, %c2_338, %c0_339] : memref<10x10x128xf32, #tpu.memory_space<vmem>>, vector<8x8x128xf32>
    %397 = vector.shape_cast %396 : vector<8x8x128xf32> to vector<64x128xf32>
    %398 = arith.truncf %397 : vector<64x128xf32> to vector<64x128xbf16>
    %c1024 = arith.constant 1024 : index
    %c0_340 = arith.constant 0 : index
    %399 = vector.load %arg13[%c1024, %c0_340] : memref<1152x128xbf16, #tpu.memory_space<vmem>>, vector<128x128xbf16>
    %cst_341 = arith.constant dense<0.000000e+00> : vector<64x128xf32>
    %400 = tpu.matmul %398, %399, %cst_341 {dimension_numbers = #tpu.dot_dimension_numbers<[1], [0], [0], [1], [0, 0, 1, 1], [], []>} : vector<64x128xbf16>, vector<128x128xbf16>, vector<64x128xf32> -> vector<64x128xf32>
    %401 = arith.addf %395, %400 : vector<64x128xf32>
    %c0_342 = arith.constant 0 : index
    %c0_343 = arith.constant 0 : index
    %402 = vector.load %arg16[%c0_342, %c0_343] : memref<16x64xf32, #tpu.memory_space<vmem>>, vector<16x64xf32>
    %cst_344 = arith.constant dense<0.000000e+00> : vector<16x128xf32>
    %403 = tpu.matmul %402, %401, %cst_344 {dimension_numbers = #tpu.dot_dimension_numbers<[1], [0], [0], [1], [0, 0, 1, 1], [], []>} : vector<16x64xf32>, vector<64x128xf32>, vector<16x128xf32> -> vector<16x128xf32>
    %c3_345 = arith.constant 3 : index
    %c0_346 = arith.constant 0 : index
    %404 = vector.load %arg15[%c3_345, %c0_346] : memref<8x128xf32, #tpu.memory_space<vmem>>, vector<1x128xf32>
    %405 = vector.broadcast %404 : vector<1x128xf32> to vector<16x128xf32>
    %406 = arith.addf %403, %405 : vector<16x128xf32>
    %c4_347 = arith.constant 4 : index
    %c0_348 = arith.constant 0 : index
    %407 = vector.load %arg15[%c4_347, %c0_348] : memref<8x128xf32, #tpu.memory_space<vmem>>, vector<1x128xf32>
    %c5_349 = arith.constant 5 : index
    %c0_350 = arith.constant 0 : index
    %408 = vector.load %arg15[%c5_349, %c0_350] : memref<8x128xf32, #tpu.memory_space<vmem>>, vector<1x128xf32>
    %c0_351 = arith.constant 0 : index
    %c0_352 = arith.constant 0 : index
    %409 = vector.load %arg18[%c0_351, %c0_352] : memref<128x128xf32, #tpu.memory_space<vmem>>, vector<128x128xf32>
    %cst_353 = arith.constant dense<0.000000e+00> : vector<128xf32>
    %410 = vector.multi_reduction <add>, %406, %cst_353 [0] : vector<16x128xf32> to vector<128xf32>
    %411 = vector.shape_cast %410 : vector<128xf32> to vector<1x128xf32>
    %412 = arith.mulf %406, %406 : vector<16x128xf32>
    %cst_354 = arith.constant dense<0.000000e+00> : vector<128xf32>
    %413 = vector.multi_reduction <add>, %412, %cst_354 [0] : vector<16x128xf32> to vector<128xf32>
    %414 = vector.shape_cast %413 : vector<128xf32> to vector<1x128xf32>
    %cst_355 = arith.constant dense<0.000000e+00> : vector<1x128xf32>
    %415 = tpu.matmul %411, %409, %cst_355 {dimension_numbers = #tpu.dot_dimension_numbers<[1], [0], [0], [1], [0, 0, 1, 1], [], []>} : vector<1x128xf32>, vector<128x128xf32>, vector<1x128xf32> -> vector<1x128xf32>
    %cst_356 = arith.constant 3.906250e-03 : f32
    %416 = vector.broadcast %cst_356 : f32 to vector<1x128xf32>
    %417 = arith.mulf %415, %416 : vector<1x128xf32>
    %cst_357 = arith.constant dense<0.000000e+00> : vector<1x128xf32>
    %418 = tpu.matmul %414, %409, %cst_357 {dimension_numbers = #tpu.dot_dimension_numbers<[1], [0], [0], [1], [0, 0, 1, 1], [], []>} : vector<1x128xf32>, vector<128x128xf32>, vector<1x128xf32> -> vector<1x128xf32>
    %cst_358 = arith.constant 3.906250e-03 : f32
    %419 = vector.broadcast %cst_358 : f32 to vector<1x128xf32>
    %420 = arith.mulf %418, %419 : vector<1x128xf32>
    %421 = arith.mulf %417, %417 : vector<1x128xf32>
    %422 = arith.subf %420, %421 : vector<1x128xf32>
    %cst_359 = arith.constant 0.000000e+00 : f32
    %423 = vector.broadcast %cst_359 : f32 to vector<1x128xf32>
    %424 = arith.maximumf %422, %423 : vector<1x128xf32>
    %cst_360 = arith.constant 9.99999974E-6 : f32
    %425 = vector.broadcast %cst_360 : f32 to vector<1x128xf32>
    %426 = arith.addf %424, %425 : vector<1x128xf32>
    %427 = math.rsqrt %426 : vector<1x128xf32>
    %428 = vector.broadcast %417 : vector<1x128xf32> to vector<16x128xf32>
    %429 = arith.subf %406, %428 : vector<16x128xf32>
    %430 = arith.mulf %427, %407 : vector<1x128xf32>
    %431 = vector.broadcast %430 : vector<1x128xf32> to vector<16x128xf32>
    %432 = arith.mulf %429, %431 : vector<16x128xf32>
    %433 = vector.broadcast %408 : vector<1x128xf32> to vector<16x128xf32>
    %434 = arith.addf %432, %433 : vector<16x128xf32>
    %435 = arith.negf %434 : vector<16x128xf32>
    %436 = math.exp %435 : vector<16x128xf32>
    %cst_361 = arith.constant 1.000000e+00 : f32
    %437 = vector.broadcast %cst_361 : f32 to vector<16x128xf32>
    %438 = arith.addf %437, %436 : vector<16x128xf32>
    %439 = arith.divf %437, %438 : vector<16x128xf32>
    %440 = arith.mulf %434, %439 : vector<16x128xf32>
    %c0_362 = arith.constant 0 : index
    %c0_363 = arith.constant 0 : index
    %441 = vector.load %arg17[%c0_362, %c0_363] : memref<16x64xf32, #tpu.memory_space<vmem>>, vector<16x64xf32>
    %cst_364 = arith.constant dense<0.000000e+00> : vector<16x64xf32>
    %442 = tpu.matmul %441, %242, %cst_364 {dimension_numbers = #tpu.dot_dimension_numbers<[1], [0], [0], [1], [0, 0, 1, 1], [], []>} : vector<16x64xf32>, vector<64x64xf32>, vector<16x64xf32> -> vector<16x64xf32>
    %443 = arith.truncf %442 : vector<16x64xf32> to vector<16x64xbf16>
    %c0_365 = arith.constant 0 : index
    %c0_366 = arith.constant 0 : index
    %444 = vector.load %arg14[%c0_365, %c0_366] : memref<64x128xbf16, #tpu.memory_space<vmem>>, vector<64x128xbf16>
    %cst_367 = arith.constant dense<0.000000e+00> : vector<16x128xf32>
    %445 = tpu.matmul %443, %444, %cst_367 {dimension_numbers = #tpu.dot_dimension_numbers<[1], [0], [0], [1], [0, 0, 1, 1], [], []>} : vector<16x64xbf16>, vector<64x128xbf16>, vector<16x128xf32> -> vector<16x128xf32>
    %c6_368 = arith.constant 6 : index
    %c0_369 = arith.constant 0 : index
    %446 = vector.load %arg15[%c6_368, %c0_369] : memref<8x128xf32, #tpu.memory_space<vmem>>, vector<1x128xf32>
    %447 = vector.broadcast %446 : vector<1x128xf32> to vector<16x128xf32>
    %448 = arith.addf %445, %447 : vector<16x128xf32>
    %449 = arith.addf %440, %448 : vector<16x128xf32>
    %450 = arith.truncf %449 : vector<16x128xf32> to vector<16x128xbf16>
    %c0_370 = arith.constant 0 : index
    %c0_371 = arith.constant 0 : index
    %451 = vector.load %arg19[%c0_370, %c0_371] : memref<128x32xbf16, #tpu.memory_space<vmem>>, vector<128x32xbf16>
    %cst_372 = arith.constant dense<0.000000e+00> : vector<16x32xf32>
    %452 = tpu.matmul %450, %451, %cst_372 {dimension_numbers = #tpu.dot_dimension_numbers<[1], [0], [0], [1], [0, 0, 1, 1], [], []>} : vector<16x128xbf16>, vector<128x32xbf16>, vector<16x32xf32> -> vector<16x32xf32>
    %c0_373 = arith.constant 0 : index
    %c0_374 = arith.constant 0 : index
    %453 = vector.load %arg20[%c0_373, %c0_374] : memref<1x32xf32, #tpu.memory_space<vmem>>, vector<1x32xf32>
    %454 = vector.broadcast %453 : vector<1x32xf32> to vector<16x32xf32>
    %455 = arith.addf %452, %454 : vector<16x32xf32>
    %c0_375 = arith.constant 0 : index
    %c0_376 = arith.constant 0 : index
    %c0_377 = arith.constant 0 : index
    %456 = vector.load %arg21[%c0_375, %c0_376, %c0_377] : memref<1x16x32xf32, #tpu.memory_space<vmem>>, vector<1x16x32xf32>
    %457 = vector.shape_cast %456 : vector<1x16x32xf32> to vector<16x32xf32>
    %458 = vector.shape_cast %455 : vector<16x32xf32> to vector<1x16x32xf32>
    tpu.vector_store %arg21[%c0_375, %c0_376, %c0_377], %458 {strides = array<i32>} : memref<1x16x32xf32, #tpu.memory_space<vmem>>, vector<1x16x32xf32>,
    return
  }
  func.func @transform_0(%arg0: i32) -> (i32, i32, i32) {
    %c0_i32 = arith.constant 0 : i32
    %c0_i32_0 = arith.constant 0 : i32
    %c0_i32_1 = arith.constant 0 : i32
    return %arg0, %c0_i32, %c0_i32_0 : i32, i32, i32
  }
  func.func @transform_1(%arg0: i32) -> (i32, i32) {
    %c0_i32 = arith.constant 0 : i32
    %c0_i32_0 = arith.constant 0 : i32
    %c0_i32_1 = arith.constant 0 : i32
    return %c0_i32, %c0_i32_0 : i32, i32
  }
  func.func @transform_2(%arg0: i32) -> (i32, i32) {
    %c0_i32 = arith.constant 0 : i32
    %c0_i32_0 = arith.constant 0 : i32
    %c0_i32_1 = arith.constant 0 : i32
    return %c0_i32, %c0_i32_0 : i32, i32
  }
  func.func @transform_3(%arg0: i32) -> (i32, i32) {
    %c0_i32 = arith.constant 0 : i32
    %c0_i32_0 = arith.constant 0 : i32
    %c0_i32_1 = arith.constant 0 : i32
    return %c0_i32, %c0_i32_0 : i32, i32
  }
  func.func @transform_4(%arg0: i32) -> (i32, i32) {
    %c0_i32 = arith.constant 0 : i32
    %c0_i32_0 = arith.constant 0 : i32
    %c0_i32_1 = arith.constant 0 : i32
    return %c0_i32, %c0_i32_0 : i32, i32
  }
  func.func @transform_5(%arg0: i32) -> (i32, i32) {
    %c0_i32 = arith.constant 0 : i32
    %c0_i32_0 = arith.constant 0 : i32
    %c0_i32_1 = arith.constant 0 : i32
    return %c0_i32, %c0_i32_0 : i32, i32
  }
  func.func @transform_6(%arg0: i32) -> (i32, i32) {
    %c0_i32 = arith.constant 0 : i32
    %c0_i32_0 = arith.constant 0 : i32
    %c0_i32_1 = arith.constant 0 : i32
    return %c0_i32, %c0_i32_0 : i32, i32
  }
  func.func @transform_7(%arg0: i32) -> (i32, i32) {
    %c0_i32 = arith.constant 0 : i32
    %c0_i32_0 = arith.constant 0 : i32
    %c0_i32_1 = arith.constant 0 : i32
    return %c0_i32, %c0_i32_0 : i32, i32
  }
  func.func @transform_8(%arg0: i32) -> (i32, i32) {
    %c0_i32 = arith.constant 0 : i32
    %c0_i32_0 = arith.constant 0 : i32
    %c0_i32_1 = arith.constant 0 : i32
    return %c0_i32, %c0_i32_0 : i32, i32
  }
  func.func @transform_9(%arg0: i32) -> (i32, i32) {
    %c0_i32 = arith.constant 0 : i32
    %c0_i32_0 = arith.constant 0 : i32
    %c0_i32_1 = arith.constant 0 : i32
    return %c0_i32, %c0_i32_0 : i32, i32
  }
  func.func @transform_10(%arg0: i32) -> (i32, i32) {
    %c0_i32 = arith.constant 0 : i32
    %c0_i32_0 = arith.constant 0 : i32
    %c0_i32_1 = arith.constant 0 : i32
    return %c0_i32, %c0_i32_0 : i32, i32
  }
  func.func @transform_11(%arg0: i32) -> (i32, i32) {
    %c0_i32 = arith.constant 0 : i32
    %c0_i32_0 = arith.constant 0 : i32
    %c0_i32_1 = arith.constant 0 : i32
    return %c0_i32, %c0_i32_0 : i32, i32
  }
  func.func @transform_12(%arg0: i32) -> (i32, i32) {
    %c0_i32 = arith.constant 0 : i32
    %c0_i32_0 = arith.constant 0 : i32
    %c0_i32_1 = arith.constant 0 : i32
    return %c0_i32, %c0_i32_0 : i32, i32
  }
  func.func @transform_13(%arg0: i32) -> (i32, i32) {
    %c0_i32 = arith.constant 0 : i32
    %c0_i32_0 = arith.constant 0 : i32
    %c0_i32_1 = arith.constant 0 : i32
    return %c0_i32, %c0_i32_0 : i32, i32
  }
  func.func @transform_14(%arg0: i32) -> (i32, i32) {
    %c0_i32 = arith.constant 0 : i32
    %c0_i32_0 = arith.constant 0 : i32
    %c0_i32_1 = arith.constant 0 : i32
    return %c0_i32, %c0_i32_0 : i32, i32
  }
  func.func @transform_15(%arg0: i32) -> (i32, i32) {
    %c0_i32 = arith.constant 0 : i32
    %c0_i32_0 = arith.constant 0 : i32
    %c0_i32_1 = arith.constant 0 : i32
    return %c0_i32, %c0_i32_0 : i32, i32
  }
  func.func @transform_16(%arg0: i32) -> (i32, i32) {
    %c0_i32 = arith.constant 0 : i32
    %c0_i32_0 = arith.constant 0 : i32
    %c0_i32_1 = arith.constant 0 : i32
    return %c0_i32, %c0_i32_0 : i32, i32
  }
  func.func @transform_17(%arg0: i32) -> (i32, i32) {
    %c0_i32 = arith.constant 0 : i32
    %c0_i32_0 = arith.constant 0 : i32
    %c0_i32_1 = arith.constant 0 : i32
    return %c0_i32, %c0_i32_0 : i32, i32
  }
  func.func @transform_18(%arg0: i32) -> (i32, i32) {
    %c0_i32 = arith.constant 0 : i32
    %c0_i32_0 = arith.constant 0 : i32
    %c0_i32_1 = arith.constant 0 : i32
    return %c0_i32, %c0_i32_0 : i32, i32
  }
  func.func @transform_19(%arg0: i32) -> (i32, i32) {
    %c0_i32 = arith.constant 0 : i32
    %c0_i32_0 = arith.constant 0 : i32
    %c0_i32_1 = arith.constant 0 : i32
    return %c0_i32, %c0_i32_0 : i32, i32
  }
  func.func @transform_20(%arg0: i32) -> (i32, i32, i32) {
    %c0_i32 = arith.constant 0 : i32
    %c0_i32_0 = arith.constant 0 : i32
    %c0_i32_1 = arith.constant 0 : i32
    return %arg0, %c0_i32, %c0_i32_0 : i32, i32, i32
  }
}

</mosaic_0001>

<bundles_post_ra>
// kernel: _lambda_.1
= control target key start
LH: loop header
LB: loop body
LE: loop exit
PB: predicated region body
PF: predicated region fallthrough
CT: control target
= control target key end

     0   :  { %s20487_s0 = inlined_call_operand.vmem [shape: f32[2,256,16], index: 0, kind: input, shape index: {}]   ;;  %s20488_s1 = inlined_call_operand.vmem [shape: bf16[16,32], index: 1, kind: input, shape index: {}]   ;;  %s20489_s2 = inlined_call_operand.vmem [shape: f32[4,32], index: 2, kind: input, shape index: {}]   ;;  %s20490_s3 = inlined_call_operand.vmem [shape: f32[32,32], index: 3, kind: input, shape index: {}]   ;;  %s20491_s4 = inlined_call_operand.vmem [shape: bf16[288,64], index: 4, kind: input, shape index: {}]   ;;  %s20492_s5 = inlined_call_operand.vmem [shape: bf16[576,64], index: 5, kind: input, shape index: {}]   ;;  %s20493_s6 = inlined_call_operand.vmem [shape: bf16[32,64], index: 6, kind: input, shape index: {}]   ;;  %s20494_s7 = inlined_call_operand.vmem [shape: f32[8,64], index: 7, kind: input, shape index: {}]   ;;  %s20495_s8 = inlined_call_operand.vmem [shape: f32[64,256], index: 8, kind: input, shape index: {}]   ;;  %s20496_s9 = inlined_call_operand.vmem [shape: f32[64,256], index: 9, kind: input, shape index: {}]   ;;  %s20497_s10 = inlined_call_operand.vmem [shape: f32[64,64], index: 10, kind: input, shape index: {}]   ;;  %s20498_s11 = inlined_call_operand.vmem [shape: bf16[576,128], index: 11, kind: input, shape index: {}]   ;;  %s20499_s12 = inlined_call_operand.vmem [shape: bf16[1152,128], index: 12, kind: input, shape index: {}]   ;;  %s20500_s13 = inlined_call_operand.vmem [shape: bf16[64,128], index: 13, kind: input, shape index: {}]   ;;  %s20501_s14 = inlined_call_operand.vmem [shape: f32[8,128], index: 14, kind: input, shape index: {}]   ;;  %s20502_s15 = inlined_call_operand.vmem [shape: f32[16,64], index: 15, kind: input, shape index: {}]   ;;  %s20503_s16 = inlined_call_operand.vmem [shape: f32[16,64], index: 16, kind: input, shape index: {}]   ;;  %s20504_s17 = inlined_call_operand.vmem [shape: f32[128,128], index: 17, kind: input, shape index: {}]   ;;  %s20505_s18 = inlined_call_operand.vmem [shape: bf16[128,32], index: 18, kind: input, shape index: {}]   ;;  %s20506_s19 = inlined_call_operand.vmem [shape: f32[1,32], index: 19, kind: input, shape index: {}]   ;;  %s20507_s20 = inlined_call_operand.hbm [shape: f32[2,16,32], index: 20, kind: output, shape index: {}]  }
   0x1   :  { %20599 = sst [smem:[#allocation95_spill]] %s20487_s0 }
   0x2   :  { %20600 = sst [smem:[#allocation96_spill]] %s20488_s1 }
   0x3   :  { %20601 = sst [smem:[#allocation97_spill]] %s20489_s2 }
   0x4   :  { %20602 = sst [smem:[#allocation98_spill]] %s20490_s3 }
   0x5   :  { %20603 = sst [smem:[#allocation99_spill]] %s20491_s4 }
   0x6   :  { %20604 = sst [smem:[#allocation100_spill]] %s20492_s5 }
   0x7   :  { %20605 = sst [smem:[#allocation101_spill]] %s20493_s6 }
   0x8   :  { %20606 = sst [smem:[#allocation102_spill]] %s20496_s9 }
   0x9   :  { %25 = vsyncpa [#allocation7], 0 }
   0xa   :  { %27 = vsyncpa [#allocation7 + $0x1], 0  ;;  %s15280_s1 = smov 0   ;;  %s15282_s22 = smov 0  }
   0xb   :  { %s15284_s23 = smov 0   ;;  %s15286_s24 = smov 0  }
   0xc LB: > { %20607 = sst [smem:[#allocation9_spill]] %s15164_s23  ;;  %s15301_s2 = sadd.s32 4294967295, %s15168_s24   ;;  %s15168_s24 = sphi %s15286_s24, %s20965_s24   ;;  %s15164_s23 = sphi %s15284_s23, %s20967_s23   ;;  %s15160_s22 = sphi %s15282_s22, %s20969_s22   ;;  %s15156_s1 = sphi %s15280_s1, %s20968_s1  }
   0xd   : > { %s11859_s25 = sadd.s32 4294967294, %s15168_s24   ;;  %s15305_s3 = sadd.s32 1, %s15168_s24  }
   0xe   : > { %20608 = sst [smem:[#allocation10_spill]] %s15305_s3  ;;  %s465_s26 = sadd.s32 1, %s15164_s23 }
   0xf   : > { %s462_s27 = ssub.s32 %s15168_s24, %s15305_s3  ;;  %p475_p0 = scmp.ne.s32.totalorder %s15164_s23, %s15160_s22 }
  0x10   : > { %p463_p1 = scmp.eq.s32.totalorder %s462_s27, 0  ;;  %p476_p2 = scmp.eq.s32.totalorder %s15301_s2, 1 }
  0x11   : > { %p481_p3 = scmp.ne.s32.totalorder %s15160_s22, %s15156_s1  ;;  %p482_p4 = scmp.eq.s32.totalorder %s11859_s25, 1 }
  0x12   : > { %s15316_s28 = scalar_select %p463_p1, %s15164_s23, %s465_s26  }
  0x13   : > { %p15318_p5 = por %p476_p2, %p475_p0  ;;  %p15322_p6 = por %p482_p4, %p481_p3 }
  0x14   : > { %20609 = sst [smem:[#allocation11_spill]] %s15316_s28  ;;  %p11862_p7 = scmp.ge.s32.totalorder %s15168_s24, 1 }
  0x15   : > { %p565_p8 = scmp.lt.s32.totalorder %s15168_s24, 3 }
  0x17   : > { %p566_p9 = pnand %p11862_p7, %p565_p8 }
  0x19   : > { %569 = sbr.rel (%p566_p9) target bundleno = 4230 (0x1086), region = 100 }
  0x1e   : > { %s20612_s21 = sld [smem:[#allocation96_spill]]  ;;  %p623_p10 = scmp.lt.s32.totalorder %s15301_s2, 1  ;;  %vm690_vm0 = vcmask 130048   ;;  %vm906_vm1 = vcmask 261120   ;;  %v15170_v49 = vmov 0.0   ;;  %vm15171_vm2 = vmmov 0  }
  0x1f   : > { %s20613_s23 = sld [smem:[#allocation95_spill]]  ;;  %1372 = vst.msk [vmem:[#allocation2] sm:$0xff] %vm906_vm1, %v15170_v49  ;;  %1373 = vst.msk [vmem:[#allocation2 + $0x8] sm:$0xff] %vm906_vm1, %v15170_v49  ;;  %vm1374_vm3 = vcmask 254976   ;;  %vm1380_vm4 = vcmask 253952   ;;  %vm4142_vm5 = vcmask 523264  }
  0x20   : > { %s624_s25 = scalar_select %p623_p10, %s15301_s2, 1  ;;  %1377 = vst.msk [vmem:[#allocation2 + $0x198] sm:$0xff] %vm906_vm1, %v15170_v49  ;;  %1378 = vst.msk [vmem:[#allocation2 + $0x1a0] sm:$0xff] %vm906_vm1, %v15170_v49  ;;  %vm4834_vm6 = vcmask 517120   ;;  %vm4840_vm7 = vcmask 516096  }
  0x21   : > { %9852 = vst [vmem:[#allocation5] sm:$0xff] %v15170_v49  ;;  %9853 = vst [vmem:[#allocation5 + $0x8] sm:$0x3] %v15170_v49  ;;  %s20614_s28 = sld [smem:[#allocation98_spill]]  ;;  %s620_s0 = sand.u32 1, %s15160_s22  }
  0x22   : > { %s12466_s26 = sshll.u32 %s624_s25, 8  ;;  %9855 = vst [vmem:[#allocation5 + $0x90] sm:$0xff] %v15170_v49  ;;  %9856 = vst [vmem:[#allocation5 + $0x98] sm:$0x3] %v15170_v49  ;;  %s20615_s30 = sld [smem:[#allocation97_spill]] }
  0x23   : > { %9857 = vst [vmem:[#allocation5 + $0x10] sm:$0x1] %v15170_v49  ;;  %9858 = vst [vmem:[#allocation5 + $0x20] sm:$0x1] %v15170_v49  ;;  %s20616_s25 = sld [smem:[#allocation99_spill]] }
  0x24   : > { %v14716_v0 = vld [vmem:[%s20612_s21] sm:$0xff]   ;;  %9859 = vst [vmem:[#allocation5 + $0x30] sm:$0x1] %v15170_v49  ;;  %9860 = vst [vmem:[#allocation5 + $0x40] sm:$0x1] %v15170_v49  ;;  %s20750_s5 = sld [smem:[#allocation100_spill]] }
  0x25   : > { %13273 = vmatprep.subr.bf16.mxu0 %v14716_v0  ;;  %14671 = vmatprep.subr.bf16.mxu1 %v14716_v0  ;;  %s15336_s3 = scalar_lea.vmem %s20613_s23, %s12466_s26  ;;  %9861 = vst [vmem:[#allocation5 + $0x50] sm:$0x1] %v15170_v49  ;;  %9862 = vst [vmem:[#allocation5 + $0x60] sm:$0x1] %v15170_v49  ;;  %s20809_s9 = sld [smem:[#allocation102_spill]] }
  0x26   : > { %13274 = vmatpush3.bf16.msra.mxu0 %v14716_v0  ;;  %14672 = vmatpush3.bf16.msra.mxu1 %v14716_v0  ;;  %v629_v1 = vld [vmem:[%s15336_s3] sm:$0xff]  ;;  %v630_v2 = vld [vmem:[%s15336_s3 + $0x8] sm:$0xff]  ;;  %v631_v3 = vld [vmem:[%s15336_s3 + $0x10] sm:$0xff]  ;;  %9863 = vst [vmem:[#allocation5 + $0x70] sm:$0x1] %v15170_v49  ;;  %s20879_s6 = sld [smem:[#allocation101_spill]] }
  0x27   : > { %v661_v4 = vpack.c.bf16 %v630_v2, %v629_v1  ;;  %v632_v5 = vld [vmem:[%s15336_s3 + $0x18] sm:$0xff]  ;;  %v633_v6 = vld [vmem:[%s15336_s3 + $0x20] sm:$0xff]  ;;  %v634_v7 = vld [vmem:[%s15336_s3 + $0x28] sm:$0xff]  ;;  %13307 = vmatprep.subr.mxu1 %v15170_v49  ;;  %9864 = vst [vmem:[#allocation5 + $0x80] sm:$0x1] %v15170_v49  ;;  %s11863_s21 = sshll.u32 %s620_s0, 4 }
  0x28   : > { %v662_v8 = vpack.c.bf16 %v632_v5, %v631_v3  ;;  %v663_v9 = vpack.c.bf16 %v634_v7, %v633_v6  ;;  %v635_v10 = vld [vmem:[%s15336_s3 + $0x30] sm:$0xff]  ;;  %v636_v11 = vld [vmem:[%s15336_s3 + $0x38] sm:$0xff]  ;;  %v637_v12 = vld [vmem:[%s15336_s3 + $0x40] sm:$0xff]  ;;  %9865 = vst [vmem:[#allocation5 + $0x19] sm:$0x1] %v15170_v49  ;;  %s12467_s23 = sshll.u32 %s15301_s2, 8 }
  0x29   : > { %13275 = vmatprep.mubr.msk.bf16.mxu0 %vm690_vm0, %v661_v4  ;;  %v638_v13 = vld [vmem:[%s15336_s3 + $0x48] sm:$0xff]  ;;  %v664_v14 = vpack.c.bf16 %v636_v11, %v635_v10  ;;  %v657_v16 = vld [vmem:[%s15336_s3 + $0xe0] sm:$0xff]  ;;  %v659_v19 = vld [vmem:[%s15336_s3 + $0xf0] sm:$0xff]  ;;  %9866 = vst [vmem:[#allocation5 + $0x29] sm:$0x1] %v15170_v49  ;;  %s15172_s26 = smov [#allocation6]  }
  0x2a   : > { %13276 = vmatmul.mubr.msk.bf16.vlgmr.msra.gmra.mxu0 %vm690_vm0, %v662_v8  ;;  %v665_v15 = vpack.c.bf16 %v638_v13, %v637_v12  ;;  %v658_v17 = vld [vmem:[%s15336_s3 + $0xe8] sm:$0xff]  ;;  %v660_v20 = vld [vmem:[%s15336_s3 + $0xf8] sm:$0xff]  ;;  %v639_v21 = vld [vmem:[%s15336_s3 + $0x50] sm:$0xff]  ;;  %9867 = vst [vmem:[#allocation5 + $0x39] sm:$0x1] %v15170_v49  ;;  %s15112_s27 = sshll.u32 %s15172_s26, 4  ;;  %s15113_s27 = int_to_ptr.vmem [resolvable:$false] %s15112_s27 }
  0x2b   : > { %13279 = vmatprep.mubr.msk.bf16.mxu0 %vm690_vm0, %v663_v9  ;;  %v675_v18 = vpack.c.bf16 %v658_v17, %v657_v16  ;;  %v640_v22 = vld [vmem:[%s15336_s3 + $0x58] sm:$0xff]  ;;  %v676_v23 = vpack.c.bf16 %v660_v20, %v659_v19  ;;  %v641_v24 = vld [vmem:[%s15336_s3 + $0x60] sm:$0xff]  ;;  %v642_v25 = vld [vmem:[%s15336_s3 + $0x68] sm:$0xff]  ;;  %9868 = vst [vmem:[#allocation5 + $0x49] sm:$0x1] %v15170_v49 }
  0x2c   : > { %v666_v26 = vpack.c.bf16 %v640_v22, %v639_v21  ;;  %v667_v27 = vpack.c.bf16 %v642_v25, %v641_v24  ;;  %v643_v28 = vld [vmem:[%s15336_s3 + $0x70] sm:$0xff]  ;;  %v644_v29 = vld [vmem:[%s15336_s3 + $0x78] sm:$0xff]  ;;  %v645_v30 = vld [vmem:[%s15336_s3 + $0x80] sm:$0xff]  ;;  %9869 = vst [vmem:[#allocation5 + $0x59] sm:$0x1] %v15170_v49 }
  0x2d   : > { %13303 = vmatprep.mubr.msk.bf16.mxu1 %vm690_vm0, %v675_v18  ;;  %v646_v31 = vld [vmem:[%s15336_s3 + $0x88] sm:$0xff]  ;;  %v668_v32 = vpack.c.bf16 %v644_v29, %v643_v28  ;;  %v647_v34 = vld [vmem:[%s15336_s3 + $0x90] sm:$0xff]  ;;  %v648_v35 = vld [vmem:[%s15336_s3 + $0x98] sm:$0xff]  ;;  %9870 = vst [vmem:[#allocation5 + $0x69] sm:$0x1] %v15170_v49 }
  0x2e   : > { %13304 = vmatmul.mubr.msk.bf16.vlgmr.msra.gmra.mxu1 %vm690_vm0, %v676_v23  ;;  %v669_v33 = vpack.c.bf16 %v646_v31, %v645_v30  ;;  %v649_v36 = vld [vmem:[%s15336_s3 + $0xa0] sm:$0xff]  ;;  %v650_v37 = vld [vmem:[%s15336_s3 + $0xa8] sm:$0xff]  ;;  %v670_v38 = vpack.c.bf16 %v648_v35, %v647_v34  ;;  %v651_v40 = vld [vmem:[%s15336_s3 + $0xb0] sm:$0xff]  ;;  %9871 = vst [vmem:[#allocation5 + $0x79] sm:$0x1] %v15170_v49 }
  0x2f   : > { %v671_v39 = vpack.c.bf16 %v650_v37, %v649_v36  ;;  %v652_v41 = vld [vmem:[%s15336_s3 + $0xb8] sm:$0xff]  ;;  %v653_v42 = vld [vmem:[%s15336_s3 + $0xc0] sm:$0xff]  ;;  %v654_v43 = vld [vmem:[%s15336_s3 + $0xc8] sm:$0xff]  ;;  %9872 = vst [vmem:[#allocation5 + $0x89] sm:$0x1] %v15170_v49  ;;  %13315 = vmatprep.mubr.msk.f32.mxu1 %vm15171_vm2, %v15170_v49 }
  0x30   : > { %v672_v44 = vpack.c.bf16 %v652_v41, %v651_v40  ;;  %v673_v45 = vpack.c.bf16 %v654_v43, %v653_v42  ;;  %v655_v46 = vld [vmem:[%s15336_s3 + $0xd0] sm:$0xff]  ;;  %v656_v47 = vld [vmem:[%s15336_s3 + $0xd8] sm:$0xff]  ;;  %v15430_v52 = vld [vmem:[%s20614_s28 + $0x8] sm:$0xff]  ;;  %1375 = vst.msk [vmem:[#allocation2 + $0x10] sm:$0x3] %vm1374_vm3, %v15170_v49 }
  0x31   : > { %v674_v48 = vpack.c.bf16 %v656_v47, %v655_v46  ;;  %v15418_v50 = vld [vmem:[%s20614_s28 + $0x18] sm:$0xff]  ;;  %v15424_v51 = vld [vmem:[%s20614_s28 + $0x10] sm:$0xff]  ;;  %v15439_v53 = vld [vmem:[%s20614_s28] sm:$0xff]  ;;  %1379 = vst.msk [vmem:[#allocation2 + $0x1a8] sm:$0x3] %vm1374_vm3, %v15170_v49  ;;  %s622_s28 = scalar_lea.vmem [#allocation6], %s11863_s21 }
  0x32   : > { %13280 = vmatmul.mubr.msk.bf16.gmra.mxu0 %vm690_vm0, %v664_v14  ;;  %13308 = vmatpush3.msra.mxu1 %v15418_v50  ;;  %v15448_v55 = vld [vmem:[%s20615_s30] ss:$0 sm:$0xff]  ;;  %1381 = vst.msk [vmem:[#allocation2 + $0x18] sm:$0x1] %vm1380_vm4, %v15170_v49  ;;  %1382 = vst.msk [vmem:[#allocation2 + $0x30] sm:$0x1] %vm1380_vm4, %v15170_v49 }
  0x33   : > { %13283 = vmatprep.mubr.msk.bf16.mxu0 %vm690_vm0, %v665_v15  ;;  %13309 = vmatprep.subr.mxu1 %v15170_v49  ;;  %1383 = vst.msk [vmem:[#allocation2 + $0x48] sm:$0x1] %vm1380_vm4, %v15170_v49  ;;  %1384 = vst.msk [vmem:[#allocation2 + $0x60] sm:$0x1] %vm1380_vm4, %v15170_v49  ;;  %s20447_s21 = scalar_lea.sflag [#allocation7], %s620_s0 }
  0x34   : > { %13310 = vmatpush3.msra.mxu1 %v15424_v51  ;;  %1385 = vst.msk [vmem:[#allocation2 + $0x78] sm:$0x1] %vm1380_vm4, %v15170_v49  ;;  %1386 = vst.msk [vmem:[#allocation2 + $0x90] sm:$0x1] %vm1380_vm4, %v15170_v49 }
  0x35   : > { %13311 = vmatprep.subr.mxu1 %v15170_v49  ;;  %1387 = vst.msk [vmem:[#allocation2 + $0xa8] sm:$0x1] %vm1380_vm4, %v15170_v49  ;;  %1388 = vst.msk [vmem:[#allocation2 + $0xc0] sm:$0x1] %vm1380_vm4, %v15170_v49 }
  0x36   : > { %13312 = vmatpush3.msra.mxu1 %v15430_v52  ;;  %1389 = vst.msk [vmem:[#allocation2 + $0xd8] sm:$0x1] %vm1380_vm4, %v15170_v49  ;;  %1390 = vst.msk [vmem:[#allocation2 + $0xf0] sm:$0x1] %vm1380_vm4, %v15170_v49 }
  0x37   : > { %13313 = vmatprep.subr.mxu1 %v15170_v49  ;;  %1391 = vst.msk [vmem:[#allocation2 + $0x108] sm:$0x1] %vm1380_vm4, %v15170_v49  ;;  %1392 = vst.msk [vmem:[#allocation2 + $0x120] sm:$0x1] %vm1380_vm4, %v15170_v49 }
  0x38   : > { %13314 = vmatpush3.msra.mxu1 %v15439_v53  ;;  %1393 = vst.msk [vmem:[#allocation2 + $0x138] sm:$0x1] %vm1380_vm4, %v15170_v49  ;;  %1394 = vst.msk [vmem:[#allocation2 + $0x150] sm:$0x1] %vm1380_vm4, %v15170_v49 }
  0x39   : > { %13318 = vmatprep.subr.mxu1 %v15170_v49  ;;  %1395 = vst.msk [vmem:[#allocation2 + $0x168] sm:$0x1] %vm1380_vm4, %v15170_v49  ;;  %1396 = vst.msk [vmem:[#allocation2 + $0x180] sm:$0x1] %vm1380_vm4, %v15170_v49 }
  0x3a   : > { %13284 = vmatmul.mubr.msk.bf16.gmra.mxu0 %vm690_vm0, %v666_v26  ;;  %1397 = vst.msk [vmem:[#allocation2 + $0x29] sm:$0x1] %vm1380_vm4, %v15170_v49  ;;  %1398 = vst.msk [vmem:[#allocation2 + $0x41] sm:$0x1] %vm1380_vm4, %v15170_v49 }
  0x3b   : > { %13287 = vmatprep.mubr.msk.bf16.mxu0 %vm690_vm0, %v667_v27  ;;  %1399 = vst.msk [vmem:[#allocation2 + $0x59] sm:$0x1] %vm1380_vm4, %v15170_v49  ;;  %1400 = vst.msk [vmem:[#allocation2 + $0x71] sm:$0x1] %vm1380_vm4, %v15170_v49 }
  0x3c   : > { %1401 = vst.msk [vmem:[#allocation2 + $0x89] sm:$0x1] %vm1380_vm4, %v15170_v49  ;;  %1402 = vst.msk [vmem:[#allocation2 + $0xa1] sm:$0x1] %vm1380_vm4, %v15170_v49 }
  0x3d   : > { %1403 = vst.msk [vmem:[#allocation2 + $0xb9] sm:$0x1] %vm1380_vm4, %v15170_v49  ;;  %1404 = vst.msk [vmem:[#allocation2 + $0xd1] sm:$0x1] %vm1380_vm4, %v15170_v49 }
  0x3e   : > { %1405 = vst.msk [vmem:[#allocation2 + $0xe9] sm:$0x1] %vm1380_vm4, %v15170_v49  ;;  %1406 = vst.msk [vmem:[#allocation2 + $0x101] sm:$0x1] %vm1380_vm4, %v15170_v49 }
  0x3f   : > { %1407 = vst.msk [vmem:[#allocation2 + $0x119] sm:$0x1] %vm1380_vm4, %v15170_v49  ;;  %1408 = vst.msk [vmem:[#allocation2 + $0x131] sm:$0x1] %vm1380_vm4, %v15170_v49 }
  0x40   : > { %1409 = vst.msk [vmem:[#allocation2 + $0x149] sm:$0x1] %vm1380_vm4, %v15170_v49  ;;  %1410 = vst.msk [vmem:[#allocation2 + $0x161] sm:$0x1] %vm1380_vm4, %v15170_v49 }
  0x41   : > { %1411 = vst.msk [vmem:[#allocation2 + $0x179] sm:$0x1] %vm1380_vm4, %v15170_v49  ;;  %1412 = vst.msk [vmem:[#allocation2 + $0x191] sm:$0x1] %vm1380_vm4, %v15170_v49 }
  0x42   : > { %13288 = vmatmul.mubr.msk.bf16.gmra.mxu0 %vm690_vm0, %v668_v32 }
  0x43   : > { %13291 = vmatprep.mubr.msk.bf16.mxu0 %vm690_vm0, %v669_v33 }
  0x4a   : > { %13292 = vmatmul.mubr.msk.bf16.gmra.mxu0 %vm690_vm0, %v670_v38 }
  0x4b   : > { %13295 = vmatprep.mubr.msk.bf16.mxu0 %vm690_vm0, %v671_v39 }
  0x52   : > { %13296 = vmatmul.mubr.msk.bf16.gmra.mxu0 %vm690_vm0, %v672_v44 }
  0x53   : > { %13299 = vmatprep.mubr.msk.bf16.mxu0 %vm690_vm0, %v673_v45 }
  0x5a   : > { %13300 = vmatmul.mubr.msk.bf16.gmra.mxu0 %vm690_vm0, %v674_v48 }
  0xea   : > { %v13277_v54 = vpop.f32.mrf.mxu0 }
  0xeb   : > { %v15454_v59 = vadd.f32 %v13277_v54, %v15448_v55 }
  0xec   : > { %v773_v56 = vpop.f32.mrf.mxu0 }
  0xed   : > { %v15451_v57 = vadd.f32 %v15448_v55, %v773_v56  ;;  %v978_v1 = vmul.f32 %v15454_v59, %v15454_v59  ;;  %v910_v5 = vsel %vm906_vm1, %v15454_v59, 0.0 }
  0xee   : > { %v13278_v58 = vpop.f32.mrf.mxu0 }
  0xef   : > { %v976_v61 = vmul.f32 %v15451_v57, %v15451_v57  ;;  %v15459_v62 = vadd.f32 %v13278_v58, %v15448_v55  ;;  %v907_v2 = vsel %vm906_vm1, %v15451_v57, 0.0  ;;  %v1011_v15 = vsel %vm906_vm1, %v978_v1, 0.0 }
  0xf0   : > { %v776_v60 = vpop.f32.mrf.mxu0 }
  0xf1   : > { %v15462_v63 = vadd.f32 %v15448_v55, %v776_v60  ;;  %v1008_v8 = vsel %vm906_vm1, %v976_v61, 0.0  ;;  %v979_v9 = vmul.f32 %v15459_v62, %v15459_v62  ;;  %v912_v16 = vsel %vm906_vm1, %v15459_v62, 0.0 }
  0xf2   : > { %v13281_v0 = vpop.f32.mrf.mxu0 }
  0xf3   : > { %v908_v3 = vsel %vm906_vm1, %v15462_v63, 0.0  ;;  %v977_v4 = vmul.f32 %v15462_v63, %v15462_v63  ;;  %v15485_v17 = vadd.f32 %v13281_v0, %v15448_v55  ;;  %v1013_v22 = vsel %vm906_vm1, %v979_v9, 0.0 }
  0xf4   : > { %v909_v6 = vadd.f32 %v908_v3, %v907_v2  ;;  %v789_v7 = vpop.f32.mrf.mxu0 }
  0xf5   : > { %v1009_v10 = vsel %vm906_vm1, %v977_v4, 0.0  ;;  %v15479_v11 = vadd.f32 %v15448_v55, %v789_v7  ;;  %v982_v29 = vmul.f32 %v15485_v17, %v15485_v17  ;;  %v918_v36 = vsel %vm906_vm1, %v15485_v17, 0.0 }
  0xf6   : > { %v911_v12 = vadd.f32 %v910_v5, %v909_v6  ;;  %v1010_v13 = vadd.f32 %v1009_v10, %v1008_v8  ;;  %v13282_v14 = vpop.f32.mrf.mxu0 }
  0xf7   : > { %v980_v18 = vmul.f32 %v15479_v11, %v15479_v11  ;;  %v914_v23 = vsel %vm906_vm1, %v15479_v11, 0.0  ;;  %v15493_v24 = vadd.f32 %v13282_v14, %v15448_v55  ;;  %v1019_v43 = vsel %vm906_vm1, %v982_v29, 0.0 }
  0xf8   : > { %v1012_v19 = vadd.f32 %v1011_v15, %v1010_v13  ;;  %v913_v20 = vadd.f32 %v912_v16, %v911_v12  ;;  %v792_v21 = vpop.f32.mrf.mxu0 }
  0xf9   : > { %v15496_v25 = vadd.f32 %v15448_v55, %v792_v21  ;;  %v1015_v30 = vsel %vm906_vm1, %v980_v18, 0.0  ;;  %v983_v37 = vmul.f32 %v15493_v24, %v15493_v24  ;;  %v920_v44 = vsel %vm906_vm1, %v15493_v24, 0.0 }
  0xfa   : > { %v915_v26 = vadd.f32 %v914_v23, %v913_v20  ;;  %v1014_v27 = vadd.f32 %v1013_v22, %v1012_v19  ;;  %v13285_v28 = vpop.f32.mrf.mxu0 }
  0xfb   : > { %v916_v31 = vsel %vm906_vm1, %v15496_v25, 0.0  ;;  %v981_v32 = vmul.f32 %v15496_v25, %v15496_v25  ;;  %v15517_v45 = vadd.f32 %v13285_v28, %v15448_v55  ;;  %v1021_v56 = vsel %vm906_vm1, %v983_v37, 0.0 }
  0xfc   : > { %v1016_v33 = vadd.f32 %v1015_v30, %v1014_v27  ;;  %v917_v34 = vadd.f32 %v916_v31, %v915_v26  ;;  %v805_v35 = vpop.f32.mrf.mxu0 }
  0xfd   : > { %v1017_v38 = vsel %vm906_vm1, %v981_v32, 0.0  ;;  %v15511_v39 = vadd.f32 %v15448_v55, %v805_v35  ;;  %v986_v3 = vmul.f32 %v15517_v45, %v15517_v45  ;;  %v926_v10 = vsel %vm906_vm1, %v15517_v45, 0.0 }
  0xfe   : > { %v919_v40 = vadd.f32 %v918_v36, %v917_v34  ;;  %v1018_v41 = vadd.f32 %v1017_v38, %v1016_v33  ;;  %v13286_v42 = vpop.f32.mrf.mxu0 }
  0xff   : > { %v984_v46 = vmul.f32 %v15511_v39, %v15511_v39  ;;  %v922_v58 = vsel %vm906_vm1, %v15511_v39, 0.0  ;;  %v15525_v60 = vadd.f32 %v13286_v42, %v15448_v55  ;;  %v1027_v19 = vsel %vm906_vm1, %v986_v3, 0.0 }
 0x100   : > { %v1020_v47 = vadd.f32 %v1019_v43, %v1018_v41  ;;  %v921_v48 = vadd.f32 %v920_v44, %v919_v40  ;;  %v808_v54 = vpop.f32.mrf.mxu0 }
 0x101   : > { %v15528_v61 = vadd.f32 %v15448_v55, %v808_v54  ;;  %v1023_v4 = vsel %vm906_vm1, %v984_v46, 0.0  ;;  %v987_v12 = vmul.f32 %v15525_v60, %v15525_v60  ;;  %v928_v20 = vsel %vm906_vm1, %v15525_v60, 0.0 }
 0x102   : > { %v923_v0 = vadd.f32 %v922_v58, %v921_v48  ;;  %v1022_v1 = vadd.f32 %v1021_v56, %v1020_v47  ;;  %v13289_v2 = vpop.f32.mrf.mxu0 }
 0x103   : > { %v924_v5 = vsel %vm906_vm1, %v15528_v61, 0.0  ;;  %v985_v6 = vmul.f32 %v15528_v61, %v15528_v61  ;;  %v15549_v21 = vadd.f32 %v13289_v2, %v15448_v55  ;;  %v1029_v28 = vsel %vm906_vm1, %v987_v12, 0.0 }
 0x104   : > { %v1024_v7 = vadd.f32 %v1023_v4, %v1022_v1  ;;  %v925_v8 = vadd.f32 %v924_v5, %v923_v0  ;;  %v821_v9 = vpop.f32.mrf.mxu0 }
 0x105   : > { %v1025_v13 = vsel %vm906_vm1, %v985_v6, 0.0  ;;  %v15543_v14 = vadd.f32 %v15448_v55, %v821_v9  ;;  %v990_v35 = vmul.f32 %v15549_v21, %v15549_v21  ;;  %v934_v43 = vsel %vm906_vm1, %v15549_v21, 0.0 }
 0x106   : > { %v927_v15 = vadd.f32 %v926_v10, %v925_v8  ;;  %v1026_v16 = vadd.f32 %v1025_v13, %v1024_v7  ;;  %v13290_v18 = vpop.f32.mrf.mxu0 }
 0x107   : > { %v988_v22 = vmul.f32 %v15543_v14, %v15543_v14  ;;  %v930_v29 = vsel %vm906_vm1, %v15543_v14, 0.0  ;;  %v15557_v30 = vadd.f32 %v13290_v18, %v15448_v55  ;;  %v1035_v58 = vsel %vm906_vm1, %v990_v35, 0.0  ;;  %v13305_v35 = vpop.f32.mrf.mxu1 }
 0x108   : > { %v1028_v23 = vadd.f32 %v1027_v19, %v1026_v16  ;;  %v929_v26 = vadd.f32 %v928_v20, %v927_v15  ;;  %v824_v27 = vpop.f32.mrf.mxu0 }
 0x109   : > { %v15560_v31 = vadd.f32 %v15448_v55, %v824_v27  ;;  %v1031_v36 = vsel %vm906_vm1, %v988_v22, 0.0  ;;  %v991_v44 = vmul.f32 %v15557_v30, %v15557_v30  ;;  %v936_v0 = vsel %vm906_vm1, %v15557_v30, 0.0 }
 0x10a   : > { %v931_v32 = vadd.f32 %v930_v29, %v929_v26  ;;  %v1030_v33 = vadd.f32 %v1029_v28, %v1028_v23  ;;  %v13293_v34 = vpop.f32.mrf.mxu0 }
 0x10b   : > { %v932_v37 = vsel %vm906_vm1, %v15560_v31, 0.0  ;;  %v989_v38 = vmul.f32 %v15560_v31, %v15560_v31  ;;  %v15581_v1 = vadd.f32 %v13293_v34, %v15448_v55  ;;  %v1037_v6 = vsel %vm906_vm1, %v991_v44, 0.0 }
 0x10c   : > { %v1032_v40 = vadd.f32 %v1031_v36, %v1030_v33  ;;  %v933_v41 = vadd.f32 %v932_v37, %v931_v32  ;;  %v837_v42 = vpop.f32.mrf.mxu0 }
 0x10d   : > { %v1033_v46 = vsel %vm906_vm1, %v989_v38, 0.0  ;;  %v15575_v47 = vadd.f32 %v15448_v55, %v837_v42  ;;  %v994_v15 = vmul.f32 %v15581_v1, %v15581_v1  ;;  %v942_v26 = vsel %vm906_vm1, %v15581_v1, 0.0 }
 0x10e   : > { %v935_v48 = vadd.f32 %v934_v43, %v933_v41  ;;  %v1034_v54 = vadd.f32 %v1033_v46, %v1032_v40  ;;  %v13294_v56 = vpop.f32.mrf.mxu0 }
 0x10f   : > { %v992_v2 = vmul.f32 %v15575_v47, %v15575_v47  ;;  %v938_v7 = vsel %vm906_vm1, %v15575_v47, 0.0  ;;  %v15589_v8 = vadd.f32 %v13294_v56, %v15448_v55  ;;  %v1043_v36 = vsel %vm906_vm1, %v994_v15, 0.0 }
 0x110   : > { %v1036_v3 = vadd.f32 %v1035_v58, %v1034_v54  ;;  %v937_v4 = vadd.f32 %v936_v0, %v935_v48  ;;  %v840_v5 = vpop.f32.mrf.mxu0 }
 0x111   : > { %v15592_v9 = vadd.f32 %v15448_v55, %v840_v5  ;;  %v1039_v16 = vsel %vm906_vm1, %v992_v2, 0.0  ;;  %v995_v27 = vmul.f32 %v15589_v8, %v15589_v8  ;;  %v944_v37 = vsel %vm906_vm1, %v15589_v8, 0.0  ;;  %v885_v2 = vpop.f32.mrf.mxu1 }
 0x112   : > { %v939_v10 = vadd.f32 %v938_v7, %v937_v4  ;;  %v1038_v12 = vadd.f32 %v1037_v6, %v1036_v3  ;;  %v13297_v13 = vpop.f32.mrf.mxu0 }
 0x113   : > { %v940_v18 = vsel %vm906_vm1, %v15592_v9, 0.0  ;;  %v993_v19 = vmul.f32 %v15592_v9, %v15592_v9  ;;  %v15613_v38 = vadd.f32 %v13297_v13, %v15448_v55  ;;  %v1045_v44 = vsel %vm906_vm1, %v995_v27, 0.0 }
 0x114   : > { %v1040_v20 = vadd.f32 %v1039_v16, %v1038_v12  ;;  %v941_v22 = vadd.f32 %v940_v18, %v939_v10  ;;  %v853_v23 = vpop.f32.mrf.mxu0 }
 0x115   : > { %v1041_v28 = vsel %vm906_vm1, %v993_v19, 0.0  ;;  %v15607_v29 = vadd.f32 %v15448_v55, %v853_v23  ;;  %v998_v3 = vmul.f32 %v15613_v38, %v15613_v38  ;;  %v950_v13 = vsel %vm906_vm1, %v15613_v38, 0.0  ;;  %v13306_v23 = vpop.f32.mrf.mxu1 }
 0x116   : > { %v943_v32 = vadd.f32 %v942_v26, %v941_v22  ;;  %v1042_v33 = vadd.f32 %v1041_v28, %v1040_v20  ;;  %v13298_v34 = vpop.f32.mrf.mxu0 }
 0x117   : > { %v996_v40 = vmul.f32 %v15607_v29, %v15607_v29  ;;  %v946_v46 = vsel %vm906_vm1, %v15607_v29, 0.0  ;;  %v15621_v48 = vadd.f32 %v13298_v34, %v15448_v55  ;;  %v1051_v26 = vsel %vm906_vm1, %v998_v3, 0.0 }
 0x118   : > { %v1044_v41 = vadd.f32 %v1043_v36, %v1042_v33  ;;  %v945_v42 = vadd.f32 %v944_v37, %v943_v32  ;;  %v856_v43 = vpop.f32.mrf.mxu0 }
 0x119   : > { %v15624_v54 = vadd.f32 %v15448_v55, %v856_v43  ;;  %v1047_v4 = vsel %vm906_vm1, %v996_v40, 0.0  ;;  %v999_v15 = vmul.f32 %v15621_v48, %v15621_v48  ;;  %v952_v27 = vsel %vm906_vm1, %v15621_v48, 0.0 }
 0x11a   : > { %v947_v56 = vadd.f32 %v946_v46, %v945_v42  ;;  %v1046_v58 = vadd.f32 %v1045_v44, %v1044_v41  ;;  %v13301_v0 = vpop.f32.mrf.mxu0  ;;  %v15659_v46 = vadd.f32 %v15448_v55, %v885_v2 }
 0x11b   : > { %v948_v5 = vsel %vm906_vm1, %v15624_v54, 0.0  ;;  %v997_v6 = vmul.f32 %v15624_v54, %v15624_v54  ;;  %v15645_v28 = vadd.f32 %v13301_v0, %v15448_v55  ;;  %v1053_v37 = vsel %vm906_vm1, %v999_v15, 0.0 }
 0x11c   : > { %v1048_v7 = vadd.f32 %v1047_v4, %v1046_v58  ;;  %v949_v10 = vadd.f32 %v948_v5, %v947_v56  ;;  %v869_v12 = vpop.f32.mrf.mxu0  ;;  %v888_v56 = vpop.f32.mrf.mxu1 }
 0x11d   : > { %v1049_v16 = vsel %vm906_vm1, %v997_v6, 0.0  ;;  %v15639_v18 = vadd.f32 %v15448_v55, %v869_v12  ;;  %v1002_v58 = vmul.f32 %v15645_v28, %v15645_v28  ;;  %v15674_v12 = vadd.f32 %v15448_v55, %v888_v56 }
 0x11e   : > { %v951_v19 = vadd.f32 %v950_v13, %v949_v10  ;;  %v1050_v20 = vadd.f32 %v1049_v16, %v1048_v7  ;;  %v13302_v22 = vpop.f32.mrf.mxu0  ;;  %v958_v7 = vsel %vm906_vm1, %v15645_v28, 0.0 }
 0x11f   : > { %v1000_v32 = vmul.f32 %v15639_v18, %v15639_v18  ;;  %v954_v40 = vsel %vm906_vm1, %v15639_v18, 0.0  ;;  %v15653_v41 = vadd.f32 %v13302_v22, %v15448_v55  ;;  %v1059_v16 = vsel %vm906_vm1, %v1002_v58, 0.0 }
 0x120   : > { %v1052_v33 = vadd.f32 %v1051_v26, %v1050_v20  ;;  %v953_v34 = vadd.f32 %v952_v27, %v951_v19  ;;  %v872_v36 = vpop.f32.mrf.mxu0  ;;  %v15678_v19 = vadd.f32 %v13305_v35, %v15448_v55  ;;  %v1004_v22 = vmul.f32 %v15659_v46, %v15659_v46 }
 0x121   : > { %v15656_v42 = vadd.f32 %v15448_v55, %v872_v36  ;;  %v1055_v0 = vsel %vm906_vm1, %v1000_v32, 0.0  ;;  %v1003_v2 = vmul.f32 %v15653_v41, %v15653_v41  ;;  %v960_v20 = vsel %vm906_vm1, %v15653_v41, 0.0 }
 0x122   : > { %v955_v43 = vadd.f32 %v954_v40, %v953_v34  ;;  %v1054_v44 = vadd.f32 %v1053_v37, %v1052_v33  ;;  %v962_v33 = vsel %vm906_vm1, %v15659_v46, 0.0  ;;  %v15688_v34 = vadd.f32 %v13306_v23, %v15448_v55 }
 0x123   : > { %v956_v3 = vsel %vm906_vm1, %v15656_v42, 0.0  ;;  %v1001_v4 = vmul.f32 %v15656_v42, %v15656_v42  ;;  %v1061_v32 = vsel %vm906_vm1, %v1003_v2, 0.0  ;;  %v1005_v35 = vmul.f32 %v15674_v12, %v15674_v12 }
 0x124   : > { %v1056_v5 = vadd.f32 %v1055_v0, %v1054_v44  ;;  %v957_v6 = vadd.f32 %v956_v3, %v955_v43  ;;  %v1006_v40 = vmul.f32 %v15678_v19, %v15678_v19  ;;  %v1063_v43 = vsel %vm906_vm1, %v1004_v22, 0.0 }
 0x125   : > { %v1057_v10 = vsel %vm906_vm1, %v1001_v4, 0.0  ;;  %v964_v44 = vsel %vm906_vm1, %v15674_v12, 0.0  ;;  %v966_v0 = vsel %vm906_vm1, %v15678_v19, 0.0  ;;  %v1007_v55 = vmul.f32 %v15688_v34, %v15688_v34 }
 0x126   : > { %v959_v13 = vadd.f32 %v958_v7, %v957_v6  ;;  %v1058_v15 = vadd.f32 %v1057_v10, %v1056_v5  ;;  %v1065_v23 = vsel %vm906_vm1, %v1005_v35, 0.0  ;;  %v1067_v5 = vsel %vm906_vm1, %v1006_v40, 0.0 }
 0x127   : > { %v968_v6 = vsel %vm906_vm1, %v15688_v34, 0.0  ;;  %v1069_v10 = vsel %vm906_vm1, %v1007_v55, 0.0  ;;  %v15800_v55 = vld [vmem:[%s20616_s25 + $0x28] sm:$0xff]  }
 0x128   : > { %v1060_v26 = vadd.f32 %v1059_v16, %v1058_v15  ;;  %v961_v27 = vadd.f32 %v960_v20, %v959_v13 }
 0x12a   : > { %v963_v36 = vadd.f32 %v962_v33, %v961_v27  ;;  %v1062_v37 = vadd.f32 %v1061_v32, %v1060_v26 }
 0x12c   : > { %v965_v56 = vadd.f32 %v964_v44, %v963_v36  ;;  %v1064_v58 = vadd.f32 %v1063_v43, %v1062_v37  ;;  %v1413_v43 = vld [vmem:[#allocation2] sm:$0xff]  ;;  %v1414_v44 = vld [vmem:[#allocation2 + $0x8] sm:$0xff] }
 0x12e   : > { %v967_v3 = vadd.f32 %v966_v0, %v965_v56  ;;  %v1066_v4 = vadd.f32 %v1065_v23, %v1064_v58  ;;  %v1445_v56 = vpack.c.bf16 %v1414_v44, %v1413_v43  ;;  %v1465_v58 = vld [vmem:[#allocation2 + $0x1] sm:$0xff]  ;;  %v1466_v0 = vld [vmem:[#allocation2 + $0x9] sm:$0xff]  ;;  %v15806_v23 = vld [vmem:[%s20616_s25 + $0x38] sm:$0xff]  }
 0x130   : > { %v969_v7 = vadd.f32 %v968_v6, %v967_v3  ;;  %v1068_v2 = vadd.f32 %v1067_v5, %v1066_v4  ;;  %13369 = vmatprep.mubr.msk.bf16.mxu0 %vm906_vm1, %v1445_v56 }
 0x132   : > { %v970_v13 = vrot.slane %v969_v7, 4  ;;  %v1070_v15 = vadd.f32 %v1069_v10, %v1068_v2 }
 0x134   : > { %v971_v16 = vadd.f32 %v970_v13, %v969_v7  ;;  %v1071_v20 = vrot.slane %v1070_v15, 4  ;;  %v1230_v13 = vlaneseq }
 0x136   : > { %v972_v22 = vrot.slane %v971_v16, 2  ;;  %v1072_v26 = vadd.f32 %v1071_v20, %v1070_v15  ;;  %v1231_v20 = vshrl.u32 %v1230_v13, 7 }
 0x138   : > { %v973_v27 = vadd.f32 %v972_v22, %v971_v16  ;;  %v1073_v32 = vrot.slane %v1072_v26, 2 }
 0x13a   : > { %v974_v33 = vrot.slane %v973_v27, 1  ;;  %v1074_v36 = vadd.f32 %v1073_v32, %v1072_v26  ;;  %v15809_v26 = vsub.s32 0, %v1231_v20 }
 0x13c   : > { %v975_v35 = vadd.f32 %v974_v33, %v973_v27  ;;  %v1075_v37 = vrot.slane %v1074_v36, 1  ;;  %20617 = vst [vmem:[#allocation12_spill] sm:$0xff] %v15809_v26 }
 0x13e   : > { %13316 = vmatmul.mubr.msk.f32.vlgmr.msra.gmra.mxu1 %vm906_vm1, %v975_v35  ;;  %v1076_v40 = vadd.f32 %v1075_v37, %v1074_v36 }
 0x13f   : > { %13319 = vmatpush3.msra.mxu1 %v15418_v50  ;;  %13326 = vmatprep.mubr.msk.f32.mxu1 %vm15171_vm2, %v15170_v49  ;;  %v14717_v50 = vld [vmem:[%s20616_s25 + $0x18] sm:$0xff]  }
 0x140   : > { %13320 = vmatprep.subr.mxu1 %v15170_v49 }
 0x141   : > { %13321 = vmatpush3.msra.mxu1 %v15424_v51  ;;  %v14718_v51 = vld [vmem:[%s20616_s25 + $0x8] sm:$0xff]  }
 0x142   : > { %13322 = vmatprep.subr.mxu1 %v15170_v49  ;;  %13365 = vmatprep.subr.bf16.mxu0 %v14718_v51 }
 0x143   : > { %13323 = vmatpush3.msra.mxu1 %v15430_v52  ;;  %v14719_v52 = vld [vmem:[%s20616_s25 + $0x10] sm:$0xff]   ;;  %13366 = vmatpush3.bf16.msra.mxu0 %v14718_v51 }
 0x144   : > { %13324 = vmatprep.subr.mxu1 %v15170_v49  ;;  %v1497_v49 = vpack.c.bf16 %v1466_v0, %v1465_v58 }
 0x145   : > { %13325 = vmatpush3.msra.mxu1 %v15439_v53  ;;  %v14720_v53 = vld [vmem:[%s20616_s25] sm:$0xff]  }
 0x146   : > { %13327 = vmatmul.mubr.msk.f32.vlgmr.msra.gmra.mxu1 %vm906_vm1, %v1076_v40  ;;  %13329 = vmatprep.subr.bf16.mxu1 %v14717_v50 }
 0x147   : > { %13330 = vmatpush3.bf16.msra.mxu1 %v14717_v50  ;;  %13367 = vmatprep.subr.bf16.mxu0 %v14720_v53 }
 0x148   : > { %13331 = vmatprep.subr.bf16.mxu1 %v14719_v52  ;;  %13368 = vmatpush3.bf16.msra.mxu0 %v14720_v53 }
 0x149   : > { %13333 = vmatprep.mubr.msk.bf16.mxu1 %vm906_vm1, %v1497_v49  ;;  %13437 = vmatprep.subr.bf16.mxu0 %v15806_v23 }
 0x14b   : > { %13332 = vmatpush3.bf16.msra.mxu1 %v14719_v52 }
 0x14c   : > { %13401 = vmatprep.subr.bf16.mxu1 %v15800_v55 }
 0x1fe   : > { %v1146_v3 = vpop.f32.mrf.mxu1 }
 0x1ff   : > { %v1150_v6 = vmul.f32 0.0009765625, %v1146_v3 }
 0x200   : > { %v13317_v4 = vpop.f32.mrf.mxu1 }
 0x201   : > { %v1225_v2 = vmul.f32 %v1150_v6, %v1150_v6  ;;  %v15812_v27 = vrot.slane %v1150_v6, %v15809_v26 }
 0x203   : > { %v1234_v32 = vsub.f32 %v15451_v57, %v15812_v27  ;;  %v1235_v33 = vsub.f32 %v15462_v63, %v15812_v27  ;;  %v1236_v35 = vsub.f32 %v15454_v59, %v15812_v27  ;;  %v1237_v36 = vsub.f32 %v15459_v62, %v15812_v27  ;;  %v900_v62 = vld [vmem:[%s20615_s30 + $0x1] sm:$0x1] }
 0x204   : > { %v1238_v37 = vsub.f32 %v15479_v11, %v15812_v27  ;;  %v1239_v40 = vsub.f32 %v15496_v25, %v15812_v27  ;;  %v1240_v50 = vsub.f32 %v15485_v17, %v15812_v27  ;;  %v1241_v57 = vsub.f32 %v15493_v24, %v15812_v27 }
 0x205   : > { %v1242_v63 = vsub.f32 %v15511_v39, %v15812_v27  ;;  %v1243_v59 = vsub.f32 %v15528_v61, %v15812_v27  ;;  %v1244_v11 = vsub.f32 %v15517_v45, %v15812_v27  ;;  %v1245_v25 = vsub.f32 %v15525_v60, %v15812_v27 }
 0x206   : > { %v1220_v5 = vpop.f32.mrf.mxu1  ;;  %v1246_v17 = vsub.f32 %v15543_v14, %v15812_v27  ;;  %v1247_v24 = vsub.f32 %v15560_v31, %v15812_v27  ;;  %v1248_v61 = vsub.f32 %v15549_v21, %v15812_v27  ;;  %v1249_v51 = vsub.f32 %v15557_v30, %v15812_v27 }
 0x207   : > { %v1224_v10 = vmul.f32 0.0009765625, %v1220_v5  ;;  %v1250_v52 = vsub.f32 %v15575_v47, %v15812_v27  ;;  %v1251_v45 = vsub.f32 %v15592_v9, %v15812_v27  ;;  %v1252_v60 = vsub.f32 %v15581_v1, %v15812_v27 }
 0x208   : > { %v13328_v7 = vpop.f32.mrf.mxu1  ;;  %v1253_v14 = vsub.f32 %v15589_v8, %v15812_v27  ;;  %v1254_v31 = vsub.f32 %v15607_v29, %v15812_v27  ;;  %v1255_v21 = vsub.f32 %v15624_v54, %v15812_v27  ;;  %v1256_v30 = vsub.f32 %v15613_v38, %v15812_v27 }
 0x209   : > { %v1226_v15 = vsub.f32 %v1224_v10, %v1225_v2  ;;  %v1257_v47 = vsub.f32 %v15621_v48, %v15812_v27  ;;  %v1258_v9 = vsub.f32 %v15639_v18, %v15812_v27  ;;  %v1259_v1 = vsub.f32 %v15656_v42, %v15812_v27 }
 0x20a   : > { %v1260_v8 = vsub.f32 %v15645_v28, %v15812_v27  ;;  %v1261_v29 = vsub.f32 %v15653_v41, %v15812_v27  ;;  %v1262_v38 = vsub.f32 %v15659_v46, %v15812_v27  ;;  %v1263_v48 = vsub.f32 %v15674_v12, %v15812_v27 }
 0x20b   : > { %v1227_v16 = vmax.f32 %v1226_v15, 0.0  ;;  %v1264_v18 = vsub.f32 %v15678_v19, %v15812_v27  ;;  %v1265_v42 = vsub.f32 %v15688_v34, %v15812_v27  ;;  %v15885_v15 = vld [vmem:[%s20615_s30 + $0x2] ss:$0 sm:$0xff] }
 0x20d   : > { %v1228_v22 = vadd.f32 1e-05, %v1227_v16 }
 0x20f   : > { %14893 = vrsqrt.f32 %v1228_v22 }
 0x21c   : > { %v14894_v39 = vpop.eup %14893 }
 0x21d   : > { %v1266_v53 = vmul.f32 %v14894_v39, %v900_v62 }
 0x21f   : > { %v1270_v54 = vrot.slane %v1266_v53, %v15809_v26 }
 0x221   : > { %v1271_v43 = vmul.f32 %v1270_v54, %v1234_v32  ;;  %v1272_v44 = vmul.f32 %v1270_v54, %v1235_v33  ;;  %v1273_v28 = vmul.f32 %v1270_v54, %v1236_v35  ;;  %v1274_v56 = vmul.f32 %v1270_v54, %v1237_v36 }
 0x222   : > { %v1275_v58 = vmul.f32 %v1270_v54, %v1238_v37  ;;  %v1276_v41 = vmul.f32 %v1270_v54, %v1239_v40  ;;  %v1277_v0 = vmul.f32 %v1270_v54, %v1240_v50  ;;  %v1278_v49 = vmul.f32 %v1270_v54, %v1241_v57 }
 0x223   : > { %v1279_v3 = vmul.f32 %v1270_v54, %v1242_v63  ;;  %v1280_v4 = vmul.f32 %v1270_v54, %v1243_v59  ;;  %v1281_v46 = vmul.f32 %v1270_v54, %v1244_v11  ;;  %v1282_v5 = vmul.f32 %v1270_v54, %v1245_v25 }
 0x224   : > { %v1283_v6 = vmul.f32 %v1270_v54, %v1246_v17  ;;  %v1284_v12 = vmul.f32 %v1270_v54, %v1247_v24  ;;  %v1285_v7 = vmul.f32 %v1270_v54, %v1248_v61  ;;  %v1286_v2 = vmul.f32 %v1270_v54, %v1249_v51 }
 0x225   : > { %v1287_v19 = vmul.f32 %v1270_v54, %v1250_v52  ;;  %v1288_v10 = vmul.f32 %v1270_v54, %v1251_v45  ;;  %v1289_v13 = vmul.f32 %v1270_v54, %v1252_v60  ;;  %v1290_v34 = vmul.f32 %v1270_v54, %v1253_v14 }
 0x226   : > { %v1291_v16 = vmul.f32 %v1270_v54, %v1254_v31  ;;  %v1292_v20 = vmul.f32 %v1270_v54, %v1255_v21  ;;  %v1293_v22 = vmul.f32 %v1270_v54, %v1256_v30  ;;  %v1294_v27 = vmul.f32 %v1270_v54, %v1257_v47 }
 0x227   : > { %v1295_v32 = vmul.f32 %v1270_v54, %v1258_v9  ;;  %v1296_v33 = vmul.f32 %v1270_v54, %v1259_v1  ;;  %v1297_v35 = vmul.f32 %v1270_v54, %v1260_v8  ;;  %v1298_v36 = vmul.f32 %v1270_v54, %v1261_v29 }
 0x228   : > { %v1299_v37 = vmul.f32 %v1270_v54, %v1262_v38  ;;  %v1300_v40 = vmul.f32 %v1270_v54, %v1263_v48  ;;  %v1301_v50 = vmul.f32 %v1270_v54, %v1264_v18  ;;  %v1302_v57 = vmul.f32 %v1270_v54, %v1265_v42 }
 0x229   : > { %v15888_v63 = vadd.f32 %v15885_v15, %v1271_v43  ;;  %v15891_v59 = vadd.f32 %v15885_v15, %v1272_v44  ;;  %v15894_v62 = vadd.f32 %v15885_v15, %v1273_v28  ;;  %v15897_v11 = vadd.f32 %v15885_v15, %v1274_v56 }
 0x22a   : > { %v15900_v25 = vadd.f32 %v15885_v15, %v1275_v58  ;;  %v15903_v17 = vadd.f32 %v15885_v15, %v1276_v41  ;;  %v15906_v24 = vadd.f32 %v15885_v15, %v1277_v0  ;;  %v15909_v39 = vadd.f32 %v15885_v15, %v1278_v49 }
 0x22b   : > { %20618 = vst [vmem:[#allocation13_spill] sm:$0xff] %v15888_v63  ;;  %20619 = vst [vmem:[#allocation14_spill] sm:$0xff] %v15891_v59  ;;  %v15912_v61 = vadd.f32 %v15885_v15, %v1279_v3  ;;  %v15915_v51 = vadd.f32 %v15885_v15, %v1280_v4  ;;  %v15918_v52 = vadd.f32 %v15885_v15, %v1281_v46 }
 0x22c   : > { %20620 = vst [vmem:[#allocation15_spill] sm:$0xff] %v15894_v62  ;;  %20621 = vst [vmem:[#allocation16_spill] sm:$0xff] %v15897_v11  ;;  %v15921_v45 = vadd.f32 %v15885_v15, %v1282_v5  ;;  %v15932_v60 = vadd.f32 %v15885_v15, %v1283_v6  ;;  %v15935_v14 = vadd.f32 %v15885_v15, %v1284_v12 }
 0x22d   : > { %20622 = vst [vmem:[#allocation17_spill] sm:$0xff] %v15900_v25  ;;  %20623 = vst [vmem:[#allocation18_spill] sm:$0xff] %v15903_v17  ;;  %v15938_v31 = vadd.f32 %v15885_v15, %v1285_v7  ;;  %v15941_v53 = vadd.f32 %v15885_v15, %v1286_v2  ;;  %v15952_v21 = vadd.f32 %v15885_v15, %v1287_v19  ;;  %v14723_v2 = vld [vmem:[%s20616_s25 + $0x20] sm:$0xff]  }
 0x22e   : > { %20624 = vst [vmem:[#allocation19_spill] sm:$0xff] %v15906_v24  ;;  %20625 = vst [vmem:[#allocation20_spill] sm:$0xff] %v15909_v39  ;;  %v15955_v30 = vadd.f32 %v15885_v15, %v1288_v10  ;;  %v15958_v47 = vadd.f32 %v15885_v15, %v1289_v13  ;;  %v15961_v9 = vadd.f32 %v15885_v15, %v1290_v34  ;;  %v14724_v10 = vld [vmem:[%s20616_s25 + $0x30] sm:$0xff]   ;;  %v16073_v13 = vld [vmem:[%s20616_s25 + $0x48] sm:$0xff]  }
 0x22f   : > { %20626 = vst [vmem:[#allocation21_spill] sm:$0xff] %v15912_v61  ;;  %20627 = vst [vmem:[#allocation22_spill] sm:$0xff] %v15915_v51  ;;  %v15972_v1 = vadd.f32 %v15885_v15, %v1291_v16  ;;  %v15975_v8 = vadd.f32 %v15885_v15, %v1292_v20  ;;  %v15978_v29 = vadd.f32 %v15885_v15, %v1293_v22  ;;  %v16078_v34 = vld [vmem:[%s20616_s25 + $0x58] sm:$0xff]  }
 0x230   : > { %20628 = vst [vmem:[#allocation23_spill] sm:$0xff] %v15918_v52  ;;  %20629 = vst [vmem:[#allocation24_spill] sm:$0xff] %v15921_v45  ;;  %v15981_v54 = vadd.f32 %v15885_v15, %v1294_v27  ;;  %v15992_v38 = vadd.f32 %v15885_v15, %v1295_v32  ;;  %v15995_v48 = vadd.f32 %v15885_v15, %v1296_v33 }
 0x231   : > { %1340 = vst.msk [vmem:[#allocation2 + $0x19] sm:$0xff] %vm906_vm1, %v15888_v63  ;;  %1341 = vst.msk [vmem:[#allocation2 + $0x21] sm:$0xff] %vm906_vm1, %v15891_v59  ;;  %v15998_v18 = vadd.f32 %v15885_v15, %v1297_v35  ;;  %v16001_v42 = vadd.f32 %v15885_v15, %v1298_v36  ;;  %v16012_v43 = vadd.f32 %v15885_v15, %v1299_v37 }
 0x232   : > { %1342 = vst.msk [vmem:[#allocation2 + $0x31] sm:$0xff] %vm906_vm1, %v15894_v62  ;;  %1343 = vst.msk [vmem:[#allocation2 + $0x39] sm:$0xff] %vm906_vm1, %v15897_v11  ;;  %v16015_v44 = vadd.f32 %v15885_v15, %v1300_v40  ;;  %v16018_v28 = vadd.f32 %v15885_v15, %v1301_v50  ;;  %v16021_v56 = vadd.f32 %v15885_v15, %v1302_v57 }
 0x233   : > { %20630 = vst [vmem:[#allocation25_spill] sm:$0xff] %v15932_v60  ;;  %20631 = vst [vmem:[#allocation26_spill] sm:$0xff] %v15935_v14 }
 0x234   : > { %20632 = vst [vmem:[#allocation27_spill] sm:$0xff] %v15938_v31  ;;  %20633 = vst [vmem:[#allocation28_spill] sm:$0xff] %v15941_v53 }
 0x235   : > { %1344 = vst.msk [vmem:[#allocation2 + $0x49] sm:$0xff] %vm906_vm1, %v15900_v25  ;;  %1345 = vst.msk [vmem:[#allocation2 + $0x51] sm:$0xff] %vm906_vm1, %v15903_v17 }
 0x236   : > { %1346 = vst.msk [vmem:[#allocation2 + $0x61] sm:$0xff] %vm906_vm1, %v15906_v24  ;;  %1347 = vst.msk [vmem:[#allocation2 + $0x69] sm:$0xff] %vm906_vm1, %v15909_v39 }
 0x237   : > { %20634 = vst [vmem:[#allocation29_spill] sm:$0xff] %v15952_v21  ;;  %20635 = vst [vmem:[#allocation30_spill] sm:$0xff] %v15955_v30 }
 0x238   : > { %20636 = vst [vmem:[#allocation31_spill] sm:$0xff] %v15958_v47  ;;  %20637 = vst [vmem:[#allocation32_spill] sm:$0xff] %v15961_v9  ;;  %v1467_v58 = vld [vmem:[#allocation2 + $0x19] sm:$0xff]  ;;  %v1468_v41 = vld [vmem:[#allocation2 + $0x21] sm:$0xff] }
 0x239   : > { %1348 = vst.msk [vmem:[#allocation2 + $0x79] sm:$0xff] %vm906_vm1, %v15912_v61  ;;  %1349 = vst.msk [vmem:[#allocation2 + $0x81] sm:$0xff] %vm906_vm1, %v15915_v51  ;;  %v1415_v0 = vld [vmem:[#allocation2 + $0x18] sm:$0xff]  ;;  %v16047_v49 = vpack.c.bf16 %v1468_v41, %v1467_v58  ;;  %v1416_v3 = vld [vmem:[#allocation2 + $0x20] sm:$0xff] }
 0x23a   : > { %1350 = vst.msk [vmem:[#allocation2 + $0x91] sm:$0xff] %vm906_vm1, %v15918_v52  ;;  %1351 = vst.msk [vmem:[#allocation2 + $0x99] sm:$0xff] %vm906_vm1, %v15921_v45  ;;  %v1469_v4 = vld [vmem:[#allocation2 + $0x31] sm:$0xff]  ;;  %v1470_v46 = vld [vmem:[#allocation2 + $0x39] sm:$0xff]  ;;  %v16049_v5 = vpack.c.bf16 %v1416_v3, %v1415_v0 }
 0x23b   : > { %20638 = vst [vmem:[#allocation33_spill] sm:$0xff] %v15972_v1  ;;  %20639 = vst [vmem:[#allocation34_spill] sm:$0xff] %v15975_v8  ;;  %v16051_v6 = vpack.c.bf16 %v1470_v46, %v1469_v4  ;;  %v1417_v12 = vld [vmem:[#allocation2 + $0x30] sm:$0xff]  ;;  %v1418_v7 = vld [vmem:[#allocation2 + $0x38] sm:$0xff]  ;;  %13334 = vmatmul.mubr.msk.bf16.vlgmr.msra.gmra.mxu1 %vm906_vm1, %v16047_v49 }
 0x23c   : > { %20640 = vst [vmem:[#allocation35_spill] sm:$0xff] %v15978_v29  ;;  %20641 = vst [vmem:[#allocation36_spill] sm:$0xff] %v15981_v54  ;;  %v16058_v19 = vpack.c.bf16 %v1418_v7, %v1417_v12  ;;  %13370 = vmatmul.mubr.msk.bf16.vlgmr.msra.gmra.mxu0 %vm906_vm1, %v16049_v5  ;;  %13402 = vmatpush3.bf16.msra.mxu1 %v15800_v55  ;;  %v1471_v15 = vld [vmem:[#allocation2 + $0x49] sm:$0xff]  ;;  %v1472_v16 = vld [vmem:[#allocation2 + $0x51] sm:$0xff] }
 0x23d   : > { %1352 = vst.msk [vmem:[#allocation2 + $0xa9] sm:$0xff] %vm906_vm1, %v15932_v60  ;;  %1353 = vst.msk [vmem:[#allocation2 + $0xb1] sm:$0xff] %vm906_vm1, %v15935_v14  ;;  %13337 = vmatprep.mubr.msk.bf16.mxu1 %vm906_vm1, %v16051_v6  ;;  %v1419_v20 = vld [vmem:[#allocation2 + $0x48] sm:$0xff]  ;;  %13438 = vmatpush3.bf16.msra.mxu0 %v15806_v23  ;;  %v1420_v22 = vld [vmem:[#allocation2 + $0x50] sm:$0xff]  ;;  %v16081_v35 = vpack.c.bf16 %v1472_v16, %v1471_v15 }
 0x23e   : > { %1354 = vst.msk [vmem:[#allocation2 + $0xc1] sm:$0xff] %vm906_vm1, %v15938_v31  ;;  %1355 = vst.msk [vmem:[#allocation2 + $0xc9] sm:$0xff] %vm906_vm1, %v15941_v53  ;;  %13373 = vmatprep.mubr.msk.bf16.mxu0 %vm906_vm1, %v16058_v19  ;;  %13403 = vmatprep.subr.bf16.mxu1 %v14723_v2  ;;  %v1473_v27 = vld [vmem:[#allocation2 + $0x61] sm:$0xff]  ;;  %v1474_v32 = vld [vmem:[#allocation2 + $0x69] sm:$0xff]  ;;  %v16083_v36 = vpack.c.bf16 %v1420_v22, %v1419_v20 }
 0x23f   : > { %20642 = vst [vmem:[#allocation37_spill] sm:$0xff] %v15992_v38  ;;  %20643 = vst [vmem:[#allocation38_spill] sm:$0xff] %v15995_v48  ;;  %13439 = vmatprep.subr.bf16.mxu0 %v14724_v10  ;;  %v1421_v55 = vld [vmem:[#allocation2 + $0x60] sm:$0xff]  ;;  %v1422_v33 = vld [vmem:[#allocation2 + $0x68] sm:$0xff]  ;;  %v16085_v37 = vpack.c.bf16 %v1474_v32, %v1473_v27 }
 0x240   : > { %20644 = vst [vmem:[#allocation39_spill] sm:$0xff] %v15998_v18  ;;  %20645 = vst [vmem:[#allocation40_spill] sm:$0xff] %v16001_v42  ;;  %13404 = vmatpush3.bf16.msra.mxu1 %v14723_v2  ;;  %v16090_v23 = vpack.c.bf16 %v1422_v33, %v1421_v55  ;;  %v1475_v40 = vld [vmem:[#allocation2 + $0x79] sm:$0xff]  ;;  %v1476_v50 = vld [vmem:[#allocation2 + $0x81] sm:$0xff] }
 0x241   : > { %1356 = vst.msk [vmem:[#allocation2 + $0xd9] sm:$0xff] %vm906_vm1, %v15952_v21  ;;  %1357 = vst.msk [vmem:[#allocation2 + $0xe1] sm:$0xff] %vm906_vm1, %v15955_v30  ;;  %13440 = vmatpush3.bf16.msra.mxu0 %v14724_v10  ;;  %13473 = vmatprep.subr.bf16.mxu1 %v16073_v13  ;;  %v1423_v57 = vld [vmem:[#allocation2 + $0x78] sm:$0xff]  ;;  %v1424_v58 = vld [vmem:[#allocation2 + $0x80] sm:$0xff]  ;;  %v16099_v46 = vpack.c.bf16 %v1476_v50, %v1475_v40 }
 0x242   : > { %1358 = vst.msk [vmem:[#allocation2 + $0xf1] sm:$0xff] %vm906_vm1, %v15958_v47  ;;  %1359 = vst.msk [vmem:[#allocation2 + $0xf9] sm:$0xff] %vm906_vm1, %v15961_v9  ;;  %13509 = vmatprep.subr.bf16.mxu0 %v16078_v34  ;;  %v1477_v41 = vld [vmem:[#allocation2 + $0x91] sm:$0xff]  ;;  %v1478_v0 = vld [vmem:[#allocation2 + $0x99] sm:$0xff]  ;;  %v16101_v12 = vpack.c.bf16 %v1424_v58, %v1423_v57 }
 0x243   : > { %20646 = vst [vmem:[#allocation41_spill] sm:$0xff] %v16012_v43  ;;  %20647 = vst [vmem:[#allocation42_spill] sm:$0xff] %v16015_v44  ;;  %13338 = vmatmul.mubr.msk.bf16.gmra.mxu1 %vm906_vm1, %v16081_v35  ;;  %v1425_v3 = vld [vmem:[#allocation2 + $0x90] sm:$0xff]  ;;  %v1426_v4 = vld [vmem:[#allocation2 + $0x98] sm:$0xff]  ;;  %v16103_v7 = vpack.c.bf16 %v1478_v0, %v1477_v41 }
 0x244   : > { %20648 = vst [vmem:[#allocation43_spill] sm:$0xff] %v16018_v28  ;;  %20649 = vst [vmem:[#allocation44_spill] sm:$0xff] %v16021_v56  ;;  %13374 = vmatmul.mubr.msk.bf16.gmra.mxu0 %vm906_vm1, %v16083_v36  ;;  %13341 = vmatprep.mubr.msk.bf16.mxu1 %vm906_vm1, %v16085_v37  ;;  %v16107_v2 = vpack.c.bf16 %v1426_v4, %v1425_v3  ;;  %v1479_v10 = vld [vmem:[#allocation2 + $0xa9] sm:$0xff]  ;;  %v1480_v15 = vld [vmem:[#allocation2 + $0xb1] sm:$0xff] }
 0x245   : > { %1360 = vst.msk [vmem:[#allocation2 + $0x109] sm:$0xff] %vm906_vm1, %v15972_v1  ;;  %1361 = vst.msk [vmem:[#allocation2 + $0x111] sm:$0xff] %vm906_vm1, %v15975_v8  ;;  %13377 = vmatprep.mubr.msk.bf16.mxu0 %vm906_vm1, %v16090_v23  ;;  %v1427_v16 = vld [vmem:[#allocation2 + $0xa8] sm:$0xff]  ;;  %v1428_v20 = vld [vmem:[#allocation2 + $0xb0] sm:$0xff]  ;;  %v16115_v33 = vpack.c.bf16 %v1480_v15, %v1479_v10 }
 0x246   : > { %1362 = vst.msk [vmem:[#allocation2 + $0x121] sm:$0xff] %vm906_vm1, %v15978_v29  ;;  %1363 = vst.msk [vmem:[#allocation2 + $0x129] sm:$0xff] %vm906_vm1, %v15981_v54  ;;  %v1481_v22 = vld [vmem:[#allocation2 + $0xc1] sm:$0xff]  ;;  %v1482_v27 = vld [vmem:[#allocation2 + $0xc9] sm:$0xff]  ;;  %v16117_v40 = vpack.c.bf16 %v1428_v20, %v1427_v16 }
 0x247   : > { %1364 = vst.msk [vmem:[#allocation2 + $0x139] sm:$0xff] %vm906_vm1, %v15992_v38  ;;  %1365 = vst.msk [vmem:[#allocation2 + $0x141] sm:$0xff] %vm906_vm1, %v15995_v48  ;;  %v1429_v32 = vld [vmem:[#allocation2 + $0xc0] sm:$0xff]  ;;  %v1430_v55 = vld [vmem:[#allocation2 + $0xc8] sm:$0xff]  ;;  %v16119_v50 = vpack.c.bf16 %v1482_v27, %v1481_v22 }
 0x248   : > { %1366 = vst.msk [vmem:[#allocation2 + $0x151] sm:$0xff] %vm906_vm1, %v15998_v18  ;;  %1367 = vst.msk [vmem:[#allocation2 + $0x159] sm:$0xff] %vm906_vm1, %v16001_v42  ;;  %v16123_v57 = vpack.c.bf16 %v1430_v55, %v1429_v32  ;;  %v1483_v58 = vld [vmem:[#allocation2 + $0xd9] sm:$0xff]  ;;  %v1484_v41 = vld [vmem:[#allocation2 + $0xe1] sm:$0xff] }
 0x249   : > { %1368 = vst.msk [vmem:[#allocation2 + $0x169] sm:$0xff] %vm906_vm1, %v16012_v43  ;;  %1369 = vst.msk [vmem:[#allocation2 + $0x171] sm:$0xff] %vm906_vm1, %v16015_v44  ;;  %v1431_v0 = vld [vmem:[#allocation2 + $0xd8] sm:$0xff]  ;;  %v1432_v3 = vld [vmem:[#allocation2 + $0xe0] sm:$0xff]  ;;  %v16131_v20 = vpack.c.bf16 %v1484_v41, %v1483_v58 }
 0x24a   : > { %1370 = vst.msk [vmem:[#allocation2 + $0x181] sm:$0xff] %vm906_vm1, %v16018_v28  ;;  %1371 = vst.msk [vmem:[#allocation2 + $0x189] sm:$0xff] %vm906_vm1, %v16021_v56  ;;  %v1485_v4 = vld [vmem:[#allocation2 + $0xf1] sm:$0xff]  ;;  %v1486_v10 = vld [vmem:[#allocation2 + $0xf9] sm:$0xff]  ;;  %v16133_v22 = vpack.c.bf16 %v1432_v3, %v1431_v0 }
 0x24b   : > { %13342 = vmatmul.mubr.msk.bf16.gmra.mxu1 %vm906_vm1, %v16099_v46  ;;  %v1433_v15 = vld [vmem:[#allocation2 + $0xf0] sm:$0xff]  ;;  %v1434_v16 = vld [vmem:[#allocation2 + $0xf8] sm:$0xff]  ;;  %v16135_v27 = vpack.c.bf16 %v1486_v10, %v1485_v4  ;;  %v1962_v1 = vld [vmem:[#allocation2 + $0x22] sm:$0xff] }
 0x24c   : > { %13378 = vmatmul.mubr.msk.bf16.gmra.mxu0 %vm906_vm1, %v16101_v12  ;;  %13345 = vmatprep.mubr.msk.bf16.mxu1 %vm906_vm1, %v16103_v7  ;;  %v16139_v32 = vpack.c.bf16 %v1434_v16, %v1433_v15  ;;  %v1487_v55 = vld [vmem:[#allocation2 + $0x109] sm:$0xff]  ;;  %v1488_v58 = vld [vmem:[#allocation2 + $0x111] sm:$0xff]  ;;  %v1964_v8 = vld [vmem:[#allocation2 + $0x3a] sm:$0xff] }
 0x24d   : > { %13381 = vmatprep.mubr.msk.bf16.mxu0 %vm906_vm1, %v16107_v2  ;;  %v1435_v41 = vld [vmem:[#allocation2 + $0x108] sm:$0xff]  ;;  %v1436_v0 = vld [vmem:[#allocation2 + $0x110] sm:$0xff]  ;;  %v1437_v10 = vld [vmem:[#allocation2 + $0x120] sm:$0xff]  ;;  %v16147_v21 = vpack.c.bf16 %v1488_v58, %v1487_v55 }
 0x24e   : > { %v1489_v3 = vld [vmem:[#allocation2 + $0x121] sm:$0xff]  ;;  %v1490_v4 = vld [vmem:[#allocation2 + $0x129] sm:$0xff]  ;;  %v16149_v15 = vpack.c.bf16 %v1436_v0, %v1435_v41  ;;  %v1491_v55 = vld [vmem:[#allocation2 + $0x139] sm:$0xff] }
 0x24f   : > { %v1438_v63 = vld [vmem:[#allocation2 + $0x128] sm:$0xff]  ;;  %v16151_v16 = vpack.c.bf16 %v1490_v4, %v1489_v3  ;;  %v1439_v41 = vld [vmem:[#allocation2 + $0x138] sm:$0xff]  ;;  %v1440_v0 = vld [vmem:[#allocation2 + $0x140] sm:$0xff] }
 0x250   : > { %v16155_v59 = vpack.c.bf16 %v1438_v63, %v1437_v10  ;;  %v1492_v58 = vld [vmem:[#allocation2 + $0x141] sm:$0xff]  ;;  %v1493_v3 = vld [vmem:[#allocation2 + $0x151] sm:$0xff]  ;;  %v1494_v4 = vld [vmem:[#allocation2 + $0x159] sm:$0xff]  ;;  %v16165_v63 = vpack.c.bf16 %v1440_v0, %v1439_v41 }
 0x251   : > { %v1441_v30 = vld [vmem:[#allocation2 + $0x150] sm:$0xff]  ;;  %v1442_v62 = vld [vmem:[#allocation2 + $0x158] sm:$0xff]  ;;  %v16163_v47 = vpack.c.bf16 %v1492_v58, %v1491_v55  ;;  %v16167_v10 = vpack.c.bf16 %v1494_v4, %v1493_v3  ;;  %v1959_v55 = vld [vmem:[#allocation2 + $0x2] sm:$0xff] }
 0x252   : > { %v16171_v11 = vpack.c.bf16 %v1442_v62, %v1441_v30  ;;  %v1960_v58 = vld [vmem:[#allocation2 + $0xa] sm:$0xff]  ;;  %v1961_v30 = vld [vmem:[#allocation2 + $0x1a] sm:$0xff]  ;;  %v1963_v17 = vld [vmem:[#allocation2 + $0x32] sm:$0xff] }
 0x253   : > { %13346 = vmatmul.mubr.msk.bf16.gmra.mxu1 %vm906_vm1, %v16115_v33  ;;  %v1495_v41 = vld [vmem:[#allocation2 + $0x169] sm:$0xff]  ;;  %v1496_v0 = vld [vmem:[#allocation2 + $0x171] sm:$0xff]  ;;  %v1991_v9 = vpack.c.bf16 %v1960_v58, %v1959_v55  ;;  %v16190_v55 = vpack.c.bf16 %v1962_v1, %v1961_v30  ;;  %v16192_v58 = vpack.c.bf16 %v1964_v8, %v1963_v17  ;;  %v1980_v54 = vld [vmem:[#allocation2 + $0xfa] sm:$0xff] }
 0x254   : > { %13382 = vmatmul.mubr.msk.bf16.gmra.mxu0 %vm906_vm1, %v16117_v40  ;;  %13349 = vmatprep.mubr.msk.bf16.mxu1 %vm906_vm1, %v16119_v50  ;;  %v1443_v3 = vld [vmem:[#allocation2 + $0x168] sm:$0xff]  ;;  %v1444_v4 = vld [vmem:[#allocation2 + $0x170] sm:$0xff]  ;;  %v16179_v25 = vpack.c.bf16 %v1496_v0, %v1495_v41  ;;  %v14727_v41 = vld [vmem:[%s20616_s25 + $0x40] sm:$0xff]  }
 0x255   : > { %13385 = vmatprep.mubr.msk.bf16.mxu0 %vm906_vm1, %v16123_v57  ;;  %v16181_v62 = vpack.c.bf16 %v1444_v4, %v1443_v3  ;;  %v1965_v17 = vld [vmem:[#allocation2 + $0x4a] sm:$0xff]  ;;  %v1966_v1 = vld [vmem:[#allocation2 + $0x52] sm:$0xff]  ;;  %v1970_v30 = vld [vmem:[#allocation2 + $0x82] sm:$0xff] }
 0x256   : > { %v16213_v8 = vld [vmem:[%s20616_s25 + $0x68] sm:$0xff]   ;;  %v16218_v3 = vld [vmem:[%s20616_s25 + $0x78] sm:$0xff]   ;;  %v16220_v4 = vpack.c.bf16 %v1966_v1, %v1965_v17 }
 0x257   : > { %v1968_v0 = vld [vmem:[#allocation2 + $0x6a] sm:$0xff]  ;;  %v1975_v24 = vld [vmem:[#allocation2 + $0xc2] sm:$0xff]  ;;  %v1979_v39 = vld [vmem:[#allocation2 + $0xf2] sm:$0xff] }
 0x258   : > { %v1976_v29 = vld [vmem:[#allocation2 + $0xca] sm:$0xff]  ;;  %v1983_v61 = vld [vmem:[#allocation2 + $0x122] sm:$0xff]  ;;  %v1987_v51 = vld [vmem:[#allocation2 + $0x152] sm:$0xff] }
 0x259   : > { %v1984_v38 = vld [vmem:[#allocation2 + $0x12a] sm:$0xff]  ;;  %v1988_v48 = vld [vmem:[#allocation2 + $0x15a] sm:$0xff] }
 0x25a   : > { %v2005_v18 = vpack.c.bf16 %v1988_v48, %v1987_v51  ;;  %v14731_v51 = vld [vmem:[%s20616_s25 + $0x60] sm:$0xff]   ;;  %v14732_v48 = vld [vmem:[%s20616_s25 + $0x70] sm:$0xff]  }
 0x25b   : > { %13350 = vmatmul.mubr.msk.bf16.gmra.mxu1 %vm906_vm1, %v16131_v20 }
 0x25c   : > { %13386 = vmatmul.mubr.msk.bf16.gmra.mxu0 %vm906_vm1, %v16133_v22  ;;  %13353 = vmatprep.mubr.msk.bf16.mxu1 %vm906_vm1, %v16135_v27 }
 0x25d   : > { %13389 = vmatprep.mubr.msk.bf16.mxu0 %vm906_vm1, %v16139_v32 }
 0x263   : > { %13354 = vmatmul.mubr.msk.bf16.gmra.mxu1 %vm906_vm1, %v16147_v21 }
 0x264   : > { %13390 = vmatmul.mubr.msk.bf16.gmra.mxu0 %vm906_vm1, %v16149_v15  ;;  %13357 = vmatprep.mubr.msk.bf16.mxu1 %vm906_vm1, %v16151_v16 }
 0x265   : > { %13393 = vmatprep.mubr.msk.bf16.mxu0 %vm906_vm1, %v16155_v59 }
 0x26b   : > { %13358 = vmatmul.mubr.msk.bf16.gmra.mxu1 %vm906_vm1, %v16163_v47 }
 0x26c   : > { %13394 = vmatmul.mubr.msk.bf16.gmra.mxu0 %vm906_vm1, %v16165_v63  ;;  %13361 = vmatprep.mubr.msk.bf16.mxu1 %vm906_vm1, %v16167_v10 }
 0x26d   : > { %13397 = vmatprep.mubr.msk.bf16.mxu0 %vm906_vm1, %v16171_v11 }
 0x273   : > { %13362 = vmatmul.mubr.msk.bf16.gmra.mxu1 %vm906_vm1, %v16179_v25 }
 0x274   : > { %13398 = vmatmul.mubr.msk.bf16.gmra.mxu0 %vm906_vm1, %v16181_v62  ;;  %13405 = vmatprep.mubr.msk.bf16.mxu1 %vm906_vm1, %v1991_v9  ;;  %v14728_v9 = vld [vmem:[%s20616_s25 + $0x50] sm:$0xff]  }
 0x275   : > { %13441 = vmatprep.mubr.msk.bf16.mxu0 %vm906_vm1, %v16049_v5  ;;  %v1967_v5 = vld [vmem:[#allocation2 + $0x62] sm:$0xff] }
 0x27b   : > { %13406 = vmatmul.mubr.msk.bf16.vlgmr.msra.gmra.mxu1 %vm906_vm1, %v16190_v55 }
 0x27c   : > { %13442 = vmatmul.mubr.msk.bf16.vlgmr.msra.gmra.mxu0 %vm906_vm1, %v16058_v19  ;;  %13409 = vmatprep.mubr.msk.bf16.mxu1 %vm906_vm1, %v16192_v58 }
 0x27d   : > { %13445 = vmatprep.mubr.msk.bf16.mxu0 %vm906_vm1, %v16083_v36  ;;  %13474 = vmatpush3.bf16.msra.mxu1 %v16073_v13  ;;  %v16222_v13 = vpack.c.bf16 %v1968_v0, %v1967_v5  ;;  %v1973_v5 = vld [vmem:[#allocation2 + $0xaa] sm:$0xff]  ;;  %v1974_v0 = vld [vmem:[#allocation2 + $0xb2] sm:$0xff] }
 0x27e   : > { %13510 = vmatpush3.bf16.msra.mxu0 %v16078_v34  ;;  %13475 = vmatprep.subr.bf16.mxu1 %v14727_v41  ;;  %v1969_v34 = vld [vmem:[#allocation2 + $0x7a] sm:$0xff] }
 0x27f   : > { %13511 = vmatprep.subr.bf16.mxu0 %v14728_v9  ;;  %v16234_v17 = vpack.c.bf16 %v1970_v30, %v1969_v34  ;;  %v16246_v34 = vpack.c.bf16 %v1974_v0, %v1973_v5  ;;  %v16248_v30 = vpack.c.bf16 %v1976_v29, %v1975_v24  ;;  %v16260_v24 = vpack.c.bf16 %v1980_v54, %v1979_v39  ;;  %v1981_v29 = vld [vmem:[#allocation2 + $0x10a] sm:$0xff]  ;;  %v1982_v0 = vld [vmem:[#allocation2 + $0x112] sm:$0xff]  ;;  %v1985_v39 = vld [vmem:[#allocation2 + $0x13a] sm:$0xff] }
 0x280   : > { %v1986_v54 = vld [vmem:[#allocation2 + $0x142] sm:$0xff] }
 0x281   : > { %13476 = vmatpush3.bf16.msra.mxu1 %v14727_v41  ;;  %v1971_v41 = vld [vmem:[#allocation2 + $0x92] sm:$0xff]  ;;  %v2004_v52 = vpack.c.bf16 %v1986_v54, %v1985_v39 }
 0x282   : > { %13512 = vmatpush3.bf16.msra.mxu0 %v14728_v9  ;;  %13545 = vmatprep.subr.bf16.mxu1 %v16213_v8  ;;  %v1972_v9 = vld [vmem:[#allocation2 + $0x9a] sm:$0xff] }
 0x283   : > { %13410 = vmatmul.mubr.msk.bf16.gmra.mxu1 %vm906_vm1, %v16220_v4  ;;  %13581 = vmatprep.subr.bf16.mxu0 %v16218_v3  ;;  %v16236_v1 = vpack.c.bf16 %v1972_v9, %v1971_v41  ;;  %v1977_v41 = vld [vmem:[#allocation2 + $0xda] sm:$0xff]  ;;  %v1978_v9 = vld [vmem:[#allocation2 + $0xe2] sm:$0xff] }
 0x284   : > { %13446 = vmatmul.mubr.msk.bf16.gmra.mxu0 %vm906_vm1, %v16090_v23  ;;  %13413 = vmatprep.mubr.msk.bf16.mxu1 %vm906_vm1, %v16222_v13  ;;  %v16258_v5 = vpack.c.bf16 %v1978_v9, %v1977_v41  ;;  %v2002_v41 = vpack.c.bf16 %v1982_v0, %v1981_v29  ;;  %v2003_v9 = vpack.c.bf16 %v1984_v38, %v1983_v61  ;;  %v1989_v61 = vld [vmem:[#allocation2 + $0x16a] sm:$0xff]  ;;  %v1990_v38 = vld [vmem:[#allocation2 + $0x172] sm:$0xff]  ;;  %v2294_v29 = vld [vmem:[#allocation2 + $0x180] sm:$0xff] }
 0x285   : > { %13449 = vmatprep.mubr.msk.bf16.mxu0 %vm906_vm1, %v16101_v12  ;;  %v2295_v0 = vld [vmem:[#allocation2 + $0x188] sm:$0xff]  ;;  %v2006_v45 = vpack.c.bf16 %v1990_v38, %v1989_v61 }
 0x286   : > { %v16282_v42 = vpack.c.bf16 %v2295_v0, %v2294_v29 }
 0x28b   : > { %13414 = vmatmul.mubr.msk.bf16.gmra.mxu1 %vm906_vm1, %v16234_v17 }
 0x28c   : > { %13450 = vmatmul.mubr.msk.bf16.gmra.mxu0 %vm906_vm1, %v16107_v2  ;;  %13417 = vmatprep.mubr.msk.bf16.mxu1 %vm906_vm1, %v16236_v1 }
 0x28d   : > { %13453 = vmatprep.mubr.msk.bf16.mxu0 %vm906_vm1, %v16117_v40 }
 0x293   : > { %13418 = vmatmul.mubr.msk.bf16.gmra.mxu1 %vm906_vm1, %v16246_v34 }
 0x294   : > { %13454 = vmatmul.mubr.msk.bf16.gmra.mxu0 %vm906_vm1, %v16123_v57  ;;  %13421 = vmatprep.mubr.msk.bf16.mxu1 %vm906_vm1, %v16248_v30 }
 0x295   : > { %13457 = vmatprep.mubr.msk.bf16.mxu0 %vm906_vm1, %v16133_v22 }
 0x29b   : > { %13422 = vmatmul.mubr.msk.bf16.gmra.mxu1 %vm906_vm1, %v16258_v5 }
 0x29c   : > { %13458 = vmatmul.mubr.msk.bf16.gmra.mxu0 %vm906_vm1, %v16139_v32  ;;  %13425 = vmatprep.mubr.msk.bf16.mxu1 %vm906_vm1, %v16260_v24 }
 0x29d   : > { %13461 = vmatprep.mubr.msk.bf16.mxu0 %vm906_vm1, %v16149_v15 }
 0x2a3   : > { %13426 = vmatmul.mubr.msk.bf16.gmra.mxu1 %vm906_vm1, %v2002_v41 }
 0x2a4   : > { %13462 = vmatmul.mubr.msk.bf16.gmra.mxu0 %vm906_vm1, %v16155_v59  ;;  %13429 = vmatprep.mubr.msk.bf16.mxu1 %vm906_vm1, %v2003_v9 }
 0x2a5   : > { %13465 = vmatprep.mubr.msk.bf16.mxu0 %vm906_vm1, %v16165_v63 }
 0x2ab   : > { %13430 = vmatmul.mubr.msk.bf16.gmra.mxu1 %vm906_vm1, %v2004_v52 }
 0x2ac   : > { %13466 = vmatmul.mubr.msk.bf16.gmra.mxu0 %vm906_vm1, %v16171_v11  ;;  %13433 = vmatprep.mubr.msk.bf16.mxu1 %vm906_vm1, %v2005_v18 }
 0x2ad   : > { %13469 = vmatprep.mubr.msk.bf16.mxu0 %vm906_vm1, %v16181_v62 }
 0x2b3   : > { %13434 = vmatmul.mubr.msk.bf16.gmra.mxu1 %vm906_vm1, %v2006_v45 }
 0x2b4   : > { %13470 = vmatmul.mubr.msk.bf16.gmra.mxu0 %vm906_vm1, %v16282_v42  ;;  %13477 = vmatprep.mubr.msk.bf16.mxu1 %vm906_vm1, %v16047_v49  ;;  %v14733_v49 = vld [vmem:[%s20616_s25 + $0x88] sm:$0xff]  }
 0x2b5   : > { %13513 = vmatprep.mubr.msk.bf16.mxu0 %vm906_vm1, %v16190_v55  ;;  %v16312_v55 = vld [vmem:[#allocation5] sm:$0xff] }
 0x2b6   : > { %4832 = vst.msk [vmem:[#allocation3] sm:$0xff] %vm4142_vm5, %v16312_v55  ;;  %4833 = vst.msk [vmem:[#allocation3 + $0x8] sm:$0xff] %vm4142_vm5, %v16312_v55 }
 0x2b7   : > { %4837 = vst.msk [vmem:[#allocation3 + $0x198] sm:$0xff] %vm4142_vm5, %v16312_v55  ;;  %4838 = vst.msk [vmem:[#allocation3 + $0x1a0] sm:$0xff] %vm4142_vm5, %v16312_v55 }
 0x2b8   : > { %8371 = vst.msk [vmem:[#allocation4] sm:$0xff] %vm4142_vm5, %v16312_v55  ;;  %8374 = vst.msk [vmem:[#allocation4 + $0x90] sm:$0xff] %vm4142_vm5, %v16312_v55 }
 0x2bb   : > { %13478 = vmatmul.mubr.msk.bf16.vlgmr.msra.gmra.mxu1 %vm906_vm1, %v16051_v6 }
 0x2bc   : > { %13514 = vmatmul.mubr.msk.bf16.vlgmr.msra.gmra.mxu0 %vm906_vm1, %v16192_v58  ;;  %13481 = vmatprep.mubr.msk.bf16.mxu1 %vm906_vm1, %v16081_v35 }
 0x2bd   : > { %13517 = vmatprep.mubr.msk.bf16.mxu0 %vm906_vm1, %v16220_v4  ;;  %13546 = vmatpush3.bf16.msra.mxu1 %v16213_v8  ;;  %v2599_v8 = vld [vmem:[#allocation2 + $0x181] sm:$0xff] }
 0x2be   : > { %13582 = vmatpush3.bf16.msra.mxu0 %v16218_v3  ;;  %13547 = vmatprep.subr.bf16.mxu1 %v14731_v51  ;;  %v2600_v3 = vld [vmem:[#allocation2 + $0x189] sm:$0xff] }
 0x2bf   : > { %13583 = vmatprep.subr.bf16.mxu0 %v14732_v48  ;;  %v2904_v4 = vld [vmem:[#allocation2 + $0x182] sm:$0xff] }
 0x2c1   : > { %13548 = vmatpush3.bf16.msra.mxu1 %v14731_v51 }
 0x2c2   : > { %13584 = vmatpush3.bf16.msra.mxu0 %v14732_v48  ;;  %13617 = vmatprep.subr.bf16.mxu1 %v14733_v49 }
 0x2c3   : > { %13482 = vmatmul.mubr.msk.bf16.gmra.mxu1 %vm906_vm1, %v16085_v37  ;;  %13653 = vmatprep.subr.mxu0 %v16312_v55 }
 0x2c4   : > { %13518 = vmatmul.mubr.msk.bf16.gmra.mxu0 %vm906_vm1, %v16222_v13  ;;  %13485 = vmatprep.mubr.msk.bf16.mxu1 %vm906_vm1, %v16099_v46 }
 0x2c5   : > { %13521 = vmatprep.mubr.msk.bf16.mxu0 %vm906_vm1, %v16234_v17  ;;  %v2905_v17 = vld [vmem:[#allocation2 + $0x18a] sm:$0xff] }
 0x2cb   : > { %13486 = vmatmul.mubr.msk.bf16.gmra.mxu1 %vm906_vm1, %v16103_v7 }
 0x2cc   : > { %13522 = vmatmul.mubr.msk.bf16.gmra.mxu0 %vm906_vm1, %v16236_v1  ;;  %13489 = vmatprep.mubr.msk.bf16.mxu1 %vm906_vm1, %v16115_v33  ;;  %v16356_v1 = vpack.c.bf16 %v2600_v3, %v2599_v8 }
 0x2cd   : > { %13525 = vmatprep.mubr.msk.bf16.mxu0 %vm906_vm1, %v16246_v34  ;;  %v16358_v34 = vpack.c.bf16 %v2905_v17, %v2904_v4 }
 0x2d3   : > { %13490 = vmatmul.mubr.msk.bf16.gmra.mxu1 %vm906_vm1, %v16119_v50 }
 0x2d4   : > { %13526 = vmatmul.mubr.msk.bf16.gmra.mxu0 %vm906_vm1, %v16248_v30  ;;  %13493 = vmatprep.mubr.msk.bf16.mxu1 %vm906_vm1, %v16131_v20 }
 0x2d5   : > { %13529 = vmatprep.mubr.msk.bf16.mxu0 %vm906_vm1, %v16258_v5 }
 0x2db   : > { %13494 = vmatmul.mubr.msk.bf16.gmra.mxu1 %vm906_vm1, %v16135_v27 }
 0x2dc   : > { %13530 = vmatmul.mubr.msk.bf16.gmra.mxu0 %vm906_vm1, %v16260_v24  ;;  %13497 = vmatprep.mubr.msk.bf16.mxu1 %vm906_vm1, %v16147_v21 }
 0x2dd   : > { %13533 = vmatprep.mubr.msk.bf16.mxu0 %vm906_vm1, %v2002_v41 }
 0x2e3   : > { %13498 = vmatmul.mubr.msk.bf16.gmra.mxu1 %vm906_vm1, %v16151_v16 }
 0x2e4   : > { %13534 = vmatmul.mubr.msk.bf16.gmra.mxu0 %vm906_vm1, %v2003_v9  ;;  %13501 = vmatprep.mubr.msk.bf16.mxu1 %vm906_vm1, %v16163_v47 }
 0x2e5   : > { %13537 = vmatprep.mubr.msk.bf16.mxu0 %vm906_vm1, %v2004_v52  ;;  %v14734_v52 = vld [vmem:[%s20616_s25 + $0x80] sm:$0xff]   ;;  %s11797_s25 = sshll.u32 %s622_s28, 4  ;;  %s20439_s25 = int_to_ptr.vmem [resolvable:$true] %s11797_s25 }
 0x2e6   : > { %s15108_s2 = scalar_lea.vmem %s20439_s25, 256  ;;  %p15115_p0 = scmp.lt.s32.totalorder %s20439_s25, %s15113_s27 }
 0x2e7   : > { %p15109_p11 = scmp.ne.s32.totalorder %s20439_s25, %s15108_s2 }
 0x2e9   : > { %p15110_p12 = pnand %p15109_p11, %p15318_p5 }
 0x2eb   : > { %13502 = vmatmul.mubr.msk.bf16.gmra.mxu1 %vm906_vm1, %v16167_v10  ;;  %p15111_p13 = pneg %p15110_p12 }
 0x2ec   : > { %13538 = vmatmul.mubr.msk.bf16.gmra.mxu0 %vm906_vm1, %v2005_v18  ;;  %13505 = vmatprep.mubr.msk.bf16.mxu1 %vm906_vm1, %v16179_v25 }
 0x2ed   : > { %13541 = vmatprep.mubr.msk.bf16.mxu0 %vm906_vm1, %v2006_v45 }
 0x2f3   : > { %13506 = vmatmul.mubr.msk.bf16.gmra.mxu1 %vm906_vm1, %v16356_v1 }
 0x2f4   : > { %13542 = vmatmul.mubr.msk.bf16.gmra.mxu0 %vm906_vm1, %v16358_v34  ;;  %13549 = vmatprep.mubr.msk.bf16.mxu1 %vm906_vm1, %v16058_v19 }
 0x2f5   : > { %13585 = vmatprep.mubr.msk.bf16.mxu0 %vm906_vm1, %v16051_v6 }
 0x2fb   : > { %v13335_v45 = vpop.f32.mrf.mxu1  ;;  %13550 = vmatmul.mubr.msk.bf16.vlgmr.msra.gmra.mxu1 %vm906_vm1, %v16083_v36 }
 0x2fc   : > { %v13371_v18 = vpop.f32.mrf.mxu0  ;;  %13586 = vmatmul.mubr.msk.bf16.vlgmr.msra.gmra.mxu0 %vm906_vm1, %v16081_v35  ;;  %13553 = vmatprep.mubr.msk.bf16.mxu1 %vm906_vm1, %v16090_v23 }
 0x2fd   : > { %v16377_v30 = vadd.f32 %v13371_v18, %v13335_v45  ;;  %13589 = vmatprep.mubr.msk.bf16.mxu0 %vm906_vm1, %v16085_v37  ;;  %v1611_v6 = vpop.f32.mrf.mxu1  ;;  %13618 = vmatpush3.bf16.msra.mxu1 %v14733_v49 }
 0x2fe   : > { %v1832_v19 = vpop.f32.mrf.mxu0  ;;  %13619 = vmatprep.subr.bf16.mxu1 %v14734_v52 }
 0x2ff   : > { %v16381_v5 = vadd.f32 %v1832_v19, %v1611_v6  ;;  %v13336_v24 = vpop.f32.mrf.mxu1 }
 0x300   : > { %v13372_v36 = vpop.f32.mrf.mxu0 }
 0x301   : > { %v16383_v41 = vadd.f32 %v13372_v36, %v13336_v24  ;;  %v1614_v9 = vpop.f32.mrf.mxu1  ;;  %13620 = vmatpush3.bf16.msra.mxu1 %v14734_v52 }
 0x302   : > { %v1835_v35 = vpop.f32.mrf.mxu0 }
 0x303   : > { %v16385_v39 = vadd.f32 %v1835_v35, %v1614_v9  ;;  %v13339_v23 = vpop.f32.mrf.mxu1  ;;  %13554 = vmatmul.mubr.msk.bf16.gmra.mxu1 %vm906_vm1, %v16101_v12 }
 0x304   : > { %v13375_v37 = vpop.f32.mrf.mxu0  ;;  %13590 = vmatmul.mubr.msk.bf16.gmra.mxu0 %vm906_vm1, %v16099_v46  ;;  %13557 = vmatprep.mubr.msk.bf16.mxu1 %vm906_vm1, %v16107_v2 }
 0x305   : > { %v16393_v54 = vadd.f32 %v13375_v37, %v13339_v23  ;;  %13593 = vmatprep.mubr.msk.bf16.mxu0 %vm906_vm1, %v16103_v7  ;;  %v1627_v61 = vpop.f32.mrf.mxu1 }
 0x306   : > { %v1848_v38 = vpop.f32.mrf.mxu0 }
 0x307   : > { %v16397_v29 = vadd.f32 %v1848_v38, %v1627_v61  ;;  %v13340_v0 = vpop.f32.mrf.mxu1 }
 0x308   : > { %v13376_v51 = vpop.f32.mrf.mxu0 }
 0x309   : > { %v16399_v48 = vadd.f32 %v13376_v51, %v13340_v0  ;;  %v1630_v12 = vpop.f32.mrf.mxu1 }
 0x30a   : > { %v1851_v49 = vpop.f32.mrf.mxu0 }
 0x30b   : > { %v16401_v8 = vadd.f32 %v1851_v49, %v1630_v12  ;;  %v13343_v46 = vpop.f32.mrf.mxu1  ;;  %13558 = vmatmul.mubr.msk.bf16.gmra.mxu1 %vm906_vm1, %v16117_v40 }
 0x30c   : > { %v13379_v2 = vpop.f32.mrf.mxu0  ;;  %13594 = vmatmul.mubr.msk.bf16.gmra.mxu0 %vm906_vm1, %v16115_v33  ;;  %13561 = vmatprep.mubr.msk.bf16.mxu1 %vm906_vm1, %v16123_v57 }
 0x30d   : > { %v16409_v7 = vadd.f32 %v13379_v2, %v13343_v46  ;;  %13597 = vmatprep.mubr.msk.bf16.mxu0 %vm906_vm1, %v16119_v50  ;;  %v1643_v3 = vpop.f32.mrf.mxu1 }
 0x30e   : > { %v1864_v4 = vpop.f32.mrf.mxu0 }
 0x30f   : > { %v16413_v17 = vadd.f32 %v1864_v4, %v1643_v3  ;;  %v13344_v52 = vpop.f32.mrf.mxu1 }
 0x310   : > { %v13380_v45 = vpop.f32.mrf.mxu0 }
 0x311   : > { %v16415_v18 = vadd.f32 %v13380_v45, %v13344_v52  ;;  %v1646_v40 = vpop.f32.mrf.mxu1 }
 0x312   : > { %v1867_v6 = vpop.f32.mrf.mxu0 }
 0x313   : > { %v16417_v19 = vadd.f32 %v1867_v6, %v1646_v40  ;;  %v13347_v33 = vpop.f32.mrf.mxu1  ;;  %13562 = vmatmul.mubr.msk.bf16.gmra.mxu1 %vm906_vm1, %v16133_v22 }
 0x314   : > { %v13383_v57 = vpop.f32.mrf.mxu0  ;;  %13598 = vmatmul.mubr.msk.bf16.gmra.mxu0 %vm906_vm1, %v16131_v20  ;;  %13565 = vmatprep.mubr.msk.bf16.mxu1 %vm906_vm1, %v16139_v32 }
 0x315   : > { %v16425_v50 = vadd.f32 %v13383_v57, %v13347_v33  ;;  %13601 = vmatprep.mubr.msk.bf16.mxu0 %vm906_vm1, %v16135_v27  ;;  %v1659_v24 = vpop.f32.mrf.mxu1  ;;  %v3211_v57 = vld [vmem:[#allocation2 + $0x1a0] sm:$0xff] }
 0x316   : > { %v1880_v36 = vpop.f32.mrf.mxu0 }
 0x317   : > { %v16429_v9 = vadd.f32 %v1880_v36, %v1659_v24  ;;  %v13348_v35 = vpop.f32.mrf.mxu1 }
 0x318   : > { %v13384_v23 = vpop.f32.mrf.mxu0 }
 0x319   : > { %v16431_v37 = vadd.f32 %v13384_v23, %v13348_v35  ;;  %v1662_v22 = vpop.f32.mrf.mxu1  ;;  %v3515_v35 = vld [vmem:[#allocation2 + $0x199] sm:$0xff]  ;;  %v3516_v23 = vld [vmem:[#allocation2 + $0x1a1] sm:$0xff] }
 0x31a   : > { %v1883_v61 = vpop.f32.mrf.mxu0 }
 0x31b   : > { %v16433_v38 = vadd.f32 %v1883_v61, %v1662_v22  ;;  %v13351_v20 = vpop.f32.mrf.mxu1  ;;  %13566 = vmatmul.mubr.msk.bf16.gmra.mxu1 %vm906_vm1, %v16149_v15 }
 0x31c   : > { %v13387_v32 = vpop.f32.mrf.mxu0  ;;  %13602 = vmatmul.mubr.msk.bf16.gmra.mxu0 %vm906_vm1, %v16147_v21  ;;  %13569 = vmatprep.mubr.msk.bf16.mxu1 %vm906_vm1, %v16155_v59 }
 0x31d   : > { %v16441_v27 = vadd.f32 %v13387_v32, %v13351_v20  ;;  %13605 = vmatprep.mubr.msk.bf16.mxu0 %vm906_vm1, %v16151_v16  ;;  %v16445_v0 = vpop.f32.mrf.mxu1 }
 0x31e   : > { %v16447_v51 = vpop.f32.mrf.mxu0 }
 0x31f   : > { %v13352_v12 = vpop.f32.mrf.mxu1 }
 0x320   : > { %v13388_v49 = vpop.f32.mrf.mxu0 }
 0x321   : > { %v16449_v46 = vadd.f32 %v13388_v49, %v13352_v12  ;;  %v16451_v15 = vpop.f32.mrf.mxu1 }
 0x322   : > { %v16453_v2 = vpop.f32.mrf.mxu0 }
 0x323   : > { %v13355_v21 = vpop.f32.mrf.mxu1  ;;  %13570 = vmatmul.mubr.msk.bf16.gmra.mxu1 %vm906_vm1, %v16165_v63 }
 0x324   : > { %v13391_v59 = vpop.f32.mrf.mxu0  ;;  %13606 = vmatmul.mubr.msk.bf16.gmra.mxu0 %vm906_vm1, %v16163_v47  ;;  %13573 = vmatprep.mubr.msk.bf16.mxu1 %vm906_vm1, %v16171_v11 }
 0x325   : > { %v16461_v16 = vadd.f32 %v13391_v59, %v13355_v21  ;;  %13609 = vmatprep.mubr.msk.bf16.mxu0 %vm906_vm1, %v16167_v10  ;;  %v1691_v3 = vpop.f32.mrf.mxu1  ;;  %v3210_v10 = vld [vmem:[#allocation2 + $0x198] sm:$0xff] }
 0x326   : > { %v1912_v4 = vpop.f32.mrf.mxu0  ;;  %v3227_v20 = vpack.c.bf16 %v3211_v57, %v3210_v10 }
 0x327   : > { %v16465_v52 = vadd.f32 %v1912_v4, %v1691_v3  ;;  %v13356_v45 = vpop.f32.mrf.mxu1 }
 0x328   : > { %v13392_v40 = vpop.f32.mrf.mxu0 }
 0x329   : > { %v16467_v6 = vadd.f32 %v13392_v40, %v13356_v45  ;;  %v16469_v63 = vpop.f32.mrf.mxu1  ;;  %v3792_v45 = vld [vmem:[#allocation2 + $0x4a] sm:$0xff]  ;;  %v3793_v40 = vld [vmem:[#allocation2 + $0x52] sm:$0xff] }
 0x32a   : > { %v16471_v33 = vpop.f32.mrf.mxu0 }
 0x32b   : > { %v13359_v47 = vpop.f32.mrf.mxu1  ;;  %13574 = vmatmul.mubr.msk.bf16.gmra.mxu1 %vm906_vm1, %v16181_v62 }
 0x32c   : > { %v13395_v11 = vpop.f32.mrf.mxu0  ;;  %13610 = vmatmul.mubr.msk.bf16.gmra.mxu0 %vm906_vm1, %v16179_v25  ;;  %13577 = vmatprep.mubr.msk.bf16.mxu1 %vm906_vm1, %v16282_v42  ;;  %v3532_v25 = vpack.c.bf16 %v3516_v23, %v3515_v35 }
 0x32d   : > { %v16479_v24 = vadd.f32 %v13395_v11, %v13359_v47  ;;  %13613 = vmatprep.mubr.msk.bf16.mxu0 %vm906_vm1, %v16356_v1  ;;  %v1707_v36 = vpop.f32.mrf.mxu1 }
 0x32e   : > { %v1928_v22 = vpop.f32.mrf.mxu0 }
 0x32f   : > { %v16483_v61 = vadd.f32 %v1928_v22, %v1707_v36  ;;  %v13360_v62 = vpop.f32.mrf.mxu1 }
 0x330   : > { %v13396_v32 = vpop.f32.mrf.mxu0 }
 0x331   : > { %v16485_v12 = vadd.f32 %v13396_v32, %v13360_v62  ;;  %v16487_v42 = vpop.f32.mrf.mxu1 }
 0x332   : > { %v16489_v49 = vpop.f32.mrf.mxu0 }
 0x333   : > { %v13363_v21 = vpop.f32.mrf.mxu1  ;;  %13578 = vmatmul.mubr.msk.bf16.gmra.mxu1 %vm906_vm1, %v3227_v20 }
 0x334   : > { %v13399_v1 = vpop.f32.mrf.mxu0  ;;  %13621 = vmatprep.mubr.msk.bf16.mxu1 %vm906_vm1, %v16192_v58  ;;  %13614 = vmatmul.mubr.msk.bf16.gmra.mxu0 %vm906_vm1, %v3532_v25  ;;  %v3823_v58 = vpack.c.bf16 %v3793_v40, %v3792_v45  ;;  %v3798_v45 = vld [vmem:[#allocation2 + $0x92] sm:$0xff]  ;;  %v3799_v40 = vld [vmem:[#allocation2 + $0x9a] sm:$0xff] }
 0x335   : > { %v16495_v59 = vadd.f32 %v13399_v1, %v13363_v21  ;;  %v1723_v3 = vpop.f32.mrf.mxu1  ;;  %13669 = vmatprep.mubr.msk.f32.mxu0 %vm15171_vm2, %v16312_v55  ;;  %v3796_v1 = vld [vmem:[#allocation2 + $0x7a] sm:$0xff] }
 0x336   : > { %v1944_v4 = vpop.f32.mrf.mxu0 }
 0x337   : > { %v16499_v47 = vadd.f32 %v1944_v4, %v1723_v3  ;;  %v13364_v11 = vpop.f32.mrf.mxu1  ;;  %v3797_v3 = vld [vmem:[#allocation2 + $0x82] sm:$0xff] }
 0x338   : > { %v13400_v10 = vpop.f32.mrf.mxu0 }
 0x339   : > { %v16501_v57 = vadd.f32 %v13400_v10, %v13364_v11  ;;  %v16503_v36 = vpop.f32.mrf.mxu1 }
 0x33a   : > { %v16505_v35 = vpop.f32.mrf.mxu0 }
 0x33b   : > { %v13407_v23 = vpop.f32.mrf.mxu1  ;;  %13622 = vmatmul.mubr.msk.bf16.vlgmr.msra.gmra.mxu1 %vm906_vm1, %v3823_v58 }
 0x33c   : > { %v2234_v22 = vadd.f32 %v13407_v23, %v16377_v30  ;;  %v13443_v62 = vpop.f32.mrf.mxu0  ;;  %13625 = vmatprep.mubr.msk.bf16.mxu1 %vm906_vm1, %v16222_v13  ;;  %v3825_v23 = vpack.c.bf16 %v3797_v3, %v3796_v1 }
 0x33d   : > { %v2105_v20 = vpop.f32.mrf.mxu1 }
 0x33e   : > { %v16511_v32 = vadd.f32 %v13443_v62, %v2234_v22  ;;  %v2232_v25 = vadd.f32 %v2105_v20, %v16381_v5  ;;  %v2410_v21 = vpop.f32.mrf.mxu0  ;;  %v3826_v5 = vpack.c.bf16 %v3799_v40, %v3798_v45 }
 0x33f   : > { %v13408_v4 = vpop.f32.mrf.mxu1 }
 0x340   : > { %v16514_v11 = vadd.f32 %v2410_v21, %v2232_v25  ;;  %v2235_v10 = vadd.f32 %v13408_v4, %v16383_v41  ;;  %v13444_v30 = vpop.f32.mrf.mxu0  ;;  %v3800_v4 = vld [vmem:[#allocation2 + $0xaa] sm:$0xff] }
 0x341   : > { %v2108_v58 = vpop.f32.mrf.mxu1 }
 0x342   : > { %v16517_v60 = vadd.f32 %v13444_v30, %v2235_v10  ;;  %v16520_v13 = vadd.f32 %v2108_v58, %v16385_v39  ;;  %v16522_v22 = vpop.f32.mrf.mxu0  ;;  %v3801_v39 = vld [vmem:[#allocation2 + $0xb2] sm:$0xff]  ;;  %v3802_v30 = vld [vmem:[#allocation2 + $0xc2] sm:$0xff]  ;;  %v3803_v58 = vld [vmem:[#allocation2 + $0xca] sm:$0xff] }
 0x343   : > { %v13411_v62 = vpop.f32.mrf.mxu1  ;;  %13626 = vmatmul.mubr.msk.bf16.gmra.mxu1 %vm906_vm1, %v3825_v23 }
 0x344   : > { %v2238_v20 = vadd.f32 %v13411_v62, %v16393_v54  ;;  %v13447_v25 = vpop.f32.mrf.mxu0  ;;  %13629 = vmatprep.mubr.msk.bf16.mxu1 %vm906_vm1, %v3826_v5  ;;  %v3827_v62 = vpack.c.bf16 %v3801_v39, %v3800_v4 }
 0x345   : > { %v2121_v41 = vpop.f32.mrf.mxu1 }
 0x346   : > { %v16527_v21 = vadd.f32 %v13447_v25, %v2238_v20  ;;  %v2236_v1 = vadd.f32 %v2121_v41, %v16397_v29  ;;  %v2426_v3 = vpop.f32.mrf.mxu0  ;;  %v3828_v29 = vpack.c.bf16 %v3803_v58, %v3802_v30 }
 0x347   : > { %v13412_v10 = vpop.f32.mrf.mxu1 }
 0x348   : > { %v16530_v45 = vadd.f32 %v2426_v3, %v2236_v1  ;;  %v2239_v40 = vadd.f32 %v13412_v10, %v16399_v48  ;;  %v13448_v23 = vpop.f32.mrf.mxu0  ;;  %v3804_v10 = vld [vmem:[#allocation2 + $0xda] sm:$0xff] }
 0x349   : > { %v2124_v54 = vpop.f32.mrf.mxu1 }
 0x34a   : > { %v16533_v43 = vadd.f32 %v13448_v23, %v2239_v40  ;;  %v16536_v5 = vadd.f32 %v2124_v54, %v16401_v8  ;;  %v16538_v20 = vpop.f32.mrf.mxu0  ;;  %v3805_v8 = vld [vmem:[#allocation2 + $0xe2] sm:$0xff]  ;;  %v3806_v23 = vld [vmem:[#allocation2 + $0xf2] sm:$0xff]  ;;  %v3807_v54 = vld [vmem:[#allocation2 + $0xfa] sm:$0xff] }
 0x34b   : > { %v13415_v25 = vpop.f32.mrf.mxu1  ;;  %13630 = vmatmul.mubr.msk.bf16.gmra.mxu1 %vm906_vm1, %v3827_v62 }
 0x34c   : > { %v2242_v41 = vadd.f32 %v13415_v25, %v16409_v7  ;;  %v13451_v1 = vpop.f32.mrf.mxu0  ;;  %13633 = vmatprep.mubr.msk.bf16.mxu1 %vm906_vm1, %v3828_v29  ;;  %v3829_v25 = vpack.c.bf16 %v3805_v8, %v3804_v10 }
 0x34d   : > { %v2137_v48 = vpop.f32.mrf.mxu1 }
 0x34e   : > { %v16543_v3 = vadd.f32 %v13451_v1, %v2242_v41  ;;  %v2240_v4 = vadd.f32 %v2137_v48, %v16413_v17  ;;  %v2442_v39 = vpop.f32.mrf.mxu0  ;;  %v3830_v17 = vpack.c.bf16 %v3807_v54, %v3806_v23 }
 0x34f   : > { %v13416_v40 = vpop.f32.mrf.mxu1 }
 0x350   : > { %v16546_v30 = vadd.f32 %v2442_v39, %v2240_v4  ;;  %v2243_v58 = vadd.f32 %v13416_v40, %v16415_v18  ;;  %v13452_v62 = vpop.f32.mrf.mxu0  ;;  %v3808_v40 = vld [vmem:[#allocation2 + $0x10a] sm:$0xff] }
 0x351   : > { %v2140_v7 = vpop.f32.mrf.mxu1 }
 0x352   : > { %v16549_v14 = vadd.f32 %v13452_v62, %v2243_v58  ;;  %v16552_v29 = vadd.f32 %v2140_v7, %v16417_v19  ;;  %v16554_v41 = vpop.f32.mrf.mxu0  ;;  %v3809_v19 = vld [vmem:[#allocation2 + $0x112] sm:$0xff]  ;;  %v3810_v62 = vld [vmem:[#allocation2 + $0x122] sm:$0xff]  ;;  %v3811_v7 = vld [vmem:[#allocation2 + $0x12a] sm:$0xff] }
 0x353   : > { %v13419_v1 = vpop.f32.mrf.mxu1  ;;  %13634 = vmatmul.mubr.msk.bf16.gmra.mxu1 %vm906_vm1, %v3829_v25 }
 0x354   : > { %v2246_v48 = vadd.f32 %v13419_v1, %v16425_v50  ;;  %v13455_v4 = vpop.f32.mrf.mxu0  ;;  %13637 = vmatprep.mubr.msk.bf16.mxu1 %vm906_vm1, %v3830_v17  ;;  %v3831_v1 = vpack.c.bf16 %v3809_v19, %v3808_v40 }
 0x355   : > { %v2153_v18 = vpop.f32.mrf.mxu1 }
 0x356   : > { %v16559_v39 = vadd.f32 %v13455_v4, %v2246_v48  ;;  %v2244_v10 = vadd.f32 %v2153_v18, %v16429_v9  ;;  %v2458_v8 = vpop.f32.mrf.mxu0  ;;  %v3832_v9 = vpack.c.bf16 %v3811_v7, %v3810_v62  ;;  %v1897_v18 = vadd.f32 %v16447_v51, %v16445_v0  ;;  %v3814_v62 = vld [vmem:[#allocation2 + $0x152] sm:$0xff]  ;;  %v3815_v7 = vld [vmem:[#allocation2 + $0x15a] sm:$0xff] }
 0x357   : > { %v13420_v58 = vpop.f32.mrf.mxu1 }
 0x358   : > { %v16562_v23 = vadd.f32 %v2458_v8, %v2244_v10  ;;  %v2247_v54 = vadd.f32 %v13420_v58, %v16431_v37  ;;  %v13456_v25 = vpop.f32.mrf.mxu0  ;;  %v3812_v58 = vld [vmem:[#allocation2 + $0x13a] sm:$0xff] }
 0x359   : > { %v2156_v50 = vpop.f32.mrf.mxu1 }
 0x35a   : > { %v16565_v44 = vadd.f32 %v13456_v25, %v2247_v54  ;;  %v16568_v17 = vadd.f32 %v2156_v50, %v16433_v38  ;;  %v16570_v48 = vpop.f32.mrf.mxu0  ;;  %v3813_v54 = vld [vmem:[#allocation2 + $0x142] sm:$0xff] }
 0x35b   : > { %v13423_v4 = vpop.f32.mrf.mxu1  ;;  %13638 = vmatmul.mubr.msk.bf16.gmra.mxu1 %vm906_vm1, %v3831_v1 }
 0x35c   : > { %v2250_v10 = vadd.f32 %v13423_v4, %v16441_v27  ;;  %v13459_v37 = vpop.f32.mrf.mxu0  ;;  %13641 = vmatprep.mubr.msk.bf16.mxu1 %vm906_vm1, %v3832_v9  ;;  %v3833_v27 = vpack.c.bf16 %v3813_v54, %v3812_v58  ;;  %v3816_v58 = vld [vmem:[#allocation2 + $0x16a] sm:$0xff]  ;;  %v3817_v54 = vld [vmem:[#allocation2 + $0x172] sm:$0xff] }
 0x35d   : > { %v2169_v8 = vpop.f32.mrf.mxu1 }
 0x35e   : > { %v16577_v40 = vadd.f32 %v13459_v37, %v2250_v10  ;;  %v2248_v19 = vadd.f32 %v2169_v8, %v1897_v18  ;;  %v2474_v38 = vpop.f32.mrf.mxu0  ;;  %v3834_v10 = vpack.c.bf16 %v3815_v7, %v3814_v62 }
 0x35f   : > { %v13424_v25 = vpop.f32.mrf.mxu1 }
 0x360   : > { %v16579_v50 = vadd.f32 %v2474_v38, %v2248_v19  ;;  %v2251_v1 = vadd.f32 %v13424_v25, %v16449_v46  ;;  %v13460_v0 = vpop.f32.mrf.mxu0 }
 0x361   : > { %v16582_v51 = vpop.f32.mrf.mxu1 }
 0x362   : > { %v16584_v4 = vadd.f32 %v13460_v0, %v2251_v1  ;;  %v16586_v9 = vpop.f32.mrf.mxu0 }
 0x363   : > { %v13427_v18 = vpop.f32.mrf.mxu1  ;;  %13642 = vmatmul.mubr.msk.bf16.gmra.mxu1 %vm906_vm1, %v3833_v27 }
 0x364   : > { %v2254_v37 = vadd.f32 %v13427_v18, %v16461_v16  ;;  %v13463_v8 = vpop.f32.mrf.mxu0  ;;  %13645 = vmatprep.mubr.msk.bf16.mxu1 %vm906_vm1, %v3834_v10  ;;  %v3835_v16 = vpack.c.bf16 %v3817_v54, %v3816_v58 }
 0x365   : > { %v2185_v19 = vpop.f32.mrf.mxu1 }
 0x366   : > { %v16591_v38 = vadd.f32 %v13463_v8, %v2254_v37  ;;  %v2252_v46 = vadd.f32 %v2185_v19, %v16465_v52  ;;  %v2490_v25 = vpop.f32.mrf.mxu0  ;;  %v3820_v19 = vld [vmem:[#allocation2 + $0x19a] sm:$0xff] }
 0x367   : > { %v13428_v1 = vpop.f32.mrf.mxu1 }
 0x368   : > { %v16594_v0 = vadd.f32 %v2490_v25, %v2252_v46  ;;  %v2255_v62 = vadd.f32 %v13428_v1, %v16467_v6  ;;  %v13464_v7 = vpop.f32.mrf.mxu0  ;;  %v3821_v46 = vld [vmem:[#allocation2 + $0x1a2] sm:$0xff] }
 0x369   : > { %v16597_v27 = vpop.f32.mrf.mxu1 }
 0x36a   : > { %v16599_v18 = vadd.f32 %v13464_v7, %v2255_v62  ;;  %v16601_v10 = vpop.f32.mrf.mxu0  ;;  %v3837_v62 = vpack.c.bf16 %v3821_v46, %v3820_v19 }
 0x36b   : > { %v13431_v37 = vpop.f32.mrf.mxu1  ;;  %13646 = vmatmul.mubr.msk.bf16.gmra.mxu1 %vm906_vm1, %v3835_v16 }
 0x36c   : > { %v2258_v52 = vadd.f32 %v13431_v37, %v16479_v24  ;;  %v13467_v8 = vpop.f32.mrf.mxu0  ;;  %13649 = vmatprep.mubr.msk.bf16.mxu1 %vm906_vm1, %v16358_v34 }
 0x36d   : > { %v2201_v6 = vpop.f32.mrf.mxu1 }
 0x36e   : > { %v16607_v25 = vadd.f32 %v13467_v8, %v2258_v52  ;;  %v2256_v58 = vadd.f32 %v2201_v6, %v16483_v61  ;;  %v2506_v54 = vpop.f32.mrf.mxu0 }
 0x36f   : > { %v13432_v1 = vpop.f32.mrf.mxu1 }
 0x370   : > { %v16610_v7 = vadd.f32 %v2506_v54, %v2256_v58  ;;  %v2259_v16 = vadd.f32 %v13432_v1, %v16485_v12  ;;  %v13468_v31 = vpop.f32.mrf.mxu0 }
 0x371   : > { %v16613_v24 = vpop.f32.mrf.mxu1 }
 0x372   : > { %v16615_v37 = vadd.f32 %v13468_v31, %v2259_v16  ;;  %v16617_v34 = vpop.f32.mrf.mxu0 }
 0x373   : > { %v13435_v28 = vpop.f32.mrf.mxu1  ;;  %13650 = vmatmul.mubr.msk.bf16.gmra.mxu1 %vm906_vm1, %v3837_v62 }
 0x374   : > { %v2262_v52 = vadd.f32 %v13435_v28, %v16495_v59  ;;  %v13471_v61 = vpop.f32.mrf.mxu0 }
 0x375   : > { %v2217_v8 = vpop.f32.mrf.mxu1 }
 0x376   : > { %v16621_v6 = vadd.f32 %v13471_v61, %v2262_v52  ;;  %v2260_v19 = vadd.f32 %v2217_v8, %v16499_v47  ;;  %v2522_v46 = vpop.f32.mrf.mxu0 }
 0x377   : > { %v13436_v12 = vpop.f32.mrf.mxu1 }
 0x378   : > { %v16624_v58 = vadd.f32 %v2522_v46, %v2260_v19  ;;  %v2263_v31 = vadd.f32 %v13436_v12, %v16501_v57  ;;  %v13472_v54 = vpop.f32.mrf.mxu0 }
 0x379   : > { %v16627_v1 = vpop.f32.mrf.mxu1 }
 0x37a   : > { %v16629_v16 = vadd.f32 %v13472_v54, %v2263_v31  ;;  %v16631_v62 = vpop.f32.mrf.mxu0 }
 0x37b   : > { %v13479_v28 = vpop.f32.mrf.mxu1 }
 0x37c   : > { %v2844_v59 = vadd.f32 %v13479_v28, %v16511_v32  ;;  %v13515_v52 = vpop.f32.mrf.mxu0 }
 0x37d   : > { %v2715_v61 = vpop.f32.mrf.mxu1 }
 0x37e   : > { %v16634_v53 = vadd.f32 %v13515_v52, %v2844_v59  ;;  %v2842_v47 = vadd.f32 %v2715_v61, %v16514_v11  ;;  %v3020_v8 = vpop.f32.mrf.mxu0 }
 0x37f   : > { %v13480_v19 = vpop.f32.mrf.mxu1 }
 0x380   : > { %v16649_v57 = vadd.f32 %v3020_v8, %v2842_v47  ;;  %v2845_v32 = vadd.f32 %v13480_v19, %v16517_v60  ;;  %v13516_v11 = vpop.f32.mrf.mxu0 }
 0x381   : > { %v16652_v46 = vpop.f32.mrf.mxu1 }
 0x382   : > { %v16654_v12 = vadd.f32 %v13516_v11, %v2845_v32  ;;  %v16656_v31 = vpop.f32.mrf.mxu0 }
 0x383   : > { %20650 = vst [vmem:[#allocation45_spill] sm:$0xff] %v16656_v31  ;;  %v13483_v54 = vpop.f32.mrf.mxu1 }
 0x384   : > { %v2848_v28 = vadd.f32 %v13483_v54, %v16527_v21  ;;  %v13519_v59 = vpop.f32.mrf.mxu0 }
 0x385   : > { %v2731_v52 = vpop.f32.mrf.mxu1 }
 0x386   : > { %v16659_v61 = vadd.f32 %v13519_v59, %v2848_v28  ;;  %v16662_v56 = vadd.f32 %v2731_v52, %v16530_v45  ;;  %v16664_v47 = vpop.f32.mrf.mxu0 }
 0x387   : > { %20652 = vst [vmem:[#allocation47_spill] sm:$0xff] %v16664_v47  ;;  %v13484_v60 = vpop.f32.mrf.mxu1 }
 0x388   : > { %20651 = vst [vmem:[#allocation46_spill] sm:$0xff] %v16662_v56  ;;  %v2849_v8 = vadd.f32 %v13484_v60, %v16533_v43  ;;  %v13520_v19 = vpop.f32.mrf.mxu0 }
 0x389   : > { %v16667_v32 = vpop.f32.mrf.mxu1 }
 0x38a   : > { %v16669_v11 = vadd.f32 %v13520_v19, %v2849_v8  ;;  %v16671_v26 = vpop.f32.mrf.mxu0 }
 0x38b   : > { %20653 = vst [vmem:[#allocation48_spill] sm:$0xff] %v16671_v26  ;;  %v13487_v21 = vpop.f32.mrf.mxu1 }
 0x38c   : > { %v2852_v54 = vadd.f32 %v13487_v21, %v16543_v3  ;;  %v13523_v28 = vpop.f32.mrf.mxu0 }
 0x38d   : > { %v2747_v59 = vpop.f32.mrf.mxu1 }
 0x38e   : > { %v16674_v31 = vadd.f32 %v13523_v28, %v2852_v54  ;;  %v16677_v45 = vadd.f32 %v2747_v59, %v16546_v30  ;;  %v16679_v52 = vpop.f32.mrf.mxu0 }
 0x38f   : > { %20655 = vst [vmem:[#allocation50_spill] sm:$0xff] %v16679_v52  ;;  %v13488_v43 = vpop.f32.mrf.mxu1 }
 0x390   : > { %20654 = vst [vmem:[#allocation49_spill] sm:$0xff] %v16677_v45  ;;  %v2853_v60 = vadd.f32 %v13488_v43, %v16549_v14  ;;  %v13524_v47 = vpop.f32.mrf.mxu0 }
 0x391   : > { %v16682_v8 = vpop.f32.mrf.mxu1 }
 0x392   : > { %v16684_v19 = vadd.f32 %v13524_v47, %v2853_v60  ;;  %v16686_v26 = vpop.f32.mrf.mxu0 }
 0x393   : > { %20656 = vst [vmem:[#allocation51_spill] sm:$0xff] %v16686_v26  ;;  %v13491_v3 = vpop.f32.mrf.mxu1 }
 0x394   : > { %v2856_v21 = vadd.f32 %v13491_v3, %v16559_v39  ;;  %v13527_v54 = vpop.f32.mrf.mxu0 }
 0x395   : > { %v2763_v28 = vpop.f32.mrf.mxu1 }
 0x396   : > { %v16689_v56 = vadd.f32 %v13527_v54, %v2856_v21  ;;  %v16692_v30 = vadd.f32 %v2763_v28, %v16562_v23  ;;  %v16694_v59 = vpop.f32.mrf.mxu0 }
 0x397   : > { %20658 = vst [vmem:[#allocation53_spill] sm:$0xff] %v16694_v59  ;;  %v13492_v14 = vpop.f32.mrf.mxu1 }
 0x398   : > { %20657 = vst [vmem:[#allocation52_spill] sm:$0xff] %v16692_v30  ;;  %v2857_v43 = vadd.f32 %v13492_v14, %v16565_v44  ;;  %v13528_v52 = vpop.f32.mrf.mxu0 }
 0x399   : > { %v16697_v47 = vpop.f32.mrf.mxu1 }
 0x39a   : > { %v16699_v60 = vadd.f32 %v13528_v52, %v2857_v43  ;;  %v16701_v26 = vpop.f32.mrf.mxu0 }
 0x39b   : > { %20659 = vst [vmem:[#allocation54_spill] sm:$0xff] %v16701_v26  ;;  %v13495_v39 = vpop.f32.mrf.mxu1 }
 0x39c   : > { %v2860_v3 = vadd.f32 %v13495_v39, %v16577_v40  ;;  %v13531_v21 = vpop.f32.mrf.mxu0 }
 0x39d   : > { %v2779_v54 = vpop.f32.mrf.mxu1 }
 0x39e   : > { %v16704_v45 = vadd.f32 %v13531_v21, %v2860_v3  ;;  %v16707_v23 = vadd.f32 %v2779_v54, %v16579_v50  ;;  %v16709_v28 = vpop.f32.mrf.mxu0 }
 0x39f   : > { %20661 = vst [vmem:[#allocation56_spill] sm:$0xff] %v16709_v28  ;;  %v13496_v44 = vpop.f32.mrf.mxu1 }
 0x3a0   : > { %20660 = vst [vmem:[#allocation55_spill] sm:$0xff] %v16707_v23  ;;  %v2861_v14 = vadd.f32 %v13496_v44, %v16584_v4  ;;  %v13532_v59 = vpop.f32.mrf.mxu0 }
 0x3a1   : > { %v16712_v52 = vpop.f32.mrf.mxu1 }
 0x3a2   : > { %v16714_v43 = vadd.f32 %v13532_v59, %v2861_v14  ;;  %v16716_v26 = vpop.f32.mrf.mxu0 }
 0x3a3   : > { %20662 = vst [vmem:[#allocation57_spill] sm:$0xff] %v16716_v26  ;;  %v13499_v40 = vpop.f32.mrf.mxu1 }
 0x3a4   : > { %v2864_v39 = vadd.f32 %v13499_v40, %v16591_v38  ;;  %v13535_v3 = vpop.f32.mrf.mxu0 }
 0x3a5   : > { %v2795_v21 = vpop.f32.mrf.mxu1 }
 0x3a6   : > { %v16719_v30 = vadd.f32 %v13535_v3, %v2864_v39  ;;  %v16722_v50 = vadd.f32 %v2795_v21, %v16594_v0  ;;  %v16724_v54 = vpop.f32.mrf.mxu0 }
 0x3a7   : > { %20664 = vst [vmem:[#allocation59_spill] sm:$0xff] %v16724_v54  ;;  %v13500_v4 = vpop.f32.mrf.mxu1 }
 0x3a8   : > { %20663 = vst [vmem:[#allocation58_spill] sm:$0xff] %v16722_v50  ;;  %v2865_v44 = vadd.f32 %v13500_v4, %v16599_v18  ;;  %v13536_v28 = vpop.f32.mrf.mxu0 }
 0x3a9   : > { %v16727_v59 = vpop.f32.mrf.mxu1 }
 0x3aa   : > { %v16729_v14 = vadd.f32 %v13536_v28, %v2865_v44  ;;  %v16731_v26 = vpop.f32.mrf.mxu0 }
 0x3ab   : > { %20665 = vst [vmem:[#allocation60_spill] sm:$0xff] %v16731_v26  ;;  %v13503_v38 = vpop.f32.mrf.mxu1 }
 0x3ac   : > { %v2868_v40 = vadd.f32 %v13503_v38, %v16607_v25  ;;  %v13539_v39 = vpop.f32.mrf.mxu0 }
 0x3ad   : > { %v2811_v3 = vpop.f32.mrf.mxu1 }
 0x3ae   : > { %v16734_v23 = vadd.f32 %v13539_v39, %v2868_v40  ;;  %v16737_v0 = vadd.f32 %v2811_v3, %v16610_v7  ;;  %v16739_v21 = vpop.f32.mrf.mxu0 }
 0x3af   : > { %20666 = vst [vmem:[#allocation61_spill] sm:$0xff] %v16739_v21  ;;  %v13504_v18 = vpop.f32.mrf.mxu1 }
 0x3b0   : > { %v2869_v4 = vadd.f32 %v13504_v18, %v16615_v37  ;;  %v13540_v54 = vpop.f32.mrf.mxu0 }
 0x3b1   : > { %v16742_v28 = vpop.f32.mrf.mxu1 }
 0x3b2   : > { %v16744_v44 = vadd.f32 %v13540_v54, %v2869_v4  ;;  %v16746_v26 = vpop.f32.mrf.mxu0 }
 0x3b3   : > { %20667 = vst [vmem:[#allocation62_spill] sm:$0xff] %v16746_v26  ;;  %v13507_v25 = vpop.f32.mrf.mxu1 }
 0x3b4   : > { %v2872_v38 = vadd.f32 %v13507_v25, %v16621_v6  ;;  %v13543_v40 = vpop.f32.mrf.mxu0 }
 0x3b5   : > { %v2827_v39 = vpop.f32.mrf.mxu1 }
 0x3b6   : > { %v16749_v50 = vadd.f32 %v13543_v40, %v2872_v38  ;;  %v16752_v7 = vadd.f32 %v2827_v39, %v16624_v58  ;;  %v16754_v3 = vpop.f32.mrf.mxu0  ;;  %v16771_v58 = vld [vmem:[%s20497_s10 + $0x38] sm:$0xff] }
 0x3b7   : > { %20669 = vst [vmem:[#allocation64_spill] sm:$0xff] %v16754_v3  ;;  %v13508_v37 = vpop.f32.mrf.mxu1  ;;  %20671 = vst [vmem:[#allocation66_spill] sm:$0xff] %v16771_v58  ;;  %13654 = vmatpush3.msra.mxu0 %v16771_v58 }
 0x3b8   : > { %20668 = vst [vmem:[#allocation63_spill] sm:$0xff] %v16752_v7  ;;  %v2873_v18 = vadd.f32 %v13508_v37, %v16629_v16  ;;  %v13544_v21 = vpop.f32.mrf.mxu0  ;;  %13655 = vmatprep.subr.mxu0 %v16312_v55 }
 0x3b9   : > { %v16757_v54 = vpop.f32.mrf.mxu1 }
 0x3ba   : > { %v16759_v4 = vadd.f32 %v13544_v21, %v2873_v18  ;;  %v16761_v26 = vpop.f32.mrf.mxu0 }
 0x3bb   : > { %20670 = vst [vmem:[#allocation65_spill] sm:$0xff] %v16761_v26  ;;  %v13551_v6 = vpop.f32.mrf.mxu1 }
 0x3bc   : > { %v16764_v25 = vadd.f32 %v13551_v6, %v16634_v53  ;;  %v16766_v38 = vpop.f32.mrf.mxu0 }
 0x3bd   : > { %v3326_v40 = vpop.f32.mrf.mxu1 }
 0x3be   : > { %v16775_v16 = vadd.f32 %v3326_v40, %v16649_v57  ;;  %v16778_v39 = vpop.f32.mrf.mxu0 }
 0x3bf   : > { %v13552_v21 = vpop.f32.mrf.mxu1 }
 0x3c0   : > { %v16781_v53 = vadd.f32 %v13552_v21, %v16654_v12  ;;  %v16785_v6 = vpop.f32.mrf.mxu0 }
 0x3c1   : > { %v16783_v37 = vpop.f32.mrf.mxu1  ;;  %20673 = vst [vmem:[#allocation68_spill] sm:$0xff] %v16785_v6 }
 0x3c2   : > { %20672 = vst [vmem:[#allocation67_spill] sm:$0xff] %v16781_v53  ;;  %v16792_v40 = vpop.f32.mrf.mxu0 }
 0x3c3   : > { %v13555_v18 = vpop.f32.mrf.mxu1 }
 0x3c4   : > { %v16788_v26 = vadd.f32 %v13555_v18, %v16659_v61  ;;  %v16799_v21 = vpop.f32.mrf.mxu0 }
 0x3c5   : > { %v16790_v58 = vpop.f32.mrf.mxu1 }
 0x3c6   : > { %20674 = vst [vmem:[#allocation69_spill] sm:$0xff] %v16788_v26  ;;  %v16806_v18 = vpop.f32.mrf.mxu0 }
 0x3c7   : > { %v13556_v57 = vpop.f32.mrf.mxu1  ;;  %20677 = vst [vmem:[#allocation72_spill] sm:$0xff] %v16806_v18 }
 0x3c8   : > { %v16795_v3 = vadd.f32 %v13556_v57, %v16669_v11  ;;  %v16814_v11 = vld [vmem:[%s20497_s10 + $0x30] sm:$0xff]  ;;  %v16819_v57 = vld [vmem:[%s20497_s10 + $0x28] sm:$0xff] }
 0x3c9   : > { %v16797_v7 = vpop.f32.mrf.mxu1  ;;  %20679 = vst [vmem:[#allocation74_spill] sm:$0xff] %v16814_v11  ;;  %20680 = vst [vmem:[#allocation75_spill] sm:$0xff] %v16819_v57  ;;  %13656 = vmatpush3.msra.mxu0 %v16814_v11  ;;  %v16840_v11 = vld [vmem:[%s20497_s10 + $0x18] sm:$0xff] }
 0x3ca   : > { %20675 = vst [vmem:[#allocation70_spill] sm:$0xff] %v16795_v3  ;;  %13657 = vmatprep.subr.mxu0 %v16312_v55  ;;  %20684 = vst [vmem:[#allocation79_spill] sm:$0xff] %v16840_v11 }
 0x3cb   : > { %v13559_v12 = vpop.f32.mrf.mxu1  ;;  %13658 = vmatpush3.msra.mxu0 %v16819_v57  ;;  %v16849_v57 = vld [vmem:[%s20497_s10 + $0x10] sm:$0xff] }
 0x3cc   : > { %v16802_v53 = vadd.f32 %v13559_v12, %v16674_v31  ;;  %13659 = vmatprep.subr.mxu0 %v16312_v55  ;;  %20685 = vst [vmem:[#allocation80_spill] sm:$0xff] %v16849_v57 }
 0x3cd   : > { %v16804_v6 = vpop.f32.mrf.mxu1 }
 0x3ce   : > { %20676 = vst [vmem:[#allocation71_spill] sm:$0xff] %v16802_v53 }
 0x3cf   : > { %v13560_v61 = vpop.f32.mrf.mxu1 }
 0x3d0   : > { %v16809_v26 = vadd.f32 %v13560_v61, %v16684_v19  ;;  %v16828_v19 = vld [vmem:[%s20497_s10 + $0x20] sm:$0xff]  ;;  %v16831_v61 = vpop.f32.mrf.mxu0 }
 0x3d1   : > { %v16821_v31 = vpop.f32.mrf.mxu1  ;;  %20681 = vst [vmem:[#allocation76_spill] sm:$0xff] %v16828_v19  ;;  %20682 = vst [vmem:[#allocation77_spill] sm:$0xff] %v16831_v61  ;;  %13660 = vmatpush3.msra.mxu0 %v16828_v19  ;;  %v16861_v19 = vld [vmem:[%s20497_s10 + $0x8] sm:$0xff] }
 0x3d2   : > { %20678 = vst [vmem:[#allocation73_spill] sm:$0xff] %v16809_v26  ;;  %13661 = vmatprep.subr.mxu0 %v16312_v55  ;;  %20688 = vst [vmem:[#allocation83_spill] sm:$0xff] %v16861_v19 }
 0x3d3   : > { %v13563_v12 = vpop.f32.mrf.mxu1  ;;  %13662 = vmatpush3.msra.mxu0 %v16840_v11  ;;  %v16870_v11 = vld [vmem:[%s20497_s10] sm:$0xff] }
 0x3d4   : > { %v16834_v26 = vadd.f32 %v13563_v12, %v16689_v56  ;;  %v16852_v12 = vpop.f32.mrf.mxu0  ;;  %13663 = vmatprep.subr.mxu0 %v16312_v55  ;;  %20690 = vst [vmem:[#allocation85_spill] sm:$0xff] %v16870_v11 }
 0x3d5   : > { %v16842_v53 = vpop.f32.mrf.mxu1  ;;  %20686 = vst [vmem:[#allocation81_spill] sm:$0xff] %v16852_v12  ;;  %13664 = vmatpush3.msra.mxu0 %v16849_v57 }
 0x3d6   : > { %20683 = vst [vmem:[#allocation78_spill] sm:$0xff] %v16834_v26  ;;  %13665 = vmatprep.subr.mxu0 %v16312_v55 }
 0x3d7   : > { %v13564_v56 = vpop.f32.mrf.mxu1  ;;  %13666 = vmatpush3.msra.mxu0 %v16861_v19 }
 0x3d8   : > { %v16855_v26 = vadd.f32 %v13564_v56, %v16699_v60  ;;  %v16873_v56 = vpop.f32.mrf.mxu0  ;;  %13667 = vmatprep.subr.mxu0 %v16312_v55 }
 0x3d9   : > { %v16863_v61 = vpop.f32.mrf.mxu1  ;;  %20691 = vst [vmem:[#allocation86_spill] sm:$0xff] %v16873_v56  ;;  %13668 = vmatpush3.msra.mxu0 %v16870_v11 }
 0x3da   : > { %20687 = vst [vmem:[#allocation82_spill] sm:$0xff] %v16855_v26  ;;  %20689 = vst [vmem:[#allocation84_spill] sm:$0xff] %v16863_v61  ;;  %13672 = vmatprep.subr.mxu0 %v16312_v55  ;;  %v16883_v12 = vpop.f32.mrf.mxu0 }
 0x3db   : > { %v13567_v60 = vpop.f32.mrf.mxu1 }
 0x3dc   : > { %v16876_v26 = vadd.f32 %v13567_v60, %v16704_v45  ;;  %v16890_v18 = vpop.f32.mrf.mxu0 }
 0x3dd   : > { %v16879_v61 = vpop.f32.mrf.mxu1 }
 0x3de   : > { %20692 = vst [vmem:[#allocation87_spill] sm:$0xff] %v16876_v26  ;;  %20693 = vst [vmem:[#allocation88_spill] sm:$0xff] %v16879_v61  ;;  %v16897_v11 = vpop.f32.mrf.mxu0 }
 0x3df   : > { %v13568_v57 = vpop.f32.mrf.mxu1 }
 0x3e0   : > { %v16886_v3 = vadd.f32 %v13568_v57, %v16714_v43  ;;  %v16904_v57 = vpop.f32.mrf.mxu0 }
 0x3e1   : > { %v16888_v19 = vpop.f32.mrf.mxu1 }
 0x3e2   : > { %20694 = vst [vmem:[#allocation89_spill] sm:$0xff] %v16886_v3  ;;  %20695 = vst [vmem:[#allocation90_spill] sm:$0xff] %v16888_v19 }
 0x3e3   : > { %v13571_v56 = vpop.f32.mrf.mxu1 }
 0x3e4   : > { %v16893_v45 = vadd.f32 %v13571_v56, %v16719_v30  ;;  %v16911_v56 = vpop.f32.mrf.mxu0 }
 0x3e5   : > { %v16895_v60 = vpop.f32.mrf.mxu1 }
 0x3e6   : > { %20696 = vst [vmem:[#allocation91_spill] sm:$0xff] %v16893_v45 }
 0x3e7   : > { %v13572_v26 = vpop.f32.mrf.mxu1 }
 0x3e8   : > { %v16900_v55 = vadd.f32 %v13572_v26, %v16729_v14  ;;  %v1900_v26 = vadd.f32 %v16453_v2, %v16451_v15  ;;  %v16930_v15 = vpop.f32.mrf.mxu0 }
 0x3e9   : > { %v16902_v61 = vpop.f32.mrf.mxu1 }
 0x3ea   : > { %20697 = vst [vmem:[#allocation92_spill] sm:$0xff] %v16902_v61  ;;  %v1916_v61 = vadd.f32 %v16471_v33, %v16469_v63  ;;  %v2542_v63 = vadd.f32 %v16538_v20, %v16536_v5  ;;  %v2546_v33 = vadd.f32 %v16554_v41, %v16552_v29 }
 0x3eb   : > { %v13575_v43 = vpop.f32.mrf.mxu1 }
 0x3ec   : > { %v16907_v3 = vadd.f32 %v13575_v43, %v16734_v23  ;;  %v1932_v23 = vadd.f32 %v16489_v49, %v16487_v42  ;;  %v2249_v43 = vadd.f32 %v16582_v51, %v1900_v26  ;;  %v2847_v51 = vadd.f32 %v16667_v32, %v2542_v63  ;;  %v20709_v63 = vld [vmem:[#allocation54_spill] sm:$0xff] }
 0x3ed   : > { %v16909_v19 = vpop.f32.mrf.mxu1  ;;  %v2851_v5 = vadd.f32 %v16682_v8, %v2546_v33  ;;  %v20701_v8 = vld [vmem:[#allocation46_spill] sm:$0xff]  ;;  %v20710_v33 = vld [vmem:[#allocation55_spill] sm:$0xff] }
 0x3ee   : > { %20698 = vst [vmem:[#allocation93_spill] sm:$0xff] %v16907_v3  ;;  %20699 = vst [vmem:[#allocation94_spill] sm:$0xff] %v16909_v19  ;;  %v1948_v19 = vadd.f32 %v16505_v35, %v16503_v36  ;;  %v2257_v42 = vadd.f32 %v16613_v24, %v1932_v23  ;;  %v2550_v36 = vadd.f32 %v16570_v48, %v16568_v17  ;;  %v20706_v23 = vld [vmem:[#allocation51_spill] sm:$0xff] }
 0x3ef   : > { %v13576_v30 = vpop.f32.mrf.mxu1 }
 0x3f0   : > { %v16914_v45 = vadd.f32 %v13576_v30, %v16744_v44  ;;  %v2538_v44 = vadd.f32 %v16522_v22, %v16520_v13  ;;  %v2253_v30 = vadd.f32 %v16597_v27, %v1916_v61  ;;  %v2261_v35 = vadd.f32 %v16627_v1, %v1948_v19  ;;  %v16951_v27 = vpop.f32.mrf.mxu0  ;;  %v20704_v61 = vld [vmem:[#allocation49_spill] sm:$0xff] }
 0x3f1   : > { %v16918_v14 = vpop.f32.mrf.mxu1  ;;  %v2554_v22 = vadd.f32 %v16586_v9, %v2249_v43  ;;  %v2855_v41 = vadd.f32 %v16697_v47, %v2550_v36  ;;  %v2562_v17 = vadd.f32 %v16617_v34, %v2257_v42  ;;  %v3156_v34 = vadd.f32 %v20706_v23, %v2851_v5  ;;  %v20707_v43 = vld [vmem:[#allocation52_spill] sm:$0xff]  ;;  %v20713_v5 = vld [vmem:[#allocation58_spill] sm:$0xff] }
 0x3f2   : > { %v2843_v13 = vadd.f32 %v16652_v46, %v2538_v44  ;;  %v2558_v29 = vadd.f32 %v16601_v10, %v2253_v30  ;;  %v2566_v9 = vadd.f32 %v16631_v62, %v2261_v35  ;;  %v20700_v46 = vld [vmem:[#allocation45_spill] sm:$0xff]  ;;  %v20711_v42 = vld [vmem:[#allocation56_spill] sm:$0xff] }
 0x3f3   : > { %v13579_v3 = vpop.f32.mrf.mxu1  ;;  %v2859_v48 = vadd.f32 %v16712_v52, %v2554_v22  ;;  %v20708_v52 = vld [vmem:[#allocation53_spill] sm:$0xff]  ;;  %v3160_v62 = vadd.f32 %v20709_v63, %v2855_v41  ;;  %v3163_v36 = vadd.f32 %v20711_v42, %v20710_v33  ;;  %v2867_v35 = vadd.f32 %v16742_v28, %v2562_v17 }
 0x3f4   : > { %v16933_v2 = vadd.f32 %v13579_v3, %v16749_v50  ;;  %v3148_v32 = vadd.f32 %v20700_v46, %v2843_v13  ;;  %v20702_v50 = vld [vmem:[#allocation47_spill] sm:$0xff]  ;;  %v2863_v47 = vadd.f32 %v16727_v59, %v2558_v29  ;;  %v20703_v3 = vld [vmem:[#allocation48_spill] sm:$0xff]  ;;  %v3159_v44 = vadd.f32 %v20708_v52, %v20707_v43  ;;  %v16977_v13 = vpop.f32.mrf.mxu0  ;;  %v20712_v22 = vld [vmem:[#allocation57_spill] sm:$0xff] }
 0x3f5   : > { %v16940_v49 = vpop.f32.mrf.mxu1  ;;  %v3151_v10 = vadd.f32 %v20702_v50, %v20701_v8  ;;  %v3152_v19 = vadd.f32 %v20703_v3, %v2847_v51  ;;  %v3758_v59 = vadd.f32 %v16778_v39, %v16775_v16  ;;  %v16980_v51 = vadd.f32 %v20712_v22, %v2859_v48  ;;  %v20715_v50 = vld [vmem:[#allocation60_spill] sm:$0xff]  ;;  %v20716_v48 = vld [vmem:[#allocation61_spill] sm:$0xff] }
 0x3f6   : > { %v3760_v41 = vadd.f32 %v16766_v38, %v16764_v25  ;;  %v3454_v46 = vadd.f32 %v16783_v37, %v3148_v32  ;;  %v16990_v28 = vadd.f32 %v20715_v50, %v2863_v47  ;;  %v2871_v16 = vadd.f32 %v16757_v54, %v2566_v9  ;;  %v20719_v32 = vld [vmem:[#allocation62_spill] sm:$0xff]  ;;  %v20720_v47 = vld [vmem:[#allocation63_spill] sm:$0xff]  ;;  %v20721_v52 = vld [vmem:[#allocation64_spill] sm:$0xff] }
 0x3f7   : > { %v13580_v20 = vpop.f32.mrf.mxu1  ;;  %v3457_v39 = vadd.f32 %v16790_v58, %v3151_v10  ;;  %v16996_v3 = vadd.f32 %v20716_v48, %v16737_v0  ;;  %v3458_v25 = vadd.f32 %v16797_v7, %v3152_v19  ;;  %v17002_v43 = vadd.f32 %v20719_v32, %v2867_v35  ;;  %v3695_v0 = vpop.f32.mrf.mxu0  ;;  %v17013_v10 = vld [vmem:[%s20494_s7] ss:$0 sm:$0xff]  ;;  %v20722_v42 = vld [vmem:[#allocation65_spill] sm:$0xff]  ;;  %v20731_v48 = vld [vmem:[#allocation78_spill] sm:$0xff] }
 0x3f8   : > { %v16954_v24 = vadd.f32 %v13580_v20, %v16759_v4  ;;  %v20705_v4 = vld [vmem:[#allocation50_spill] sm:$0xff]  ;;  %v20714_v20 = vld [vmem:[#allocation59_spill] sm:$0xff]  ;;  %v17006_v54 = vadd.f32 %v20721_v52, %v20720_v47  ;;  %v3462_v9 = vadd.f32 %v16821_v31, %v3156_v34  ;;  %v3759_v7 = vadd.f32 %v16792_v40, %v3454_v46  ;;  %v20726_v22 = vld [vmem:[#allocation77_spill] sm:$0xff] }
 0x3f9   : > { %v16958_v1 = vpop.f32.mrf.mxu1  ;;  %v3155_v26 = vadd.f32 %v20705_v4, %v20704_v61  ;;  %v16984_v29 = vadd.f32 %v20714_v20, %v20713_v5  ;;  %v20717_v61 = vld [vmem:[#allocation67_spill] sm:$0xff]  ;;  %v20718_v4 = vld [vmem:[#allocation68_spill] sm:$0xff]  ;;  %v3465_v19 = vadd.f32 %v16842_v53, %v3159_v44  ;;  %v17021_v35 = vadd.f32 %v20722_v42, %v2871_v16  ;;  %v20727_v20 = vld [vmem:[#allocation81_spill] sm:$0xff] }
 0x3fa   : > { %v3761_v23 = vadd.f32 %v20718_v4, %v20717_v61  ;;  %v3763_v40 = vadd.f32 %v20727_v20, %v3458_v25  ;;  %v20729_v53 = vld [vmem:[#allocation86_spill] sm:$0xff]  ;;  %v17044_v61 = vadd.f32 %v16904_v57, %v20731_v48  ;;  %v17046_v4 = vpop.f32.mrf.mxu0  ;;  %v20733_v57 = vld [vmem:[#allocation84_spill] sm:$0xff] }
 0x3fb   : > { %v13623_v30 = vpop.f32.mrf.mxu1  ;;  %v3461_v58 = vadd.f32 %v16804_v6, %v3155_v26  ;;  %v20723_v6 = vld [vmem:[#allocation69_spill] sm:$0xff]  ;;  %v20724_v26 = vld [vmem:[#allocation72_spill] sm:$0xff]  ;;  %v3466_v32 = vadd.f32 %v20733_v57, %v3160_v62 }
 0x3fc   : > { %v4065_v38 = vadd.f32 %v13623_v30, %v3760_v41  ;;  %v3764_v31 = vadd.f32 %v16799_v21, %v20723_v6  ;;  %v3762_v34 = vadd.f32 %v20724_v26, %v3457_v39  ;;  %v20728_v41 = vld [vmem:[#allocation71_spill] sm:$0xff]  ;;  %v17040_v39 = vadd.f32 %v16897_v11, %v3462_v9 }
 0x3fd   : > { %v3936_v8 = vpop.f32.mrf.mxu1  ;;  %v3768_v44 = vadd.f32 %v20729_v53, %v20728_v41  ;;  %v3766_v16 = vadd.f32 %v16883_v12, %v3461_v58  ;;  %v17083_v20 = vadd.f32 %v16951_v27, %v3466_v32 }
 0x3fe   : > { %v4063_v17 = vadd.f32 %v3936_v8, %v3758_v59  ;;  %v20725_v59 = vld [vmem:[#allocation70_spill] sm:$0xff]  ;;  %v17032_v46 = vadd.f32 %v17013_v10, %v4065_v38 }
 0x3ff   : > { %v13624_v37 = vpop.f32.mrf.mxu1  ;;  %v3765_v5 = vadd.f32 %v20726_v22, %v20725_v59  ;;  %v20732_v38 = vld [vmem:[#allocation82_spill] sm:$0xff] }
 0x400   : > { %v17018_v30 = vadd.f32 %v17013_v10, %v4063_v17  ;;  %v4066_v63 = vadd.f32 %v13624_v37, %v3761_v23  ;;  %v20730_v17 = vld [vmem:[#allocation73_spill] sm:$0xff]  ;;  %v17049_v23 = vadd.f32 %v16911_v56, %v3465_v19  ;;  %v17061_v37 = vadd.f32 %v16930_v15, %v20732_v38 }
 0x401   : > { %v3939_v33 = vpop.f32.mrf.mxu1  ;;  %v17037_v21 = vadd.f32 %v16890_v18, %v20730_v17  ;;  %v4214_v56 = vmul.f32 %v17032_v46, %v17032_v46  ;;  %v4146_v62 = vsel %vm4142_vm5, %v17032_v46, 0.0 }
 0x402   : > { %v4064_v8 = vadd.f32 %v3939_v33, %v3759_v7  ;;  %v4212_v25 = vmul.f32 %v17018_v30, %v17018_v30  ;;  %v17054_v12 = vadd.f32 %v17013_v10, %v4066_v63  ;;  %v4143_v58 = vsel %vm4142_vm5, %v17018_v30, 0.0  ;;  %v20734_v63 = vld [vmem:[#allocation88_spill] sm:$0xff]  ;;  %v3698_v33 = vpop.f32.mrf.mxu0 }
 0x403   : > { %v13627_v50 = vpop.f32.mrf.mxu1  ;;  %v3469_v15 = vadd.f32 %v20734_v63, %v3163_v36 }
 0x404   : > { %v17057_v18 = vadd.f32 %v17013_v10, %v4064_v8  ;;  %v4069_v47 = vadd.f32 %v13627_v50, %v3764_v31  ;;  %v4244_v31 = vsel %vm4142_vm5, %v4212_v25, 0.0  ;;  %v4215_v26 = vmul.f32 %v17054_v12, %v17054_v12  ;;  %v13607_v38 = vpop.f32.mrf.mxu0 }
 0x405   : > { %v3952_v11 = vpop.f32.mrf.mxu1  ;;  %v4247_v8 = vsel %vm4142_vm5, %v4214_v56, 0.0  ;;  %v4148_v50 = vsel %vm4142_vm5, %v17054_v12, 0.0  ;;  %v17097_v27 = vadd.f32 %v3695_v0, %v3469_v15 }
 0x406   : > { %v4067_v52 = vadd.f32 %v3952_v11, %v3762_v34  ;;  %v4144_v9 = vsel %vm4142_vm5, %v17057_v18, 0.0  ;;  %v4213_v7 = vmul.f32 %v17057_v18, %v17057_v18  ;;  %v17086_v53 = vadd.f32 %v17013_v10, %v4069_v47 }
 0x407   : > { %v13628_v19 = vpop.f32.mrf.mxu1  ;;  %v4145_v42 = vadd.f32 %v4144_v9, %v4143_v58  ;;  %v4249_v47 = vsel %vm4142_vm5, %v4215_v26, 0.0 }
 0x408   : > { %v17076_v6 = vadd.f32 %v17013_v10, %v4067_v52  ;;  %v4245_v34 = vsel %vm4142_vm5, %v4213_v7, 0.0  ;;  %v4070_v59 = vadd.f32 %v13628_v19, %v3765_v5  ;;  %v20735_v5 = vld [vmem:[#allocation87_spill] sm:$0xff] }
 0x409   : > { %v3955_v22 = vpop.f32.mrf.mxu1  ;;  %v4147_v36 = vadd.f32 %v4146_v62, %v4145_v42  ;;  %v4246_v41 = vadd.f32 %v4245_v34, %v4244_v31  ;;  %v17095_v11 = vadd.f32 %v16977_v13, %v20735_v5  ;;  %v4218_v13 = vmul.f32 %v17086_v53, %v17086_v53  ;;  %v20736_v31 = vld [vmem:[#allocation90_spill] sm:$0xff]  ;;  %v3711_v34 = vpop.f32.mrf.mxu0 }
 0x40a   : > { %v4216_v17 = vmul.f32 %v17076_v6, %v17076_v6  ;;  %v4068_v48 = vadd.f32 %v3955_v22, %v3763_v40  ;;  %v4150_v52 = vsel %vm4142_vm5, %v17076_v6, 0.0  ;;  %v17103_v56 = vadd.f32 %v17013_v10, %v4070_v59 }
 0x40b   : > { %v13631_v25 = vpop.f32.mrf.mxu1  ;;  %v4248_v57 = vadd.f32 %v4247_v8, %v4246_v41  ;;  %v4149_v32 = vadd.f32 %v4148_v50, %v4147_v36  ;;  %v3470_v26 = vadd.f32 %v20736_v31, %v16980_v51  ;;  %v4154_v59 = vsel %vm4142_vm5, %v17086_v53, 0.0 }
 0x40c   : > { %v17106_v40 = vadd.f32 %v17013_v10, %v4068_v48  ;;  %v4251_v19 = vsel %vm4142_vm5, %v4216_v17, 0.0  ;;  %v4073_v62 = vadd.f32 %v13631_v25, %v3768_v44  ;;  %v20737_v17 = vld [vmem:[#allocation89_spill] sm:$0xff] }
 0x40d   : > { %v3968_v58 = vpop.f32.mrf.mxu1  ;;  %v4151_v0 = vadd.f32 %v4150_v52, %v4149_v32  ;;  %v4250_v9 = vadd.f32 %v4249_v47, %v4248_v57  ;;  %v17128_v51 = vadd.f32 %v17046_v4, %v20737_v17  ;;  %v4255_v57 = vsel %vm4142_vm5, %v4218_v13, 0.0  ;;  %v13608_v4 = vpop.f32.mrf.mxu0 }
 0x40e   : > { %v4071_v7 = vadd.f32 %v3968_v58, %v3766_v16  ;;  %v4152_v63 = vsel %vm4142_vm5, %v17106_v40, 0.0  ;;  %v4217_v15 = vmul.f32 %v17106_v40, %v17106_v40  ;;  %v4219_v16 = vmul.f32 %v17103_v56, %v17103_v56 }
 0x40f   : > { %v13632_v42 = vpop.f32.mrf.mxu1  ;;  %v4252_v22 = vadd.f32 %v4251_v19, %v4250_v9  ;;  %v4153_v36 = vadd.f32 %v4152_v63, %v4151_v0  ;;  %v4156_v32 = vsel %vm4142_vm5, %v17103_v56, 0.0  ;;  %v17135_v47 = vadd.f32 %v17013_v10, %v4073_v62 }
 0x410   : > { %v4253_v41 = vsel %vm4142_vm5, %v4217_v15, 0.0  ;;  %v17123_v8 = vadd.f32 %v17013_v10, %v4071_v7  ;;  %v4074_v44 = vadd.f32 %v13632_v42, %v17037_v21  ;;  %v17139_v58 = vadd.f32 %v3698_v33, %v3470_v26 }
 0x411   : > { %v3971_v50 = vpop.f32.mrf.mxu1  ;;  %v4155_v48 = vadd.f32 %v4154_v59, %v4153_v36  ;;  %v4254_v25 = vadd.f32 %v4253_v41, %v4252_v22  ;;  %v4257_v13 = vsel %vm4142_vm5, %v4219_v16, 0.0  ;;  %v20738_v36 = vld [vmem:[#allocation91_spill] sm:$0xff]  ;;  %v3714_v41 = vpop.f32.mrf.mxu0 }
 0x412   : > { %v4072_v5 = vadd.f32 %v3971_v50, %v17040_v39  ;;  %v4220_v21 = vmul.f32 %v17123_v8, %v17123_v8  ;;  %v3473_v39 = vadd.f32 %v16895_v60, %v16984_v29  ;;  %v4158_v19 = vsel %vm4142_vm5, %v17123_v8, 0.0 }
 0x413   : > { %v13635_v52 = vpop.f32.mrf.mxu1  ;;  %v4256_v0 = vadd.f32 %v4255_v57, %v4254_v25  ;;  %v4157_v9 = vadd.f32 %v4156_v32, %v4155_v48  ;;  %v17150_v63 = vadd.f32 %v17013_v10, %v4074_v44  ;;  %v4222_v60 = vmul.f32 %v17135_v47, %v17135_v47 }
 0x414   : > { %v17142_v7 = vadd.f32 %v17013_v10, %v4072_v5  ;;  %v4259_v29 = vsel %vm4142_vm5, %v4220_v21, 0.0  ;;  %v4077_v26 = vadd.f32 %v13635_v52, %v17044_v61  ;;  %v17162_v16 = vadd.f32 %v13607_v38, %v20738_v36 }
 0x415   : > { %v3984_v15 = vpop.f32.mrf.mxu1  ;;  %v4159_v33 = vadd.f32 %v4158_v19, %v4157_v9  ;;  %v4258_v62 = vadd.f32 %v4257_v13, %v4256_v0  ;;  %v4162_v48 = vsel %vm4142_vm5, %v17135_v47, 0.0  ;;  %v4223_v25 = vmul.f32 %v17150_v63, %v17150_v63 }
 0x416   : > { %v4160_v42 = vsel %vm4142_vm5, %v17142_v7, 0.0  ;;  %v4221_v31 = vmul.f32 %v17142_v7, %v17142_v7  ;;  %v4075_v59 = vadd.f32 %v3984_v15, %v17049_v23  ;;  %v3778_v57 = vadd.f32 %v3711_v34, %v3473_v39  ;;  %v20739_v34 = vld [vmem:[#allocation92_spill] sm:$0xff]  ;;  %v13611_v15 = vpop.f32.mrf.mxu0 }
 0x417   : > { %v13636_v22 = vpop.f32.mrf.mxu1  ;;  %v4260_v44 = vadd.f32 %v4259_v29, %v4258_v62  ;;  %v4161_v50 = vadd.f32 %v4160_v42, %v4159_v33  ;;  %v4263_v52 = vsel %vm4142_vm5, %v4222_v60, 0.0  ;;  %v4164_v0 = vsel %vm4142_vm5, %v17150_v63, 0.0 }
 0x418   : > { %v4261_v17 = vsel %vm4142_vm5, %v4221_v31, 0.0  ;;  %v17170_v5 = vadd.f32 %v17013_v10, %v4075_v59  ;;  %v4078_v61 = vadd.f32 %v13636_v22, %v17061_v37  ;;  %v17178_v9 = vadd.f32 %v17013_v10, %v4077_v26 }
 0x419   : > { %v3987_v23 = vpop.f32.mrf.mxu1  ;;  %v4163_v38 = vadd.f32 %v4162_v48, %v4161_v50  ;;  %v4262_v32 = vadd.f32 %v4261_v17, %v4260_v44  ;;  %v17183_v37 = vadd.f32 %v13608_v4, %v16900_v55  ;;  %v3474_v39 = vadd.f32 %v20739_v34, %v16990_v28  ;;  %v20740_v17 = vld [vmem:[#allocation94_spill] sm:$0xff] }
 0x41a   : > { %v4076_v21 = vadd.f32 %v3987_v23, %v17083_v20  ;;  %v4224_v13 = vmul.f32 %v17170_v5, %v17170_v5  ;;  %v4265_v62 = vsel %vm4142_vm5, %v4223_v25, 0.0  ;;  %v4166_v42 = vsel %vm4142_vm5, %v17170_v5, 0.0  ;;  %v3727_v25 = vpop.f32.mrf.mxu0 }
 0x41b   : > { %v13639_v19 = vpop.f32.mrf.mxu1  ;;  %v4264_v20 = vadd.f32 %v4263_v52, %v4262_v32  ;;  %v4165_v33 = vadd.f32 %v4164_v0, %v4163_v38  ;;  %v17191_v31 = vadd.f32 %v17013_v10, %v4078_v61  ;;  %v4226_v59 = vmul.f32 %v17178_v9, %v17178_v9 }
 0x41c   : > { %v17194_v60 = vadd.f32 %v17013_v10, %v4076_v21  ;;  %v4081_v26 = vadd.f32 %v13639_v19, %v17095_v11  ;;  %v4267_v22 = vsel %vm4142_vm5, %v4224_v13, 0.0  ;;  %v3477_v48 = vadd.f32 %v20740_v17, %v16996_v3 }
 0x41d   : > { %v4000_v29 = vpop.f32.mrf.mxu1  ;;  %v4167_v55 = vadd.f32 %v4166_v42, %v4165_v33  ;;  %v4266_v4 = vadd.f32 %v4265_v62, %v4264_v20  ;;  %v4170_v23 = vsel %vm4142_vm5, %v17178_v9, 0.0  ;;  %v4227_v38 = vmul.f32 %v17191_v31, %v17191_v31 }
 0x41e   : > { %v4079_v28 = vadd.f32 %v4000_v29, %v17097_v27  ;;  %v4168_v36 = vsel %vm4142_vm5, %v17194_v60, 0.0  ;;  %v4225_v44 = vmul.f32 %v17194_v60, %v17194_v60  ;;  %v3779_v0 = vadd.f32 %v3714_v41, %v3474_v39  ;;  %v20741_v29 = vld [vmem:[#allocation93_spill] sm:$0xff]  ;;  %v13612_v41 = vpop.f32.mrf.mxu0 }
 0x41f   : > { %v13640_v50 = vpop.f32.mrf.mxu1  ;;  %v4268_v61 = vadd.f32 %v4267_v22, %v4266_v4  ;;  %v4169_v11 = vadd.f32 %v4168_v36, %v4167_v55  ;;  %v17217_v19 = vadd.f32 %v17013_v10, %v4081_v26  ;;  %v4271_v34 = vsel %vm4142_vm5, %v4226_v59, 0.0 }
 0x420   : > { %v17208_v27 = vadd.f32 %v17013_v10, %v4079_v28  ;;  %v4269_v32 = vsel %vm4142_vm5, %v4225_v44, 0.0  ;;  %v4082_v21 = vadd.f32 %v13640_v50, %v17128_v51  ;;  %v4172_v20 = vsel %vm4142_vm5, %v17191_v31, 0.0 }
 0x421   : > { %v4003_v52 = vpop.f32.mrf.mxu1  ;;  %v4171_v13 = vadd.f32 %v4170_v23, %v4169_v11  ;;  %v4270_v3 = vadd.f32 %v4269_v32, %v4268_v61  ;;  %v3784_v51 = vadd.f32 %v13611_v15, %v20741_v29  ;;  %v3782_v55 = vadd.f32 %v3727_v25, %v3477_v48 }
 0x422   : > { %v4228_v33 = vmul.f32 %v17208_v27, %v17208_v27  ;;  %v4080_v62 = vadd.f32 %v4003_v52, %v17139_v58  ;;  %v4273_v26 = vsel %vm4142_vm5, %v4227_v38, 0.0  ;;  %v4174_v28 = vsel %vm4142_vm5, %v17208_v27, 0.0  ;;  %v3730_v38 = vpop.f32.mrf.mxu0 }
 0x423   : > { %v13643_v42 = vpop.f32.mrf.mxu1  ;;  %v4272_v39 = vadd.f32 %v4271_v34, %v4270_v3  ;;  %v4173_v4 = vadd.f32 %v4172_v20, %v4171_v13  ;;  %v17230_v59 = vadd.f32 %v17013_v10, %v4082_v21  ;;  %v4230_v58 = vmul.f32 %v17217_v19, %v17217_v19 }
 0x424   : > { %v17233_v22 = vadd.f32 %v17013_v10, %v4080_v62  ;;  %v4275_v17 = vsel %vm4142_vm5, %v4228_v33, 0.0  ;;  %v4085_v61 = vadd.f32 %v13643_v42, %v17162_v16  ;;  %v3478_v23 = vadd.f32 %v16918_v14, %v17002_v43  ;;  %v13615_v14 = vpop.f32.mrf.mxu0 }
 0x425   : > { %v4016_v36 = vpop.f32.mrf.mxu1  ;;  %v4175_v15 = vadd.f32 %v4174_v28, %v4173_v4  ;;  %v4274_v44 = vadd.f32 %v4273_v26, %v4272_v39  ;;  %v4178_v32 = vsel %vm4142_vm5, %v17217_v19, 0.0  ;;  %v4231_v52 = vmul.f32 %v17230_v59, %v17230_v59 }
 0x426   : > { %v4083_v50 = vadd.f32 %v4016_v36, %v3778_v57  ;;  %v4176_v48 = vsel %vm4142_vm5, %v17233_v22, 0.0  ;;  %v4229_v25 = vmul.f32 %v17233_v22, %v17233_v22  ;;  %v3785_v20 = vadd.f32 %v13612_v41, %v16914_v45 }
 0x427   : > { %v13644_v11 = vpop.f32.mrf.mxu1  ;;  %v4276_v21 = vadd.f32 %v4275_v17, %v4274_v44  ;;  %v4177_v57 = vadd.f32 %v4176_v48, %v4175_v15  ;;  %v4279_v42 = vsel %vm4142_vm5, %v4230_v58, 0.0  ;;  %v4180_v29 = vsel %vm4142_vm5, %v17230_v59, 0.0 }
 0x428   : > { %v4277_v13 = vsel %vm4142_vm5, %v4229_v25, 0.0  ;;  %v17251_v3 = vadd.f32 %v17013_v10, %v4083_v50  ;;  %v4086_v16 = vadd.f32 %v13644_v11, %v17183_v37  ;;  %v17259_v39 = vadd.f32 %v17013_v10, %v4085_v61  ;;  %v3743_v50 = vpop.f32.mrf.mxu0 }
 0x429   : > { %v4019_v34 = vpop.f32.mrf.mxu1  ;;  %v4179_v43 = vadd.f32 %v4178_v32, %v4177_v57  ;;  %v4278_v33 = vadd.f32 %v4277_v13, %v4276_v21  ;;  %v4281_v36 = vsel %vm4142_vm5, %v4231_v52, 0.0  ;;  %v3481_v11 = vadd.f32 %v16940_v49, %v17006_v54 }
 0x42a   : > { %v4084_v62 = vadd.f32 %v4019_v34, %v3779_v0  ;;  %v4232_v4 = vmul.f32 %v17251_v3, %v17251_v3  ;;  %v17264_v45 = vadd.f32 %v17013_v10, %v4086_v16  ;;  %v3783_v0 = vadd.f32 %v3730_v38, %v3478_v23 }
 0x42b   : > { %v13647_v26 = vpop.f32.mrf.mxu1  ;;  %v4280_v37 = vadd.f32 %v4279_v42, %v4278_v33  ;;  %v4181_v28 = vadd.f32 %v4180_v29, %v4179_v43  ;;  %v4182_v58 = vsel %vm4142_vm5, %v17251_v3, 0.0  ;;  %v4234_v23 = vmul.f32 %v17259_v39, %v17259_v39  ;;  %v13616_v33 = vpop.f32.mrf.mxu0 }
 0x42c   : > { %v17267_v41 = vadd.f32 %v17013_v10, %v4084_v62  ;;  %v4089_v15 = vadd.f32 %v13647_v26, %v3784_v51  ;;  %v4283_v38 = vsel %vm4142_vm5, %v4232_v4, 0.0  ;;  %v4235_v57 = vmul.f32 %v17264_v45, %v17264_v45 }
 0x42d   : > { %v4032_v44 = vpop.f32.mrf.mxu1  ;;  %v4183_v17 = vadd.f32 %v4182_v58, %v4181_v28  ;;  %v4282_v48 = vadd.f32 %v4281_v36, %v4280_v37  ;;  %v4186_v16 = vsel %vm4142_vm5, %v17259_v39, 0.0  ;;  %v3786_v4 = vadd.f32 %v3743_v50, %v3481_v11 }
 0x42e   : > { %v4184_v25 = vsel %vm4142_vm5, %v17267_v41, 0.0  ;;  %v4233_v61 = vmul.f32 %v17267_v41, %v17267_v41  ;;  %v4087_v32 = vadd.f32 %v4032_v44, %v3782_v55  ;;  %v17287_v34 = vadd.f32 %v17013_v10, %v4089_v15 }
 0x42f   : > { %v13648_v51 = vpop.f32.mrf.mxu1  ;;  %v4284_v21 = vadd.f32 %v4283_v38, %v4282_v48  ;;  %v4185_v52 = vadd.f32 %v4184_v25, %v4183_v17  ;;  %v3788_v55 = vadd.f32 %v13615_v14, %v16933_v2  ;;  %v4287_v26 = vsel %vm4142_vm5, %v4234_v23, 0.0  ;;  %v3746_v48 = vpop.f32.mrf.mxu0 }
 0x430   : > { %v4285_v13 = vsel %vm4142_vm5, %v4233_v61, 0.0  ;;  %v17290_v49 = vadd.f32 %v17013_v10, %v4087_v32  ;;  %v4090_v54 = vadd.f32 %v13648_v51, %v3785_v20  ;;  %v4188_v37 = vsel %vm4142_vm5, %v17264_v45, 0.0 }
 0x431   : > { %v4035_v43 = vpop.f32.mrf.mxu1  ;;  %v4187_v62 = vadd.f32 %v4186_v16, %v4185_v52  ;;  %v4286_v42 = vadd.f32 %v4285_v13, %v4284_v21  ;;  %v3482_v20 = vadd.f32 %v16958_v1, %v17021_v35  ;;  %v4289_v58 = vsel %vm4142_vm5, %v4235_v57, 0.0 }
 0x432   : > { %v4088_v29 = vadd.f32 %v4035_v43, %v3783_v0  ;;  %v4236_v28 = vmul.f32 %v17290_v49, %v17290_v49  ;;  %v4238_v0 = vmul.f32 %v17287_v34, %v17287_v34  ;;  %v4190_v15 = vsel %vm4142_vm5, %v17290_v49, 0.0 }
 0x433   : > { %v13651_v36 = vpop.f32.mrf.mxu1  ;;  %v4288_v2 = vadd.f32 %v4287_v26, %v4286_v42  ;;  %v4189_v14 = vadd.f32 %v4188_v37, %v4187_v62  ;;  %v17306_v44 = vadd.f32 %v17013_v10, %v4090_v54  ;;  %v3789_v51 = vadd.f32 %v13616_v33, %v16954_v24 }
 0x434   : > { %v17309_v50 = vadd.f32 %v17013_v10, %v4088_v29  ;;  %v4093_v35 = vadd.f32 %v13651_v36, %v3788_v55  ;;  %v4291_v11 = vsel %vm4142_vm5, %v4236_v28, 0.0  ;;  %v3787_v13 = vadd.f32 %v3746_v48, %v3482_v20 }
 0x435   : > { %v4048_v17 = vpop.f32.mrf.mxu1  ;;  %v4191_v25 = vadd.f32 %v4190_v15, %v4189_v14  ;;  %v4290_v1 = vadd.f32 %v4289_v58, %v4288_v2  ;;  %v4194_v16 = vsel %vm4142_vm5, %v17287_v34, 0.0  ;;  %v4239_v54 = vmul.f32 %v17306_v44, %v17306_v44 }
 0x436   : > { %v4091_v61 = vadd.f32 %v4048_v17, %v3786_v4  ;;  %v4192_v23 = vsel %vm4142_vm5, %v17309_v50, 0.0  ;;  %v4237_v38 = vmul.f32 %v17309_v50, %v17309_v50  ;;  %v4295_v62 = vsel %vm4142_vm5, %v4238_v0, 0.0 }
 0x437   : > { %v13652_v32 = vpop.f32.mrf.mxu1  ;;  %v4292_v21 = vadd.f32 %v4291_v11, %v4290_v1  ;;  %v4193_v57 = vadd.f32 %v4192_v23, %v4191_v25  ;;  %v17327_v24 = vadd.f32 %v17013_v10, %v4093_v35  ;;  %v4196_v33 = vsel %vm4142_vm5, %v17306_v44, 0.0 }
 0x438   : > { %v17318_v52 = vadd.f32 %v17013_v10, %v4091_v61  ;;  %v4293_v43 = vsel %vm4142_vm5, %v4237_v38, 0.0  ;;  %v4094_v26 = vadd.f32 %v13652_v32, %v3789_v51  ;;  %v4297_v20 = vsel %vm4142_vm5, %v4239_v54, 0.0 }
 0x439   : > { %v4051_v55 = vpop.f32.mrf.mxu1  ;;  %v4195_v42 = vadd.f32 %v4194_v16, %v4193_v57  ;;  %v4294_v29 = vadd.f32 %v4293_v43, %v4292_v21  ;;  %v4242_v14 = vmul.f32 %v17327_v24, %v17327_v24  ;;  %v4202_v11 = vsel %vm4142_vm5, %v17327_v24, 0.0 }
 0x43a   : > { %v4240_v4 = vmul.f32 %v17318_v52, %v17318_v52  ;;  %v4092_v37 = vadd.f32 %v4051_v55, %v3787_v13  ;;  %v4198_v58 = vsel %vm4142_vm5, %v17318_v52, 0.0  ;;  %v17343_v48 = vadd.f32 %v17013_v10, %v4094_v26 }
 0x43b   : > { %v4296_v28 = vadd.f32 %v4295_v62, %v4294_v29  ;;  %v4197_v36 = vadd.f32 %v4196_v33, %v4195_v42  ;;  %v4303_v51 = vsel %vm4142_vm5, %v4242_v14, 0.0 }
 0x43c   : > { %v17337_v2 = vadd.f32 %v17013_v10, %v4092_v37  ;;  %v4299_v17 = vsel %vm4142_vm5, %v4240_v4, 0.0  ;;  %v4204_v10 = vsel %vm4142_vm5, %v17343_v48, 0.0  ;;  %v4243_v21 = vmul.f32 %v17343_v48, %v17343_v48  ;;  %v20742_v37 = vld [vmem:[#allocation66_spill] sm:$0xff] }
 0x43d   : > { %v4199_v0 = vadd.f32 %v4198_v58, %v4197_v36  ;;  %v4298_v15 = vadd.f32 %v4297_v20, %v4296_v28  ;;  %v17360_v28 = vld [vmem:[#allocation5] sm:$0xff]  ;;  %v20743_v20 = vld [vmem:[#allocation74_spill] sm:$0xff]  ;;  %v20744_v58 = vld [vmem:[#allocation75_spill] sm:$0xff] }
 0x43e   : > { %v4200_v25 = vsel %vm4142_vm5, %v17337_v2, 0.0  ;;  %v4241_v1 = vmul.f32 %v17337_v2, %v17337_v2  ;;  %v4305_v54 = vsel %vm4142_vm5, %v4243_v21, 0.0  ;;  %v17394_v21 = vld [vmem:[%s20750_s5 + $0x28] sm:$0xff]   ;;  %4835 = vst.msk [vmem:[#allocation3 + $0x10] sm:$0x3] %vm4834_vm6, %v17360_v28 }
 0x43f   : > { %v4300_v35 = vadd.f32 %v4299_v17, %v4298_v15  ;;  %v4201_v61 = vadd.f32 %v4200_v25, %v4199_v0  ;;  %v20745_v0 = vld [vmem:[#allocation76_spill] sm:$0xff]  ;;  %v20746_v15 = vld [vmem:[#allocation79_spill] sm:$0xff]  ;;  %4839 = vst.msk [vmem:[#allocation3 + $0x1a8] sm:$0x3] %vm4834_vm6, %v17360_v28  ;;  %8372 = vst.msk [vmem:[#allocation4 + $0x8] sm:$0x3] %vm4834_vm6, %v17360_v28 }
 0x440   : > { %v4301_v23 = vsel %vm4142_vm5, %v4241_v1, 0.0  ;;  %v20747_v25 = vld [vmem:[#allocation80_spill] sm:$0xff]  ;;  %v20748_v1 = vld [vmem:[#allocation83_spill] sm:$0xff]  ;;  %8375 = vst.msk [vmem:[#allocation4 + $0x98] sm:$0x3] %vm4834_vm6, %v17360_v28 }
 0x441   : > { %v4203_v38 = vadd.f32 %v4202_v11, %v4201_v61  ;;  %v4302_v32 = vadd.f32 %v4301_v23, %v4300_v35  ;;  %v20749_v61 = vld [vmem:[#allocation85_spill] sm:$0xff]  ;;  %4841 = vst.msk [vmem:[#allocation3 + $0x18] sm:$0x1] %vm4840_vm7, %v17360_v28  ;;  %4842 = vst.msk [vmem:[#allocation3 + $0x30] sm:$0x1] %vm4840_vm7, %v17360_v28 }
 0x442   : > { %4843 = vst.msk [vmem:[#allocation3 + $0x48] sm:$0x1] %vm4840_vm7, %v17360_v28  ;;  %4844 = vst.msk [vmem:[#allocation3 + $0x60] sm:$0x1] %vm4840_vm7, %v17360_v28 }
 0x443   : > { %v4205_v57 = vadd.f32 %v4204_v10, %v4203_v38  ;;  %v4304_v13 = vadd.f32 %v4303_v51, %v4302_v32  ;;  %v14735_v38 = vld [vmem:[%s20750_s5 + $0x38] sm:$0xff]   ;;  %v14736_v51 = vld [vmem:[%s20750_s5 + $0x30] sm:$0xff]   ;;  %4845 = vst.msk [vmem:[#allocation3 + $0x78] sm:$0x1] %vm4840_vm7, %v17360_v28  ;;  %4846 = vst.msk [vmem:[#allocation3 + $0x90] sm:$0x1] %vm4840_vm7, %v17360_v28 }
 0x444   : > { %v14737_v32 = vld [vmem:[%s20750_s5 + $0x18] sm:$0xff]   ;;  %13691 = vmatprep.subr.bf16.mxu1 %v14735_v38  ;;  %v14738_v10 = vld [vmem:[%s20750_s5 + $0x10] sm:$0xff]   ;;  %4847 = vst.msk [vmem:[#allocation3 + $0xa8] sm:$0x1] %vm4840_vm7, %v17360_v28  ;;  %4848 = vst.msk [vmem:[#allocation3 + $0xc0] sm:$0x1] %vm4840_vm7, %v17360_v28 }
 0x445   : > { %v4206_v16 = vrot.slane %v4205_v57, 4  ;;  %v4306_v55 = vadd.f32 %v4305_v54, %v4304_v13  ;;  %13692 = vmatpush3.bf16.msra.mxu1 %v14735_v38  ;;  %v17404_v13 = vld [vmem:[%s20750_s5 + $0x20] sm:$0xff]   ;;  %v17408_v54 = vld [vmem:[#allocation3] sm:$0xff]  ;;  %4849 = vst.msk [vmem:[#allocation3 + $0xd8] sm:$0x1] %vm4840_vm7, %v17360_v28 }
 0x446   : > { %13693 = vmatprep.subr.bf16.mxu1 %v14736_v51  ;;  %4850 = vst.msk [vmem:[#allocation3 + $0xf0] sm:$0x1] %vm4840_vm7, %v17360_v28  ;;  %4851 = vst.msk [vmem:[#allocation3 + $0x108] sm:$0x1] %vm4840_vm7, %v17360_v28 }
 0x447   : > { %v4207_v43 = vadd.f32 %v4206_v16, %v4205_v57  ;;  %v4307_v29 = vrot.slane %v4306_v55, 4  ;;  %v17399_v57 = vld [vmem:[%s20750_s5 + $0x8] sm:$0xff]   ;;  %4852 = vst.msk [vmem:[#allocation3 + $0x120] sm:$0x1] %vm4840_vm7, %v17360_v28  ;;  %4853 = vst.msk [vmem:[#allocation3 + $0x138] sm:$0x1] %vm4840_vm7, %v17360_v28 }
 0x448   : > { %4854 = vst.msk [vmem:[#allocation3 + $0x150] sm:$0x1] %vm4840_vm7, %v17360_v28  ;;  %4855 = vst.msk [vmem:[#allocation3 + $0x168] sm:$0x1] %vm4840_vm7, %v17360_v28 }
 0x449   : > { %v4208_v62 = vrot.slane %v4207_v43, 2  ;;  %v4308_v26 = vadd.f32 %v4307_v29, %v4306_v55  ;;  %13694 = vmatpush3.bf16.msra.mxu1 %v14736_v51  ;;  %v4874_v55 = vld [vmem:[#allocation3 + $0x8] sm:$0xff]  ;;  %4856 = vst.msk [vmem:[#allocation3 + $0x180] sm:$0x1] %vm4840_vm7, %v17360_v28  ;;  %4857 = vst.msk [vmem:[#allocation3 + $0x29] sm:$0x1] %vm4840_vm7, %v17360_v28 }
 0x44a   : > { %13695 = vmatprep.subr.bf16.mxu1 %v17394_v21  ;;  %4858 = vst.msk [vmem:[#allocation3 + $0x41] sm:$0x1] %vm4840_vm7, %v17360_v28  ;;  %4859 = vst.msk [vmem:[#allocation3 + $0x59] sm:$0x1] %vm4840_vm7, %v17360_v28 }
 0x44b   : > { %v4209_v42 = vadd.f32 %v4208_v62, %v4207_v43  ;;  %v4309_v36 = vrot.slane %v4308_v26, 2  ;;  %v17415_v43 = vld [vmem:[%s20750_s5] sm:$0xff]   ;;  %4860 = vst.msk [vmem:[#allocation3 + $0x71] sm:$0x1] %vm4840_vm7, %v17360_v28  ;;  %4861 = vst.msk [vmem:[#allocation3 + $0x89] sm:$0x1] %vm4840_vm7, %v17360_v28  ;;  %v4905_v62 = vpack.c.bf16 %v4874_v55, %v17408_v54 }
 0x44c   : > { %4862 = vst.msk [vmem:[#allocation3 + $0xa1] sm:$0x1] %vm4840_vm7, %v17360_v28  ;;  %4863 = vst.msk [vmem:[#allocation3 + $0xb9] sm:$0x1] %vm4840_vm7, %v17360_v28 }
 0x44d   : > { %v4210_v33 = vrot.slane %v4209_v42, 1  ;;  %v4310_v14 = vadd.f32 %v4309_v36, %v4308_v26  ;;  %4864 = vst.msk [vmem:[#allocation3 + $0xd1] sm:$0x1] %vm4840_vm7, %v17360_v28  ;;  %4865 = vst.msk [vmem:[#allocation3 + $0xe9] sm:$0x1] %vm4840_vm7, %v17360_v28  ;;  %13696 = vmatpush3.bf16.msra.mxu1 %v17394_v21  ;;  %v4930_v36 = vld [vmem:[#allocation3 + $0x9] sm:$0xff] }
 0x44e   : > { %4866 = vst.msk [vmem:[#allocation3 + $0x101] sm:$0x1] %vm4840_vm7, %v17360_v28  ;;  %4867 = vst.msk [vmem:[#allocation3 + $0x119] sm:$0x1] %vm4840_vm7, %v17360_v28  ;;  %13697 = vmatprep.subr.bf16.mxu1 %v17404_v13 }
 0x44f   : > { %v4211_v4 = vadd.f32 %v4210_v33, %v4209_v42  ;;  %v4311_v17 = vrot.slane %v4310_v14, 1  ;;  %4868 = vst.msk [vmem:[#allocation3 + $0x131] sm:$0x1] %vm4840_vm7, %v17360_v28  ;;  %4869 = vst.msk [vmem:[#allocation3 + $0x149] sm:$0x1] %vm4840_vm7, %v17360_v28 }
 0x450   : > { %4870 = vst.msk [vmem:[#allocation3 + $0x161] sm:$0x1] %vm4840_vm7, %v17360_v28  ;;  %4871 = vst.msk [vmem:[#allocation3 + $0x179] sm:$0x1] %vm4840_vm7, %v17360_v28 }
 0x451   : > { %13670 = vmatmul.mubr.msk.f32.vlgmr.msra.gmra.mxu0 %vm4142_vm5, %v4211_v4  ;;  %v4312_v35 = vadd.f32 %v4311_v17, %v4310_v14  ;;  %4872 = vst.msk [vmem:[#allocation3 + $0x191] sm:$0x1] %vm4840_vm7, %v17360_v28  ;;  %8376 = vst.msk [vmem:[#allocation4 + $0x10] sm:$0x1] %vm4840_vm7, %v17360_v28  ;;  %13698 = vmatpush3.bf16.msra.mxu1 %v17404_v13  ;;  %v17531_v14 = vld [vmem:[%s20750_s5 + $0x58] sm:$0xff]  }
 0x452   : > { %13673 = vmatpush3.msra.mxu0 %v20742_v37  ;;  %13688 = vmatprep.mubr.msk.f32.mxu0 %vm15171_vm2, %v17360_v28  ;;  %8377 = vst.msk [vmem:[#allocation4 + $0x20] sm:$0x1] %vm4840_vm7, %v17360_v28  ;;  %8378 = vst.msk [vmem:[#allocation4 + $0x30] sm:$0x1] %vm4840_vm7, %v17360_v28  ;;  %v4929_v37 = vld [vmem:[#allocation3 + $0x1] sm:$0xff] }
 0x453   : > { %13674 = vmatprep.subr.mxu0 %v17360_v28  ;;  %8379 = vst.msk [vmem:[#allocation4 + $0x40] sm:$0x1] %vm4840_vm7, %v17360_v28  ;;  %8380 = vst.msk [vmem:[#allocation4 + $0x50] sm:$0x1] %vm4840_vm7, %v17360_v28  ;;  %13771 = vmatprep.subr.bf16.mxu1 %v17531_v14  ;;  %v17540_v17 = vld [vmem:[%s20750_s5 + $0x78] sm:$0xff]  }
 0x454   : > { %13675 = vmatpush3.msra.mxu0 %v20743_v20  ;;  %8381 = vst.msk [vmem:[#allocation4 + $0x60] sm:$0x1] %vm4840_vm7, %v17360_v28  ;;  %8382 = vst.msk [vmem:[#allocation4 + $0x70] sm:$0x1] %vm4840_vm7, %v17360_v28  ;;  %v4961_v20 = vpack.c.bf16 %v4930_v36, %v4929_v37 }
 0x455   : > { %13676 = vmatprep.subr.mxu0 %v17360_v28  ;;  %8383 = vst.msk [vmem:[#allocation4 + $0x80] sm:$0x1] %vm4840_vm7, %v17360_v28  ;;  %8384 = vst.msk [vmem:[#allocation4 + $0x19] sm:$0x1] %vm4840_vm7, %v17360_v28 }
 0x456   : > { %13677 = vmatpush3.msra.mxu0 %v20744_v58  ;;  %8385 = vst.msk [vmem:[#allocation4 + $0x29] sm:$0x1] %vm4840_vm7, %v17360_v28  ;;  %8386 = vst.msk [vmem:[#allocation4 + $0x39] sm:$0x1] %vm4840_vm7, %v17360_v28  ;;  %13699 = vmatprep.mubr.msk.bf16.mxu1 %vm4142_vm5, %v4961_v20 }
 0x457   : > { %13678 = vmatprep.subr.mxu0 %v17360_v28  ;;  %8387 = vst.msk [vmem:[#allocation4 + $0x49] sm:$0x1] %vm4840_vm7, %v17360_v28  ;;  %8388 = vst.msk [vmem:[#allocation4 + $0x59] sm:$0x1] %vm4840_vm7, %v17360_v28 }
 0x458   : > { %13679 = vmatpush3.msra.mxu0 %v20745_v0  ;;  %8389 = vst.msk [vmem:[#allocation4 + $0x69] sm:$0x1] %vm4840_vm7, %v17360_v28  ;;  %8390 = vst.msk [vmem:[#allocation4 + $0x79] sm:$0x1] %vm4840_vm7, %v17360_v28 }
 0x459   : > { %13680 = vmatprep.subr.mxu0 %v17360_v28  ;;  %8391 = vst.msk [vmem:[#allocation4 + $0x89] sm:$0x1] %vm4840_vm7, %v17360_v28 }
 0x45a   : > { %13681 = vmatpush3.msra.mxu0 %v20746_v15  ;;  %v4132_v15 = vld [vmem:[%s20494_s7 + $0x1] sm:$0x1] }
 0x45b   : > { %13682 = vmatprep.subr.mxu0 %v17360_v28 }
 0x45c   : > { %13683 = vmatpush3.msra.mxu0 %v20747_v25  ;;  %v20751_v25 = vld [vmem:[#allocation12_spill] sm:$0xff] }
 0x45d   : > { %13684 = vmatprep.subr.mxu0 %v17360_v28 }
 0x45e   : > { %13685 = vmatpush3.msra.mxu0 %v20748_v1 }
 0x45f   : > { %13686 = vmatprep.subr.mxu0 %v17360_v28 }
 0x460   : > { %13687 = vmatpush3.msra.mxu0 %v20749_v61 }
 0x461   : > { %13689 = vmatmul.mubr.msk.f32.vlgmr.msra.gmra.mxu0 %vm4142_vm5, %v4312_v35  ;;  %13731 = vmatprep.subr.bf16.mxu0 %v14737_v32 }
 0x462   : > { %13732 = vmatpush3.bf16.msra.mxu0 %v14737_v32  ;;  %13739 = vmatprep.mubr.msk.bf16.mxu0 %vm4142_vm5, %v4905_v62 }
 0x463   : > { %13733 = vmatprep.subr.bf16.mxu0 %v14738_v10 }
 0x466   : > { %13734 = vmatpush3.bf16.msra.mxu0 %v14738_v10 }
 0x467   : > { %13735 = vmatprep.subr.bf16.mxu0 %v17399_v57 }
 0x46a   : > { %13736 = vmatpush3.bf16.msra.mxu0 %v17399_v57 }
 0x46b   : > { %13737 = vmatprep.subr.bf16.mxu0 %v17415_v43 }
 0x46e   : > { %13738 = vmatpush3.bf16.msra.mxu0 %v17415_v43 }
 0x46f   : > { %13811 = vmatprep.subr.bf16.mxu0 %v17540_v17 }
 0x511   : > { %v4382_v11 = vpop.f32.mrf.mxu0 }
 0x512   : > { %v17406_v16 = vmul.f32 0.00048828125, %v4382_v11 }
 0x513   : > { %v13671_v23 = vpop.f32.mrf.mxu0 }
 0x514   : > { %v4461_v29 = vmul.f32 %v17406_v16, %v17406_v16  ;;  %v17544_v1 = vrot.slane %v17406_v16, %v20751_v25 }
 0x516   : > { %v4470_v61 = vsub.f32 %v17018_v30, %v17544_v1  ;;  %v4471_v11 = vsub.f32 %v17057_v18, %v17544_v1  ;;  %v4472_v23 = vsub.f32 %v17032_v46, %v17544_v1  ;;  %v4473_v38 = vsub.f32 %v17054_v12, %v17544_v1 }
 0x517   : > { %v4474_v51 = vsub.f32 %v17076_v6, %v17544_v1  ;;  %v4475_v10 = vsub.f32 %v17106_v40, %v17544_v1  ;;  %v4476_v30 = vsub.f32 %v17086_v53, %v17544_v1  ;;  %v4477_v18 = vsub.f32 %v17103_v56, %v17544_v1 }
 0x518   : > { %v4478_v46 = vsub.f32 %v17123_v8, %v17544_v1  ;;  %v4479_v12 = vsub.f32 %v17142_v7, %v17544_v1  ;;  %v4480_v21 = vsub.f32 %v17135_v47, %v17544_v1  ;;  %v4481_v6 = vsub.f32 %v17150_v63, %v17544_v1 }
 0x519   : > { %v4482_v40 = vsub.f32 %v17170_v5, %v17544_v1  ;;  %v4483_v53 = vsub.f32 %v17194_v60, %v17544_v1  ;;  %v4484_v56 = vsub.f32 %v17178_v9, %v17544_v1  ;;  %v4485_v8 = vsub.f32 %v17191_v31, %v17544_v1  ;;  %v17590_v5 = vld [vmem:[%s20494_s7 + $0x2] ss:$0 sm:$0xff] }
 0x51a   : > { %v4486_v7 = vsub.f32 %v17208_v27, %v17544_v1  ;;  %v4487_v9 = vsub.f32 %v17233_v22, %v17544_v1  ;;  %v4488_v31 = vsub.f32 %v17217_v19, %v17544_v1  ;;  %v4489_v60 = vsub.f32 %v17230_v59, %v17544_v1 }
 0x51b   : > { %v4490_v13 = vsub.f32 %v17251_v3, %v17544_v1  ;;  %v4491_v16 = vsub.f32 %v17267_v41, %v17544_v1  ;;  %v4492_v54 = vsub.f32 %v17259_v39, %v17544_v1  ;;  %v4493_v22 = vsub.f32 %v17264_v45, %v17544_v1 }
 0x51c   : > { %v4494_v19 = vsub.f32 %v17290_v49, %v17544_v1  ;;  %v4495_v59 = vsub.f32 %v17309_v50, %v17544_v1  ;;  %v4498_v36 = vsub.f32 %v17318_v52, %v17544_v1  ;;  %v4499_v20 = vsub.f32 %v17337_v2, %v17544_v1 }
 0x521   : > { %v4456_v42 = vpop.f32.mrf.mxu0 }
 0x522   : > { %v4460_v33 = vmul.f32 0.00048828125, %v4456_v42 }
 0x523   : > { %v13690_v4 = vpop.f32.mrf.mxu0 }
 0x524   : > { %v4462_v26 = vsub.f32 %v4460_v33, %v4461_v29  ;;  %v4496_v4 = vsub.f32 %v17287_v34, %v17544_v1 }
 0x526   : > { %v4463_v28 = vmax.f32 %v4462_v26, 0.0  ;;  %v4497_v26 = vsub.f32 %v17306_v44, %v17544_v1 }
 0x528   : > { %v4464_v58 = vadd.f32 1e-05, %v4463_v28 }
 0x52a   : > { %14895 = vrsqrt.f32 %v4464_v58 }
 0x537   : > { %v14896_v0 = vpop.eup %14895 }
 0x538   : > { %v4502_v35 = vmul.f32 %v14896_v0, %v4132_v15  ;;  %v4500_v15 = vsub.f32 %v17327_v24, %v17544_v1 }
 0x53a   : > { %v17556_v32 = vrot.slane %v4502_v35, %v20751_v25 }
 0x53c   : > { %v4507_v47 = vmul.f32 %v17556_v32, %v4470_v61  ;;  %v4508_v57 = vmul.f32 %v17556_v32, %v4471_v11  ;;  %v4509_v63 = vmul.f32 %v17556_v32, %v4472_v23  ;;  %v4510_v27 = vmul.f32 %v17556_v32, %v4473_v38 }
 0x53d   : > { %v4511_v43 = vmul.f32 %v17556_v32, %v4474_v51  ;;  %v4512_v55 = vmul.f32 %v17556_v32, %v4475_v10  ;;  %v4513_v62 = vmul.f32 %v17556_v32, %v4476_v30  ;;  %v4514_v37 = vmul.f32 %v17556_v32, %v4477_v18 }
 0x53e   : > { %v17615_v42 = vadd.f32 %v17590_v5, %v4507_v47  ;;  %v17618_v29 = vadd.f32 %v17590_v5, %v4508_v57  ;;  %v17621_v33 = vadd.f32 %v17590_v5, %v4509_v63  ;;  %v17629_v28 = vadd.f32 %v17590_v5, %v4510_v27 }
 0x53f   : > { %v4515_v58 = vmul.f32 %v17556_v32, %v4478_v46  ;;  %v17637_v0 = vadd.f32 %v17590_v5, %v4511_v43  ;;  %v4516_v35 = vmul.f32 %v17556_v32, %v4479_v12  ;;  %v4517_v61 = vmul.f32 %v17556_v32, %v4480_v21 }
 0x540   : > { %v17644_v11 = vadd.f32 %v17590_v5, %v4512_v55  ;;  %v17647_v23 = vadd.f32 %v17590_v5, %v4513_v62  ;;  %v12053_v38 = vmul.f32 -1.442695, %v17615_v42  ;;  %v12054_v51 = vmul.f32 -1.442695, %v17618_v29 }
 0x541   : > { %v12055_v10 = vmul.f32 -1.442695, %v17621_v33  ;;  %v4501_v30 = vsub.f32 %v17343_v48, %v17544_v1  ;;  %v4518_v18 = vmul.f32 %v17556_v32, %v4481_v6  ;;  %v17656_v46 = vadd.f32 %v17590_v5, %v4514_v37 }
 0x542   : > { %v12056_v12 = vmul.f32 -1.442695, %v17629_v28  ;;  %v4519_v21 = vmul.f32 %v17556_v32, %v4482_v40  ;;  %v17661_v47 = vadd.f32 %v17590_v5, %v4515_v58  ;;  %14897 = vpow2.f32 %v12053_v38 }
 0x543   : > { %v12057_v57 = vmul.f32 -1.442695, %v17637_v0  ;;  %v4520_v63 = vmul.f32 %v17556_v32, %v4483_v53  ;;  %v17666_v27 = vadd.f32 %v17590_v5, %v4516_v35  ;;  %14899 = vpow2.f32 %v12054_v51 }
 0x544   : > { %v12058_v6 = vmul.f32 -1.442695, %v17644_v11  ;;  %v4521_v43 = vmul.f32 %v17556_v32, %v4484_v56  ;;  %v17671_v55 = vadd.f32 %v17590_v5, %v4517_v61  ;;  %14901 = vpow2.f32 %v12055_v10 }
 0x545   : > { %v12059_v40 = vmul.f32 -1.442695, %v17647_v23  ;;  %v4522_v62 = vmul.f32 %v17556_v32, %v4485_v8  ;;  %v17676_v37 = vadd.f32 %v17590_v5, %v4518_v18  ;;  %14903 = vpow2.f32 %v12056_v12 }
 0x546   : > { %v12060_v53 = vmul.f32 -1.442695, %v17656_v46  ;;  %v4523_v58 = vmul.f32 %v17556_v32, %v4486_v7  ;;  %v17681_v35 = vadd.f32 %v17590_v5, %v4519_v21  ;;  %14905 = vpow2.f32 %v12057_v57 }
 0x547   : > { %v12061_v56 = vmul.f32 -1.442695, %v17661_v47  ;;  %v4524_v61 = vmul.f32 %v17556_v32, %v4487_v9  ;;  %v17686_v38 = vadd.f32 %v17590_v5, %v4520_v63  ;;  %14907 = vpow2.f32 %v12058_v6 }
 0x548   : > { %v12062_v8 = vmul.f32 -1.442695, %v17666_v27  ;;  %v4525_v51 = vmul.f32 %v17556_v32, %v4488_v31  ;;  %v17691_v10 = vadd.f32 %v17590_v5, %v4521_v43  ;;  %14909 = vpow2.f32 %v12059_v40 }
 0x549   : > { %v12063_v7 = vmul.f32 -1.442695, %v17671_v55  ;;  %v4526_v18 = vmul.f32 %v17556_v32, %v4489_v60  ;;  %v17696_v12 = vadd.f32 %v17590_v5, %v4522_v62  ;;  %14911 = vpow2.f32 %v12060_v53 }
 0x54a   : > { %v12064_v9 = vmul.f32 -1.442695, %v17676_v37  ;;  %v4527_v21 = vmul.f32 %v17556_v32, %v4490_v13  ;;  %v17704_v31 = vadd.f32 %v17590_v5, %v4523_v58  ;;  %14913 = vpow2.f32 %v12061_v56 }
 0x54b   : > { %v12065_v57 = vmul.f32 -1.442695, %v17681_v35  ;;  %v4528_v60 = vmul.f32 %v17556_v32, %v4491_v16  ;;  %v17712_v63 = vadd.f32 %v17590_v5, %v4524_v61  ;;  %14915 = vpow2.f32 %v12062_v8 }
 0x54c   : > { %v12066_v6 = vmul.f32 -1.442695, %v17686_v38  ;;  %v4529_v3 = vmul.f32 %v17556_v32, %v4492_v54  ;;  %v17720_v13 = vadd.f32 %v17590_v5, %v4525_v51  ;;  %14917 = vpow2.f32 %v12063_v7 }
 0x54d   : > { %v12067_v43 = vmul.f32 -1.442695, %v17691_v10  ;;  %v4530_v41 = vmul.f32 %v17556_v32, %v4493_v22  ;;  %v17728_v16 = vadd.f32 %v17590_v5, %v4526_v18  ;;  %14919 = vpow2.f32 %v12064_v9 }
 0x54e   : > { %v12068_v40 = vmul.f32 -1.442695, %v17696_v12  ;;  %v4531_v39 = vmul.f32 %v17556_v32, %v4494_v19  ;;  %v17736_v54 = vadd.f32 %v17590_v5, %v4527_v21  ;;  %14921 = vpow2.f32 %v12065_v57 }
 0x54f   : > { %v12069_v62 = vmul.f32 -1.442695, %v17704_v31  ;;  %v17739_v45 = vpop.eup %14897  ;;  %v4532_v22 = vmul.f32 %v17556_v32, %v4495_v59  ;;  %v17746_v53 = vadd.f32 %v17590_v5, %v4528_v60  ;;  %14923 = vpow2.f32 %v12066_v6 }
 0x550   : > { %v12070_v49 = vmul.f32 -1.442695, %v17712_v63  ;;  %v14900_v19 = vpop.eup %14899  ;;  %v4533_v58 = vmul.f32 %v17556_v32, %v4496_v4  ;;  %v17754_v56 = vadd.f32 %v17590_v5, %v4529_v3  ;;  %14925 = vpow2.f32 %v12067_v43 }
 0x551   : > { %v12071_v50 = vmul.f32 -1.442695, %v17720_v13  ;;  %v14902_v61 = vpop.eup %14901  ;;  %v4534_v59 = vmul.f32 %v17556_v32, %v4497_v26  ;;  %v17762_v8 = vadd.f32 %v17590_v5, %v4530_v41  ;;  %14927 = vpow2.f32 %v12068_v40 }
 0x552   : > { %v12072_v34 = vmul.f32 -1.442695, %v17728_v16  ;;  %v14904_v51 = vpop.eup %14903  ;;  %v4535_v4 = vmul.f32 %v17556_v32, %v4498_v36  ;;  %v17770_v7 = vadd.f32 %v17590_v5, %v4531_v39  ;;  %14929 = vpow2.f32 %v12069_v62 }
 0x553   : > { %v12073_v44 = vmul.f32 -1.442695, %v17736_v54  ;;  %v14906_v18 = vpop.eup %14905  ;;  %v4536_v26 = vmul.f32 %v17556_v32, %v4499_v20  ;;  %v17778_v9 = vadd.f32 %v17590_v5, %v4532_v22  ;;  %14931 = vpow2.f32 %v12070_v49 }
 0x554   : > { %v12074_v52 = vmul.f32 -1.442695, %v17746_v53  ;;  %v14908_v21 = vpop.eup %14907  ;;  %v4537_v36 = vmul.f32 %v17556_v32, %v4500_v15  ;;  %v17786_v57 = vadd.f32 %v17590_v5, %v4533_v58  ;;  %14933 = vpow2.f32 %v12071_v50 }
 0x555   : > { %v12075_v2 = vmul.f32 -1.442695, %v17754_v56  ;;  %v14910_v60 = vpop.eup %14909  ;;  %v4538_v20 = vmul.f32 %v17556_v32, %v4501_v30  ;;  %v17794_v6 = vadd.f32 %v17590_v5, %v4534_v59  ;;  %14935 = vpow2.f32 %v12072_v34 }
 0x556   : > { %v12076_v24 = vmul.f32 -1.442695, %v17762_v8  ;;  %v14912_v3 = vpop.eup %14911  ;;  %v17798_v15 = vadd.f32 %v17590_v5, %v4535_v4  ;;  %14937 = vpow2.f32 %v12073_v44  ;;  %v12077_v43 = vmul.f32 -1.442695, %v17770_v7 }
 0x557   : > { %v14914_v41 = vpop.eup %14913  ;;  %v17802_v40 = vadd.f32 %v17590_v5, %v4536_v26  ;;  %14939 = vpow2.f32 %v12074_v52  ;;  %v12078_v48 = vmul.f32 -1.442695, %v17778_v9  ;;  %v17806_v32 = vadd.f32 %v17590_v5, %v4537_v36 }
 0x558   : > { %v14916_v1 = vpop.eup %14915  ;;  %14941 = vpow2.f32 %v12075_v2  ;;  %v12079_v30 = vmul.f32 -1.442695, %v17786_v57  ;;  %v17810_v62 = vadd.f32 %v17590_v5, %v4538_v20  ;;  %v12080_v22 = vmul.f32 -1.442695, %v17794_v6 }
 0x559   : > { %20752 = vst [vmem:[#allocation45_spill] sm:$0xff] %v17802_v40  ;;  %20753 = vst [vmem:[#allocation46_spill] sm:$0xff] %v17806_v32  ;;  %v14918_v39 = vpop.eup %14917  ;;  %14943 = vpow2.f32 %v12076_v24  ;;  %v12081_v58 = vmul.f32 -1.442695, %v17798_v15  ;;  %v12082_v59 = vmul.f32 -1.442695, %v17802_v40 }
 0x55a   : > { %20754 = vst [vmem:[#allocation47_spill] sm:$0xff] %v17810_v62  ;;  %v14920_v49 = vpop.eup %14919  ;;  %14945 = vpow2.f32 %v12077_v43  ;;  %v12083_v4 = vmul.f32 -1.442695, %v17806_v32  ;;  %v12084_v5 = vmul.f32 -1.442695, %v17810_v62  ;;  %v4671_v52 = vadd.f32 1.0, %v17739_v45 }
 0x55b   : > { %v14922_v50 = vpop.eup %14921  ;;  %14947 = vpow2.f32 %v12078_v48  ;;  %v4672_v2 = vadd.f32 1.0, %v14900_v19  ;;  %v4673_v24 = vadd.f32 1.0, %v14902_v61  ;;  %v4674_v48 = vadd.f32 1.0, %v14904_v51 }
 0x55c   : > { %v14924_v34 = vpop.eup %14923  ;;  %14949 = vpow2.f32 %v12079_v30  ;;  %v4675_v25 = vadd.f32 1.0, %v14906_v18  ;;  %v4677_v40 = vadd.f32 1.0, %v14910_v60  ;;  %v4678_v45 = vadd.f32 1.0, %v14912_v3 }
 0x55d   : > { %v14926_v44 = vpop.eup %14925  ;;  %14951 = vpow2.f32 %v12080_v22  ;;  %v4676_v22 = vadd.f32 1.0, %v14908_v21  ;;  %v4679_v19 = vadd.f32 1.0, %v14914_v41  ;;  %v4680_v61 = vadd.f32 1.0, %v14916_v1 }
 0x55e   : > { %v14928_v26 = vpop.eup %14927  ;;  %14953 = vpow2.f32 %v12081_v58  ;;  %v4681_v51 = vadd.f32 1.0, %v14918_v39  ;;  %v4685_v41 = vadd.f32 1.0, %v14926_v44 }
 0x55f   : > { %v14930_v36 = vpop.eup %14929  ;;  %14955 = vpow2.f32 %v12082_v59  ;;  %v4686_v1 = vadd.f32 1.0, %v14928_v26 }
 0x560   : > { %v14932_v20 = vpop.eup %14931  ;;  %14957 = vpow2.f32 %v12083_v4 }
 0x561   : > { %v14934_v43 = vpop.eup %14933  ;;  %14959 = vpow2.f32 %v12084_v5 }
 0x562   : > { %v14936_v30 = vpop.eup %14935  ;;  %14961 = vrcp.f32 %v4671_v52  ;;  %v4682_v52 = vadd.f32 1.0, %v14920_v49 }
 0x563   : > { %v14938_v32 = vpop.eup %14937  ;;  %14963 = vrcp.f32 %v4672_v2  ;;  %v4683_v2 = vadd.f32 1.0, %v14922_v50 }
 0x564   : > { %v14940_v62 = vpop.eup %14939  ;;  %14965 = vrcp.f32 %v4673_v24  ;;  %v4684_v24 = vadd.f32 1.0, %v14924_v34  ;;  %v4691_v26 = vadd.f32 1.0, %v14938_v32 }
 0x565   : > { %v14942_v58 = vpop.eup %14941  ;;  %14967 = vrcp.f32 %v4674_v48  ;;  %v4688_v48 = vadd.f32 1.0, %v14932_v20  ;;  %v4692_v20 = vadd.f32 1.0, %v14940_v62 }
 0x566   : > { %v14944_v59 = vpop.eup %14943  ;;  %14969 = vrcp.f32 %v4675_v25 }
 0x567   : > { %v14946_v4 = vpop.eup %14945  ;;  %14971 = vrcp.f32 %v4676_v22  ;;  %v4689_v22 = vadd.f32 1.0, %v14934_v43  ;;  %v4694_v32 = vadd.f32 1.0, %v14944_v59 }
 0x568   : > { %v14948_v5 = vpop.eup %14947  ;;  %14973 = vrcp.f32 %v4677_v40  ;;  %v4687_v40 = vadd.f32 1.0, %v14930_v36 }
 0x569   : > { %v14950_v18 = vpop.eup %14949  ;;  %14975 = vrcp.f32 %v4678_v45 }
 0x56a   : > { %v14952_v21 = vpop.eup %14951  ;;  %14977 = vrcp.f32 %v4679_v19  ;;  %v4690_v19 = vadd.f32 1.0, %v14936_v30 }
 0x56b   : > { %v17818_v60 = vpop.eup %14953  ;;  %14979 = vrcp.f32 %v4680_v61 }
 0x56c   : > { %v17820_v3 = vpop.eup %14955  ;;  %14981 = vrcp.f32 %v4681_v51 }
 0x56d   : > { %v17822_v25 = vpop.eup %14957  ;;  %14983 = vrcp.f32 %v4682_v52  ;;  %v4693_v52 = vadd.f32 1.0, %v14942_v58 }
 0x56e   : > { %v17824_v39 = vpop.eup %14959  ;;  %14985 = vrcp.f32 %v4683_v2  ;;  %v4695_v2 = vadd.f32 1.0, %v14946_v4 }
 0x56f   : > { %v14962_v49 = vpop.eup %14961  ;;  %14987 = vrcp.f32 %v4684_v24  ;;  %v4696_v24 = vadd.f32 1.0, %v14948_v5 }
 0x570   : > { %v14964_v50 = vpop.eup %14963  ;;  %14989 = vrcp.f32 %v4685_v41  ;;  %v4767_v34 = vmul.f32 %v14962_v49, %v17615_v42  ;;  %v4697_v41 = vadd.f32 1.0, %v14950_v18 }
 0x571   : > { %v14966_v45 = vpop.eup %14965  ;;  %14991 = vrcp.f32 %v4686_v1  ;;  %v4768_v44 = vmul.f32 %v14964_v50, %v17618_v29  ;;  %v4698_v1 = vadd.f32 1.0, %v14952_v21 }
 0x572   : > { %v14968_v61 = vpop.eup %14967  ;;  %14993 = vrcp.f32 %v4687_v40  ;;  %v4769_v51 = vmul.f32 %v14966_v45, %v17621_v33  ;;  %4800 = vst.msk [vmem:[#allocation3 + $0x19] sm:$0xff] %vm4142_vm5, %v4767_v34 }
 0x573   : > { %v14970_v36 = vpop.eup %14969  ;;  %14995 = vrcp.f32 %v4688_v48  ;;  %v4770_v43 = vmul.f32 %v14968_v61, %v17629_v28  ;;  %4801 = vst.msk [vmem:[#allocation3 + $0x21] sm:$0xff] %vm4142_vm5, %v4768_v44  ;;  %v4700_v48 = vadd.f32 1.0, %v17820_v3  ;;  %v4702_v44 = vadd.f32 1.0, %v17824_v39 }
 0x574   : > { %v14972_v42 = vpop.eup %14971  ;;  %14997 = vrcp.f32 %v4689_v22  ;;  %v4771_v30 = vmul.f32 %v14970_v36, %v17637_v0  ;;  %4802 = vst.msk [vmem:[#allocation3 + $0x31] sm:$0xff] %vm4142_vm5, %v4769_v51  ;;  %v14746_v51 = vld [vmem:[%s20750_s5 + $0x70] sm:$0xff]  }
 0x575   : > { %v14974_v29 = vpop.eup %14973  ;;  %14999 = vrcp.f32 %v4690_v19  ;;  %v4772_v33 = vmul.f32 %v14972_v42, %v17644_v11  ;;  %4803 = vst.msk [vmem:[#allocation3 + $0x39] sm:$0xff] %vm4142_vm5, %v4770_v43  ;;  %v4701_v19 = vadd.f32 1.0, %v17822_v25 }
 0x576   : > { %v14976_v62 = vpop.eup %14975  ;;  %15001 = vrcp.f32 %v4691_v26  ;;  %v4773_v28 = vmul.f32 %v14974_v29, %v17647_v23  ;;  %4804 = vst.msk [vmem:[#allocation3 + $0x49] sm:$0xff] %vm4142_vm5, %v4771_v30 }
 0x577   : > { %v14978_v58 = vpop.eup %14977  ;;  %15003 = vrcp.f32 %v4692_v20  ;;  %v4774_v0 = vmul.f32 %v14976_v62, %v17656_v46  ;;  %4805 = vst.msk [vmem:[#allocation3 + $0x51] sm:$0xff] %vm4142_vm5, %v4772_v33  ;;  %v4699_v46 = vadd.f32 1.0, %v17818_v60 }
 0x578   : > { %v14980_v59 = vpop.eup %14979  ;;  %15005 = vrcp.f32 %v4693_v52  ;;  %v4775_v11 = vmul.f32 %v14978_v58, %v17661_v47  ;;  %4806 = vst.msk [vmem:[#allocation3 + $0x61] sm:$0xff] %vm4142_vm5, %v4773_v28 }
 0x579   : > { %v14982_v4 = vpop.eup %14981  ;;  %15007 = vrcp.f32 %v4694_v32  ;;  %v4776_v23 = vmul.f32 %v14980_v59, %v17666_v27  ;;  %4807 = vst.msk [vmem:[#allocation3 + $0x69] sm:$0xff] %vm4142_vm5, %v4774_v0  ;;  %v4931_v5 = vld [vmem:[#allocation3 + $0x19] sm:$0xff] }
 0x57a   : > { %v4875_v40 = vld [vmem:[#allocation3 + $0x18] sm:$0xff]  ;;  %v14984_v49 = vpop.eup %14983  ;;  %15009 = vrcp.f32 %v4695_v2  ;;  %v4777_v18 = vmul.f32 %v14982_v4, %v17671_v55  ;;  %4808 = vst.msk [vmem:[#allocation3 + $0x79] sm:$0xff] %vm4142_vm5, %v4775_v11  ;;  %v4932_v47 = vld [vmem:[#allocation3 + $0x21] sm:$0xff] }
 0x57b   : > { %v4876_v50 = vld [vmem:[#allocation3 + $0x20] sm:$0xff]  ;;  %v14986_v21 = vpop.eup %14985  ;;  %15011 = vrcp.f32 %v4696_v24  ;;  %v4778_v27 = vmul.f32 %v14984_v49, %v17676_v37  ;;  %4809 = vst.msk [vmem:[#allocation3 + $0x81] sm:$0xff] %vm4142_vm5, %v4776_v23  ;;  %v17850_v22 = vpack.c.bf16 %v4932_v47, %v4931_v5  ;;  %v4933_v60 = vld [vmem:[#allocation3 + $0x31] sm:$0xff] }
 0x57c   : > { %v17852_v34 = vpack.c.bf16 %v4876_v50, %v4875_v40  ;;  %v4877_v45 = vld [vmem:[#allocation3 + $0x30] sm:$0xff]  ;;  %v14744_v55 = vld [vmem:[%s20750_s5 + $0x50] sm:$0xff]   ;;  %v14988_v3 = vpop.eup %14987  ;;  %15013 = vrcp.f32 %v4697_v41  ;;  %v4779_v37 = vmul.f32 %v14986_v21, %v17681_v35  ;;  %4810 = vst.msk [vmem:[#allocation3 + $0x91] sm:$0xff] %vm4142_vm5, %v4777_v18  ;;  %v4878_v26 = vld [vmem:[#allocation3 + $0x38] sm:$0xff] }
 0x57d   : > { %v4934_v61 = vld [vmem:[#allocation3 + $0x39] sm:$0xff]  ;;  %v14990_v36 = vpop.eup %14989  ;;  %15015 = vrcp.f32 %v4698_v1  ;;  %v4780_v20 = vmul.f32 %v14988_v3, %v17686_v38  ;;  %4811 = vst.msk [vmem:[#allocation3 + $0x99] sm:$0xff] %vm4142_vm5, %v4778_v27  ;;  %13700 = vmatmul.mubr.msk.bf16.vlgmr.msra.gmra.mxu1 %vm4142_vm5, %v17850_v22  ;;  %v17872_v25 = vpack.c.bf16 %v4878_v26, %v4877_v45  ;;  %v14750_v5 = vld [vmem:[%s20750_s5 + $0x60] sm:$0xff]   ;;  %v17936_v50 = vld [vmem:[%s20750_s5 + $0xb8] sm:$0xff]  }
 0x57e   : > { %13740 = vmatmul.mubr.msk.bf16.vlgmr.msra.gmra.mxu0 %vm4142_vm5, %v17852_v34  ;;  %v17870_v35 = vpack.c.bf16 %v4934_v61, %v4933_v60  ;;  %v14992_v39 = vpop.eup %14991  ;;  %15017 = vrcp.f32 %v4699_v46  ;;  %v4781_v43 = vmul.f32 %v14990_v36, %v17691_v10  ;;  %4812 = vst.msk [vmem:[#allocation3 + $0xa9] sm:$0xff] %vm4142_vm5, %v4779_v37  ;;  %13772 = vmatpush3.bf16.msra.mxu1 %v17531_v14  ;;  %v14747_v38 = vld [vmem:[%s20750_s5 + $0x48] sm:$0xff]   ;;  %v4935_v10 = vld [vmem:[#allocation3 + $0x49] sm:$0xff] }
 0x57f   : > { %13812 = vmatpush3.bf16.msra.mxu0 %v17540_v17  ;;  %v14994_v42 = vpop.eup %14993  ;;  %15019 = vrcp.f32 %v4700_v48  ;;  %v4782_v52 = vmul.f32 %v14992_v39, %v17696_v12  ;;  %4813 = vst.msk [vmem:[#allocation3 + $0xb1] sm:$0xff] %vm4142_vm5, %v4780_v20  ;;  %13743 = vmatprep.mubr.msk.bf16.mxu0 %vm4142_vm5, %v17872_v25  ;;  %v4879_v14 = vld [vmem:[#allocation3 + $0x48] sm:$0xff]  ;;  %v14748_v17 = vld [vmem:[%s20750_s5 + $0x68] sm:$0xff]   ;;  %v4880_v32 = vld [vmem:[#allocation3 + $0x50] sm:$0xff] }
 0x580   : > { %13703 = vmatprep.mubr.msk.bf16.mxu1 %vm4142_vm5, %v17870_v35  ;;  %v14996_v30 = vpop.eup %14995  ;;  %15021 = vrcp.f32 %v4701_v19  ;;  %v4783_v29 = vmul.f32 %v14994_v42, %v17704_v31  ;;  %4814 = vst.msk [vmem:[#allocation3 + $0xc1] sm:$0xff] %vm4142_vm5, %v4781_v43  ;;  %v4936_v12 = vld [vmem:[#allocation3 + $0x51] sm:$0xff]  ;;  %v4937_v33 = vld [vmem:[#allocation3 + $0x61] sm:$0xff]  ;;  %13773 = vmatprep.subr.bf16.mxu1 %v14744_v55  ;;  %v4938_v28 = vld [vmem:[#allocation3 + $0x69] sm:$0xff] }
 0x581   : > { %13813 = vmatprep.subr.bf16.mxu0 %v14746_v51  ;;  %v14998_v62 = vpop.eup %14997  ;;  %15023 = vrcp.f32 %v4702_v44  ;;  %v4784_v2 = vmul.f32 %v14996_v30, %v17712_v63  ;;  %4815 = vst.msk [vmem:[#allocation3 + $0xc9] sm:$0xff] %vm4142_vm5, %v4782_v52  ;;  %v4881_v58 = vld [vmem:[#allocation3 + $0x60] sm:$0xff]  ;;  %v4882_v24 = vld [vmem:[#allocation3 + $0x68] sm:$0xff]  ;;  %v17898_v11 = vpack.c.bf16 %v4936_v12, %v4935_v10  ;;  %v17900_v63 = vpack.c.bf16 %v4880_v32, %v4879_v14 }
 0x582   : > { %v15000_v0 = vpop.eup %14999  ;;  %v4785_v59 = vmul.f32 %v14998_v62, %v17720_v13  ;;  %4816 = vst.msk [vmem:[#allocation3 + $0xd9] sm:$0xff] %vm4142_vm5, %v4783_v29  ;;  %13774 = vmatpush3.bf16.msra.mxu1 %v14744_v55  ;;  %v17904_v13 = vpack.c.bf16 %v4938_v28, %v4937_v33  ;;  %v17906_v23 = vpack.c.bf16 %v4882_v24, %v4881_v58  ;;  %v4939_v47 = vld [vmem:[#allocation3 + $0x79] sm:$0xff]  ;;  %v4940_v60 = vld [vmem:[#allocation3 + $0x81] sm:$0xff] }
 0x583   : > { %13814 = vmatpush3.bf16.msra.mxu0 %v14746_v51  ;;  %v15002_v31 = vpop.eup %15001  ;;  %v4786_v41 = vmul.f32 %v15000_v0, %v17728_v16  ;;  %4817 = vst.msk [vmem:[#allocation3 + $0xe1] sm:$0xff] %vm4142_vm5, %v4784_v2  ;;  %13775 = vmatprep.subr.bf16.mxu1 %v14747_v38  ;;  %v14749_v16 = vld [vmem:[%s20750_s5 + $0x40] sm:$0xff]   ;;  %v4884_v45 = vld [vmem:[#allocation3 + $0x80] sm:$0xff]  ;;  %v17946_v36 = vpack.c.bf16 %v4940_v60, %v4939_v47  ;;  %v20757_v14 = vld [vmem:[#allocation47_spill] sm:$0xff] }
 0x584   : > { %13815 = vmatprep.subr.bf16.mxu0 %v14748_v17  ;;  %v15004_v4 = vpop.eup %15003  ;;  %v4787_v1 = vmul.f32 %v15002_v31, %v17736_v54  ;;  %4818 = vst.msk [vmem:[#allocation3 + $0xf1] sm:$0xff] %vm4142_vm5, %v4785_v59  ;;  %v4941_v55 = vld [vmem:[#allocation3 + $0x91] sm:$0xff]  ;;  %v4942_v19 = vld [vmem:[#allocation3 + $0x99] sm:$0xff] }
 0x585   : > { %v15006_v40 = vpop.eup %15005  ;;  %v4788_v49 = vmul.f32 %v15004_v4, %v17746_v53  ;;  %4819 = vst.msk [vmem:[#allocation3 + $0xf9] sm:$0xff] %vm4142_vm5, %v4786_v41  ;;  %13704 = vmatmul.mubr.msk.bf16.gmra.mxu1 %vm4142_vm5, %v17898_v11  ;;  %v17929_v53 = vld [vmem:[%s20750_s5 + $0x98] sm:$0xff]   ;;  %v4885_v44 = vld [vmem:[#allocation3 + $0x90] sm:$0xff]  ;;  %v4886_v37 = vld [vmem:[#allocation3 + $0x98] sm:$0xff]  ;;  %v17952_v43 = vpack.c.bf16 %v4942_v19, %v4941_v55 }
 0x586   : > { %13744 = vmatmul.mubr.msk.bf16.gmra.mxu0 %vm4142_vm5, %v17900_v63  ;;  %v15008_v54 = vpop.eup %15007  ;;  %v4789_v46 = vmul.f32 %v15006_v40, %v17754_v56  ;;  %4820 = vst.msk [vmem:[#allocation3 + $0x109] sm:$0xff] %vm4142_vm5, %v4787_v1  ;;  %13707 = vmatprep.mubr.msk.bf16.mxu1 %vm4142_vm5, %v17904_v13  ;;  %v4883_v56 = vld [vmem:[#allocation3 + $0x78] sm:$0xff]  ;;  %v20756_v52 = vld [vmem:[#allocation46_spill] sm:$0xff]  ;;  %v4943_v30 = vld [vmem:[#allocation3 + $0xa9] sm:$0xff] }
 0x587   : > { %13747 = vmatprep.mubr.msk.bf16.mxu0 %vm4142_vm5, %v17906_v23  ;;  %v15010_v48 = vpop.eup %15009  ;;  %v4790_v18 = vmul.f32 %v15008_v54, %v17762_v8  ;;  %4821 = vst.msk [vmem:[#allocation3 + $0x111] sm:$0xff] %vm4142_vm5, %v4788_v49  ;;  %13776 = vmatpush3.bf16.msra.mxu1 %v14747_v38  ;;  %v17948_v20 = vpack.c.bf16 %v4884_v45, %v4883_v56  ;;  %v20755_v38 = vld [vmem:[#allocation45_spill] sm:$0xff]  ;;  %v4887_v29 = vld [vmem:[#allocation3 + $0xa8] sm:$0xff]  ;;  %v4888_v32 = vld [vmem:[#allocation3 + $0xb0] sm:$0xff] }
 0x588   : > { %13816 = vmatpush3.bf16.msra.mxu0 %v14748_v17  ;;  %v15012_v21 = vpop.eup %15011  ;;  %v4791_v27 = vmul.f32 %v15010_v48, %v17770_v7  ;;  %4822 = vst.msk [vmem:[#allocation3 + $0x121] sm:$0xff] %vm4142_vm5, %v4789_v46  ;;  %13777 = vmatprep.subr.bf16.mxu1 %v14749_v16  ;;  %v4944_v12 = vld [vmem:[#allocation3 + $0xb1] sm:$0xff]  ;;  %v4945_v33 = vld [vmem:[#allocation3 + $0xc1] sm:$0xff]  ;;  %v4946_v62 = vld [vmem:[#allocation3 + $0xc9] sm:$0xff]  ;;  %v17976_v24 = vpack.c.bf16 %v4888_v32, %v4887_v29 }
 0x589   : > { %13817 = vmatprep.subr.bf16.mxu0 %v14750_v5  ;;  %v15014_v8 = vpop.eup %15013  ;;  %v4792_v3 = vmul.f32 %v15012_v21, %v17778_v9  ;;  %4823 = vst.msk [vmem:[#allocation3 + $0x129] sm:$0xff] %vm4142_vm5, %v4790_v18  ;;  %v4889_v2 = vld [vmem:[#allocation3 + $0xc0] sm:$0xff]  ;;  %v4890_v28 = vld [vmem:[#allocation3 + $0xc8] sm:$0xff]  ;;  %v17974_v58 = vpack.c.bf16 %v4944_v12, %v4943_v30  ;;  %v17978_v0 = vpack.c.bf16 %v4946_v62, %v4945_v33  ;;  %v4891_v41 = vld [vmem:[#allocation3 + $0xd8] sm:$0xff] }
 0x58a   : > { %v15016_v61 = vpop.eup %15015  ;;  %v4793_v26 = vmul.f32 %v15014_v8, %v17786_v57  ;;  %4824 = vst.msk [vmem:[#allocation3 + $0x139] sm:$0xff] %vm4142_vm5, %v4791_v27  ;;  %v17954_v57 = vpack.c.bf16 %v4886_v37, %v4885_v44  ;;  %v17980_v59 = vpack.c.bf16 %v4890_v28, %v4889_v2  ;;  %v4947_v31 = vld [vmem:[#allocation3 + $0xd9] sm:$0xff]  ;;  %v4948_v4 = vld [vmem:[#allocation3 + $0xe1] sm:$0xff]  ;;  %v5452_v30 = vld [vmem:[#allocation3 + $0xa] sm:$0xff] }
 0x58b   : > { %v15018_v7 = vpop.eup %15017  ;;  %v4794_v51 = vmul.f32 %v15016_v61, %v17794_v6  ;;  %4825 = vst.msk [vmem:[#allocation3 + $0x141] sm:$0xff] %vm4142_vm5, %v4792_v3  ;;  %13778 = vmatpush3.bf16.msra.mxu1 %v14749_v16  ;;  %v4892_v1 = vld [vmem:[#allocation3 + $0xe0] sm:$0xff]  ;;  %v4949_v16 = vld [vmem:[#allocation3 + $0xf1] sm:$0xff]  ;;  %v17990_v54 = vpack.c.bf16 %v4948_v4, %v4947_v31 }
 0x58c   : > { %13818 = vmatpush3.bf16.msra.mxu0 %v14750_v5  ;;  %v15020_v9 = vpop.eup %15019  ;;  %v4795_v39 = vmul.f32 %v15018_v7, %v17798_v15  ;;  %4826 = vst.msk [vmem:[#allocation3 + $0x151] sm:$0xff] %vm4142_vm5, %v4793_v26  ;;  %13851 = vmatprep.subr.bf16.mxu1 %v17929_v53  ;;  %v4950_v5 = vld [vmem:[#allocation3 + $0xf9] sm:$0xff]  ;;  %v4893_v40 = vld [vmem:[#allocation3 + $0xf0] sm:$0xff]  ;;  %v17992_v46 = vpack.c.bf16 %v4892_v1, %v4891_v41  ;;  %v5454_v31 = vld [vmem:[#allocation3 + $0x22] sm:$0xff] }
 0x58d   : > { %13891 = vmatprep.subr.bf16.mxu0 %v17936_v50  ;;  %v15022_v6 = vpop.eup %15021  ;;  %v4796_v42 = vmul.f32 %v15020_v9, %v20755_v38  ;;  %4827 = vst.msk [vmem:[#allocation3 + $0x159] sm:$0xff] %vm4142_vm5, %v4794_v51  ;;  %13708 = vmatmul.mubr.msk.bf16.gmra.mxu1 %vm4142_vm5, %v17946_v36  ;;  %v4894_v49 = vld [vmem:[#allocation3 + $0xf8] sm:$0xff]  ;;  %v17994_v48 = vpack.c.bf16 %v4950_v5, %v4949_v16  ;;  %v4951_v47 = vld [vmem:[#allocation3 + $0x109] sm:$0xff]  ;;  %v14752_v5 = vld [vmem:[%s20750_s5 + $0x90] sm:$0xff]  }
 0x58e   : > { %13748 = vmatmul.mubr.msk.bf16.gmra.mxu0 %vm4142_vm5, %v17948_v20  ;;  %v15024_v15 = vpop.eup %15023  ;;  %v4797_v10 = vmul.f32 %v15022_v6, %v20756_v52  ;;  %4828 = vst.msk [vmem:[#allocation3 + $0x169] sm:$0xff] %vm4142_vm5, %v4795_v39  ;;  %13711 = vmatprep.mubr.msk.bf16.mxu1 %vm4142_vm5, %v17952_v43  ;;  %v17996_v18 = vpack.c.bf16 %v4894_v49, %v4893_v40  ;;  %v4895_v56 = vld [vmem:[#allocation3 + $0x108] sm:$0xff]  ;;  %v4952_v21 = vld [vmem:[#allocation3 + $0x111] sm:$0xff]  ;;  %v5453_v28 = vld [vmem:[#allocation3 + $0x1a] sm:$0xff] }
 0x58f   : > { %13751 = vmatprep.mubr.msk.bf16.mxu0 %vm4142_vm5, %v17954_v57  ;;  %v4798_v17 = vmul.f32 %v15024_v15, %v20757_v14  ;;  %4829 = vst.msk [vmem:[#allocation3 + $0x171] sm:$0xff] %vm4142_vm5, %v4796_v42  ;;  %v4896_v27 = vld [vmem:[#allocation3 + $0x110] sm:$0xff]  ;;  %v4953_v60 = vld [vmem:[#allocation3 + $0x121] sm:$0xff]  ;;  %v18006_v3 = vpack.c.bf16 %v4952_v21, %v4951_v47  ;;  %v18049_v1 = vpack.c.bf16 %v5454_v31, %v5453_v28 }
 0x590   : > { %4830 = vst.msk [vmem:[#allocation3 + $0x181] sm:$0xff] %vm4142_vm5, %v4797_v10  ;;  %v4954_v45 = vld [vmem:[#allocation3 + $0x129] sm:$0xff]  ;;  %v4897_v55 = vld [vmem:[#allocation3 + $0x120] sm:$0xff]  ;;  %v18008_v19 = vpack.c.bf16 %v4896_v27, %v4895_v56  ;;  %v5455_v41 = vld [vmem:[#allocation3 + $0x32] sm:$0xff] }
 0x591   : > { %4831 = vst.msk [vmem:[#allocation3 + $0x189] sm:$0xff] %vm4142_vm5, %v4798_v17  ;;  %v4898_v8 = vld [vmem:[#allocation3 + $0x128] sm:$0xff]  ;;  %v18010_v44 = vpack.c.bf16 %v4954_v45, %v4953_v60  ;;  %v4955_v61 = vld [vmem:[#allocation3 + $0x139] sm:$0xff]  ;;  %v14758_v45 = vld [vmem:[%s20750_s5 + $0xa0] sm:$0xff]  }
 0x592   : > { %v18012_v37 = vpack.c.bf16 %v4898_v8, %v4897_v55  ;;  %v4899_v26 = vld [vmem:[#allocation3 + $0x138] sm:$0xff]  ;;  %v4956_v7 = vld [vmem:[#allocation3 + $0x141] sm:$0xff]  ;;  %v5457_v49 = vld [vmem:[#allocation3 + $0x4a] sm:$0xff] }
 0x593   : > { %v4900_v51 = vld [vmem:[#allocation3 + $0x140] sm:$0xff]  ;;  %v4957_v9 = vld [vmem:[#allocation3 + $0x151] sm:$0xff]  ;;  %v18022_v42 = vpack.c.bf16 %v4956_v7, %v4955_v61  ;;  %v18096_v61 = vld [vmem:[%s20750_s5 + $0xd8] sm:$0xff]  }
 0x594   : > { %v4958_v39 = vld [vmem:[#allocation3 + $0x159] sm:$0xff]  ;;  %v4901_v6 = vld [vmem:[#allocation3 + $0x150] sm:$0xff]  ;;  %v18024_v15 = vpack.c.bf16 %v4900_v51, %v4899_v26  ;;  %v5451_v17 = vld [vmem:[#allocation3 + $0x2] sm:$0xff] }
 0x595   : > { %13712 = vmatmul.mubr.msk.bf16.gmra.mxu1 %vm4142_vm5, %v17974_v58  ;;  %v4902_v38 = vld [vmem:[#allocation3 + $0x158] sm:$0xff]  ;;  %v18026_v52 = vpack.c.bf16 %v4958_v39, %v4957_v9  ;;  %v4959_v14 = vld [vmem:[#allocation3 + $0x169] sm:$0xff]  ;;  %v5483_v33 = vpack.c.bf16 %v5452_v30, %v5451_v17  ;;  %v14754_v40 = vld [vmem:[%s20750_s5 + $0xb0] sm:$0xff]  }
 0x596   : > { %13752 = vmatmul.mubr.msk.bf16.gmra.mxu0 %vm4142_vm5, %v17976_v24  ;;  %13715 = vmatprep.mubr.msk.bf16.mxu1 %vm4142_vm5, %v17978_v0  ;;  %v18028_v10 = vpack.c.bf16 %v4902_v38, %v4901_v6  ;;  %v4960_v29 = vld [vmem:[#allocation3 + $0x171] sm:$0xff]  ;;  %v4903_v12 = vld [vmem:[#allocation3 + $0x168] sm:$0xff]  ;;  %v5456_v4 = vld [vmem:[#allocation3 + $0x3a] sm:$0xff] }
 0x597   : > { %13755 = vmatprep.mubr.msk.bf16.mxu0 %vm4142_vm5, %v17980_v59  ;;  %v4904_v32 = vld [vmem:[#allocation3 + $0x170] sm:$0xff]  ;;  %v18038_v62 = vpack.c.bf16 %v4960_v29, %v4959_v14  ;;  %v18051_v16 = vpack.c.bf16 %v5456_v4, %v5455_v41  ;;  %v14756_v56 = vld [vmem:[%s20750_s5 + $0xa8] sm:$0xff]   ;;  %v5459_v21 = vld [vmem:[#allocation3 + $0x62] sm:$0xff] }
 0x598   : > { %v18040_v2 = vpack.c.bf16 %v4904_v32, %v4903_v12  ;;  %v5458_v47 = vld [vmem:[#allocation3 + $0x52] sm:$0xff]  ;;  %v5460_v27 = vld [vmem:[#allocation3 + $0x6a] sm:$0xff]  ;;  %v5461_v55 = vld [vmem:[#allocation3 + $0x7a] sm:$0xff] }
 0x599   : > { %v18075_v60 = vpack.c.bf16 %v5458_v47, %v5457_v49  ;;  %v5462_v8 = vld [vmem:[#allocation3 + $0x82] sm:$0xff]  ;;  %v5463_v7 = vld [vmem:[#allocation3 + $0x92] sm:$0xff]  ;;  %v5464_v51 = vld [vmem:[#allocation3 + $0x9a] sm:$0xff] }
 0x59a   : > { %v18101_v26 = vld [vmem:[%s20750_s5 + $0xf8] sm:$0xff]   ;;  %v18103_v9 = vpack.c.bf16 %v5462_v8, %v5461_v55  ;;  %v5466_v6 = vld [vmem:[#allocation3 + $0xb2] sm:$0xff]  ;;  %v5472_v12 = vld [vmem:[#allocation3 + $0xfa] sm:$0xff] }
 0x59b   : > { %v5465_v39 = vld [vmem:[#allocation3 + $0xaa] sm:$0xff]  ;;  %v5467_v38 = vld [vmem:[#allocation3 + $0xc2] sm:$0xff]  ;;  %v5471_v29 = vld [vmem:[#allocation3 + $0xf2] sm:$0xff] }
 0x59c   : > { %v5468_v14 = vld [vmem:[#allocation3 + $0xca] sm:$0xff]  ;;  %v18117_v17 = vpack.c.bf16 %v5466_v6, %v5465_v39  ;;  %v5475_v28 = vld [vmem:[#allocation3 + $0x122] sm:$0xff]  ;;  %v5482_v47 = vld [vmem:[#allocation3 + $0x172] sm:$0xff] }
 0x59d   : > { %13716 = vmatmul.mubr.msk.bf16.gmra.mxu1 %vm4142_vm5, %v17990_v54  ;;  %v18119_v30 = vpack.c.bf16 %v5468_v14, %v5467_v38  ;;  %v5476_v31 = vld [vmem:[#allocation3 + $0x12a] sm:$0xff]  ;;  %v7064_v55 = vld [vmem:[#allocation3 + $0x81] sm:$0xff] }
 0x59e   : > { %13756 = vmatmul.mubr.msk.bf16.gmra.mxu0 %vm4142_vm5, %v17992_v46  ;;  %13719 = vmatprep.mubr.msk.bf16.mxu1 %vm4142_vm5, %v17994_v48  ;;  %v18143_v4 = vpack.c.bf16 %v5476_v31, %v5475_v28  ;;  %v14770_v38 = vld [vmem:[%s20750_s5 + $0x100] sm:$0xff]  }
 0x59f   : > { %13759 = vmatprep.mubr.msk.bf16.mxu0 %vm4142_vm5, %v17996_v18  ;;  %v7067_v28 = vld [vmem:[#allocation3 + $0xa9] sm:$0xff]  ;;  %v7068_v31 = vld [vmem:[#allocation3 + $0xb1] sm:$0xff] }
 0x5a5   : > { %13720 = vmatmul.mubr.msk.bf16.gmra.mxu1 %vm4142_vm5, %v18006_v3 }
 0x5a6   : > { %13760 = vmatmul.mubr.msk.bf16.gmra.mxu0 %vm4142_vm5, %v18008_v19  ;;  %13723 = vmatprep.mubr.msk.bf16.mxu1 %vm4142_vm5, %v18010_v44 }
 0x5a7   : > { %13763 = vmatprep.mubr.msk.bf16.mxu0 %vm4142_vm5, %v18012_v37 }
 0x5ad   : > { %13724 = vmatmul.mubr.msk.bf16.gmra.mxu1 %vm4142_vm5, %v18022_v42 }
 0x5ae   : > { %13764 = vmatmul.mubr.msk.bf16.gmra.mxu0 %vm4142_vm5, %v18024_v15  ;;  %13727 = vmatprep.mubr.msk.bf16.mxu1 %vm4142_vm5, %v18026_v52 }
 0x5af   : > { %13767 = vmatprep.mubr.msk.bf16.mxu0 %vm4142_vm5, %v18028_v10 }
 0x5b5   : > { %13728 = vmatmul.mubr.msk.bf16.gmra.mxu1 %vm4142_vm5, %v18038_v62 }
 0x5b6   : > { %13768 = vmatmul.mubr.msk.bf16.gmra.mxu0 %vm4142_vm5, %v18040_v2  ;;  %13779 = vmatprep.mubr.msk.bf16.mxu1 %vm4142_vm5, %v5483_v33  ;;  %v18131_v33 = vpack.c.bf16 %v5472_v12, %v5471_v29 }
 0x5b7   : > { %13819 = vmatprep.mubr.msk.bf16.mxu0 %vm4142_vm5, %v17852_v34  ;;  %v14755_v34 = vld [vmem:[%s20750_s5 + $0x88] sm:$0xff]  }
 0x5bd   : > { %13780 = vmatmul.mubr.msk.bf16.vlgmr.msra.gmra.mxu1 %vm4142_vm5, %v18049_v1 }
 0x5be   : > { %13820 = vmatmul.mubr.msk.bf16.vlgmr.msra.gmra.mxu0 %vm4142_vm5, %v17872_v25  ;;  %13783 = vmatprep.mubr.msk.bf16.mxu1 %vm4142_vm5, %v18051_v16 }
 0x5bf   : > { %13823 = vmatprep.mubr.msk.bf16.mxu0 %vm4142_vm5, %v17900_v63  ;;  %13852 = vmatpush3.bf16.msra.mxu1 %v17929_v53  ;;  %v18077_v53 = vpack.c.bf16 %v5460_v27, %v5459_v21 }
 0x5c0   : > { %13892 = vmatpush3.bf16.msra.mxu0 %v17936_v50  ;;  %13853 = vmatprep.subr.bf16.mxu1 %v14752_v5  ;;  %v14757_v50 = vld [vmem:[%s20750_s5 + $0x80] sm:$0xff]  }
 0x5c1   : > { %13893 = vmatprep.subr.bf16.mxu0 %v14754_v40 }
 0x5c3   : > { %13854 = vmatpush3.bf16.msra.mxu1 %v14752_v5  ;;  %v5479_v5 = vld [vmem:[#allocation3 + $0x152] sm:$0xff] }
 0x5c4   : > { %13894 = vmatpush3.bf16.msra.mxu0 %v14754_v40  ;;  %13855 = vmatprep.subr.bf16.mxu1 %v14755_v34  ;;  %v5480_v40 = vld [vmem:[#allocation3 + $0x15a] sm:$0xff] }
 0x5c5   : > { %13895 = vmatprep.subr.bf16.mxu0 %v14756_v56  ;;  %13784 = vmatmul.mubr.msk.bf16.gmra.mxu1 %vm4142_vm5, %v18075_v60  ;;  %v5497_v49 = vpack.c.bf16 %v5480_v40, %v5479_v5  ;;  %v7069_v5 = vld [vmem:[#allocation3 + $0xc1] sm:$0xff]  ;;  %v7070_v40 = vld [vmem:[#allocation3 + $0xc9] sm:$0xff] }
 0x5c6   : > { %13824 = vmatmul.mubr.msk.bf16.gmra.mxu0 %vm4142_vm5, %v17906_v23  ;;  %13787 = vmatprep.mubr.msk.bf16.mxu1 %vm4142_vm5, %v18077_v53 }
 0x5c7   : > { %13827 = vmatprep.mubr.msk.bf16.mxu0 %vm4142_vm5, %v17948_v20  ;;  %13856 = vmatpush3.bf16.msra.mxu1 %v14755_v34  ;;  %v18105_v20 = vpack.c.bf16 %v5464_v51, %v5463_v7  ;;  %v7066_v51 = vld [vmem:[#allocation3 + $0x99] sm:$0xff] }
 0x5c8   : > { %13896 = vmatpush3.bf16.msra.mxu0 %v14756_v56  ;;  %13857 = vmatprep.subr.bf16.mxu1 %v14757_v50  ;;  %v5802_v56 = vld [vmem:[#allocation3 + $0x180] sm:$0xff] }
 0x5c9   : > { %13897 = vmatprep.subr.bf16.mxu0 %v14758_v45 }
 0x5cb   : > { %13858 = vmatpush3.bf16.msra.mxu1 %v14757_v50  ;;  %v14767_v50 = vld [vmem:[%s20750_s5 + $0x118] sm:$0xff]  }
 0x5cc   : > { %13898 = vmatpush3.bf16.msra.mxu0 %v14758_v45  ;;  %13931 = vmatprep.subr.bf16.mxu1 %v18096_v61  ;;  %v7063_v45 = vld [vmem:[#allocation3 + $0x79] sm:$0xff] }
 0x5cd   : > { %13971 = vmatprep.subr.bf16.mxu0 %v18101_v26  ;;  %13788 = vmatmul.mubr.msk.bf16.gmra.mxu1 %vm4142_vm5, %v18103_v9  ;;  %v7092_v6 = vpack.c.bf16 %v7064_v55, %v7063_v45 }
 0x5ce   : > { %13828 = vmatmul.mubr.msk.bf16.gmra.mxu0 %vm4142_vm5, %v17954_v57  ;;  %13791 = vmatprep.mubr.msk.bf16.mxu1 %vm4142_vm5, %v18105_v20  ;;  %v5469_v57 = vld [vmem:[#allocation3 + $0xda] sm:$0xff] }
 0x5cf   : > { %13831 = vmatprep.mubr.msk.bf16.mxu0 %vm4142_vm5, %v17976_v24  ;;  %v5470_v24 = vld [vmem:[#allocation3 + $0xe2] sm:$0xff] }
 0x5d0   : > { %v18129_v32 = vpack.c.bf16 %v5470_v24, %v5469_v57 }
 0x5d5   : > { %13792 = vmatmul.mubr.msk.bf16.gmra.mxu1 %vm4142_vm5, %v18117_v17 }
 0x5d6   : > { %13832 = vmatmul.mubr.msk.bf16.gmra.mxu0 %vm4142_vm5, %v17980_v59  ;;  %13795 = vmatprep.mubr.msk.bf16.mxu1 %vm4142_vm5, %v18119_v30  ;;  %v5473_v59 = vld [vmem:[#allocation3 + $0x10a] sm:$0xff] }
 0x5d7   : > { %13835 = vmatprep.mubr.msk.bf16.mxu0 %vm4142_vm5, %v17992_v46  ;;  %v5474_v46 = vld [vmem:[#allocation3 + $0x112] sm:$0xff] }
 0x5d8   : > { %v18141_v41 = vpack.c.bf16 %v5474_v46, %v5473_v59  ;;  %v6747_v59 = vld [vmem:[#allocation3 + $0xb0] sm:$0xff] }
 0x5dd   : > { %13796 = vmatmul.mubr.msk.bf16.gmra.mxu1 %vm4142_vm5, %v18129_v32 }
 0x5de   : > { %13836 = vmatmul.mubr.msk.bf16.gmra.mxu0 %vm4142_vm5, %v17996_v18  ;;  %13799 = vmatprep.mubr.msk.bf16.mxu1 %vm4142_vm5, %v18131_v33  ;;  %v5477_v18 = vld [vmem:[#allocation3 + $0x13a] sm:$0xff] }
 0x5df   : > { %13839 = vmatprep.mubr.msk.bf16.mxu0 %vm4142_vm5, %v18008_v19  ;;  %v5478_v19 = vld [vmem:[#allocation3 + $0x142] sm:$0xff] }
 0x5e0   : > { %v5496_v34 = vpack.c.bf16 %v5478_v19, %v5477_v18  ;;  %v6749_v19 = vld [vmem:[#allocation3 + $0xc8] sm:$0xff] }
 0x5e5   : > { %13800 = vmatmul.mubr.msk.bf16.gmra.mxu1 %vm4142_vm5, %v18141_v41 }
 0x5e6   : > { %13840 = vmatmul.mubr.msk.bf16.gmra.mxu0 %vm4142_vm5, %v18012_v37  ;;  %13803 = vmatprep.mubr.msk.bf16.mxu1 %vm4142_vm5, %v18143_v4  ;;  %v5481_v37 = vld [vmem:[#allocation3 + $0x16a] sm:$0xff] }
 0x5e7   : > { %13843 = vmatprep.mubr.msk.bf16.mxu0 %vm4142_vm5, %v18024_v15  ;;  %v5803_v15 = vld [vmem:[#allocation3 + $0x188] sm:$0xff]  ;;  %v5498_v21 = vpack.c.bf16 %v5482_v47, %v5481_v37 }
 0x5e8   : > { %v18159_v27 = vpack.c.bf16 %v5803_v15, %v5802_v56  ;;  %v7094_v15 = vpack.c.bf16 %v7068_v31, %v7067_v28  ;;  %v7077_v28 = vld [vmem:[#allocation3 + $0x121] sm:$0xff]  ;;  %v7078_v31 = vld [vmem:[#allocation3 + $0x129] sm:$0xff] }
 0x5ed   : > { %13804 = vmatmul.mubr.msk.bf16.gmra.mxu1 %vm4142_vm5, %v5496_v34 }
 0x5ee   : > { %13844 = vmatmul.mubr.msk.bf16.gmra.mxu0 %vm4142_vm5, %v18028_v10  ;;  %13807 = vmatprep.mubr.msk.bf16.mxu1 %vm4142_vm5, %v5497_v49  ;;  %v14760_v10 = vld [vmem:[%s20750_s5 + $0xd0] sm:$0xff]  }
 0x5ef   : > { %13847 = vmatprep.mubr.msk.bf16.mxu0 %vm4142_vm5, %v18040_v2  ;;  %v14762_v2 = vld [vmem:[%s20750_s5 + $0xf0] sm:$0xff]  }
 0x5f5   : > { %13808 = vmatmul.mubr.msk.bf16.gmra.mxu1 %vm4142_vm5, %v5498_v21 }
 0x5f6   : > { %13848 = vmatmul.mubr.msk.bf16.gmra.mxu0 %vm4142_vm5, %v18159_v27  ;;  %13859 = vmatprep.mubr.msk.bf16.mxu1 %vm4142_vm5, %v17850_v22  ;;  %v14763_v22 = vld [vmem:[%s20750_s5 + $0xc8] sm:$0xff]  }
 0x5f7   : > { %13899 = vmatprep.mubr.msk.bf16.mxu0 %vm4142_vm5, %v18049_v1  ;;  %v14764_v1 = vld [vmem:[%s20750_s5 + $0xe8] sm:$0xff]  }
 0x5fd   : > { %13860 = vmatmul.mubr.msk.bf16.vlgmr.msra.gmra.mxu1 %vm4142_vm5, %v17870_v35 }
 0x5fe   : > { %13900 = vmatmul.mubr.msk.bf16.vlgmr.msra.gmra.mxu0 %vm4142_vm5, %v18051_v16  ;;  %13863 = vmatprep.mubr.msk.bf16.mxu1 %vm4142_vm5, %v17898_v11  ;;  %v14765_v16 = vld [vmem:[%s20750_s5 + $0xc0] sm:$0xff]  }
 0x5ff   : > { %13903 = vmatprep.mubr.msk.bf16.mxu0 %vm4142_vm5, %v18075_v60  ;;  %13932 = vmatpush3.bf16.msra.mxu1 %v18096_v61  ;;  %v14766_v60 = vld [vmem:[%s20750_s5 + $0xe0] sm:$0xff]  }
 0x600   : > { %13972 = vmatpush3.bf16.msra.mxu0 %v18101_v26  ;;  %13933 = vmatprep.subr.bf16.mxu1 %v14760_v10  ;;  %v6744_v26 = vld [vmem:[#allocation3 + $0x90] sm:$0xff] }
 0x601   : > { %13973 = vmatprep.subr.bf16.mxu0 %v14762_v2 }
 0x603   : > { %13934 = vmatpush3.bf16.msra.mxu1 %v14760_v10 }
 0x604   : > { %13974 = vmatpush3.bf16.msra.mxu0 %v14762_v2  ;;  %13935 = vmatprep.subr.bf16.mxu1 %v14763_v22  ;;  %v7095_v2 = vpack.c.bf16 %v7070_v40, %v7069_v5 }
 0x605   : > { %13975 = vmatprep.subr.bf16.mxu0 %v14764_v1  ;;  %13864 = vmatmul.mubr.msk.bf16.gmra.mxu1 %vm4142_vm5, %v17904_v13 }
 0x606   : > { %13904 = vmatmul.mubr.msk.bf16.gmra.mxu0 %vm4142_vm5, %v18077_v53  ;;  %13867 = vmatprep.mubr.msk.bf16.mxu1 %vm4142_vm5, %v17946_v36  ;;  %v6123_v36 = vld [vmem:[#allocation3 + $0x181] sm:$0xff] }
 0x607   : > { %13907 = vmatprep.mubr.msk.bf16.mxu0 %vm4142_vm5, %v18103_v9  ;;  %13936 = vmatpush3.bf16.msra.mxu1 %v14763_v22 }
 0x608   : > { %13976 = vmatpush3.bf16.msra.mxu0 %v14764_v1  ;;  %13937 = vmatprep.subr.bf16.mxu1 %v14765_v16 }
 0x609   : > { %13977 = vmatprep.subr.bf16.mxu0 %v14766_v60 }
 0x60b   : > { %13938 = vmatpush3.bf16.msra.mxu1 %v14765_v16 }
 0x60c   : > { %13978 = vmatpush3.bf16.msra.mxu0 %v14766_v60  ;;  %14011 = vmatprep.subr.bf16.mxu1 %v14767_v50 }
 0x60d   : > { %13868 = vmatmul.mubr.msk.bf16.gmra.mxu1 %vm4142_vm5, %v17952_v43  ;;  %v6124_v43 = vld [vmem:[#allocation3 + $0x189] sm:$0xff] }
 0x60e   : > { %13908 = vmatmul.mubr.msk.bf16.gmra.mxu0 %vm4142_vm5, %v18105_v20  ;;  %13871 = vmatprep.mubr.msk.bf16.mxu1 %vm4142_vm5, %v17974_v58  ;;  %v6444_v58 = vld [vmem:[#allocation3 + $0x182] sm:$0xff] }
 0x60f   : > { %13911 = vmatprep.mubr.msk.bf16.mxu0 %vm4142_vm5, %v18117_v17 }
 0x615   : > { %13872 = vmatmul.mubr.msk.bf16.gmra.mxu1 %vm4142_vm5, %v17978_v0  ;;  %v6445_v0 = vld [vmem:[#allocation3 + $0x18a] sm:$0xff] }
 0x616   : > { %13912 = vmatmul.mubr.msk.bf16.gmra.mxu0 %vm4142_vm5, %v18119_v30  ;;  %13875 = vmatprep.mubr.msk.bf16.mxu1 %vm4142_vm5, %v17990_v54  ;;  %v18244_v54 = vpack.c.bf16 %v6124_v43, %v6123_v36  ;;  %v6750_v36 = vld [vmem:[#allocation3 + $0xd8] sm:$0xff]  ;;  %v6751_v43 = vld [vmem:[#allocation3 + $0xe0] sm:$0xff] }
 0x617   : > { %13915 = vmatprep.mubr.msk.bf16.mxu0 %vm4142_vm5, %v18129_v32 }
 0x61d   : > { %13876 = vmatmul.mubr.msk.bf16.gmra.mxu1 %vm4142_vm5, %v17994_v48  ;;  %v18246_v48 = vpack.c.bf16 %v6445_v0, %v6444_v58  ;;  %v7071_v0 = vld [vmem:[#allocation3 + $0xd9] sm:$0xff] }
 0x61e   : > { %13916 = vmatmul.mubr.msk.bf16.gmra.mxu0 %vm4142_vm5, %v18131_v33  ;;  %13879 = vmatprep.mubr.msk.bf16.mxu1 %vm4142_vm5, %v18006_v3  ;;  %v14768_v3 = vld [vmem:[%s20750_s5 + $0x110] sm:$0xff]   ;;  %v6746_v33 = vld [vmem:[#allocation3 + $0xa8] sm:$0xff] }
 0x61f   : > { %13919 = vmatprep.mubr.msk.bf16.mxu0 %vm4142_vm5, %v18141_v41  ;;  %v6748_v41 = vld [vmem:[#allocation3 + $0xc0] sm:$0xff]  ;;  %v6773_v56 = vpack.c.bf16 %v6747_v59, %v6746_v33  ;;  %v6757_v59 = vld [vmem:[#allocation3 + $0x128] sm:$0xff] }
 0x620   : > { %v6774_v10 = vpack.c.bf16 %v6749_v19, %v6748_v41 }
 0x625   : > { %13880 = vmatmul.mubr.msk.bf16.gmra.mxu1 %vm4142_vm5, %v18010_v44 }
 0x626   : > { %13920 = vmatmul.mubr.msk.bf16.gmra.mxu0 %vm4142_vm5, %v18143_v4  ;;  %13883 = vmatprep.mubr.msk.bf16.mxu1 %vm4142_vm5, %v18022_v42 }
 0x627   : > { %13923 = vmatprep.mubr.msk.bf16.mxu0 %vm4142_vm5, %v5496_v34 }
 0x62d   : > { %13884 = vmatmul.mubr.msk.bf16.gmra.mxu1 %vm4142_vm5, %v18026_v52 }
 0x62e   : > { %13924 = vmatmul.mubr.msk.bf16.gmra.mxu0 %vm4142_vm5, %v5497_v49  ;;  %13887 = vmatprep.mubr.msk.bf16.mxu1 %vm4142_vm5, %v18038_v62  ;;  %v14769_v62 = vld [vmem:[%s20750_s5 + $0x108] sm:$0xff]   ;;  %v20758_v49 = vld [vmem:[#allocation44_spill] sm:$0xff] }
 0x62f   : > { %13927 = vmatprep.mubr.msk.bf16.mxu0 %vm4142_vm5, %v5498_v21 }
 0x635   : > { %13888 = vmatmul.mubr.msk.bf16.gmra.mxu1 %vm4142_vm5, %v18244_v54 }
 0x636   : > { %13928 = vmatmul.mubr.msk.bf16.gmra.mxu0 %vm4142_vm5, %v18246_v48  ;;  %13939 = vmatprep.mubr.msk.bf16.mxu1 %vm4142_vm5, %v17872_v25 }
 0x637   : > { %13979 = vmatprep.mubr.msk.bf16.mxu0 %vm4142_vm5, %v17870_v35 }
 0x63d   : > { %v13701_v44 = vpop.f32.mrf.mxu1  ;;  %13940 = vmatmul.mubr.msk.bf16.vlgmr.msra.gmra.mxu1 %vm4142_vm5, %v17900_v63  ;;  %v6742_v63 = vld [vmem:[#allocation3 + $0x78] sm:$0xff] }
 0x63e   : > { %v13741_v42 = vpop.f32.mrf.mxu0  ;;  %13980 = vmatmul.mubr.msk.bf16.vlgmr.msra.gmra.mxu0 %vm4142_vm5, %v17898_v11  ;;  %14012 = vmatpush3.bf16.msra.mxu1 %v14767_v50  ;;  %v6743_v11 = vld [vmem:[#allocation3 + $0x80] sm:$0xff] }
 0x63f   : > { %v18263_v52 = vadd.f32 %v13741_v42, %v13701_v44  ;;  %13943 = vmatprep.mubr.msk.bf16.mxu1 %vm4142_vm5, %v17906_v23  ;;  %13983 = vmatprep.mubr.msk.bf16.mxu0 %vm4142_vm5, %v17904_v13  ;;  %v5091_v35 = vpop.f32.mrf.mxu1  ;;  %v6745_v23 = vld [vmem:[#allocation3 + $0x98] sm:$0xff]  ;;  %v6771_v39 = vpack.c.bf16 %v6743_v11, %v6742_v63  ;;  %v6752_v44 = vld [vmem:[#allocation3 + $0xf0] sm:$0xff] }
 0x640   : > { %v5324_v25 = vpop.f32.mrf.mxu0  ;;  %14013 = vmatprep.subr.bf16.mxu1 %v14768_v3  ;;  %v7065_v13 = vld [vmem:[#allocation3 + $0x91] sm:$0xff]  ;;  %v6772_v17 = vpack.c.bf16 %v6745_v23, %v6744_v26  ;;  %v7074_v63 = vld [vmem:[#allocation3 + $0xf9] sm:$0xff] }
 0x641   : > { %v18272_v53 = vadd.f32 %v5324_v25, %v5091_v35  ;;  %v13702_v8 = vpop.f32.mrf.mxu1  ;;  %v7093_v24 = vpack.c.bf16 %v7066_v51, %v7065_v13  ;;  %v6753_v25 = vld [vmem:[#allocation3 + $0xf8] sm:$0xff] }
 0x642   : > { %v13742_v61 = vpop.f32.mrf.mxu0  ;;  %14014 = vmatpush3.bf16.msra.mxu1 %v14768_v3  ;;  %v7072_v3 = vld [vmem:[#allocation3 + $0xe1] sm:$0xff]  ;;  %v6776_v23 = vpack.c.bf16 %v6753_v25, %v6752_v44  ;;  %v7081_v44 = vld [vmem:[#allocation3 + $0x151] sm:$0xff] }
 0x643   : > { %v18274_v7 = vadd.f32 %v13742_v61, %v13702_v8  ;;  %v5094_v9 = vpop.f32.mrf.mxu1  ;;  %14015 = vmatprep.subr.bf16.mxu1 %v14769_v62  ;;  %v6775_v8 = vpack.c.bf16 %v6751_v43, %v6750_v36  ;;  %v7096_v61 = vpack.c.bf16 %v7072_v3, %v7071_v0  ;;  %v6760_v36 = vld [vmem:[#allocation3 + $0x150] sm:$0xff]  ;;  %v6761_v3 = vld [vmem:[#allocation3 + $0x158] sm:$0xff] }
 0x644   : > { %v5327_v20 = vpop.f32.mrf.mxu0 }
 0x645   : > { %v18279_v14 = vadd.f32 %v5327_v20, %v5094_v9  ;;  %v13705_v30 = vpop.f32.mrf.mxu1  ;;  %13944 = vmatmul.mubr.msk.bf16.gmra.mxu1 %vm4142_vm5, %v6771_v39 }
 0x646   : > { %v13745_v57 = vpop.f32.mrf.mxu0  ;;  %13984 = vmatmul.mubr.msk.bf16.gmra.mxu0 %vm4142_vm5, %v7092_v6  ;;  %14016 = vmatpush3.bf16.msra.mxu1 %v14769_v62  ;;  %v7073_v62 = vld [vmem:[#allocation3 + $0xf1] sm:$0xff] }
 0x647   : > { %v18283_v29 = vadd.f32 %v13745_v57, %v13705_v30  ;;  %13947 = vmatprep.mubr.msk.bf16.mxu1 %vm4142_vm5, %v6772_v17  ;;  %13987 = vmatprep.mubr.msk.bf16.mxu0 %vm4142_vm5, %v7093_v24  ;;  %v5107_v12 = vpop.f32.mrf.mxu1  ;;  %v7097_v13 = vpack.c.bf16 %v7074_v63, %v7073_v62  ;;  %v6755_v17 = vld [vmem:[#allocation3 + $0x110] sm:$0xff] }
 0x648   : > { %v5340_v32 = vpop.f32.mrf.mxu0  ;;  %14017 = vmatprep.subr.bf16.mxu1 %v14770_v38  ;;  %v7075_v57 = vld [vmem:[#allocation3 + $0x109] sm:$0xff]  ;;  %v7076_v24 = vld [vmem:[#allocation3 + $0x111] sm:$0xff] }
 0x649   : > { %v18287_v46 = vadd.f32 %v5340_v32, %v5107_v12  ;;  %v13706_v4 = vpop.f32.mrf.mxu1  ;;  %v6756_v12 = vld [vmem:[#allocation3 + $0x120] sm:$0xff]  ;;  %v7098_v5 = vpack.c.bf16 %v7076_v24, %v7075_v57 }
 0x64a   : > { %v13746_v18 = vpop.f32.mrf.mxu0  ;;  %14018 = vmatpush3.bf16.msra.mxu1 %v14770_v38  ;;  %v6754_v38 = vld [vmem:[#allocation3 + $0x108] sm:$0xff] }
 0x64b   : > { %v18289_v34 = vadd.f32 %v13746_v18, %v13706_v4  ;;  %12929 = vmatprep.subr.mxu1 %v20758_v49  ;;  %v5110_v37 = vpop.f32.mrf.mxu1  ;;  %v6777_v19 = vpack.c.bf16 %v6755_v17, %v6754_v38  ;;  %v6778_v49 = vpack.c.bf16 %v6757_v59, %v6756_v12  ;;  %v7083_v38 = vld [vmem:[#allocation3 + $0x169] sm:$0xff]  ;;  %v7084_v17 = vld [vmem:[#allocation3 + $0x171] sm:$0xff] }
 0x64c   : > { %v5343_v47 = vpop.f32.mrf.mxu0 }
 0x64d   : > { %v18292_v21 = vadd.f32 %v5343_v47, %v5110_v37  ;;  %v13709_v22 = vpop.f32.mrf.mxu1  ;;  %13948 = vmatmul.mubr.msk.bf16.gmra.mxu1 %vm4142_vm5, %v6773_v56  ;;  %v7099_v37 = vpack.c.bf16 %v7078_v31, %v7077_v28  ;;  %v7102_v28 = vpack.c.bf16 %v7084_v17, %v7083_v38  ;;  %v7383_v38 = vld [vmem:[#allocation3 + $0x6a] sm:$0xff] }
 0x64e   : > { %v13749_v1 = vpop.f32.mrf.mxu0  ;;  %13988 = vmatmul.mubr.msk.bf16.gmra.mxu0 %vm4142_vm5, %v7094_v15  ;;  %13951 = vmatprep.mubr.msk.bf16.mxu1 %vm4142_vm5, %v6774_v10 }
 0x64f   : > { %v18296_v16 = vadd.f32 %v13749_v1, %v13709_v22  ;;  %13991 = vmatprep.mubr.msk.bf16.mxu0 %vm4142_vm5, %v7095_v2  ;;  %v5123_v60 = vpop.f32.mrf.mxu1  ;;  %v6758_v22 = vld [vmem:[#allocation3 + $0x138] sm:$0xff]  ;;  %v6759_v1 = vld [vmem:[#allocation3 + $0x140] sm:$0xff] }
 0x650   : > { %v5356_v50 = vpop.f32.mrf.mxu0  ;;  %v6779_v63 = vpack.c.bf16 %v6759_v1, %v6758_v22 }
 0x651   : > { %v18300_v58 = vadd.f32 %v5356_v50, %v5123_v60  ;;  %v13710_v42 = vpop.f32.mrf.mxu1  ;;  %v7079_v60 = vld [vmem:[#allocation3 + $0x139] sm:$0xff]  ;;  %v7080_v50 = vld [vmem:[#allocation3 + $0x141] sm:$0xff] }
 0x652   : > { %v13750_v35 = vpop.f32.mrf.mxu0 }
 0x653   : > { %v18302_v11 = vadd.f32 %v13750_v35, %v13710_v42  ;;  %v5126_v45 = vpop.f32.mrf.mxu1  ;;  %v7082_v42 = vld [vmem:[#allocation3 + $0x159] sm:$0xff] }
 0x654   : > { %v5359_v55 = vpop.f32.mrf.mxu0 }
 0x655   : > { %v18304_v26 = vadd.f32 %v5359_v55, %v5126_v45  ;;  %v13713_v51 = vpop.f32.mrf.mxu1  ;;  %13952 = vmatmul.mubr.msk.bf16.gmra.mxu1 %vm4142_vm5, %v6775_v8  ;;  %v7100_v45 = vpack.c.bf16 %v7080_v50, %v7079_v60  ;;  %v6780_v55 = vpack.c.bf16 %v6761_v3, %v6760_v36  ;;  %v7101_v8 = vpack.c.bf16 %v7082_v42, %v7081_v44  ;;  %v7378_v50 = vld [vmem:[#allocation3 + $0x32] sm:$0xff]  ;;  %v7379_v36 = vld [vmem:[#allocation3 + $0x3a] sm:$0xff] }
 0x656   : > { %v13753_v9 = vpop.f32.mrf.mxu0  ;;  %13992 = vmatmul.mubr.msk.bf16.gmra.mxu0 %vm4142_vm5, %v7096_v61  ;;  %13955 = vmatprep.mubr.msk.bf16.mxu1 %vm4142_vm5, %v6776_v23 }
 0x657   : > { %v18308_v20 = vadd.f32 %v13753_v9, %v13713_v51  ;;  %13995 = vmatprep.mubr.msk.bf16.mxu0 %vm4142_vm5, %v7097_v13  ;;  %v5139_v39 = vpop.f32.mrf.mxu1 }
 0x658   : > { %v5372_v6 = vpop.f32.mrf.mxu0 }
 0x659   : > { %v18312_v30 = vadd.f32 %v5372_v6, %v5139_v39  ;;  %v13714_v32 = vpop.f32.mrf.mxu1  ;;  %v6762_v39 = vld [vmem:[#allocation3 + $0x168] sm:$0xff]  ;;  %v6763_v6 = vld [vmem:[#allocation3 + $0x170] sm:$0xff] }
 0x65a   : > { %v13754_v33 = vpop.f32.mrf.mxu0  ;;  %v6781_v59 = vpack.c.bf16 %v6763_v6, %v6762_v39  ;;  %v7382_v6 = vld [vmem:[#allocation3 + $0x62] sm:$0xff] }
 0x65b   : > { %v18314_v41 = vadd.f32 %v13754_v33, %v13714_v32  ;;  %v5142_v4 = vpop.f32.mrf.mxu1 }
 0x65c   : > { %v5375_v18 = vpop.f32.mrf.mxu0 }
 0x65d   : > { %v18316_v40 = vadd.f32 %v5375_v18, %v5142_v4  ;;  %v13717_v47 = vpop.f32.mrf.mxu1  ;;  %13956 = vmatmul.mubr.msk.bf16.gmra.mxu1 %vm4142_vm5, %v6777_v19  ;;  %v6766_v18 = vld [vmem:[#allocation3 + $0x198] sm:$0xff] }
 0x65e   : > { %v13757_v56 = vpop.f32.mrf.mxu0  ;;  %13996 = vmatmul.mubr.msk.bf16.gmra.mxu0 %vm4142_vm5, %v7098_v5  ;;  %13959 = vmatprep.mubr.msk.bf16.mxu1 %vm4142_vm5, %v6778_v49  ;;  %v6767_v5 = vld [vmem:[#allocation3 + $0x1a0] sm:$0xff] }
 0x65f   : > { %v18320_v15 = vadd.f32 %v13757_v56, %v13717_v47  ;;  %13999 = vmatprep.mubr.msk.bf16.mxu0 %vm4142_vm5, %v7099_v37  ;;  %v18324_v10 = vpop.f32.mrf.mxu1  ;;  %v7087_v49 = vld [vmem:[#allocation3 + $0x199] sm:$0xff]  ;;  %v7088_v37 = vld [vmem:[#allocation3 + $0x1a1] sm:$0xff]  ;;  %v6783_v60 = vpack.c.bf16 %v6767_v5, %v6766_v18  ;;  %v20760_v5 = vld [vmem:[#allocation28_spill] sm:$0xff] }
 0x660   : > { %v18326_v2 = vpop.f32.mrf.mxu0 }
 0x661   : > { %v13718_v43 = vpop.f32.mrf.mxu1 }
 0x662   : > { %v13758_v0 = vpop.f32.mrf.mxu0 }
 0x663   : > { %v18328_v35 = vadd.f32 %v13758_v0, %v13718_v43  ;;  %v18330_v25 = vpop.f32.mrf.mxu1  ;;  %v7104_v43 = vpack.c.bf16 %v7088_v37, %v7087_v49  ;;  %v20761_v49 = vld [vmem:[#allocation43_spill] sm:$0xff] }
 0x664   : > { %v18332_v62 = vpop.f32.mrf.mxu0 }
 0x665   : > { %v13721_v61 = vpop.f32.mrf.mxu1  ;;  %13960 = vmatmul.mubr.msk.bf16.gmra.mxu1 %vm4142_vm5, %v6779_v63 }
 0x666   : > { %v13761_v23 = vpop.f32.mrf.mxu0  ;;  %14000 = vmatmul.mubr.msk.bf16.gmra.mxu0 %vm4142_vm5, %v7100_v45  ;;  %13963 = vmatprep.mubr.msk.bf16.mxu1 %vm4142_vm5, %v6780_v55 }
 0x667   : > { %v18336_v13 = vadd.f32 %v13761_v23, %v13721_v61  ;;  %14003 = vmatprep.mubr.msk.bf16.mxu0 %vm4142_vm5, %v7101_v8  ;;  %v18340_v51 = vpop.f32.mrf.mxu1  ;;  %v7380_v8 = vld [vmem:[#allocation3 + $0x4a] sm:$0xff]  ;;  %v7381_v61 = vld [vmem:[#allocation3 + $0x52] sm:$0xff] }
 0x668   : > { %v18342_v9 = vpop.f32.mrf.mxu0 }
 0x669   : > { %v13722_v57 = vpop.f32.mrf.mxu1 }
 0x66a   : > { %v13762_v24 = vpop.f32.mrf.mxu0 }
 0x66b   : > { %v18344_v12 = vadd.f32 %v13762_v24, %v13722_v57  ;;  %v18346_v32 = vpop.f32.mrf.mxu1 }
 0x66c   : > { %v18348_v33 = vpop.f32.mrf.mxu0 }
 0x66d   : > { %v13725_v31 = vpop.f32.mrf.mxu1  ;;  %13964 = vmatmul.mubr.msk.bf16.gmra.mxu1 %vm4142_vm5, %v6781_v59  ;;  %v7411_v59 = vpack.c.bf16 %v7381_v61, %v7380_v8  ;;  %v7387_v8 = vld [vmem:[#allocation3 + $0x9a] sm:$0xff] }
 0x66e   : > { %v13765_v4 = vpop.f32.mrf.mxu0  ;;  %14004 = vmatmul.mubr.msk.bf16.gmra.mxu0 %vm4142_vm5, %v7102_v28  ;;  %13967 = vmatprep.mubr.msk.bf16.mxu1 %vm4142_vm5, %v18159_v27  ;;  %v7412_v28 = vpack.c.bf16 %v7383_v38, %v7382_v6 }
 0x66f   : > { %v18352_v19 = vadd.f32 %v13765_v4, %v13725_v31  ;;  %14007 = vmatprep.mubr.msk.bf16.mxu0 %vm4142_vm5, %v18244_v54  ;;  %v18358_v47 = vpop.f32.mrf.mxu1  ;;  %v7410_v54 = vpack.c.bf16 %v7379_v36, %v7378_v50  ;;  %v20762_v50 = vld [vmem:[#allocation27_spill] sm:$0xff]  ;;  %v7384_v36 = vld [vmem:[#allocation3 + $0x7a] sm:$0xff] }
 0x670   : > { %v18360_v56 = vpop.f32.mrf.mxu0 }
 0x671   : > { %v13726_v22 = vpop.f32.mrf.mxu1 }
 0x672   : > { %v13766_v1 = vpop.f32.mrf.mxu0 }
 0x673   : > { %v18362_v0 = vadd.f32 %v13766_v1, %v13726_v22  ;;  %v18364_v3 = vpop.f32.mrf.mxu1 }
 0x674   : > { %v18366_v27 = vpop.f32.mrf.mxu0 }
 0x675   : > { %v13729_v44 = vpop.f32.mrf.mxu1  ;;  %13968 = vmatmul.mubr.msk.bf16.gmra.mxu1 %vm4142_vm5, %v6783_v60 }
 0x676   : > { %v13769_v42 = vpop.f32.mrf.mxu0  ;;  %14008 = vmatmul.mubr.msk.bf16.gmra.mxu0 %vm4142_vm5, %v7104_v43  ;;  %14019 = vmatprep.mubr.msk.bf16.mxu1 %vm4142_vm5, %v7410_v54  ;;  %v7385_v43 = vld [vmem:[#allocation3 + $0x82] sm:$0xff] }
 0x677   : > { %v18370_v63 = vadd.f32 %v13769_v42, %v13729_v44  ;;  %v18373_v45 = vpop.f32.mrf.mxu1  ;;  %v20763_v54 = vld [vmem:[#allocation42_spill] sm:$0xff]  ;;  %v7386_v42 = vld [vmem:[#allocation3 + $0x92] sm:$0xff] }
 0x678   : > { %v18375_v55 = vpop.f32.mrf.mxu0 }
 0x679   : > { %v13730_v23 = vpop.f32.mrf.mxu1 }
 0x67a   : > { %v13770_v39 = vpop.f32.mrf.mxu0 }
 0x67b   : > { %v18377_v17 = vadd.f32 %v13770_v39, %v13730_v23  ;;  %v18379_v57 = vpop.f32.mrf.mxu1  ;;  %v20764_v23 = vld [vmem:[#allocation26_spill] sm:$0xff]  ;;  %v20765_v39 = vld [vmem:[#allocation41_spill] sm:$0xff] }
 0x67c   : > { %v18381_v24 = vpop.f32.mrf.mxu0 }
 0x67d   : > { %20759 = vst [vmem:[#allocation48_spill] sm:$0xff] %v18381_v24  ;;  %v13781_v31 = vpop.f32.mrf.mxu1  ;;  %14020 = vmatmul.mubr.msk.bf16.vlgmr.msra.gmra.mxu1 %vm4142_vm5, %v7411_v59 }
 0x67e   : > { %v13821_v4 = vpop.f32.mrf.mxu0  ;;  %v5742_v18 = vadd.f32 %v13781_v31, %v18263_v52  ;;  %12930 = vmatpush3.msra.mxu1 %v20760_v5  ;;  %14023 = vmatprep.mubr.msk.bf16.mxu1 %vm4142_vm5, %v7412_v28  ;;  %v20766_v31 = vld [vmem:[#allocation25_spill] sm:$0xff] }
 0x67f   : > { %12931 = vmatprep.subr.mxu1 %v20761_v49  ;;  %v5613_v37 = vpop.f32.mrf.mxu1 }
 0x680   : > { %v18388_v22 = vpop.f32.mrf.mxu0  ;;  %v18390_v1 = vadd.f32 %v13821_v4, %v5742_v18  ;;  %v18393_v60 = vadd.f32 %v5613_v37, %v18272_v53  ;;  %12932 = vmatpush3.msra.mxu1 %v20762_v50  ;;  %v7413_v53 = vpack.c.bf16 %v7385_v43, %v7384_v36  ;;  %v7414_v4 = vpack.c.bf16 %v7387_v8, %v7386_v42  ;;  %v20767_v18 = vld [vmem:[#allocation40_spill] sm:$0xff]  ;;  %v20769_v50 = vld [vmem:[#allocation39_spill] sm:$0xff]  ;;  %v20771_v8 = vld [vmem:[#allocation38_spill] sm:$0xff] }
 0x681   : > { %12933 = vmatprep.subr.mxu1 %v20763_v54  ;;  %v13782_v52 = vpop.f32.mrf.mxu1  ;;  %v20768_v37 = vld [vmem:[#allocation24_spill] sm:$0xff] }
 0x682   : > { %v13822_v44 = vpop.f32.mrf.mxu0  ;;  %v5743_v61 = vadd.f32 %v13782_v52, %v18274_v7  ;;  %12934 = vmatpush3.msra.mxu1 %v20764_v23  ;;  %v20770_v52 = vld [vmem:[#allocation23_spill] sm:$0xff]  ;;  %v7389_v42 = vld [vmem:[#allocation3 + $0xb2] sm:$0xff] }
 0x683   : > { %12935 = vmatprep.subr.mxu1 %v20765_v39  ;;  %v5616_v6 = vpop.f32.mrf.mxu1  ;;  %v7390_v23 = vld [vmem:[#allocation3 + $0xc2] sm:$0xff]  ;;  %v7391_v39 = vld [vmem:[#allocation3 + $0xca] sm:$0xff] }
 0x684   : > { %v18400_v38 = vpop.f32.mrf.mxu0  ;;  %v18402_v59 = vadd.f32 %v13822_v44, %v5743_v61  ;;  %v18405_v28 = vadd.f32 %v5616_v6, %v18279_v14  ;;  %12936 = vmatpush3.msra.mxu1 %v20766_v31  ;;  %v7388_v44 = vld [vmem:[#allocation3 + $0xaa] sm:$0xff]  ;;  %v20772_v31 = vld [vmem:[#allocation22_spill] sm:$0xff] }
 0x685   : > { %12937 = vmatprep.subr.mxu1 %v20767_v18  ;;  %v13785_v5 = vpop.f32.mrf.mxu1  ;;  %14024 = vmatmul.mubr.msk.bf16.gmra.mxu1 %vm4142_vm5, %v7413_v53 }
 0x686   : > { %v13825_v7 = vpop.f32.mrf.mxu0  ;;  %v5746_v49 = vadd.f32 %v13785_v5, %v18283_v29  ;;  %12938 = vmatpush3.msra.mxu1 %v20768_v37  ;;  %14027 = vmatprep.mubr.msk.bf16.mxu1 %vm4142_vm5, %v7414_v4  ;;  %v20773_v4 = vld [vmem:[#allocation37_spill] sm:$0xff]  ;;  %v7415_v5 = vpack.c.bf16 %v7389_v42, %v7388_v44  ;;  %v20777_v44 = vld [vmem:[#allocation35_spill] sm:$0xff] }
 0x687   : > { %12939 = vmatprep.subr.mxu1 %v20769_v50  ;;  %v5629_v36 = vpop.f32.mrf.mxu1  ;;  %v20774_v37 = vld [vmem:[#allocation21_spill] sm:$0xff]  ;;  %v7416_v50 = vpack.c.bf16 %v7391_v39, %v7390_v23  ;;  %v7393_v39 = vld [vmem:[#allocation3 + $0xe2] sm:$0xff] }
 0x688   : > { %v5950_v14 = vpop.f32.mrf.mxu0  ;;  %v18414_v43 = vadd.f32 %v13825_v7, %v5746_v49  ;;  %v5744_v54 = vadd.f32 %v5629_v36, %v18287_v46  ;;  %12940 = vmatpush3.msra.mxu1 %v20770_v52  ;;  %v20775_v36 = vld [vmem:[#allocation36_spill] sm:$0xff]  ;;  %v7392_v23 = vld [vmem:[#allocation3 + $0xda] sm:$0xff] }
 0x689   : > { %12941 = vmatprep.subr.mxu1 %v20771_v8  ;;  %v13786_v61 = vpop.f32.mrf.mxu1  ;;  %v20776_v52 = vld [vmem:[#allocation20_spill] sm:$0xff] }
 0x68a   : > { %v13826_v29 = vpop.f32.mrf.mxu0  ;;  %v18419_v6 = vadd.f32 %v5950_v14, %v5744_v54  ;;  %v5747_v53 = vadd.f32 %v13786_v61, %v18289_v34  ;;  %12942 = vmatpush3.msra.mxu1 %v20772_v31 }
 0x68b   : > { %12943 = vmatprep.subr.mxu1 %v20773_v4  ;;  %v5632_v18 = vpop.f32.mrf.mxu1  ;;  %v7394_v4 = vld [vmem:[#allocation3 + $0xf2] sm:$0xff] }
 0x68c   : > { %v18424_v46 = vpop.f32.mrf.mxu0  ;;  %v18426_v7 = vadd.f32 %v13826_v29, %v5747_v53  ;;  %v18429_v49 = vadd.f32 %v5632_v18, %v18292_v21  ;;  %12944 = vmatpush3.msra.mxu1 %v20774_v37  ;;  %v20778_v29 = vld [vmem:[#allocation19_spill] sm:$0xff]  ;;  %v20779_v53 = vld [vmem:[#allocation34_spill] sm:$0xff] }
 0x68d   : > { %12945 = vmatprep.subr.mxu1 %v20775_v36  ;;  %v13789_v14 = vpop.f32.mrf.mxu1  ;;  %14028 = vmatmul.mubr.msk.bf16.gmra.mxu1 %vm4142_vm5, %v7415_v5  ;;  %v7395_v18 = vld [vmem:[#allocation3 + $0xfa] sm:$0xff] }
 0x68e   : > { %v13829_v34 = vpop.f32.mrf.mxu0  ;;  %v5750_v54 = vadd.f32 %v13789_v14, %v18296_v16  ;;  %12946 = vmatpush3.msra.mxu1 %v20776_v52  ;;  %14031 = vmatprep.mubr.msk.bf16.mxu1 %vm4142_vm5, %v7416_v50  ;;  %v20780_v50 = vld [vmem:[#allocation18_spill] sm:$0xff]  ;;  %v20781_v36 = vld [vmem:[#allocation33_spill] sm:$0xff] }
 0x68f   : > { %12947 = vmatprep.subr.mxu1 %v20777_v44  ;;  %v5645_v42 = vpop.f32.mrf.mxu1  ;;  %v20782_v44 = vld [vmem:[#allocation17_spill] sm:$0xff] }
 0x690   : > { %v5966_v21 = vpop.f32.mrf.mxu0  ;;  %v18438_v8 = vadd.f32 %v13829_v34, %v5750_v54  ;;  %v5748_v61 = vadd.f32 %v5645_v42, %v18300_v58  ;;  %12948 = vmatpush3.msra.mxu1 %v20778_v29  ;;  %v7417_v34 = vpack.c.bf16 %v7393_v39, %v7392_v23  ;;  %v7418_v42 = vpack.c.bf16 %v7395_v18, %v7394_v4  ;;  %v20785_v23 = vld [vmem:[#allocation31_spill] sm:$0xff] }
 0x691   : > { %12949 = vmatprep.subr.mxu1 %v20779_v53  ;;  %v13790_v31 = vpop.f32.mrf.mxu1  ;;  %v20784_v53 = vld [vmem:[#allocation16_spill] sm:$0xff]  ;;  %v20786_v4 = vld [vmem:[#allocation15_spill] sm:$0xff] }
 0x692   : > { %v13830_v16 = vpop.f32.mrf.mxu0  ;;  %v18443_v5 = vadd.f32 %v5966_v21, %v5748_v61  ;;  %v5751_v37 = vadd.f32 %v13790_v31, %v18302_v11  ;;  %12950 = vmatpush3.msra.mxu1 %v20780_v50  ;;  %v20783_v21 = vld [vmem:[#allocation32_spill] sm:$0xff]  ;;  %v20787_v50 = vld [vmem:[#allocation30_spill] sm:$0xff] }
 0x693   : > { %12951 = vmatprep.subr.mxu1 %v20781_v36  ;;  %v5648_v14 = vpop.f32.mrf.mxu1  ;;  %v7396_v18 = vld [vmem:[#allocation3 + $0x10a] sm:$0xff] }
 0x694   : > { %v18448_v58 = vpop.f32.mrf.mxu0  ;;  %v18450_v54 = vadd.f32 %v13830_v16, %v5751_v37  ;;  %v18453_v52 = vadd.f32 %v5648_v14, %v18304_v26  ;;  %12952 = vmatpush3.msra.mxu1 %v20782_v44  ;;  %v7397_v37 = vld [vmem:[#allocation3 + $0x112] sm:$0xff]  ;;  %v7398_v14 = vld [vmem:[#allocation3 + $0x122] sm:$0xff] }
 0x695   : > { %12953 = vmatprep.subr.mxu1 %v20783_v21  ;;  %v13793_v61 = vpop.f32.mrf.mxu1  ;;  %14032 = vmatmul.mubr.msk.bf16.gmra.mxu1 %vm4142_vm5, %v7417_v34  ;;  %v7399_v34 = vld [vmem:[#allocation3 + $0x12a] sm:$0xff]  ;;  %v20788_v21 = vld [vmem:[#allocation14_spill] sm:$0xff] }
 0x696   : > { %v13833_v11 = vpop.f32.mrf.mxu0  ;;  %v5754_v29 = vadd.f32 %v13793_v61, %v18308_v20  ;;  %12954 = vmatpush3.msra.mxu1 %v20784_v53  ;;  %14035 = vmatprep.mubr.msk.bf16.mxu1 %vm4142_vm5, %v7418_v42  ;;  %v20789_v61 = vld [vmem:[#allocation29_spill] sm:$0xff] }
 0x697   : > { %12955 = vmatprep.subr.mxu1 %v20785_v23  ;;  %v5661_v39 = vpop.f32.mrf.mxu1 }
 0x698   : > { %v5982_v26 = vpop.f32.mrf.mxu0  ;;  %v18462_v31 = vadd.f32 %v13833_v11, %v5754_v29  ;;  %v5752_v16 = vadd.f32 %v5661_v39, %v18312_v30  ;;  %12956 = vmatpush3.msra.mxu1 %v20786_v4  ;;  %v7419_v29 = vpack.c.bf16 %v7397_v37, %v7396_v18  ;;  %v20790_v39 = vld [vmem:[#allocation13_spill] sm:$0xff]  ;;  %v7420_v4 = vpack.c.bf16 %v7399_v34, %v7398_v14 }
 0x699   : > { %12957 = vmatprep.subr.mxu1 %v20787_v50  ;;  %v13794_v36 = vpop.f32.mrf.mxu1  ;;  %v7402_v34 = vld [vmem:[#allocation3 + $0x152] sm:$0xff] }
 0x69a   : > { %v13834_v20 = vpop.f32.mrf.mxu0  ;;  %v18467_v44 = vadd.f32 %v5982_v26, %v5752_v16  ;;  %v5755_v42 = vadd.f32 %v13794_v36, %v18314_v41  ;;  %12958 = vmatpush3.msra.mxu1 %v20788_v21  ;;  %v5389_v41 = vadd.f32 %v18326_v2, %v18324_v10 }
 0x69b   : > { %12959 = vmatprep.subr.mxu1 %v20789_v61  ;;  %v5664_v11 = vpop.f32.mrf.mxu1  ;;  %v7403_v61 = vld [vmem:[#allocation3 + $0x15a] sm:$0xff] }
 0x69c   : > { %v18472_v30 = vpop.f32.mrf.mxu0  ;;  %v18474_v53 = vadd.f32 %v13834_v20, %v5755_v42  ;;  %v18477_v23 = vadd.f32 %v5664_v11, %v18316_v40  ;;  %12960 = vmatpush3.msra.mxu1 %v20790_v39  ;;  %v7400_v20 = vld [vmem:[#allocation3 + $0x13a] sm:$0xff]  ;;  %v7401_v42 = vld [vmem:[#allocation3 + $0x142] sm:$0xff] }
 0x69d   : > { %v13797_v26 = vpop.f32.mrf.mxu1  ;;  %14036 = vmatmul.mubr.msk.bf16.gmra.mxu1 %vm4142_vm5, %v7419_v29  ;;  %v7421_v2 = vpack.c.bf16 %v7401_v42, %v7400_v20  ;;  %v7404_v20 = vld [vmem:[#allocation3 + $0x16a] sm:$0xff]  ;;  %v7405_v42 = vld [vmem:[#allocation3 + $0x172] sm:$0xff] }
 0x69e   : > { %v13837_v16 = vpop.f32.mrf.mxu0  ;;  %v5758_v50 = vadd.f32 %v13797_v26, %v18320_v15  ;;  %14039 = vmatprep.mubr.msk.bf16.mxu1 %vm4142_vm5, %v7420_v4  ;;  %v7422_v4 = vpack.c.bf16 %v7403_v61, %v7402_v34 }
 0x69f   : > { %v5677_v18 = vpop.f32.mrf.mxu1 }
 0x6a0   : > { %v5998_v37 = vpop.f32.mrf.mxu0  ;;  %v18485_v36 = vadd.f32 %v13837_v16, %v5758_v50  ;;  %v5756_v40 = vadd.f32 %v5677_v18, %v5389_v41  ;;  %v5405_v41 = vadd.f32 %v18342_v9, %v18340_v51 }
 0x6a1   : > { %v13798_v21 = vpop.f32.mrf.mxu1 }
 0x6a2   : > { %v13838_v14 = vpop.f32.mrf.mxu0  ;;  %v18487_v11 = vadd.f32 %v5998_v37, %v5756_v40  ;;  %v5759_v29 = vadd.f32 %v13798_v21, %v18328_v35 }
 0x6a3   : > { %v18490_v10 = vpop.f32.mrf.mxu1 }
 0x6a4   : > { %v18492_v15 = vpop.f32.mrf.mxu0  ;;  %v18494_v39 = vadd.f32 %v13838_v14, %v5759_v29 }
 0x6a5   : > { %v13801_v26 = vpop.f32.mrf.mxu1  ;;  %14040 = vmatmul.mubr.msk.bf16.gmra.mxu1 %vm4142_vm5, %v7421_v2 }
 0x6a6   : > { %v13841_v16 = vpop.f32.mrf.mxu0  ;;  %v5762_v50 = vadd.f32 %v13801_v26, %v18336_v13  ;;  %14043 = vmatprep.mubr.msk.bf16.mxu1 %vm4142_vm5, %v7422_v4  ;;  %v7423_v13 = vpack.c.bf16 %v7405_v42, %v7404_v20  ;;  %v5421_v26 = vadd.f32 %v18360_v56, %v18358_v47 }
 0x6a7   : > { %v5693_v35 = vpop.f32.mrf.mxu1 }
 0x6a8   : > { %v6014_v18 = vpop.f32.mrf.mxu0  ;;  %v18501_v37 = vadd.f32 %v13841_v16, %v5762_v50  ;;  %v5760_v40 = vadd.f32 %v5693_v35, %v5405_v41  ;;  %v7409_v41 = vld [vmem:[#allocation3 + $0x1a2] sm:$0xff] }
 0x6a9   : > { %v13802_v21 = vpop.f32.mrf.mxu1 }
 0x6aa   : > { %v13842_v14 = vpop.f32.mrf.mxu0  ;;  %v18503_v34 = vadd.f32 %v6014_v18, %v5760_v40  ;;  %v5763_v61 = vadd.f32 %v13802_v21, %v18344_v12  ;;  %v7408_v12 = vld [vmem:[#allocation3 + $0x19a] sm:$0xff] }
 0x6ab   : > { %v18506_v29 = vpop.f32.mrf.mxu1  ;;  %v7425_v21 = vpack.c.bf16 %v7409_v41, %v7408_v12 }
 0x6ac   : > { %v18508_v51 = vpop.f32.mrf.mxu0  ;;  %v18510_v9 = vadd.f32 %v13842_v14, %v5763_v61 }
 0x6ad   : > { %v13805_v2 = vpop.f32.mrf.mxu1  ;;  %14044 = vmatmul.mubr.msk.bf16.gmra.mxu1 %vm4142_vm5, %v7423_v13 }
 0x6ae   : > { %v13845_v4 = vpop.f32.mrf.mxu0  ;;  %v5766_v16 = vadd.f32 %v13805_v2, %v18352_v19  ;;  %14047 = vmatprep.mubr.msk.bf16.mxu1 %vm4142_vm5, %v18246_v48  ;;  %v5437_v2 = vadd.f32 %v18375_v55, %v18373_v45 }
 0x6af   : > { %v5709_v50 = vpop.f32.mrf.mxu1 }
 0x6b0   : > { %v6030_v35 = vpop.f32.mrf.mxu0  ;;  %v18518_v18 = vadd.f32 %v13845_v4, %v5766_v16  ;;  %v5764_v40 = vadd.f32 %v5709_v50, %v5421_v26 }
 0x6b1   : > { %v13806_v20 = vpop.f32.mrf.mxu1 }
 0x6b2   : > { %v13846_v42 = vpop.f32.mrf.mxu0  ;;  %v18520_v14 = vadd.f32 %v6030_v35, %v5764_v40  ;;  %v5767_v61 = vadd.f32 %v13806_v20, %v18362_v0 }
 0x6b3   : > { %v18523_v47 = vpop.f32.mrf.mxu1 }
 0x6b4   : > { %v18525_v19 = vpop.f32.mrf.mxu0  ;;  %v18527_v56 = vadd.f32 %v13846_v42, %v5767_v61 }
 0x6b5   : > { %v13809_v48 = vpop.f32.mrf.mxu1  ;;  %14048 = vmatmul.mubr.msk.bf16.gmra.mxu1 %vm4142_vm5, %v7425_v21 }
 0x6b6   : > { %v13849_v13 = vpop.f32.mrf.mxu0  ;;  %v5770_v4 = vadd.f32 %v13809_v48, %v18370_v63  ;;  %v6061_v63 = vadd.f32 %v18388_v22, %v18393_v60 }
 0x6b7   : > { %v5725_v26 = vpop.f32.mrf.mxu1 }
 0x6b8   : > { %v6046_v16 = vpop.f32.mrf.mxu0  ;;  %v18533_v12 = vadd.f32 %v13849_v13, %v5770_v4  ;;  %v5768_v0 = vadd.f32 %v5725_v26, %v5437_v2 }
 0x6b9   : > { %v13810_v41 = vpop.f32.mrf.mxu1 }
 0x6ba   : > { %v13850_v50 = vpop.f32.mrf.mxu0  ;;  %v18535_v35 = vadd.f32 %v6046_v16, %v5768_v0  ;;  %v5771_v40 = vadd.f32 %v13810_v41, %v18377_v17 }
 0x6bb   : > { %v18538_v20 = vpop.f32.mrf.mxu1 }
 0x6bc   : > { %20791 = vst [vmem:[#allocation49_spill] sm:$0xff] %v18538_v20  ;;  %v18540_v42 = vpop.f32.mrf.mxu0  ;;  %v18542_v21 = vadd.f32 %v13850_v50, %v5771_v40 }
 0x6bd   : > { %20792 = vst [vmem:[#allocation50_spill] sm:$0xff] %v18540_v42  ;;  %v13861_v45 = vpop.f32.mrf.mxu1 }
 0x6be   : > { %v13901_v55 = vpop.f32.mrf.mxu0  ;;  %v6384_v61 = vadd.f32 %v13861_v45, %v18390_v1 }
 0x6bf   : > { %v6255_v48 = vpop.f32.mrf.mxu1 }
 0x6c0   : > { %v6576_v13 = vpop.f32.mrf.mxu0  ;;  %v18547_v2 = vadd.f32 %v13901_v55, %v6384_v61  ;;  %v6382_v4 = vadd.f32 %v6255_v48, %v6061_v63 }
 0x6c1   : > { %v13862_v26 = vpop.f32.mrf.mxu1 }
 0x6c2   : > { %v13902_v17 = vpop.f32.mrf.mxu0  ;;  %v18549_v16 = vadd.f32 %v6576_v13, %v6382_v4  ;;  %v6385_v0 = vadd.f32 %v13862_v26, %v18402_v59 }
 0x6c3   : > { %v18552_v41 = vpop.f32.mrf.mxu1 }
 0x6c4   : > { %20793 = vst [vmem:[#allocation51_spill] sm:$0xff] %v18549_v16  ;;  %v18554_v50 = vpop.f32.mrf.mxu0  ;;  %v18556_v40 = vadd.f32 %v13902_v17, %v6385_v0 }
 0x6c5   : > { %v13865_v22 = vpop.f32.mrf.mxu1 }
 0x6c6   : > { %v13905_v60 = vpop.f32.mrf.mxu0  ;;  %v6388_v1 = vadd.f32 %v13865_v22, %v18414_v43 }
 0x6c7   : > { %v6271_v45 = vpop.f32.mrf.mxu1 }
 0x6c8   : > { %v6592_v55 = vpop.f32.mrf.mxu0  ;;  %v18559_v61 = vadd.f32 %v13905_v60, %v6388_v1  ;;  %v6386_v63 = vadd.f32 %v6271_v45, %v18419_v6 }
 0x6c9   : > { %v13866_v48 = vpop.f32.mrf.mxu1 }
 0x6ca   : > { %v13906_v13 = vpop.f32.mrf.mxu0  ;;  %v18562_v4 = vadd.f32 %v6592_v55, %v6386_v63  ;;  %v6389_v59 = vadd.f32 %v13866_v48, %v18426_v7 }
 0x6cb   : > { %v18565_v26 = vpop.f32.mrf.mxu1 }
 0x6cc   : > { %20794 = vst [vmem:[#allocation52_spill] sm:$0xff] %v18562_v4  ;;  %v18567_v17 = vpop.f32.mrf.mxu0  ;;  %v18569_v0 = vadd.f32 %v13906_v13, %v6389_v59 }
 0x6cd   : > { %v13869_v16 = vpop.f32.mrf.mxu1 }
 0x6ce   : > { %v13909_v43 = vpop.f32.mrf.mxu0  ;;  %v6392_v22 = vadd.f32 %v13869_v16, %v18438_v8 }
 0x6cf   : > { %v6287_v60 = vpop.f32.mrf.mxu1 }
 0x6d0   : > { %v6608_v1 = vpop.f32.mrf.mxu0  ;;  %v18572_v42 = vadd.f32 %v13909_v43, %v6392_v22  ;;  %v6390_v6 = vadd.f32 %v6287_v60, %v18443_v5 }
 0x6d1   : > { %v13870_v45 = vpop.f32.mrf.mxu1 }
 0x6d2   : > { %v13910_v55 = vpop.f32.mrf.mxu0  ;;  %v18575_v63 = vadd.f32 %v6608_v1, %v6390_v6  ;;  %v6393_v7 = vadd.f32 %v13870_v45, %v18450_v54 }
 0x6d3   : > { %v18578_v48 = vpop.f32.mrf.mxu1 }
 0x6d4   : > { %20795 = vst [vmem:[#allocation53_spill] sm:$0xff] %v18575_v63  ;;  %v18580_v13 = vpop.f32.mrf.mxu0  ;;  %v18582_v59 = vadd.f32 %v13910_v55, %v6393_v7 }
 0x6d5   : > { %v13873_v4 = vpop.f32.mrf.mxu1 }
 0x6d6   : > { %v13913_v8 = vpop.f32.mrf.mxu0  ;;  %v6396_v16 = vadd.f32 %v13873_v4, %v18462_v31 }
 0x6d7   : > { %v6303_v43 = vpop.f32.mrf.mxu1 }
 0x6d8   : > { %v6624_v22 = vpop.f32.mrf.mxu0  ;;  %v18585_v20 = vadd.f32 %v13913_v8, %v6396_v16  ;;  %v6394_v5 = vadd.f32 %v6303_v43, %v18467_v44 }
 0x6d9   : > { %v13874_v60 = vpop.f32.mrf.mxu1 }
 0x6da   : > { %v13914_v1 = vpop.f32.mrf.mxu0  ;;  %v18588_v6 = vadd.f32 %v6624_v22, %v6394_v5  ;;  %v6397_v54 = vadd.f32 %v13874_v60, %v18474_v53 }
 0x6db   : > { %v18591_v45 = vpop.f32.mrf.mxu1 }
 0x6dc   : > { %v18593_v55 = vpop.f32.mrf.mxu0  ;;  %v18595_v7 = vadd.f32 %v13914_v1, %v6397_v54  ;;  %v5408_v54 = vadd.f32 %v18348_v33, %v18346_v32 }
 0x6dd   : > { %v13877_v63 = vpop.f32.mrf.mxu1 }
 0x6de   : > { %v13917_v31 = vpop.f32.mrf.mxu0  ;;  %v6400_v4 = vadd.f32 %v13877_v63, %v18485_v36 }
 0x6df   : > { %v6319_v8 = vpop.f32.mrf.mxu1 }
 0x6e0   : > { %v6640_v16 = vpop.f32.mrf.mxu0  ;;  %v18598_v24 = vadd.f32 %v13917_v31, %v6400_v4  ;;  %v6398_v44 = vadd.f32 %v6319_v8, %v18487_v11  ;;  %v5761_v4 = vadd.f32 %v18506_v29, %v5408_v54  ;;  %v5424_v29 = vadd.f32 %v18366_v27, %v18364_v3 }
 0x6e1   : > { %v13878_v43 = vpop.f32.mrf.mxu1 }
 0x6e2   : > { %v13918_v22 = vpop.f32.mrf.mxu0  ;;  %v18601_v5 = vadd.f32 %v6640_v16, %v6398_v44  ;;  %v6401_v53 = vadd.f32 %v13878_v43, %v18494_v39  ;;  %v6082_v32 = vadd.f32 %v18508_v51, %v5761_v4 }
 0x6e3   : > { %v18604_v60 = vpop.f32.mrf.mxu1 }
 0x6e4   : > { %20796 = vst [vmem:[#allocation54_spill] sm:$0xff] %v18601_v5  ;;  %v18606_v1 = vpop.f32.mrf.mxu0  ;;  %v18610_v36 = vadd.f32 %v13918_v22, %v6401_v53 }
 0x6e5   : > { %v13881_v63 = vpop.f32.mrf.mxu1 }
 0x6e6   : > { %v13921_v31 = vpop.f32.mrf.mxu0  ;;  %v6404_v11 = vadd.f32 %v13881_v63, %v18501_v37 }
 0x6e7   : > { %v6335_v8 = vpop.f32.mrf.mxu1 }
 0x6e8   : > { %v18614_v16 = vpop.f32.mrf.mxu0  ;;  %v18616_v44 = vadd.f32 %v13921_v31, %v6404_v11  ;;  %v18619_v39 = vadd.f32 %v6335_v8, %v18503_v34  ;;  %v5765_v11 = vadd.f32 %v18523_v47, %v5424_v29 }
 0x6e9   : > { %20797 = vst [vmem:[#allocation55_spill] sm:$0xff] %v18614_v16  ;;  %v13882_v43 = vpop.f32.mrf.mxu1 }
 0x6ea   : > { %v13922_v5 = vpop.f32.mrf.mxu0  ;;  %v6405_v33 = vadd.f32 %v13882_v43, %v18510_v9 }
 0x6eb   : > { %v6338_v22 = vpop.f32.mrf.mxu1 }
 0x6ec   : > { %v6659_v53 = vpop.f32.mrf.mxu0  ;;  %v18625_v37 = vadd.f32 %v13922_v5, %v6405_v33  ;;  %v6403_v54 = vadd.f32 %v6338_v22, %v6082_v32  ;;  %v6086_v5 = vadd.f32 %v18525_v19, %v5765_v11 }
 0x6ed   : > { %v13885_v63 = vpop.f32.mrf.mxu1 }
 0x6ee   : > { %v13925_v31 = vpop.f32.mrf.mxu0  ;;  %v18628_v34 = vadd.f32 %v6659_v53, %v6403_v54  ;;  %v6408_v8 = vadd.f32 %v13885_v63, %v18518_v18 }
 0x6ef   : > { %v6351_v16 = vpop.f32.mrf.mxu1 }
 0x6f0   : > { %v18631_v51 = vpop.f32.mrf.mxu0  ;;  %v18633_v9 = vadd.f32 %v13925_v31, %v6408_v8  ;;  %v18636_v4 = vadd.f32 %v6351_v16, %v18520_v14 }
 0x6f1   : > { %v13886_v3 = vpop.f32.mrf.mxu1 }
 0x6f2   : > { %v13926_v27 = vpop.f32.mrf.mxu0  ;;  %v6409_v43 = vadd.f32 %v13886_v3, %v18527_v56 }
 0x6f3   : > { %v6354_v32 = vpop.f32.mrf.mxu1 }
 0x6f4   : > { %v6675_v47 = vpop.f32.mrf.mxu0  ;;  %v18640_v33 = vadd.f32 %v13926_v27, %v6409_v43  ;;  %v6407_v22 = vadd.f32 %v6354_v32, %v6086_v5 }
 0x6f5   : > { %v13889_v18 = vpop.f32.mrf.mxu1 }
 0x6f6   : > { %v13929_v53 = vpop.f32.mrf.mxu0  ;;  %v18642_v29 = vadd.f32 %v6675_v47, %v6407_v22  ;;  %v6412_v54 = vadd.f32 %v13889_v18, %v18533_v12  ;;  %v6062_v12 = vadd.f32 %v18400_v38, %v18405_v28  ;;  %v6066_v28 = vadd.f32 %v18424_v46, %v18429_v49 }
 0x6f7   : > { %v6367_v63 = vpop.f32.mrf.mxu1 }
 0x6f8   : > { %v18645_v14 = vpop.f32.mrf.mxu0  ;;  %v18647_v16 = vadd.f32 %v13929_v53, %v6412_v54  ;;  %v18650_v19 = vadd.f32 %v6367_v63, %v18535_v35  ;;  %v6383_v43 = vadd.f32 %v18552_v41, %v6062_v12 }
 0x6f9   : > { %v13890_v56 = vpop.f32.mrf.mxu1 }
 0x6fa   : > { %v18652_v31 = vpop.f32.mrf.mxu0  ;;  %v18655_v11 = vadd.f32 %v13890_v56, %v18542_v21  ;;  %v6704_v53 = vadd.f32 %v18554_v50, %v6383_v43 }
 0x6fb   : > { %v18657_v8 = vpop.f32.mrf.mxu1 }
 0x6fc   : > { %v18659_v3 = vpop.f32.mrf.mxu0 }
 0x6fd   : > { %v13941_v27 = vpop.f32.mrf.mxu1 }
 0x6fe   : > { %v13981_v5 = vpop.f32.mrf.mxu0  ;;  %v7027_v35 = vadd.f32 %v13941_v27, %v18547_v2  ;;  %v6387_v27 = vadd.f32 %v18565_v26, %v6066_v28  ;;  %v6070_v26 = vadd.f32 %v18448_v58, %v18453_v52  ;;  %v6074_v52 = vadd.f32 %v18472_v30, %v18477_v23 }
 0x6ff   : > { %v18665_v32 = vpop.f32.mrf.mxu1 }
 0x700   : > { %20798 = vst [vmem:[#allocation56_spill] sm:$0xff] %v18665_v32  ;;  %v18667_v47 = vpop.f32.mrf.mxu0  ;;  %v18669_v22 = vadd.f32 %v13981_v5, %v7027_v35  ;;  %v6708_v46 = vadd.f32 %v18567_v17, %v6387_v27 }
 0x701   : > { %20799 = vst [vmem:[#allocation57_spill] sm:$0xff] %v18667_v47  ;;  %v13942_v21 = vpop.f32.mrf.mxu1 }
 0x702   : > { %v13982_v18 = vpop.f32.mrf.mxu0  ;;  %v7028_v54 = vadd.f32 %v13942_v21, %v18556_v40 }
 0x703   : > { %v6901_v63 = vpop.f32.mrf.mxu1 }
 0x704   : > { %v7222_v38 = vpop.f32.mrf.mxu0  ;;  %v18675_v41 = vadd.f32 %v13982_v18, %v7028_v54  ;;  %v7026_v2 = vadd.f32 %v6901_v63, %v6704_v53 }
 0x705   : > { %v13945_v56 = vpop.f32.mrf.mxu1 }
 0x706   : > { %v13985_v12 = vpop.f32.mrf.mxu0  ;;  %v18678_v5 = vadd.f32 %v7222_v38, %v7026_v2  ;;  %v7031_v35 = vadd.f32 %v13945_v56, %v18559_v61  ;;  %v6391_v38 = vadd.f32 %v18578_v48, %v6070_v26 }
 0x707   : > { %v18681_v47 = vpop.f32.mrf.mxu1 }
 0x708   : > { %20800 = vst [vmem:[#allocation58_spill] sm:$0xff] %v18681_v47  ;;  %v18683_v50 = vpop.f32.mrf.mxu0  ;;  %v18685_v40 = vadd.f32 %v13985_v12, %v7031_v35  ;;  %v5392_v35 = vadd.f32 %v18332_v62, %v18330_v25  ;;  %v7700_v25 = vld [vmem:[%s20495_s8 + $0x8] sm:$0xff] }
 0x709   : > { %20801 = vst [vmem:[#allocation59_spill] sm:$0xff] %v18683_v50  ;;  %v13946_v43 = vpop.f32.mrf.mxu1  ;;  %7784 = vmatprep.mubr.f32.mxu0 %v7700_v25  ;;  %v20833_v50 = vld [vmem:[#allocation48_spill] sm:$0xff] }
 0x70a   : > { %v13986_v21 = vpop.f32.mrf.mxu0  ;;  %v7032_v49 = vadd.f32 %v13946_v43, %v18569_v0  ;;  %v6712_v0 = vadd.f32 %v18580_v13, %v6391_v38  ;;  %v5757_v13 = vadd.f32 %v18490_v10, %v5392_v35 }
 0x70b   : > { %v6917_v18 = vpop.f32.mrf.mxu1 }
 0x70c   : > { %v18691_v53 = vadd.f32 %v13986_v21, %v7032_v49  ;;  %v7030_v54 = vadd.f32 %v6917_v18, %v6708_v46  ;;  %v7238_v61 = vpop.f32.mrf.mxu0  ;;  %v6078_v62 = vadd.f32 %v18492_v15, %v5757_v13 }
 0x70d   : > { %v13949_v63 = vpop.f32.mrf.mxu1 }
 0x70e   : > { %v18694_v28 = vadd.f32 %v7238_v61, %v7030_v54  ;;  %v18697_v2 = vadd.f32 %v13949_v63, %v18572_v42  ;;  %v6395_v42 = vadd.f32 %v18591_v45, %v6074_v52  ;;  %v6399_v49 = vadd.f32 %v18604_v60, %v6078_v62 }
 0x70f   : > { %v18699_v56 = vpop.f32.mrf.mxu1 }
 0x710   : > { %v6716_v46 = vadd.f32 %v18593_v55, %v6395_v42  ;;  %v18732_v55 = vpop.f32.mrf.mxu0  ;;  %v6720_v26 = vadd.f32 %v18606_v1, %v6399_v49 }
 0x711   : > { %v13950_v17 = vpop.f32.mrf.mxu1 }
 0x712   : > { %v18703_v12 = vadd.f32 %v13950_v17, %v18582_v59  ;;  %v18740_v15 = vpop.f32.mrf.mxu0 }
 0x713   : > { %v6933_v58 = vpop.f32.mrf.mxu1 }
 0x714   : > { %v18707_v27 = vadd.f32 %v6933_v58, %v6712_v0 }
 0x715   : > { %v13953_v48 = vpop.f32.mrf.mxu1 }
 0x716   : > { %v18713_v43 = vadd.f32 %v13953_v48, %v18585_v20 }
 0x717   : > { %v18715_v21 = vpop.f32.mrf.mxu1 }
 0x719   : > { %v13954_v59 = vpop.f32.mrf.mxu1 }
 0x71a   : > { %v18720_v30 = vadd.f32 %v13954_v59, %v18595_v7 }
 0x71b   : > { %v6949_v23 = vpop.f32.mrf.mxu1 }
 0x71c   : > { %v18726_v45 = vadd.f32 %v6949_v23, %v6716_v46 }
 0x71d   : > { %v13957_v20 = vpop.f32.mrf.mxu1 }
 0x71e   : > { %v18730_v10 = vadd.f32 %v13957_v20, %v18598_v24  ;;  %v18747_v24 = vpop.f32.mrf.mxu0  ;;  %v8132_v20 = vld [vmem:[%s20809_s9 + $0x8] sm:$0xff] }
 0x71f   : > { %v18734_v7 = vpop.f32.mrf.mxu1  ;;  %8211 = vmatprep.mubr.f32.mxu1 %v8132_v20 }
 0x720   : > { %20802 = vst [vmem:[#allocation60_spill] sm:$0xff] %v18730_v10  ;;  %20803 = vst [vmem:[#allocation61_spill] sm:$0xff] %v18734_v7  ;;  %v18754_v1 = vpop.f32.mrf.mxu0 }
 0x721   : > { %v13958_v18 = vpop.f32.mrf.mxu1 }
 0x722   : > { %v18738_v54 = vadd.f32 %v13958_v18, %v18610_v36 }
 0x723   : > { %v6965_v61 = vpop.f32.mrf.mxu1 }
 0x724   : > { %20804 = vst [vmem:[#allocation67_spill] sm:$0xff] %v18738_v54  ;;  %v18742_v63 = vadd.f32 %v6965_v61, %v6720_v26  ;;  %v8133_v26 = vld [vmem:[%s20809_s9 + $0x10] sm:$0xff]  ;;  %v8136_v61 = vld [vmem:[%s20809_s9 + $0x28] sm:$0xff] }
 0x725   : > { %v13961_v38 = vpop.f32.mrf.mxu1 }
 0x726   : > { %20805 = vst [vmem:[#allocation68_spill] sm:$0xff] %v18742_v63  ;;  %v18745_v60 = vadd.f32 %v13961_v38, %v18616_v44  ;;  %v18762_v44 = vpop.f32.mrf.mxu0 }
 0x727   : > { %v18749_v17 = vpop.f32.mrf.mxu1 }
 0x728   : > { %20806 = vst [vmem:[#allocation62_spill] sm:$0xff] %v18745_v60  ;;  %20807 = vst [vmem:[#allocation63_spill] sm:$0xff] %v18749_v17 }
 0x729   : > { %v13962_v0 = vpop.f32.mrf.mxu1 }
 0x72a   : > { %v18752_v58 = vadd.f32 %v13962_v0, %v18625_v37  ;;  %v18769_v37 = vpop.f32.mrf.mxu0 }
 0x72b   : > { %v6981_v36 = vpop.f32.mrf.mxu1 }
 0x72c   : > { %v18757_v52 = vadd.f32 %v6981_v36, %v18628_v34 }
 0x72d   : > { %v13965_v48 = vpop.f32.mrf.mxu1 }
 0x72e   : > { %20808 = vst [vmem:[#allocation64_spill] sm:$0xff] %v18757_v52  ;;  %v18760_v35 = vadd.f32 %v13965_v48, %v18633_v9  ;;  %v18777_v9 = vpop.f32.mrf.mxu0 }
 0x72f   : > { %v18764_v42 = vpop.f32.mrf.mxu1 }
 0x731   : > { %v13966_v13 = vpop.f32.mrf.mxu1 }
 0x732   : > { %v18767_v59 = vadd.f32 %v13966_v13, %v18640_v33  ;;  %v8131_v33 = vld [vmem:[%s20809_s9] sm:$0xff] }
 0x733   : > { %v6997_v46 = vpop.f32.mrf.mxu1  ;;  %8212 = vmatmul.mubr.f32.vlgmr.msra.gmra.mxu1 %v8131_v33  ;;  %v8135_v13 = vld [vmem:[%s20809_s9 + $0x20] sm:$0xff] }
 0x734   : > { %v18772_v23 = vadd.f32 %v6997_v46, %v18642_v29  ;;  %v8134_v29 = vld [vmem:[%s20809_s9 + $0x18] sm:$0xff] }
 0x735   : > { %v13969_v34 = vpop.f32.mrf.mxu1  ;;  %8216 = vmatprep.mubr.f32.mxu1 %v8134_v29  ;;  %v8138_v46 = vld [vmem:[%s20809_s9 + $0x38] sm:$0xff]  ;;  %v8137_v29 = vld [vmem:[%s20809_s9 + $0x30] sm:$0xff] }
 0x736   : > { %v18775_v25 = vadd.f32 %v13969_v34, %v18647_v16  ;;  %v18792_v16 = vpop.f32.mrf.mxu0 }
 0x737   : > { %v18779_v62 = vpop.f32.mrf.mxu1  ;;  %8217 = vmatmul.mubr.f32.gmra.mxu1 %v8133_v26 }
 0x738   : > { %v18805_v36 = vpop.f32.mrf.mxu0  ;;  %8221 = vmatprep.mubr.f32.mxu1 %v8136_v61  ;;  %v8140_v61 = vld [vmem:[%s20809_s9 + $0x48] sm:$0xff] }
 0x739   : > { %v18790_v49 = vpop.f32.mrf.mxu1  ;;  %20811 = vst [vmem:[#allocation69_spill] sm:$0xff] %v18805_v36 }
 0x73b   : > { %v18794_v18 = vpop.f32.mrf.mxu1  ;;  %8222 = vmatmul.mubr.f32.gmra.mxu1 %v8135_v13 }
 0x73c   : > { %8226 = vmatprep.mubr.f32.mxu1 %v8138_v46  ;;  %v8139_v46 = vld [vmem:[%s20809_s9 + $0x40] sm:$0xff] }
 0x73d   : > { %v14021_v38 = vpop.f32.mrf.mxu1 }
 0x73e   : > { %v18803_v0 = vadd.f32 %v14021_v38, %v18669_v22  ;;  %v18818_v22 = vpop.f32.mrf.mxu0 }
 0x73f   : > { %v18807_v48 = vpop.f32.mrf.mxu1  ;;  %20814 = vst [vmem:[#allocation77_spill] sm:$0xff] %v18818_v22  ;;  %8227 = vmatmul.mubr.f32.gmra.mxu1 %v8137_v29 }
 0x740   : > { %20810 = vst [vmem:[#allocation65_spill] sm:$0xff] %v18803_v0  ;;  %20812 = vst [vmem:[#allocation72_spill] sm:$0xff] %v18807_v48  ;;  %v18832_v13 = vpop.f32.mrf.mxu0  ;;  %8231 = vmatprep.mubr.f32.mxu1 %v8140_v61  ;;  %v8141_v61 = vld [vmem:[%s20809_s9 + $0x50] sm:$0xff]  ;;  %v8144_v48 = vld [vmem:[%s20809_s9 + $0x68] sm:$0xff] }
 0x741   : > { %v14022_v34 = vpop.f32.mrf.mxu1  ;;  %20817 = vst [vmem:[#allocation86_spill] sm:$0xff] %v18832_v13 }
 0x742   : > { %v18816_v20 = vadd.f32 %v14022_v34, %v18675_v41 }
 0x743   : > { %v7543_v33 = vpop.f32.mrf.mxu1  ;;  %8232 = vmatmul.mubr.f32.gmra.mxu1 %v8139_v46 }
 0x744   : > { %20813 = vst [vmem:[#allocation70_spill] sm:$0xff] %v18816_v20  ;;  %v18824_v26 = vadd.f32 %v7543_v33, %v18678_v5  ;;  %v8142_v5 = vld [vmem:[%s20809_s9 + $0x58] sm:$0xff] }
 0x745   : > { %v14025_v38 = vpop.f32.mrf.mxu1  ;;  %8236 = vmatprep.mubr.f32.mxu1 %v8142_v5  ;;  %v8143_v5 = vld [vmem:[%s20809_s9 + $0x60] sm:$0xff] }
 0x746   : > { %20815 = vst [vmem:[#allocation81_spill] sm:$0xff] %v18824_v26  ;;  %v18830_v41 = vadd.f32 %v14025_v38, %v18685_v40  ;;  %v18845_v40 = vpop.f32.mrf.mxu0 }
 0x747   : > { %v18834_v34 = vpop.f32.mrf.mxu1  ;;  %20820 = vst [vmem:[#allocation82_spill] sm:$0xff] %v18845_v40  ;;  %8237 = vmatmul.mubr.f32.gmra.mxu1 %v8141_v61 }
 0x748   : > { %20816 = vst [vmem:[#allocation71_spill] sm:$0xff] %v18830_v41  ;;  %20818 = vst [vmem:[#allocation73_spill] sm:$0xff] %v18834_v34  ;;  %8241 = vmatprep.mubr.f32.mxu1 %v8144_v48  ;;  %v8145_v48 = vld [vmem:[%s20809_s9 + $0x70] sm:$0xff] }
 0x749   : > { %v14026_v33 = vpop.f32.mrf.mxu1 }
 0x74a   : > { %v18843_v26 = vadd.f32 %v14026_v33, %v18691_v53  ;;  %v18858_v53 = vpop.f32.mrf.mxu0 }
 0x74b   : > { %v7559_v29 = vpop.f32.mrf.mxu1  ;;  %20822 = vst [vmem:[#allocation88_spill] sm:$0xff] %v18858_v53  ;;  %8242 = vmatmul.mubr.f32.gmra.mxu1 %v8143_v5 }
 0x74c   : > { %20819 = vst [vmem:[#allocation78_spill] sm:$0xff] %v18843_v26  ;;  %v18851_v38 = vadd.f32 %v7559_v29, %v18694_v28  ;;  %v8146_v28 = vld [vmem:[%s20809_s9 + $0x78] sm:$0xff]  ;;  %v18870_v29 = vpop.f32.mrf.mxu0  ;;  %s20444_s9 = scalar_lea.hbm %s20507_s20, %s12467_s23 }
 0x74d   : > { %v18856_v0 = vpop.f32.mrf.mxu1  ;;  %20824 = vst [vmem:[#allocation90_spill] sm:$0xff] %v18870_v29  ;;  %8246 = vmatprep.mubr.f32.mxu1 %v8146_v28  ;;  %v5440_v29 = vadd.f32 %v20833_v50, %v18379_v57 }
 0x74e   : > { %20821 = vst [vmem:[#allocation84_spill] sm:$0xff] %v18851_v38  ;;  %v18877_v20 = vpop.f32.mrf.mxu0 }
 0x74f   : > { %v18860_v46 = vpop.f32.mrf.mxu1  ;;  %8247 = vmatmul.mubr.f32.gmra.mxu1 %v8145_v48 }
 0x750   : > { %20823 = vst [vmem:[#allocation87_spill] sm:$0xff] %v18860_v46  ;;  %v18879_v32 = vpop.f32.mrf.mxu0  ;;  %v6731_v46 = vadd.f32 %v18645_v14, %v18650_v19 }
 0x751   : > { %v18868_v33 = vpop.f32.mrf.mxu1  ;;  %20825 = vst [vmem:[#allocation89_spill] sm:$0xff] %v18879_v32 }
 0x752   : > { %v14005_v5 = vpop.f32.mrf.mxu0 }
 0x753   : > { %v18872_v22 = vpop.f32.mrf.mxu1 }
 0x754   : > { %v18887_v28 = vpop.f32.mrf.mxu0 }
 0x755   : > { %v14033_v61 = vpop.f32.mrf.mxu1 }
 0x756   : > { %v14006_v48 = vpop.f32.mrf.mxu0 }
 0x757   : > { %v7588_v40 = vpop.f32.mrf.mxu1 }
 0x759   : > { %v14034_v63 = vpop.f32.mrf.mxu1 }
 0x75b   : > { %v7591_v7 = vpop.f32.mrf.mxu1 }
 0x75d   : > { %v18881_v36 = vpop.f32.mrf.mxu1 }
 0x75e   : > { %20826 = vst [vmem:[#allocation91_spill] sm:$0xff] %v18881_v36  ;;  %v7318_v36 = vpop.f32.mrf.mxu0 }
 0x75f   : > { %v18883_v10 = vpop.f32.mrf.mxu1 }
 0x760   : > { %20827 = vst [vmem:[#allocation92_spill] sm:$0xff] %v18883_v10  ;;  %v20835_v10 = vld [vmem:[#allocation49_spill] sm:$0xff] }
 0x761   : > { %v18885_v38 = vpop.f32.mrf.mxu1  ;;  %v5769_v32 = vadd.f32 %v20835_v10, %v5440_v29 }
 0x762   : > { %20828 = vst [vmem:[#allocation94_spill] sm:$0xff] %v18885_v38  ;;  %v14009_v38 = vpop.f32.mrf.mxu0 }
 0x763   : > { %v18889_v34 = vpop.f32.mrf.mxu1 }
 0x764   : > { %20829 = vst [vmem:[#allocation93_spill] sm:$0xff] %v18889_v34  ;;  %v20837_v34 = vld [vmem:[#allocation50_spill] sm:$0xff] }
 0x765   : > { %v18891_v13 = vpop.f32.mrf.mxu1  ;;  %v6090_v17 = vadd.f32 %v20837_v34, %v5769_v32 }
 0x766   : > { %20830 = vst [vmem:[#allocation66_spill] sm:$0xff] %v18891_v13  ;;  %v7331_v13 = vpop.f32.mrf.mxu0 }
 0x767   : > { %v18893_v54 = vpop.f32.mrf.mxu1 }
 0x768   : > { %20831 = vst [vmem:[#allocation74_spill] sm:$0xff] %v18893_v54  ;;  %v6734_v54 = vadd.f32 %v18652_v31, %v18655_v11  ;;  %v14010_v50 = vpop.f32.mrf.mxu0 }
 0x769   : > { %v18895_v41 = vpop.f32.mrf.mxu1 }
 0x76a   : > { %20832 = vst [vmem:[#allocation75_spill] sm:$0xff] %v18895_v41  ;;  %v6411_v41 = vadd.f32 %v18657_v8, %v6090_v17  ;;  %v7056_v57 = vadd.f32 %v18790_v49, %v6734_v54  ;;  %v7334_v31 = vpop.f32.mrf.mxu0  ;;  %v7053_v8 = vadd.f32 %v18779_v62, %v6731_v46  ;;  %v7376_v54 = vadd.f32 %v14009_v38, %v18775_v25 }
 0x76b   : > { %v18899_v26 = vpop.f32.mrf.mxu1  ;;  %v7037_v49 = vadd.f32 %v18715_v21, %v18588_v6  ;;  %v6727_v6 = vadd.f32 %v18631_v51, %v18636_v4  ;;  %v7357_v21 = vadd.f32 %v18747_v24, %v18703_v12  ;;  %v7355_v24 = vadd.f32 %v18754_v1, %v18707_v27  ;;  %v20841_v1 = vld [vmem:[#allocation87_spill] sm:$0xff] }
 0x76c   : > { %20834 = vst [vmem:[#allocation76_spill] sm:$0xff] %v18899_v26  ;;  %v6732_v10 = vadd.f32 %v18659_v3, %v6411_v41  ;;  %v7377_v34 = vadd.f32 %v14010_v50, %v7056_v57  ;;  %v7360_v3 = vadd.f32 %v18762_v44, %v18713_v43  ;;  %v7374_v62 = vadd.f32 %v7331_v13, %v7053_v8  ;;  %v20842_v13 = vld [vmem:[#allocation62_spill] sm:$0xff]  ;;  %v20855_v8 = vld [vmem:[#allocation71_spill] sm:$0xff] }
 0x76d   : > { %v14045_v52 = vpop.f32.mrf.mxu1  ;;  %v7358_v25 = vadd.f32 %v18769_v37, %v7037_v49  ;;  %v7049_v44 = vadd.f32 %v18764_v42, %v6727_v6  ;;  %v20838_v37 = vld [vmem:[#allocation53_spill] sm:$0xff]  ;;  %v7678_v4 = vadd.f32 %v18868_v33, %v7357_v21  ;;  %v20851_v50 = vld [vmem:[#allocation78_spill] sm:$0xff]  ;;  %v20867_v21 = vld [vmem:[#allocation56_spill] sm:$0xff] }
 0x76e   : > { %v7054_v32 = vadd.f32 %v18794_v18, %v6732_v10  ;;  %v7033_v51 = vadd.f32 %v18699_v56, %v20838_v37  ;;  %v7676_v56 = vadd.f32 %v18872_v22, %v7355_v24  ;;  %v20852_v10 = vld [vmem:[#allocation90_spill] sm:$0xff] }
 0x76f   : > { %v18902_v47 = vpop.f32.mrf.mxu1  ;;  %v7370_v42 = vadd.f32 %v18887_v28, %v7049_v44  ;;  %v20848_v28 = vld [vmem:[#allocation64_spill] sm:$0xff]  ;;  %v20858_v49 = vld [vmem:[#allocation74_spill] sm:$0xff] }
 0x770   : > { %20836 = vst [vmem:[#allocation79_spill] sm:$0xff] %v18902_v47  ;;  %v7361_v47 = vadd.f32 %v18777_v9, %v18720_v30  ;;  %v7375_v18 = vadd.f32 %v7334_v31, %v7054_v32  ;;  %v7359_v30 = vadd.f32 %v18792_v16, %v18726_v45  ;;  %v7681_v9 = vadd.f32 %v14033_v61, %v7360_v3  ;;  %v20846_v61 = vld [vmem:[#allocation52_spill] sm:$0xff]  ;;  %v20854_v31 = vld [vmem:[#allocation59_spill] sm:$0xff]  ;;  %v20865_v6 = vld [vmem:[#allocation94_spill] sm:$0xff] }
 0x771   : > { %v14046_v53 = vpop.f32.mrf.mxu1  ;;  %v7679_v45 = vadd.f32 %v7588_v40, %v7358_v25  ;;  %v20845_v33 = vld [vmem:[#allocation75_spill] sm:$0xff]  ;;  %v20864_v25 = vld [vmem:[#allocation61_spill] sm:$0xff]  ;;  %v20869_v44 = vld [vmem:[#allocation82_spill] sm:$0xff] }
 0x772   : > { %v7682_v14 = vadd.f32 %v14034_v63, %v7361_v47  ;;  %v7680_v38 = vadd.f32 %v7591_v7, %v7359_v30  ;;  %v7373_v47 = vadd.f32 %v14006_v48, %v18767_v59  ;;  %v7372_v63 = vadd.f32 %v14005_v5, %v18760_v35  ;;  %v20847_v5 = vld [vmem:[#allocation58_spill] sm:$0xff]  ;;  %v20861_v30 = vld [vmem:[#allocation60_spill] sm:$0xff] }
 0x773   : > { %v7639_v60 = vpop.f32.mrf.mxu1  ;;  %v7356_v7 = vadd.f32 %v18732_v55, %v18697_v2  ;;  %v7371_v59 = vadd.f32 %v7318_v36, %v18772_v23  ;;  %v7354_v2 = vadd.f32 %v18740_v15, %v7033_v51  ;;  %v20839_v55 = vld [vmem:[#allocation55_spill] sm:$0xff]  ;;  %v20850_v48 = vld [vmem:[#allocation66_spill] sm:$0xff]  ;;  %v20853_v32 = vld [vmem:[#allocation76_spill] sm:$0xff] }
 0x774   : > { %v7694_v16 = vadd.f32 %v14046_v53, %v7373_v47  ;;  %v7693_v12 = vadd.f32 %v14045_v52, %v7372_v63  ;;  %v6723_v23 = vadd.f32 %v20839_v55, %v18619_v39  ;;  %v7369_v52 = vadd.f32 %v18877_v20, %v18752_v58  ;;  %v20844_v53 = vld [vmem:[#allocation63_spill] sm:$0xff]  ;;  %v20849_v58 = vld [vmem:[#allocation89_spill] sm:$0xff]  ;;  %v20868_v63 = vld [vmem:[#allocation68_spill] sm:$0xff] }
 0x775   : > { %v14049_v26 = vpop.f32.mrf.mxu1  ;;  %v7677_v35 = vadd.f32 %v18856_v0, %v7356_v7  ;;  %v7675_v0 = vadd.f32 %v20841_v1, %v7354_v2  ;;  %v7029_v39 = vadd.f32 %v20847_v5, %v20846_v61  ;;  %v7367_v20 = vadd.f32 %v20849_v58, %v20848_v28  ;;  %v20870_v7 = vld [vmem:[#allocation91_spill] sm:$0xff]  ;;  %v20871_v51 = vld [vmem:[#allocation70_spill] sm:$0xff]  ;;  %v20876_v2 = vld [vmem:[#allocation92_spill] sm:$0xff] }
 0x776   : > { %v7697_v41 = vadd.f32 %v14049_v26, %v7376_v54  ;;  %v7692_v26 = vadd.f32 %v7639_v60, %v7371_v59  ;;  %v20843_v60 = vld [vmem:[#allocation88_spill] sm:$0xff]  ;;  %v7045_v15 = vadd.f32 %v20844_v53, %v6723_v23  ;;  %v7690_v22 = vadd.f32 %v20845_v33, %v7369_v52  ;;  %v20856_v54 = vld [vmem:[#allocation67_spill] sm:$0xff]  ;;  %v20878_v52 = vld [vmem:[#allocation81_spill] sm:$0xff] }
 0x777   : > { %v7652_v29 = vpop.f32.mrf.mxu1  ;;  %v20840_v36 = vld [vmem:[#allocation79_spill] sm:$0xff]  ;;  %v7368_v40 = vadd.f32 %v20843_v60, %v20842_v13  ;;  %v20877_v55 = vld [vmem:[#allocation72_spill] sm:$0xff]  ;;  %v7704_v13 = vld [vmem:[%s20495_s8 + $0x28] sm:$0xff] }
 0x778   : > { %v7695_v43 = vadd.f32 %v7652_v29, %v7374_v62  ;;  %v7691_v27 = vadd.f32 %v20840_v36, %v7370_v42  ;;  %v7366_v29 = vadd.f32 %v20852_v10, %v7045_v15  ;;  %v7699_v36 = vld [vmem:[%s20495_s8] sm:$0xff]  ;;  %v7705_v53 = vld [vmem:[%s20495_s8 + $0x30] sm:$0xff]  ;;  %v7708_v15 = vld [vmem:[%s20495_s8 + $0x48] sm:$0xff] }
 0x779   : > { %v14050_v11 = vpop.f32.mrf.mxu1  ;;  %v7689_v57 = vadd.f32 %v20850_v48, %v7368_v40  ;;  %v18992_v1 = vld [vmem:[#allocation5] sm:$0xff]  ;;  %v7706_v40 = vld [vmem:[%s20495_s8 + $0x38] sm:$0xff]  ;;  %v7709_v61 = vld [vmem:[%s20495_s8 + $0x50] sm:$0xff] }
 0x77a   : > { %v7698_v17 = vadd.f32 %v14050_v11, %v7377_v34  ;;  %v7688_v34 = vadd.f32 %v20853_v32, %v7367_v20  ;;  %v7350_v11 = vadd.f32 %v20854_v31, %v7029_v39  ;;  %v7703_v60 = vld [vmem:[%s20495_s8 + $0x20] sm:$0xff]  ;;  %v7712_v5 = vld [vmem:[%s20495_s8 + $0x68] sm:$0xff]  ;;  %v7714_v28 = vld [vmem:[%s20495_s8 + $0x78] sm:$0xff] }
 0x77b   : > { %v7655_v19 = vpop.f32.mrf.mxu1  ;;  %v7707_v33 = vld [vmem:[%s20495_s8 + $0x40] sm:$0xff]  ;;  %v7713_v58 = vld [vmem:[%s20495_s8 + $0x70] sm:$0xff]  ;;  %v19039_v20 = vld [vmem:[%s20497_s10 + $0x38] sm:$0xff] }
 0x77c   : > { %12855 = vmatprep.subr.mxu0 %v7698_v17  ;;  %v7696_v46 = vadd.f32 %v7655_v19, %v7375_v18  ;;  %v20857_v17 = vld [vmem:[#allocation86_spill] sm:$0xff]  ;;  %v20859_v19 = vld [vmem:[#allocation73_spill] sm:$0xff]  ;;  %v7711_v39 = vld [vmem:[%s20495_s8 + $0x60] sm:$0xff] }
 0x77d   : > { %12856 = vmatpush3.msra.mxu0 %v7682_v14  ;;  %v7365_v3 = vadd.f32 %v20857_v17, %v20856_v54  ;;  %v7687_v14 = vadd.f32 %v20858_v49, %v7366_v29  ;;  %v7671_v18 = vadd.f32 %v20859_v19, %v7350_v11  ;;  %v19044_v48 = vld [vmem:[%s20497_s10 + $0x30] sm:$0xff]  ;;  %v19065_v10 = vld [vmem:[%s20497_s10 + $0x18] sm:$0xff]  ;;  %v19079_v32 = vld [vmem:[%s20497_s10 + $0x8] sm:$0xff] }
 0x77e   : > { %12857 = vmatprep.subr.mxu0 %v7697_v41  ;;  %v20860_v41 = vld [vmem:[#allocation84_spill] sm:$0xff]  ;;  %v19072_v29 = vld [vmem:[%s20497_s10 + $0x10] sm:$0xff] }
 0x77f   : > { %12858 = vmatpush3.msra.mxu0 %v7681_v9  ;;  %v20862_v9 = vld [vmem:[#allocation69_spill] sm:$0xff]  ;;  %v7686_v47 = vadd.f32 %v20865_v6, %v7365_v3 }
 0x780   : > { %12859 = vmatprep.subr.mxu0 %v7696_v46  ;;  %v7364_v62 = vadd.f32 %v20862_v9, %v20861_v30  ;;  %v20863_v46 = vld [vmem:[#allocation54_spill] sm:$0xff]  ;;  %v12265_v30 = vld [vmem:[%s20494_s7 + $0x3] ss:$0 sm:$0xff] }
 0x781   : > { %12860 = vmatpush3.msra.mxu0 %v7680_v38  ;;  %v7041_v38 = vadd.f32 %v20864_v25, %v20863_v46 }
 0x782   : > { %12861 = vmatprep.subr.mxu0 %v7695_v43  ;;  %v20866_v43 = vld [vmem:[#allocation51_spill] sm:$0xff]  ;;  %v7685_v37 = vadd.f32 %v20870_v7, %v7364_v62 }
 0x783   : > { %12862 = vmatpush3.msra.mxu0 %v7679_v45  ;;  %v7025_v45 = vadd.f32 %v20867_v21, %v20866_v43 }
 0x784   : > { %12863 = vmatprep.subr.mxu0 %v7694_v16  ;;  %v7363_v16 = vadd.f32 %v20869_v44, %v20868_v63 }
 0x785   : > { %12864 = vmatpush3.msra.mxu0 %v7678_v4  ;;  %v20872_v4 = vld [vmem:[#allocation77_spill] sm:$0xff] }
 0x786   : > { %12865 = vmatprep.subr.mxu0 %v7693_v12  ;;  %v7362_v59 = vadd.f32 %v20872_v4, %v7041_v38  ;;  %v20873_v12 = vld [vmem:[#allocation93_spill] sm:$0xff] }
 0x787   : > { %12866 = vmatpush3.msra.mxu0 %v7677_v35  ;;  %v7684_v24 = vadd.f32 %v20873_v12, %v7363_v16  ;;  %v20874_v35 = vld [vmem:[#allocation57_spill] sm:$0xff] }
 0x788   : > { %12867 = vmatprep.subr.mxu0 %v7692_v26  ;;  %v7346_v42 = vadd.f32 %v20874_v35, %v7025_v45  ;;  %v20875_v26 = vld [vmem:[#allocation65_spill] sm:$0xff] }
 0x789   : > { %12868 = vmatpush3.msra.mxu0 %v7676_v56  ;;  %v7683_v56 = vadd.f32 %v20876_v2, %v7362_v59 }
 0x78a   : > { %12869 = vmatprep.subr.mxu0 %v7691_v27  ;;  %v7667_v23 = vadd.f32 %v20877_v55, %v7346_v42  ;;  %v7702_v27 = vld [vmem:[%s20495_s8 + $0x18] sm:$0xff] }
 0x78b   : > { %12870 = vmatpush3.msra.mxu0 %v7675_v0  ;;  %v7701_v0 = vld [vmem:[%s20495_s8 + $0x10] sm:$0xff] }
 0x78c   : > { %12871 = vmatprep.subr.mxu0 %v7690_v22  ;;  %v7710_v22 = vld [vmem:[%s20495_s8 + $0x58] sm:$0xff] }
 0x78d   : > { %12872 = vmatpush3.msra.mxu0 %v20851_v50  ;;  %v19058_v50 = vld [vmem:[%s20497_s10 + $0x20] sm:$0xff] }
 0x78e   : > { %12873 = vmatprep.subr.mxu0 %v7689_v57  ;;  %v19051_v57 = vld [vmem:[%s20497_s10 + $0x28] sm:$0xff] }
 0x78f   : > { %12874 = vmatpush3.msra.mxu0 %v20855_v8 }
 0x790   : > { %12875 = vmatprep.subr.mxu0 %v7688_v34  ;;  %v19086_v34 = vld [vmem:[%s20497_s10] sm:$0xff] }
 0x791   : > { %12876 = vmatpush3.msra.mxu0 %v20860_v41 }
 0x792   : > { %12877 = vmatprep.subr.mxu0 %v7687_v14 }
 0x793   : > { %12878 = vmatpush3.msra.mxu0 %v7671_v18 }
 0x794   : > { %12879 = vmatprep.subr.mxu0 %v7686_v47 }
 0x795   : > { %12880 = vmatpush3.msra.mxu0 %v20871_v51 }
 0x796   : > { %12881 = vmatprep.subr.mxu0 %v7685_v37 }
 0x797   : > { %12882 = vmatpush3.msra.mxu0 %v20875_v26 }
 0x798   : > { %12883 = vmatprep.subr.mxu0 %v7684_v24 }
 0x799   : > { %12884 = vmatpush3.msra.mxu0 %v20878_v52 }
 0x79a   : > { %12885 = vmatprep.subr.mxu0 %v7683_v56 }
 0x79b   : > { %12886 = vmatpush3.msra.mxu0 %v7667_v23 }
 0x79c   : > { %7785 = vmatmul.mubr.f32.vlgmr.msra.gmra.mxu0 %v7699_v36  ;;  %14051 = vmatprep.subr.mxu0 %v18992_v1 }
 0x79d   : > { %7789 = vmatprep.mubr.f32.mxu0 %v7702_v27  ;;  %14052 = vmatpush3.msra.mxu0 %v19039_v20 }
 0x79e   : > { %14053 = vmatprep.subr.mxu0 %v18992_v1 }
 0x79f   : > { %14054 = vmatpush3.msra.mxu0 %v19044_v48 }
 0x7a0   : > { %7790 = vmatmul.mubr.f32.gmra.mxu0 %v7701_v0  ;;  %14055 = vmatprep.subr.mxu0 %v18992_v1 }
 0x7a1   : > { %7794 = vmatprep.mubr.f32.mxu0 %v7704_v13  ;;  %14056 = vmatpush3.msra.mxu0 %v19051_v57 }
 0x7a2   : > { %14057 = vmatprep.subr.mxu0 %v18992_v1 }
 0x7a3   : > { %14058 = vmatpush3.msra.mxu0 %v19058_v50 }
 0x7a4   : > { %7795 = vmatmul.mubr.f32.gmra.mxu0 %v7703_v60  ;;  %14059 = vmatprep.subr.mxu0 %v18992_v1 }
 0x7a5   : > { %7799 = vmatprep.mubr.f32.mxu0 %v7706_v40  ;;  %14060 = vmatpush3.msra.mxu0 %v19065_v10 }
 0x7a6   : > { %14061 = vmatprep.subr.mxu0 %v18992_v1 }
 0x7a7   : > { %14062 = vmatpush3.msra.mxu0 %v19072_v29 }
 0x7a8   : > { %7800 = vmatmul.mubr.f32.gmra.mxu0 %v7705_v53  ;;  %14063 = vmatprep.subr.mxu0 %v18992_v1 }
 0x7a9   : > { %7804 = vmatprep.mubr.f32.mxu0 %v7708_v15  ;;  %14064 = vmatpush3.msra.mxu0 %v19079_v32 }
 0x7aa   : > { %14065 = vmatprep.subr.mxu0 %v18992_v1 }
 0x7ab   : > { %14066 = vmatpush3.msra.mxu0 %v19086_v34 }
 0x7ac   : > { %7805 = vmatmul.mubr.f32.gmra.mxu0 %v7707_v33  ;;  %14070 = vmatprep.subr.mxu0 %v18992_v1 }
 0x7ad   : > { %7809 = vmatprep.mubr.f32.mxu0 %v7710_v22 }
 0x7b0   : > { %7810 = vmatmul.mubr.f32.gmra.mxu0 %v7709_v61 }
 0x7b1   : > { %7814 = vmatprep.mubr.f32.mxu0 %v7712_v5 }
 0x7b4   : > { %7815 = vmatmul.mubr.f32.gmra.mxu0 %v7711_v39 }
 0x7b5   : > { %7819 = vmatprep.mubr.f32.mxu0 %v7714_v28 }
 0x7b8   : > { %7820 = vmatmul.mubr.f32.gmra.mxu0 %v7713_v58 }
 0x7b9   : > { %14067 = vmatprep.mubr.msk.f32.mxu0 %vm15171_vm2, %v18992_v1 }
 0x7f3   : > { %v19092_v49 = vpop.f32.mrf.mxu1 }
 0x7f5   : > { %v19097_v62 = vpop.f32.mrf.mxu1 }
 0x7f7   : > { %v19105_v45 = vpop.f32.mrf.mxu1 }
 0x7f9   : > { %v19123_v42 = vpop.f32.mrf.mxu1 }
 0x7fb   : > { %v19138_v15 = vpop.f32.mrf.mxu1 }
 0x85c   : > { %v12887_v31 = vpop.f32.mrf.mxu0 }
 0x85e   : > { %v12888_v11 = vpop.f32.mrf.mxu0 }
 0x85f   : > { %v12889_v18 = vadd.f32 %v12888_v11, %v12887_v31 }
 0x860   : > { %v12890_v8 = vpop.f32.mrf.mxu0 }
 0x861   : > { %v19101_v6 = vadd.f32 %v12889_v18, %v12265_v30 }
 0x862   : > { %v12891_v54 = vpop.f32.mrf.mxu0 }
 0x863   : > { %v12892_v19 = vadd.f32 %v12891_v54, %v12890_v8  ;;  %v7835_v37 = vsel %vm4142_vm5, %v19101_v6, 0.0  ;;  %v7856_v51 = vmul.f32 %v19101_v6, %v19101_v6 }
 0x864   : > { %v12893_v17 = vpop.f32.mrf.mxu0 }
 0x865   : > { %v19099_v25 = vadd.f32 %v12892_v19, %v12265_v30  ;;  %v7864_v36 = vsel %vm4142_vm5, %v7856_v51, 0.0  ;;  %v12968_v19 = vpop.f32.mrf.mxu1 }
 0x866   : > { %v12894_v3 = vpop.f32.mrf.mxu0 }
 0x867   : > { %v12895_v9 = vadd.f32 %v12894_v3, %v12893_v17  ;;  %v7836_v44 = vsel %vm4142_vm5, %v19099_v25, 0.0  ;;  %v7857_v16 = vmul.f32 %v19099_v25, %v19099_v25 }
 0x868   : > { %v12896_v14 = vpop.f32.mrf.mxu0  ;;  %v7837_v26 = vadd.f32 %v7836_v44, %v7835_v37 }
 0x869   : > { %v19103_v43 = vadd.f32 %v12895_v9, %v12265_v30  ;;  %v7865_v56 = vsel %vm4142_vm5, %v7857_v16, 0.0  ;;  %v12970_v16 = vpop.f32.mrf.mxu1 }
 0x86a   : > { %v12897_v41 = vpop.f32.mrf.mxu0  ;;  %v7866_v33 = vadd.f32 %v7865_v56, %v7864_v36 }
 0x86b   : > { %v12898_v38 = vadd.f32 %v12897_v41, %v12896_v14  ;;  %v7838_v59 = vsel %vm4142_vm5, %v19103_v43, 0.0  ;;  %v7858_v12 = vmul.f32 %v19103_v43, %v19103_v43 }
 0x86c   : > { %v12899_v46 = vpop.f32.mrf.mxu0  ;;  %v7839_v27 = vadd.f32 %v7838_v59, %v7837_v26 }
 0x86d   : > { %v19111_v7 = vadd.f32 %v12898_v38, %v12265_v30  ;;  %v7867_v13 = vsel %vm4142_vm5, %v7858_v12, 0.0 }
 0x86e   : > { %v12900_v47 = vpop.f32.mrf.mxu0  ;;  %v7868_v31 = vadd.f32 %v7867_v13, %v7866_v33 }
 0x86f   : > { %v12901_v21 = vadd.f32 %v12900_v47, %v12899_v46  ;;  %v7840_v55 = vsel %vm4142_vm5, %v19111_v7, 0.0  ;;  %v7859_v23 = vmul.f32 %v19111_v7, %v19111_v7 }
 0x870   : > { %v12902_v63 = vpop.f32.mrf.mxu0  ;;  %v7841_v22 = vadd.f32 %v7840_v55, %v7839_v27 }
 0x871   : > { %v19121_v24 = vadd.f32 %v12901_v21, %v12265_v30  ;;  %v7869_v5 = vsel %vm4142_vm5, %v7859_v23, 0.0 }
 0x872   : > { %v12903_v4 = vpop.f32.mrf.mxu0  ;;  %v7870_v18 = vadd.f32 %v7869_v5, %v7868_v31 }
 0x873   : > { %v12904_v35 = vadd.f32 %v12903_v4, %v12902_v63  ;;  %v7842_v60 = vsel %vm4142_vm5, %v19121_v24, 0.0  ;;  %v7860_v40 = vmul.f32 %v19121_v24, %v19121_v24 }
 0x874   : > { %v12905_v2 = vpop.f32.mrf.mxu0  ;;  %v7843_v11 = vadd.f32 %v7842_v60, %v7841_v22 }
 0x875   : > { %v19130_v52 = vadd.f32 %v12904_v35, %v12265_v30  ;;  %v7871_v54 = vsel %vm4142_vm5, %v7860_v40, 0.0  ;;  %v12971_v35 = vpop.f32.mrf.mxu1 }
 0x876   : > { %v12906_v0 = vpop.f32.mrf.mxu0  ;;  %v7872_v38 = vadd.f32 %v7871_v54, %v7870_v18  ;;  %v14774_v54 = vld [vmem:[%s20498_s11 + $0x18] sm:$0xff]   ;;  %v14779_v18 = vld [vmem:[%s20498_s11 + $0x20] sm:$0xff]  }
 0x877   : > { %v12907_v53 = vadd.f32 %v12906_v0, %v12905_v2  ;;  %v7844_v39 = vsel %vm4142_vm5, %v19130_v52, 0.0  ;;  %v7861_v28 = vmul.f32 %v19130_v52, %v19130_v52  ;;  %v12973_v56 = vpop.f32.mrf.mxu1  ;;  %14117 = vmatprep.subr.bf16.mxu1 %v14774_v54 }
 0x878   : > { %v12908_v61 = vpop.f32.mrf.mxu0  ;;  %v7845_v41 = vadd.f32 %v7844_v39, %v7843_v11  ;;  %14118 = vmatpush3.bf16.msra.mxu1 %v14774_v54 }
 0x879   : > { %v19145_v58 = vadd.f32 %v12907_v53, %v12265_v30  ;;  %v7873_v9 = vsel %vm4142_vm5, %v7861_v28, 0.0  ;;  %v12974_v27 = vpop.f32.mrf.mxu1 }
 0x87a   : > { %v12909_v8 = vpop.f32.mrf.mxu0  ;;  %v7874_v37 = vadd.f32 %v7873_v9, %v7872_v38  ;;  %v19222_v9 = vld [vmem:[%s20498_s11 + $0x58] sm:$0xff]  }
 0x87b   : > { %v7846_v17 = vsel %vm4142_vm5, %v19145_v58, 0.0  ;;  %v7862_v3 = vmul.f32 %v19145_v58, %v19145_v58  ;;  %v12910_v14 = vadd.f32 %v12909_v8, %v12908_v61  ;;  %v12976_v60 = vpop.f32.mrf.mxu1  ;;  %v14773_v8 = vld [vmem:[%s20498_s11 + $0x38] sm:$0xff]  }
 0x87c   : > { %v7847_v47 = vadd.f32 %v7846_v17, %v7845_v41  ;;  %v14775_v17 = vld [vmem:[%s20498_s11 + $0x30] sm:$0xff]   ;;  %v14780_v41 = vld [vmem:[%s20498_s11] sm:$0xff]   ;;  %v19227_v38 = vld [vmem:[%s20498_s11 + $0x78] sm:$0xff]  }
 0x87d   : > { %v19153_v46 = vadd.f32 %v12910_v14, %v12265_v30  ;;  %v7875_v21 = vsel %vm4142_vm5, %v7862_v3, 0.0  ;;  %v12977_v53 = vpop.f32.mrf.mxu1  ;;  %v14776_v3 = vld [vmem:[%s20498_s11 + $0x10] sm:$0xff]   ;;  %v14777_v14 = vld [vmem:[%s20498_s11 + $0x28] sm:$0xff]  }
 0x87e   : > { %v7876_v59 = vadd.f32 %v7875_v21, %v7874_v37  ;;  %14119 = vmatprep.subr.bf16.mxu1 %v14776_v3 }
 0x87f   : > { %v7848_v63 = vsel %vm4142_vm5, %v19153_v46, 0.0  ;;  %v7863_v44 = vmul.f32 %v19153_v46, %v19153_v46  ;;  %v12979_v22 = vpop.f32.mrf.mxu1  ;;  %14120 = vmatpush3.bf16.msra.mxu1 %v14776_v3 }
 0x880   : > { %v7849_v51 = vadd.f32 %v7848_v63, %v7847_v47 }
 0x881   : > { %v7877_v4 = vsel %vm4142_vm5, %v7863_v44, 0.0 }
 0x882   : > { %v7850_v12 = vrot.slane %v7849_v51, 4  ;;  %v7878_v26 = vadd.f32 %v7877_v4, %v7876_v59 }
 0x884   : > { %v7851_v30 = vadd.f32 %v7850_v12, %v7849_v51  ;;  %v7879_v23 = vrot.slane %v7878_v26, 4 }
 0x886   : > { %v7852_v2 = vrot.slane %v7851_v30, 2  ;;  %v7880_v13 = vadd.f32 %v7879_v23, %v7878_v26  ;;  %v7825_v26 = vld [vmem:[%s20494_s7 + $0x4] sm:$0x1] }
 0x888   : > { %v7853_v55 = vadd.f32 %v7852_v2, %v7851_v30  ;;  %v7881_v40 = vrot.slane %v7880_v13, 2 }
 0x88a   : > { %v7854_v36 = vrot.slane %v7853_v55, 1  ;;  %v7882_v33 = vadd.f32 %v7881_v40, %v7880_v13  ;;  %v12268_v13 = vld [vmem:[%s20494_s7 + $0x5] ss:$0 sm:$0xff] }
 0x88c   : > { %v7855_v0 = vadd.f32 %v7854_v36, %v7853_v55  ;;  %v7883_v61 = vrot.slane %v7882_v33, 1 }
 0x88e   : > { %14068 = vmatmul.mubr.msk.f32.vlgmr.msra.gmra.mxu0 %vm4142_vm5, %v7855_v0 }
 0x88f   : > { %14071 = vmatpush3.msra.mxu0 %v19039_v20  ;;  %14086 = vmatprep.mubr.msk.f32.mxu0 %vm15171_vm2, %v18992_v1  ;;  %v12963_v20 = vadd.f32 %v19097_v62, %v19092_v49  ;;  %v7884_v49 = vadd.f32 %v7883_v61, %v7882_v33  ;;  %v14772_v62 = vld [vmem:[%s20879_s6] sm:$0xff]  }
 0x890   : > { %14072 = vmatprep.subr.mxu0 %v18992_v1 }
 0x891   : > { %14073 = vmatpush3.msra.mxu0 %v19044_v48  ;;  %v12966_v48 = vadd.f32 %v19123_v42, %v19105_v45  ;;  %v12972_v45 = vadd.f32 %v12971_v35, %v12970_v16  ;;  %v12975_v42 = vadd.f32 %v12974_v27, %v12973_v56  ;;  %v20880_v35 = vld [vmem:[#allocation12_spill] sm:$0xff] }
 0x892   : > { %14074 = vmatprep.subr.mxu0 %v18992_v1 }
 0x893   : > { %14075 = vmatpush3.msra.mxu0 %v19051_v57  ;;  %v14771_v57 = vld [vmem:[%s20879_s6 + $0x8] sm:$0xff]   ;;  %s15114_s6 = scalar_lea.vmem %s15113_s27, 512 }
 0x894   : > { %14076 = vmatprep.subr.mxu0 %v18992_v1  ;;  %p15116_p1 = scmp.lt.s32.totalorder %s15114_s6, %s15108_s2 }
 0x895   : > { %14077 = vmatpush3.msra.mxu0 %v19058_v50  ;;  %v8252_v50 = vpack.c.bf16 %v12966_v48, %v12963_v20 }
 0x896   : > { %14078 = vmatprep.subr.mxu0 %v18992_v1  ;;  %p15117_p2 = por %p15116_p1, %p15115_p0 }
 0x897   : > { %14079 = vmatpush3.msra.mxu0 %v19065_v10  ;;  %v12980_v10 = vpop.f32.mrf.mxu1 }
 0x898   : > { %14080 = vmatprep.subr.mxu0 %v18992_v1  ;;  %v12981_v11 = vadd.f32 %v12980_v10, %v12979_v22  ;;  %p15118_p3 = pnand %p15117_p2, %p15111_p13 }
 0x899   : > { %14081 = vmatpush3.msra.mxu0 %v19072_v29  ;;  %v12969_v29 = vadd.f32 %v12968_v19, %v19138_v15  ;;  %v12982_v5 = vpop.f32.mrf.mxu1  ;;  %v14778_v19 = vld [vmem:[%s20498_s11 + $0x8] sm:$0xff]  }
 0x89a   : > { %14082 = vmatprep.subr.mxu0 %v18992_v1  ;;  %14121 = vmatprep.subr.bf16.mxu1 %v14778_v19 }
 0x89b   : > { %14083 = vmatpush3.msra.mxu0 %v19079_v32  ;;  %v12978_v32 = vadd.f32 %v12977_v53, %v12976_v60  ;;  %v8253_v39 = vpack.c.bf16 %v12972_v45, %v12969_v29  ;;  %v12983_v31 = vpop.f32.mrf.mxu1  ;;  %14122 = vmatpush3.bf16.msra.mxu1 %v14778_v19 }
 0x89c   : > { %14084 = vmatprep.subr.mxu0 %v18992_v1  ;;  %14123 = vmatprep.subr.bf16.mxu1 %v14780_v41 }
 0x89d   : > { %14085 = vmatpush3.msra.mxu0 %v19086_v34  ;;  %v8254_v28 = vpack.c.bf16 %v12978_v32, %v12975_v42  ;;  %v12984_v34 = vadd.f32 %v12983_v31, %v12982_v5 }
 0x89e   : > { %14087 = vmatmul.mubr.msk.f32.vlgmr.msra.gmra.mxu0 %vm4142_vm5, %v7884_v49  ;;  %14089 = vmatprep.subr.bf16.mxu0 %v14771_v57 }
 0x89f   : > { %14090 = vmatpush3.bf16.msra.mxu0 %v14771_v57  ;;  %14093 = vmatprep.mubr.msk.bf16.mxu0 %vm906_vm1, %v8252_v50  ;;  %v8255_v15 = vpack.c.bf16 %v12984_v34, %v12981_v11 }
 0x8a0   : > { %14091 = vmatprep.subr.bf16.mxu0 %v14772_v62  ;;  %14124 = vmatpush3.bf16.msra.mxu1 %v14780_v41 }
 0x8a1   : > { %14149 = vmatprep.subr.bf16.mxu1 %v19227_v38 }
 0x8a3   : > { %14092 = vmatpush3.bf16.msra.mxu0 %v14772_v62 }
 0x8a4   : > { %14101 = vmatprep.subr.bf16.mxu0 %v14773_v8 }
 0x8a6   : > { %14094 = vmatmul.mubr.msk.bf16.vlgmr.msra.gmra.mxu0 %vm906_vm1, %v8253_v39 }
 0x8a7   : > { %14097 = vmatprep.mubr.msk.bf16.mxu0 %vm906_vm1, %v8254_v28  ;;  %14102 = vmatpush3.bf16.msra.mxu0 %v14773_v8 }
 0x8a8   : > { %14103 = vmatprep.subr.bf16.mxu0 %v14775_v17 }
 0x8ab   : > { %14104 = vmatpush3.bf16.msra.mxu0 %v14775_v17 }
 0x8ac   : > { %14105 = vmatprep.subr.bf16.mxu0 %v14777_v14 }
 0x8ae   : > { %14098 = vmatmul.mubr.msk.bf16.gmra.mxu0 %vm906_vm1, %v8255_v15 }
 0x8af   : > { %14106 = vmatpush3.bf16.msra.mxu0 %v14777_v14 }
 0x8b0   : > { %14107 = vmatprep.subr.bf16.mxu0 %v14779_v18 }
 0x8b3   : > { %14108 = vmatpush3.bf16.msra.mxu0 %v14779_v18 }
 0x8b4   : > { %14133 = vmatprep.subr.bf16.mxu0 %v19222_v9 }
 0x94e   : > { %v7954_v47 = vpop.f32.mrf.mxu0 }
 0x94f   : > { %v7958_v63 = vmul.f32 0.001953125, %v7954_v47 }
 0x950   : > { %v14069_v21 = vpop.f32.mrf.mxu0 }
 0x951   : > { %v8033_v16 = vmul.f32 %v7958_v63, %v7958_v63  ;;  %v8041_v30 = vrot.slane %v7958_v63, %v20880_v35 }
 0x953   : > { %v8044_v55 = vsub.f32 %v19103_v43, %v8041_v30  ;;  %v8042_v36 = vsub.f32 %v19101_v6, %v8041_v30  ;;  %v8045_v27 = vsub.f32 %v19111_v7, %v8041_v30  ;;  %v8043_v0 = vsub.f32 %v19099_v25, %v8041_v30 }
 0x954   : > { %v8048_v60 = vsub.f32 %v19145_v58, %v8041_v30  ;;  %v8046_v40 = vsub.f32 %v19121_v24, %v8041_v30  ;;  %v8049_v53 = vsub.f32 %v19153_v46, %v8041_v30  ;;  %v8047_v43 = vsub.f32 %v19130_v52, %v8041_v30  ;;  %v12277_v30 = vld [vmem:[%s20494_s7 + $0x6] ss:$0 sm:$0xff] }
 0x95e   : > { %v8028_v44 = vpop.f32.mrf.mxu0 }
 0x95f   : > { %v8032_v37 = vmul.f32 0.001953125, %v8028_v44 }
 0x960   : > { %v14088_v51 = vpop.f32.mrf.mxu0 }
 0x961   : > { %v8034_v4 = vsub.f32 %v8032_v37, %v8033_v16 }
 0x963   : > { %v8035_v59 = vmax.f32 %v8034_v4, 0.0 }
 0x965   : > { %v8036_v12 = vadd.f32 1e-05, %v8035_v59 }
 0x966   : > { %v14095_v31 = vpop.f32.mrf.mxu0 }
 0x967   : > { %15025 = vrsqrt.f32 %v8036_v12 }
 0x968   : > { %v8323_v11 = vpop.f32.mrf.mxu0 }
 0x96a   : > { %v14096_v19 = vpop.f32.mrf.mxu0 }
 0x96c   : > { %v8326_v37 = vpop.f32.mrf.mxu0 }
 0x96e   : > { %v14099_v59 = vpop.f32.mrf.mxu0 }
 0x970   : > { %v8339_v12 = vpop.f32.mrf.mxu0 }
 0x974   : > { %v15026_v2 = vpop.eup %15025 }
 0x975   : > { %v8050_v56 = vmul.f32 %v15026_v2, %v7825_v26 }
 0x977   : > { %v8054_v23 = vrot.slane %v8050_v56, %v20880_v35 }
 0x979   : > { %v8057_v33 = vmul.f32 %v8054_v23, %v8044_v55  ;;  %v8055_v20 = vmul.f32 %v8054_v23, %v8042_v36  ;;  %v8058_v48 = vmul.f32 %v8054_v23, %v8045_v27  ;;  %v8056_v6 = vmul.f32 %v8054_v23, %v8043_v0 }
 0x97a   : > { %v8061_v22 = vmul.f32 %v8054_v23, %v8048_v60  ;;  %v8059_v7 = vmul.f32 %v8054_v23, %v8046_v40  ;;  %v8062_v61 = vmul.f32 %v8054_v23, %v8049_v53  ;;  %v8060_v25 = vmul.f32 %v8054_v23, %v8047_v43  ;;  %v14100_v23 = vpop.f32.mrf.mxu0 }
 0x97b   : > { %v8069_v57 = vadd.f32 %v12268_v13, %v8057_v33  ;;  %v8067_v50 = vadd.f32 %v12268_v13, %v8055_v20  ;;  %v19247_v10 = vadd.f32 %v12268_v13, %v8058_v48  ;;  %v19249_v49 = vadd.f32 %v12268_v13, %v8056_v6 }
 0x97c   : > { %v19251_v58 = vadd.f32 %v12268_v13, %v8061_v22  ;;  %v19253_v24 = vadd.f32 %v12268_v13, %v8059_v7  ;;  %v19256_v29 = vadd.f32 %v12268_v13, %v8062_v61  ;;  %v19259_v42 = vadd.f32 %v12268_v13, %v8060_v25  ;;  %v8342_v25 = vpop.f32.mrf.mxu0 }
 0x97d   : > { %v12271_v46 = vmul.f32 -1.442695, %v8069_v57  ;;  %v12269_v52 = vmul.f32 -1.442695, %v8067_v50  ;;  %v12272_v62 = vmul.f32 -1.442695, %v19247_v10  ;;  %v8332_v55 = vadd.f32 %v14095_v31, %v12277_v30 }
 0x97e   : > { %v12270_v45 = vmul.f32 -1.442695, %v19249_v49  ;;  %v12275_v32 = vmul.f32 -1.442695, %v19251_v58  ;;  %v12273_v5 = vmul.f32 -1.442695, %v19253_v24  ;;  %v8324_v0 = vadd.f32 %v12277_v30, %v8323_v11 }
 0x97f   : > { %15027 = vpow2.f32 %v12271_v46  ;;  %v12276_v39 = vmul.f32 -1.442695, %v19256_v29  ;;  %v12274_v28 = vmul.f32 -1.442695, %v19259_v42  ;;  %v8335_v53 = vadd.f32 %v14096_v19, %v12277_v30 }
 0x980   : > { %15029 = vpow2.f32 %v12269_v52  ;;  %v8327_v48 = vadd.f32 %v12277_v30, %v8326_v37  ;;  %v8348_v61 = vadd.f32 %v14099_v59, %v12277_v30 }
 0x981   : > { %15031 = vpow2.f32 %v12272_v62 }
 0x982   : > { %15033 = vpow2.f32 %v12270_v45 }
 0x983   : > { %15035 = vpow2.f32 %v12275_v32 }
 0x984   : > { %15037 = vpow2.f32 %v12273_v5  ;;  %v8343_v5 = vadd.f32 %v12277_v30, %v8342_v25  ;;  %v14792_v25 = vld [vmem:[%s20498_s11 + $0xb0] sm:$0xff]  }
 0x985   : > { %15039 = vpow2.f32 %v12276_v39 }
 0x986   : > { %15041 = vpow2.f32 %v12274_v28  ;;  %v8392_v28 = vld [vmem:[#allocation4] sm:$0xff] }
 0x98c   : > { %v15028_v34 = vpop.eup %15027 }
 0x98d   : > { %v15030_v15 = vpop.eup %15029  ;;  %v8101_v8 = vadd.f32 1.0, %v15028_v34 }
 0x98e   : > { %v15032_v54 = vpop.eup %15031  ;;  %v8099_v17 = vadd.f32 1.0, %v15030_v15 }
 0x98f   : > { %v15034_v3 = vpop.eup %15033  ;;  %15043 = vrcp.f32 %v8101_v8  ;;  %v8102_v14 = vadd.f32 1.0, %v15032_v54 }
 0x990   : > { %v15036_v18 = vpop.eup %15035  ;;  %15045 = vrcp.f32 %v8099_v17  ;;  %v8100_v41 = vadd.f32 1.0, %v15034_v3 }
 0x991   : > { %v15038_v47 = vpop.eup %15037  ;;  %15047 = vrcp.f32 %v8102_v14  ;;  %v8105_v21 = vadd.f32 1.0, %v15036_v18 }
 0x992   : > { %v15040_v63 = vpop.eup %15039  ;;  %15049 = vrcp.f32 %v8100_v41  ;;  %v8103_v44 = vadd.f32 1.0, %v15038_v47  ;;  %v14783_v41 = vld [vmem:[%s20498_s11 + $0x50] sm:$0xff]  }
 0x993   : > { %v15042_v16 = vpop.eup %15041  ;;  %15051 = vrcp.f32 %v8105_v21  ;;  %v8106_v51 = vadd.f32 1.0, %v15040_v63  ;;  %v14784_v63 = vld [vmem:[%s20498_s11 + $0x70] sm:$0xff]  }
 0x994   : > { %15053 = vrcp.f32 %v8103_v44  ;;  %v8104_v4 = vadd.f32 1.0, %v15042_v16 }
 0x995   : > { %15055 = vrcp.f32 %v8106_v51  ;;  %v14785_v51 = vld [vmem:[%s20498_s11 + $0x48] sm:$0xff]  }
 0x996   : > { %15057 = vrcp.f32 %v8104_v4  ;;  %v14786_v4 = vld [vmem:[%s20498_s11 + $0x68] sm:$0xff]  }
 0x99c   : > { %v15044_v26 = vpop.eup %15043 }
 0x99d   : > { %v15046_v2 = vpop.eup %15045  ;;  %v8125_v56 = vmul.f32 %v15044_v26, %v8069_v57 }
 0x99e   : > { %v15048_v36 = vpop.eup %15047  ;;  %v8123_v27 = vmul.f32 %v15046_v2, %v8067_v50 }
 0x99f   : > { %v15050_v13 = vpop.eup %15049  ;;  %v19268_v60 = vadd.f32 %v8332_v55, %v8125_v56  ;;  %v8126_v40 = vmul.f32 %v15048_v36, %v19247_v10  ;;  %v14787_v55 = vld [vmem:[%s20498_s11 + $0x40] sm:$0xff]  }
 0x9a0   : > { %v15052_v43 = vpop.eup %15051  ;;  %v19271_v33 = vadd.f32 %v8324_v0, %v8123_v27  ;;  %v8124_v20 = vmul.f32 %v15050_v13, %v19249_v49  ;;  %v8340_v49 = vadd.f32 %v12277_v30, %v8339_v12  ;;  %v8634_v12 = vld [vmem:[#allocation4 + $0x2] sm:$0xff]  ;;  %v14789_v27 = vld [vmem:[%s20498_s11 + $0x98] sm:$0xff]  }
 0x9a1   : > { %20881 = vst [vmem:[#allocation80_spill] sm:$0xff] %v19268_v60  ;;  %v15054_v6 = vpop.eup %15053  ;;  %8365 = vst.msk [vmem:[#allocation4 + $0x31] sm:$0xff] %vm4142_vm5, %v19268_v60  ;;  %v19276_v22 = vadd.f32 %v8335_v53, %v8126_v40  ;;  %v8129_v7 = vmul.f32 %v15052_v43, %v19251_v58  ;;  %v8351_v58 = vadd.f32 %v14100_v23, %v12277_v30  ;;  %v14788_v23 = vld [vmem:[%s20498_s11 + $0x60] sm:$0xff]   ;;  %v14790_v40 = vld [vmem:[%s20498_s11 + $0xb8] sm:$0xff]  }
 0x9a2   : > { %20882 = vst [vmem:[#allocation83_spill] sm:$0xff] %v19271_v33  ;;  %v15056_v57 = vpop.eup %15055  ;;  %8363 = vst.msk [vmem:[#allocation4 + $0x11] sm:$0xff] %vm4142_vm5, %v19271_v33  ;;  %v19281_v50 = vadd.f32 %v8327_v48, %v8124_v20  ;;  %v8127_v10 = vmul.f32 %v15054_v6, %v19253_v24 }
 0x9a3   : > { %20883 = vst [vmem:[#allocation85_spill] sm:$0xff] %v19276_v22  ;;  %v15058_v46 = vpop.eup %15057  ;;  %8366 = vst.msk [vmem:[#allocation4 + $0x41] sm:$0xff] %vm4142_vm5, %v19276_v22  ;;  %v19286_v52 = vadd.f32 %v8348_v61, %v8129_v7  ;;  %v8130_v62 = vmul.f32 %v15056_v57, %v19256_v29  ;;  %v8412_v29 = vld [vmem:[#allocation4 + $0x1] sm:$0xff]  ;;  %v14791_v7 = vld [vmem:[%s20498_s11 + $0x90] sm:$0xff]  }
 0x9a4   : > { %20884 = vst [vmem:[#allocation45_spill] sm:$0xff] %v19281_v50  ;;  %8364 = vst.msk [vmem:[#allocation4 + $0x21] sm:$0xff] %vm4142_vm5, %v19281_v50  ;;  %v19291_v45 = vadd.f32 %v8340_v49, %v8127_v10  ;;  %v8128_v32 = vmul.f32 %v15058_v46, %v19259_v42  ;;  %v14793_v49 = vld [vmem:[%s20498_s11 + $0x88] sm:$0xff]  }
 0x9a5   : > { %20885 = vst [vmem:[#allocation46_spill] sm:$0xff] %v19286_v52  ;;  %8369 = vst.msk [vmem:[#allocation4 + $0x71] sm:$0xff] %vm4142_vm5, %v19286_v52  ;;  %v19296_v24 = vadd.f32 %v8351_v58, %v8130_v62  ;;  %v14794_v62 = vld [vmem:[%s20498_s11 + $0xa8] sm:$0xff]  }
 0x9a6   : > { %20886 = vst [vmem:[#allocation47_spill] sm:$0xff] %v19291_v45  ;;  %8367 = vst.msk [vmem:[#allocation4 + $0x51] sm:$0xff] %vm4142_vm5, %v19291_v45  ;;  %v19300_v39 = vadd.f32 %v8343_v5, %v8128_v32 }
 0x9a7   : > { %20887 = vst [vmem:[#allocation44_spill] sm:$0xff] %v19296_v24  ;;  %8370 = vst.msk [vmem:[#allocation4 + $0x81] sm:$0xff] %vm4142_vm5, %v19296_v24 }
 0x9a8   : > { %20888 = vst [vmem:[#allocation28_spill] sm:$0xff] %v19300_v39  ;;  %8368 = vst.msk [vmem:[#allocation4 + $0x61] sm:$0xff] %vm4142_vm5, %v19300_v39  ;;  %v19306_v42 = vld [vmem:[#allocation4 + $0x31] sm:$0xff] }
 0x9a9   : > { %v19308_v31 = vld [vmem:[#allocation4 + $0x11] sm:$0xff] }
 0x9aa   : > { %v8393_v11 = vld [vmem:[#allocation4 + $0x10] sm:$0xff]  ;;  %v8420_v15 = vpack.c.bf16 %v19308_v31, %v8412_v29  ;;  %v19313_v54 = vld [vmem:[#allocation4 + $0x41] sm:$0xff] }
 0x9ab   : > { %v19310_v34 = vld [vmem:[#allocation4 + $0x30] sm:$0xff]  ;;  %v8400_v8 = vpack.c.bf16 %v8393_v11, %v8392_v28  ;;  %v19315_v17 = vld [vmem:[#allocation4 + $0x21] sm:$0xff] }
 0x9ac   : > { %v8394_v3 = vld [vmem:[#allocation4 + $0x20] sm:$0xff]  ;;  %14109 = vmatprep.mubr.msk.bf16.mxu0 %vm4142_vm5, %v8420_v15  ;;  %v19323_v19 = vpack.c.bf16 %v19306_v42, %v19315_v17  ;;  %v19353_v37 = vld [vmem:[#allocation4 + $0x71] sm:$0xff]  ;;  %v8900_v5 = vpack.c.bf16 %v19315_v17, %v19308_v31  ;;  %v8901_v15 = vpack.c.bf16 %v19313_v54, %v19306_v42 }
 0x9ad   : > { %v19317_v14 = vld [vmem:[#allocation4 + $0x40] sm:$0xff]  ;;  %14125 = vmatprep.mubr.msk.bf16.mxu1 %vm4142_vm5, %v8400_v8  ;;  %v19326_v18 = vpack.c.bf16 %v19310_v34, %v8394_v3  ;;  %v19331_v47 = vld [vmem:[#allocation4 + $0x51] sm:$0xff]  ;;  %v8771_v36 = vpack.c.bf16 %v8394_v3, %v8393_v11 }
 0x9ae   : > { %v8397_v21 = vld [vmem:[#allocation4 + $0x50] sm:$0xff]  ;;  %14110 = vmatmul.mubr.msk.bf16.vlgmr.msra.gmra.mxu0 %vm4142_vm5, %v19323_v19  ;;  %v19342_v44 = vpack.c.bf16 %v19331_v47, %v19313_v54  ;;  %v8636_v0 = vld [vmem:[#allocation4 + $0x22] sm:$0xff]  ;;  %v8772_v48 = vpack.c.bf16 %v19317_v14, %v19310_v34  ;;  %v14797_v31 = vld [vmem:[%s20498_s11 + $0xd8] sm:$0xff]  }
 0x9af   : > { %14126 = vmatmul.mubr.msk.bf16.vlgmr.msra.gmra.mxu1 %vm4142_vm5, %v19326_v18  ;;  %v19345_v16 = vpack.c.bf16 %v8397_v21, %v19317_v14  ;;  %14134 = vmatpush3.bf16.msra.mxu0 %v19222_v9  ;;  %v19361_v9 = vld [vmem:[#allocation4 + $0x61] sm:$0xff]  ;;  %v8399_v59 = vld [vmem:[#allocation4 + $0x70] sm:$0xff]  ;;  %v14798_v34 = vld [vmem:[%s20498_s11 + $0xf8] sm:$0xff]  }
 0x9b0   : > { %14150 = vmatpush3.bf16.msra.mxu1 %v19227_v38  ;;  %14113 = vmatprep.mubr.msk.bf16.mxu0 %vm4142_vm5, %v19342_v44  ;;  %v8398_v38 = vld [vmem:[#allocation4 + $0x60] sm:$0xff]  ;;  %v19363_v30 = vld [vmem:[#allocation4 + $0x12] sm:$0xff]  ;;  %v19367_v26 = vpack.c.bf16 %v19353_v37, %v19361_v9  ;;  %v8902_v17 = vpack.c.bf16 %v19361_v9, %v19331_v47  ;;  %v14801_v54 = vld [vmem:[%s20498_s11 + $0xc8] sm:$0xff]  }
 0x9b1   : > { %14129 = vmatprep.mubr.msk.bf16.mxu1 %vm4142_vm5, %v19345_v16  ;;  %14135 = vmatprep.subr.bf16.mxu0 %v14783_v41  ;;  %v19369_v2 = vpack.c.bf16 %v8399_v59, %v8398_v38  ;;  %v8642_v56 = vpack.c.bf16 %v19363_v30, %v8634_v12  ;;  %v8637_v13 = vld [vmem:[#allocation4 + $0x32] sm:$0xff]  ;;  %v8638_v53 = vld [vmem:[#allocation4 + $0x42] sm:$0xff]  ;;  %v8773_v61 = vpack.c.bf16 %v8398_v38, %v8397_v21 }
 0x9b2   : > { %14151 = vmatprep.subr.bf16.mxu1 %v14784_v63  ;;  %v8639_v43 = vld [vmem:[#allocation4 + $0x52] sm:$0xff]  ;;  %v19390_v20 = vpack.c.bf16 %v8637_v13, %v8636_v0  ;;  %v8640_v57 = vld [vmem:[#allocation4 + $0x62] sm:$0xff]  ;;  %v9029_v28 = vpack.c.bf16 %v8636_v0, %v19363_v30  ;;  %v9030_v8 = vpack.c.bf16 %v8638_v53, %v8637_v13 }
 0x9b3   : > { %14136 = vmatpush3.bf16.msra.mxu0 %v14783_v41  ;;  %v19394_v6 = vpack.c.bf16 %v8639_v43, %v8638_v53  ;;  %v8641_v10 = vld [vmem:[#allocation4 + $0x72] sm:$0xff]  ;;  %v19411_v46 = vld [vmem:[#allocation4 + $0x80] sm:$0xff]  ;;  %v9031_v14 = vpack.c.bf16 %v8640_v57, %v8639_v43  ;;  %v14802_v21 = vld [vmem:[%s20498_s11 + $0xe8] sm:$0xff]  }
 0x9b4   : > { %14152 = vmatpush3.bf16.msra.mxu1 %v14784_v63  ;;  %14137 = vmatprep.subr.bf16.mxu0 %v14785_v51  ;;  %v19416_v58 = vpack.c.bf16 %v8641_v10, %v8640_v57  ;;  %v8774_v32 = vpack.c.bf16 %v19411_v46, %v8399_v59  ;;  %v14795_v29 = vld [vmem:[%s20498_s11 + $0x80] sm:$0xff]   ;;  %v14799_v3 = vld [vmem:[%s20498_s11 + $0xd0] sm:$0xff]   ;;  %v9562_v0 = vld [vmem:[%s20504_s17 + $0x48] sm:$0xff] }
 0x9b5   : > { %14153 = vmatprep.subr.bf16.mxu1 %v14786_v4  ;;  %v14796_v11 = vld [vmem:[%s20498_s11 + $0xa0] sm:$0xff]   ;;  %v14800_v41 = vld [vmem:[%s20498_s11 + $0xf0] sm:$0xff]   ;;  %v9558_v43 = vld [vmem:[%s20504_s17 + $0x28] sm:$0xff] }
 0x9b6   : > { %14114 = vmatmul.mubr.msk.bf16.gmra.mxu0 %vm4142_vm5, %v19367_v26  ;;  %v8899_v42 = vld [vmem:[#allocation4 + $0x81] sm:$0xff]  ;;  %v14806_v38 = vld [vmem:[%s20498_s11 + $0x110] sm:$0xff]  }
 0x9b7   : > { %14130 = vmatmul.mubr.msk.bf16.gmra.mxu1 %vm4142_vm5, %v19369_v2  ;;  %14138 = vmatpush3.bf16.msra.mxu0 %v14785_v51  ;;  %v9028_v47 = vld [vmem:[#allocation4 + $0x82] sm:$0xff]  ;;  %v8903_v63 = vpack.c.bf16 %v8899_v42, %v19353_v37  ;;  %v14805_v37 = vld [vmem:[%s20498_s11 + $0x118] sm:$0xff]   ;;  %v9559_v53 = vld [vmem:[%s20504_s17 + $0x30] sm:$0xff] }
 0x9b8   : > { %14141 = vmatprep.mubr.msk.bf16.mxu0 %vm4142_vm5, %v8642_v56  ;;  %14154 = vmatpush3.bf16.msra.mxu1 %v14786_v4  ;;  %v9032_v51 = vpack.c.bf16 %v9028_v47, %v8641_v10  ;;  %v14803_v4 = vld [vmem:[%s20498_s11 + $0xc0] sm:$0xff]   ;;  %v9416_v30 = vld [vmem:[#allocation4 + $0x92] sm:$0xff] }
 0x9b9   : > { %14157 = vmatprep.mubr.msk.bf16.mxu1 %vm4142_vm5, %v8771_v36  ;;  %14139 = vmatprep.subr.bf16.mxu0 %v14787_v55  ;;  %v14804_v9 = vld [vmem:[%s20498_s11 + $0xe0] sm:$0xff]   ;;  %v9567_v56 = vld [vmem:[%s20504_s17 + $0x70] sm:$0xff]  ;;  %v9564_v36 = vld [vmem:[%s20504_s17 + $0x58] sm:$0xff] }
 0x9ba   : > { %14155 = vmatprep.subr.bf16.mxu1 %v14788_v23  ;;  %v19498_v12 = vld [vmem:[#allocation5] sm:$0xff] }
 0x9bb   : > { %14140 = vmatpush3.bf16.msra.mxu0 %v14787_v55  ;;  %20889 = vst [vmem:[#allocation43_spill] sm:$0xff] %v19498_v12  ;;  %v9566_v55 = vld [vmem:[%s20504_s17 + $0x68] sm:$0xff]  ;;  %v9561_v13 = vld [vmem:[%s20504_s17 + $0x40] sm:$0xff] }
 0x9bc   : > { %14156 = vmatpush3.bf16.msra.mxu1 %v14788_v23  ;;  %14165 = vmatprep.subr.bf16.mxu0 %v14789_v27  ;;  %v9565_v23 = vld [vmem:[%s20504_s17 + $0x60] sm:$0xff] }
 0x9bd   : > { %14181 = vmatprep.subr.bf16.mxu1 %v14790_v40 }
 0x9be   : > { %14142 = vmatmul.mubr.msk.bf16.vlgmr.msra.gmra.mxu0 %vm4142_vm5, %v19390_v20 }
 0x9bf   : > { %14158 = vmatmul.mubr.msk.bf16.vlgmr.msra.gmra.mxu1 %vm4142_vm5, %v8772_v48  ;;  %14145 = vmatprep.mubr.msk.bf16.mxu0 %vm4142_vm5, %v19394_v6  ;;  %v9556_v48 = vld [vmem:[%s20504_s17 + $0x18] sm:$0xff] }
 0x9c0   : > { %14161 = vmatprep.mubr.msk.bf16.mxu1 %vm4142_vm5, %v8773_v61  ;;  %14166 = vmatpush3.bf16.msra.mxu0 %v14789_v27  ;;  %v9563_v27 = vld [vmem:[%s20504_s17 + $0x50] sm:$0xff]  ;;  %v9553_v61 = vld [vmem:[%s20504_s17] sm:$0xff] }
 0x9c1   : > { %14182 = vmatpush3.bf16.msra.mxu1 %v14790_v40  ;;  %14167 = vmatprep.subr.bf16.mxu0 %v14791_v7  ;;  %v9560_v40 = vld [vmem:[%s20504_s17 + $0x38] sm:$0xff] }
 0x9c2   : > { %14183 = vmatprep.subr.bf16.mxu1 %v14792_v25 }
 0x9c4   : > { %14168 = vmatpush3.bf16.msra.mxu0 %v14791_v7  ;;  %v9554_v7 = vld [vmem:[%s20504_s17 + $0x8] sm:$0xff] }
 0x9c5   : > { %14184 = vmatpush3.bf16.msra.mxu1 %v14792_v25  ;;  %14169 = vmatprep.subr.bf16.mxu0 %v14793_v49 }
 0x9c6   : > { %14146 = vmatmul.mubr.msk.bf16.gmra.mxu0 %vm4142_vm5, %v19416_v58  ;;  %14185 = vmatprep.subr.bf16.mxu1 %v14794_v62 }
 0x9c7   : > { %14162 = vmatmul.mubr.msk.bf16.gmra.mxu1 %vm4142_vm5, %v8774_v32  ;;  %14173 = vmatprep.mubr.msk.bf16.mxu0 %vm4142_vm5, %v8900_v5 }
 0x9c8   : > { %14170 = vmatpush3.bf16.msra.mxu0 %v14793_v49  ;;  %14189 = vmatprep.mubr.msk.bf16.mxu1 %vm4142_vm5, %v9029_v28 }
 0x9c9   : > { %14186 = vmatpush3.bf16.msra.mxu1 %v14794_v62  ;;  %14171 = vmatprep.subr.bf16.mxu0 %v14795_v29 }
 0x9ca   : > { %14187 = vmatprep.subr.bf16.mxu1 %v14796_v11 }
 0x9cc   : > { %14172 = vmatpush3.bf16.msra.mxu0 %v14795_v29 }
 0x9cd   : > { %14188 = vmatpush3.bf16.msra.mxu1 %v14796_v11  ;;  %14197 = vmatprep.subr.bf16.mxu0 %v14797_v31 }
 0x9ce   : > { %14213 = vmatprep.subr.bf16.mxu1 %v14798_v34 }
 0x9cf   : > { %14174 = vmatmul.mubr.msk.bf16.vlgmr.msra.gmra.mxu0 %vm4142_vm5, %v8901_v15 }
 0x9d0   : > { %14190 = vmatmul.mubr.msk.bf16.vlgmr.msra.gmra.mxu1 %vm4142_vm5, %v9030_v8  ;;  %14177 = vmatprep.mubr.msk.bf16.mxu0 %vm4142_vm5, %v8902_v17 }
 0x9d1   : > { %14193 = vmatprep.mubr.msk.bf16.mxu1 %vm4142_vm5, %v9031_v14  ;;  %14198 = vmatpush3.bf16.msra.mxu0 %v14797_v31 }
 0x9d2   : > { %14214 = vmatpush3.bf16.msra.mxu1 %v14798_v34  ;;  %14199 = vmatprep.subr.bf16.mxu0 %v14799_v3 }
 0x9d3   : > { %14215 = vmatprep.subr.bf16.mxu1 %v14800_v41 }
 0x9d5   : > { %14200 = vmatpush3.bf16.msra.mxu0 %v14799_v3 }
 0x9d6   : > { %14216 = vmatpush3.bf16.msra.mxu1 %v14800_v41  ;;  %14201 = vmatprep.subr.bf16.mxu0 %v14801_v54 }
 0x9d7   : > { %14178 = vmatmul.mubr.msk.bf16.gmra.mxu0 %vm4142_vm5, %v8903_v63  ;;  %14217 = vmatprep.subr.bf16.mxu1 %v14802_v21 }
 0x9d8   : > { %14194 = vmatmul.mubr.msk.bf16.gmra.mxu1 %vm4142_vm5, %v9032_v51  ;;  %14205 = vmatprep.mubr.msk.bf16.mxu0 %vm4142_vm5, %v19326_v18  ;;  %v14807_v18 = vld [vmem:[%s20498_s11 + $0x108] sm:$0xff]  }
 0x9d9   : > { %14202 = vmatpush3.bf16.msra.mxu0 %v14801_v54  ;;  %14221 = vmatprep.mubr.msk.bf16.mxu1 %vm4142_vm5, %v19323_v19  ;;  %v9158_v19 = vld [vmem:[#allocation4 + $0x90] sm:$0xff] }
 0x9da   : > { %14218 = vmatpush3.bf16.msra.mxu1 %v14802_v21  ;;  %14203 = vmatprep.subr.bf16.mxu0 %v14803_v4 }
 0x9db   : > { %14219 = vmatprep.subr.bf16.mxu1 %v14804_v9 }
 0x9dd   : > { %14204 = vmatpush3.bf16.msra.mxu0 %v14803_v4 }
 0x9de   : > { %14220 = vmatpush3.bf16.msra.mxu1 %v14804_v9  ;;  %14229 = vmatprep.subr.bf16.mxu0 %v14805_v37 }
 0x9df   : > { %14245 = vmatprep.subr.mxu1 %v18992_v1  ;;  %v9287_v1 = vld [vmem:[#allocation4 + $0x91] sm:$0xff] }
 0x9e0   : > { %14206 = vmatmul.mubr.msk.bf16.vlgmr.msra.gmra.mxu0 %vm4142_vm5, %v19345_v16  ;;  %v9162_v16 = vpack.c.bf16 %v9158_v19, %v19411_v46  ;;  %v9291_v59 = vpack.c.bf16 %v9287_v1, %v8899_v42 }
 0x9e1   : > { %14222 = vmatmul.mubr.msk.bf16.vlgmr.msra.gmra.mxu1 %vm4142_vm5, %v19342_v44  ;;  %14209 = vmatprep.mubr.msk.bf16.mxu0 %vm4142_vm5, %v19369_v2  ;;  %v14808_v44 = vld [vmem:[%s20498_s11 + $0x100] sm:$0xff]   ;;  %v9568_v2 = vld [vmem:[%s20504_s17 + $0x78] sm:$0xff] }
 0x9e2   : > { %14225 = vmatprep.mubr.msk.bf16.mxu1 %vm4142_vm5, %v19367_v26  ;;  %14230 = vmatpush3.bf16.msra.mxu0 %v14805_v37  ;;  %v9420_v26 = vpack.c.bf16 %v9416_v30, %v9028_v47 }
 0x9e3   : > { %14231 = vmatprep.subr.bf16.mxu0 %v14806_v38  ;;  %14246 = vmatpush3.msra.mxu1 %v9568_v2 }
 0x9e4   : > { %14247 = vmatprep.subr.mxu1 %v19498_v12 }
 0x9e5   : > { %14248 = vmatpush3.msra.mxu1 %v9567_v56 }
 0x9e6   : > { %14232 = vmatpush3.bf16.msra.mxu0 %v14806_v38  ;;  %14249 = vmatprep.subr.mxu1 %v19498_v12 }
 0x9e7   : > { %14233 = vmatprep.subr.bf16.mxu0 %v14807_v18  ;;  %14250 = vmatpush3.msra.mxu1 %v9566_v55 }
 0x9e8   : > { %14210 = vmatmul.mubr.msk.bf16.gmra.mxu0 %vm4142_vm5, %v9162_v16  ;;  %14251 = vmatprep.subr.mxu1 %v19498_v12 }
 0x9e9   : > { %14226 = vmatmul.mubr.msk.bf16.gmra.mxu1 %vm4142_vm5, %v9291_v59  ;;  %14237 = vmatprep.mubr.msk.bf16.mxu0 %vm4142_vm5, %v19390_v20  ;;  %v9557_v20 = vld [vmem:[%s20504_s17 + $0x20] sm:$0xff] }
 0x9ea   : > { %14234 = vmatpush3.bf16.msra.mxu0 %v14807_v18  ;;  %14277 = vmatprep.mubr.msk.f32.mxu1 %vm15171_vm2, %v19498_v12 }
 0x9eb   : > { %14235 = vmatprep.subr.bf16.mxu0 %v14808_v44  ;;  %14252 = vmatpush3.msra.mxu1 %v9565_v23 }
 0x9ec   : > { %14253 = vmatprep.subr.mxu1 %v19498_v12 }
 0x9ed   : > { %14254 = vmatpush3.msra.mxu1 %v9564_v36 }
 0x9ee   : > { %14236 = vmatpush3.bf16.msra.mxu0 %v14808_v44  ;;  %14255 = vmatprep.subr.mxu1 %v19498_v12 }
 0x9ef   : > { %14280 = vmatprep.subr.mxu0 %v19498_v12  ;;  %14256 = vmatpush3.msra.mxu1 %v9563_v27 }
 0x9f0   : > { %14257 = vmatprep.subr.mxu1 %v19498_v12 }
 0x9f1   : > { %14238 = vmatmul.mubr.msk.bf16.vlgmr.msra.gmra.mxu0 %vm4142_vm5, %v19394_v6  ;;  %14258 = vmatpush3.msra.mxu1 %v9562_v0  ;;  %v9555_v6 = vld [vmem:[%s20504_s17 + $0x10] sm:$0xff] }
 0x9f2   : > { %14241 = vmatprep.mubr.msk.bf16.mxu0 %vm4142_vm5, %v19416_v58  ;;  %14281 = vmatpush3.msra.mxu0 %v9568_v2 }
 0x9f3   : > { %14282 = vmatprep.subr.mxu0 %v19498_v12  ;;  %14259 = vmatprep.subr.mxu1 %v19498_v12 }
 0x9f4   : > { %14283 = vmatpush3.msra.mxu0 %v9567_v56  ;;  %14260 = vmatpush3.msra.mxu1 %v9561_v13 }
 0x9f5   : > { %14284 = vmatprep.subr.mxu0 %v19498_v12  ;;  %14261 = vmatprep.subr.mxu1 %v19498_v12 }
 0x9f6   : > { %14285 = vmatpush3.msra.mxu0 %v9566_v55  ;;  %14262 = vmatpush3.msra.mxu1 %v9560_v40 }
 0x9f7   : > { %14286 = vmatprep.subr.mxu0 %v19498_v12  ;;  %14263 = vmatprep.subr.mxu1 %v19498_v12 }
 0x9f8   : > { %14287 = vmatpush3.msra.mxu0 %v9565_v23  ;;  %14264 = vmatpush3.msra.mxu1 %v9559_v53 }
 0x9f9   : > { %14242 = vmatmul.mubr.msk.bf16.gmra.mxu0 %vm4142_vm5, %v9420_v26  ;;  %14288 = vmatprep.subr.mxu0 %v19498_v12 }
 0x9fa   : > { %14312 = vmatprep.mubr.msk.f32.mxu0 %vm15171_vm2, %v19498_v12  ;;  %14289 = vmatpush3.msra.mxu0 %v9564_v36 }
 0x9fb   : > { %14290 = vmatprep.subr.mxu0 %v19498_v12  ;;  %14265 = vmatprep.subr.mxu1 %v19498_v12 }
 0x9fc   : > { %14291 = vmatpush3.msra.mxu0 %v9563_v27  ;;  %14266 = vmatpush3.msra.mxu1 %v9558_v43 }
 0x9fd   : > { %14292 = vmatprep.subr.mxu0 %v19498_v12  ;;  %14267 = vmatprep.subr.mxu1 %v19498_v12 }
 0x9fe   : > { %14293 = vmatpush3.msra.mxu0 %v9562_v0  ;;  %14268 = vmatpush3.msra.mxu1 %v9557_v20 }
 0x9ff   : > { %14294 = vmatprep.subr.mxu0 %v19498_v12  ;;  %14269 = vmatprep.subr.mxu1 %v19498_v12 }
 0xa00   : > { %14295 = vmatpush3.msra.mxu0 %v9561_v13  ;;  %14270 = vmatpush3.msra.mxu1 %v9556_v48 }
 0xa01   : > { %14296 = vmatprep.subr.mxu0 %v19498_v12  ;;  %14271 = vmatprep.subr.mxu1 %v19498_v12 }
 0xa02   : > { %14297 = vmatpush3.msra.mxu0 %v9560_v40  ;;  %14272 = vmatpush3.msra.mxu1 %v9555_v6 }
 0xa03   : > { %14298 = vmatprep.subr.mxu0 %v19498_v12  ;;  %14273 = vmatprep.subr.mxu1 %v19498_v12 }
 0xa04   : > { %14299 = vmatpush3.msra.mxu0 %v9559_v53  ;;  %14274 = vmatpush3.msra.mxu1 %v9554_v7 }
 0xa05   : > { %14300 = vmatprep.subr.mxu0 %v19498_v12  ;;  %14275 = vmatprep.subr.mxu1 %v19498_v12 }
 0xa06   : > { %14301 = vmatpush3.msra.mxu0 %v9558_v43  ;;  %14276 = vmatpush3.msra.mxu1 %v9553_v61 }
 0xa07   : > { %14302 = vmatprep.subr.mxu0 %v19498_v12 }
 0xa08   : > { %14303 = vmatpush3.msra.mxu0 %v9557_v20 }
 0xa09   : > { %14304 = vmatprep.subr.mxu0 %v19498_v12 }
 0xa0a   : > { %14305 = vmatpush3.msra.mxu0 %v9556_v48 }
 0xa0b   : > { %14306 = vmatprep.subr.mxu0 %v19498_v12 }
 0xa0c   : > { %14307 = vmatpush3.msra.mxu0 %v9555_v6 }
 0xa0d   : > { %14308 = vmatprep.subr.mxu0 %v19498_v12 }
 0xa0e   : > { %14309 = vmatpush3.msra.mxu0 %v9554_v7 }
 0xa0f   : > { %14310 = vmatprep.subr.mxu0 %v19498_v12 }
 0xa10   : > { %14311 = vmatpush3.msra.mxu0 %v9553_v61 }
 0xa6e   : > { %v14111_v25 = vpop.f32.mrf.mxu0 }
 0xa6f   : > { %v14127_v57 = vpop.f32.mrf.mxu1 }
 0xa70   : > { %v8502_v10 = vpop.f32.mrf.mxu0  ;;  %v8612_v6 = vadd.f32 %v14127_v57, %v14111_v25 }
 0xa71   : > { %v8603_v49 = vpop.f32.mrf.mxu1 }
 0xa72   : > { %v14112_v46 = vpop.f32.mrf.mxu0  ;;  %v8604_v43 = vadd.f32 %v8603_v49, %v8502_v10 }
 0xa73   : > { %v14128_v62 = vpop.f32.mrf.mxu1 }
 0xa74   : > { %v8505_v58 = vpop.f32.mrf.mxu0  ;;  %v8615_v33 = vadd.f32 %v14128_v62, %v14112_v46 }
 0xa75   : > { %v8606_v32 = vpop.f32.mrf.mxu1 }
 0xa76   : > { %v14115_v5 = vpop.f32.mrf.mxu0  ;;  %v8607_v50 = vadd.f32 %v8606_v32, %v8505_v58 }
 0xa77   : > { %v14131_v29 = vpop.f32.mrf.mxu1 }
 0xa78   : > { %v8518_v28 = vpop.f32.mrf.mxu0  ;;  %v8628_v10 = vadd.f32 %v14131_v29, %v14115_v5 }
 0xa79   : > { %v8619_v11 = vpop.f32.mrf.mxu1 }
 0xa7a   : > { %v14116_v31 = vpop.f32.mrf.mxu0  ;;  %v8620_v35 = vadd.f32 %v8619_v11, %v8518_v28 }
 0xa7b   : > { %v14132_v34 = vpop.f32.mrf.mxu1 }
 0xa7c   : > { %v8521_v15 = vpop.f32.mrf.mxu0  ;;  %v8631_v46 = vadd.f32 %v14132_v34, %v14116_v31 }
 0xa7d   : > { %v8622_v8 = vpop.f32.mrf.mxu1 }
 0xa7e   : > { %v14143_v17 = vpop.f32.mrf.mxu0  ;;  %v8623_v62 = vadd.f32 %v8622_v8, %v8521_v15 }
 0xa7f   : > { %v14159_v3 = vpop.f32.mrf.mxu1  ;;  %v8757_v60 = vadd.f32 %v14143_v17, %v8612_v6 }
 0xa80   : > { %v8724_v14 = vpop.f32.mrf.mxu0 }
 0xa81   : > { %v8853_v41 = vpop.f32.mrf.mxu1  ;;  %v8755_v7 = vadd.f32 %v8724_v14, %v8604_v43 }
 0xa82   : > { %v14144_v42 = vpop.f32.mrf.mxu0 }
 0xa83   : > { %v14160_v54 = vpop.f32.mrf.mxu1  ;;  %v8758_v39 = vadd.f32 %v14144_v42, %v8615_v33  ;;  %v8884_v52 = vadd.f32 %v8853_v41, %v8755_v7 }
 0xa84   : > { %v8727_v47 = vpop.f32.mrf.mxu0 }
 0xa85   : > { %v8856_v21 = vpop.f32.mrf.mxu1  ;;  %v8756_v24 = vadd.f32 %v8727_v47, %v8607_v50  ;;  %v8887_v49 = vadd.f32 %v14160_v54, %v8758_v39 }
 0xa86   : > { %v14147_v63 = vpop.f32.mrf.mxu0 }
 0xa87   : > { %v19588_v51 = vpop.f32.mrf.mxu1  ;;  %v8761_v58 = vadd.f32 %v14147_v63, %v8628_v10 }
 0xa88   : > { %v8740_v4 = vpop.f32.mrf.mxu0 }
 0xa89   : > { %v8869_v9 = vpop.f32.mrf.mxu1  ;;  %v8759_v25 = vadd.f32 %v8740_v4, %v8620_v35  ;;  %v8890_v39 = vadd.f32 %v19588_v51, %v8761_v58 }
 0xa8a   : > { %v14148_v37 = vpop.f32.mrf.mxu0 }
 0xa8b   : > { %v19590_v38 = vpop.f32.mrf.mxu1  ;;  %v8762_v42 = vadd.f32 %v14148_v37, %v8631_v46 }
 0xa8c   : > { %20890 = vst [vmem:[#allocation27_spill] sm:$0xff] %v19590_v38  ;;  %v8743_v19 = vpop.f32.mrf.mxu0  ;;  %v8885_v38 = vadd.f32 %v8856_v21, %v8756_v24 }
 0xa8d   : > { %v19592_v18 = vpop.f32.mrf.mxu1  ;;  %v8760_v28 = vadd.f32 %v8743_v19, %v8623_v62 }
 0xa8e   : > { %20891 = vst [vmem:[#allocation42_spill] sm:$0xff] %v19592_v18 }
 0xa8f   : > { %v14175_v1 = vpop.f32.mrf.mxu0 }
 0xa90   : > { %v14191_v16 = vpop.f32.mrf.mxu1 }
 0xa91   : > { %v8982_v59 = vpop.f32.mrf.mxu0 }
 0xa92   : > { %v9111_v44 = vpop.f32.mrf.mxu1 }
 0xa93   : > { %v14176_v30 = vpop.f32.mrf.mxu0  ;;  %v20895_v34 = vld [vmem:[#allocation27_spill] sm:$0xff] }
 0xa94   : > { %v14192_v26 = vpop.f32.mrf.mxu1  ;;  %v9016_v32 = vadd.f32 %v14176_v30, %v8887_v49  ;;  %v8891_v15 = vadd.f32 %v20895_v34, %v8762_v42 }
 0xa95   : > { %v8985_v2 = vpop.f32.mrf.mxu0  ;;  %v20896_v8 = vld [vmem:[#allocation42_spill] sm:$0xff] }
 0xa96   : > { %v9114_v56 = vpop.f32.mrf.mxu1  ;;  %v9014_v33 = vadd.f32 %v8985_v2, %v8885_v38  ;;  %v9145_v24 = vadd.f32 %v14192_v26, %v9016_v32  ;;  %v8889_v54 = vadd.f32 %v20896_v8, %v8760_v28 }
 0xa97   : > { %v14179_v55 = vpop.f32.mrf.mxu0 }
 0xa98   : > { %v19594_v23 = vpop.f32.mrf.mxu1  ;;  %v9143_v35 = vadd.f32 %v9114_v56, %v9014_v33  ;;  %v9019_v47 = vadd.f32 %v14179_v55, %v8890_v39 }
 0xa99   : > { %20892 = vst [vmem:[#allocation26_spill] sm:$0xff] %v19594_v23  ;;  %v8998_v36 = vpop.f32.mrf.mxu0  ;;  %v9013_v23 = vadd.f32 %v8982_v59, %v8884_v52 }
 0xa9a   : > { %v9127_v27 = vpop.f32.mrf.mxu1 }
 0xa9b   : > { %v14180_v0 = vpop.f32.mrf.mxu0  ;;  %v9142_v17 = vadd.f32 %v9111_v44, %v9013_v23 }
 0xa9c   : > { %v19596_v13 = vpop.f32.mrf.mxu1 }
 0xa9d   : > { %20893 = vst [vmem:[#allocation41_spill] sm:$0xff] %v19596_v13  ;;  %v9001_v40 = vpop.f32.mrf.mxu0  ;;  %v8886_v13 = vadd.f32 %v14159_v3, %v8757_v60  ;;  %v8888_v60 = vadd.f32 %v8869_v9, %v8759_v25  ;;  %v9020_v9 = vadd.f32 %v14180_v0, %v8891_v15 }
 0xa9e   : > { %v19598_v53 = vpop.f32.mrf.mxu1  ;;  %v9018_v38 = vadd.f32 %v9001_v40, %v8889_v54 }
 0xa9f   : > { %20894 = vst [vmem:[#allocation25_spill] sm:$0xff] %v19598_v53  ;;  %v9015_v57 = vadd.f32 %v14175_v1, %v8886_v13  ;;  %v9017_v5 = vadd.f32 %v8998_v36, %v8888_v60 }
 0xaa0   : > { %v14207_v20 = vpop.f32.mrf.mxu0  ;;  %v20897_v44 = vld [vmem:[#allocation26_spill] sm:$0xff] }
 0xaa1   : > { %v14223_v48 = vpop.f32.mrf.mxu1  ;;  %v9144_v52 = vadd.f32 %v14191_v16, %v9015_v57  ;;  %v9146_v1 = vadd.f32 %v9127_v27, %v9017_v5  ;;  %v9148_v30 = vadd.f32 %v20897_v44, %v9019_v47 }
 0xaa2   : > { %v9241_v61 = vpop.f32.mrf.mxu0 }
 0xaa3   : > { %v9370_v22 = vpop.f32.mrf.mxu1  ;;  %v9272_v11 = vadd.f32 %v9241_v61, %v9142_v17  ;;  %v9274_v29 = vadd.f32 %v14207_v20, %v9144_v52 }
 0xaa4   : > { %v14208_v45 = vpop.f32.mrf.mxu0  ;;  %v20898_v13 = vld [vmem:[#allocation41_spill] sm:$0xff] }
 0xaa5   : > { %v14224_v18 = vpop.f32.mrf.mxu1  ;;  %v9275_v21 = vadd.f32 %v14208_v45, %v9145_v24  ;;  %v9401_v4 = vadd.f32 %v9370_v22, %v9272_v11  ;;  %v9403_v16 = vadd.f32 %v14223_v48, %v9274_v29  ;;  %v9149_v55 = vadd.f32 %v20898_v13, %v9020_v9 }
 0xaa6   : > { %v9244_v12 = vpop.f32.mrf.mxu0  ;;  %v20899_v45 = vld [vmem:[#allocation25_spill] sm:$0xff] }
 0xaa7   : > { %v9373_v41 = vpop.f32.mrf.mxu1  ;;  %v9273_v37 = vadd.f32 %v9244_v12, %v9143_v35  ;;  %v9404_v26 = vadd.f32 %v14224_v18, %v9275_v21  ;;  %v9147_v43 = vadd.f32 %v20899_v45, %v9018_v38  ;;  %v12356_v12 = vld [vmem:[%s20501_s14] ss:$0 sm:$0xff] }
 0xaa8   : > { %v14211_v53 = vpop.f32.mrf.mxu0 }
 0xaa9   : > { %v14227_v31 = vpop.f32.mrf.mxu1  ;;  %v9402_v56 = vadd.f32 %v9373_v41, %v9273_v37  ;;  %v9278_v22 = vadd.f32 %v14211_v53, %v9148_v30 }
 0xaaa   : > { %v9257_v14 = vpop.f32.mrf.mxu0 }
 0xaab   : > { %v9386_v51 = vpop.f32.mrf.mxu1  ;;  %v9276_v23 = vadd.f32 %v9257_v14, %v9146_v1  ;;  %v9407_v25 = vadd.f32 %v14227_v31, %v9278_v22  ;;  %v14810_v22 = vld [vmem:[%s20499_s12 + $0x38] sm:$0xff]  }
 0xaac   : > { %v14212_v50 = vpop.f32.mrf.mxu0  ;;  %14339 = vmatprep.subr.bf16.mxu0 %v14810_v22 }
 0xaad   : > { %v14228_v40 = vpop.f32.mrf.mxu1  ;;  %v9279_v18 = vadd.f32 %v14212_v50, %v9149_v55  ;;  %v9405_v61 = vadd.f32 %v9386_v51, %v9276_v23 }
 0xaae   : > { %v9260_v3 = vpop.f32.mrf.mxu0 }
 0xaaf   : > { %v9277_v6 = vadd.f32 %v9260_v3, %v9147_v43  ;;  %v9389_v14 = vpop.f32.mrf.mxu1  ;;  %v9408_v17 = vadd.f32 %v14228_v40, %v9279_v18  ;;  %v14809_v43 = vld [vmem:[%s20499_s12 + $0x78] sm:$0xff]   ;;  %v14814_v40 = vld [vmem:[%s20499_s12 + $0x28] sm:$0xff]   ;;  %v14816_v18 = vld [vmem:[%s20499_s12 + $0x20] sm:$0xff]  }
 0xab0   : > { %14315 = vmatprep.subr.bf16.mxu1 %v14809_v43 }
 0xab1   : > { %v14239_v63 = vpop.f32.mrf.mxu0  ;;  %v9406_v33 = vadd.f32 %v9389_v14, %v9277_v6  ;;  %v14817_v6 = vld [vmem:[%s20499_s12 + $0x58] sm:$0xff]   ;;  %v14822_v14 = vld [vmem:[%s20499_s12 + $0x8] sm:$0xff]  }
 0xab2   : > { %v9532_v36 = vadd.f32 %v14239_v63, %v9403_v16 }
 0xab3   : > { %v9499_v19 = vpop.f32.mrf.mxu0 }
 0xab4   : > { %v9530_v59 = vadd.f32 %v9499_v19, %v9401_v4  ;;  %v19611_v10 = vadd.f32 %v12356_v12, %v9532_v36 }
 0xab5   : > { %v14240_v2 = vpop.f32.mrf.mxu0 }
 0xab6   : > { %v9533_v27 = vadd.f32 %v14240_v2, %v9404_v26  ;;  %v19609_v20 = vadd.f32 %v12356_v12, %v9530_v59  ;;  %v9584_v42 = vmul.f32 %v19611_v10, %v19611_v10 }
 0xab7   : > { %v9502_v0 = vpop.f32.mrf.mxu0 }
 0xab8   : > { %v9531_v48 = vadd.f32 %v9502_v0, %v9402_v56  ;;  %v19615_v53 = vadd.f32 %v12356_v12, %v9533_v27  ;;  %v9582_v46 = vmul.f32 %v19609_v20, %v19609_v20  ;;  %v14812_v27 = vld [vmem:[%s20499_s12 + $0x30] sm:$0xff]   ;;  %v14813_v0 = vld [vmem:[%s20499_s12 + $0x68] sm:$0xff]  }
 0xab9   : > { %v14243_v7 = vpop.f32.mrf.mxu0 }
 0xaba   : > { %v19613_v49 = vadd.f32 %v12356_v12, %v9531_v48  ;;  %v9536_v41 = vadd.f32 %v14243_v7, %v9407_v25  ;;  %v9585_v11 = vmul.f32 %v19615_v53, %v19615_v53  ;;  %v14815_v48 = vld [vmem:[%s20499_s12 + $0x60] sm:$0xff]   ;;  %v14818_v7 = vld [vmem:[%s20499_s12 + $0x18] sm:$0xff]   ;;  %v14820_v25 = vld [vmem:[%s20499_s12 + $0x10] sm:$0xff]  }
 0xabb   : > { %v9515_v57 = vpop.f32.mrf.mxu0 }
 0xabc   : > { %v9569_v62 = vadd.f32 %v19613_v49, %v19609_v20  ;;  %v9583_v58 = vmul.f32 %v19613_v49, %v19613_v49  ;;  %v9534_v32 = vadd.f32 %v9515_v57, %v9405_v61  ;;  %v19631_v29 = vadd.f32 %v12356_v12, %v9536_v41  ;;  %v14819_v61 = vld [vmem:[%s20499_s12 + $0x50] sm:$0xff]   ;;  %v14821_v57 = vld [vmem:[%s20499_s12 + $0x48] sm:$0xff]  }
 0xabd   : > { %v14244_v50 = vpop.f32.mrf.mxu0 }
 0xabe   : > { %v9570_v28 = vadd.f32 %v9569_v62, %v19611_v10  ;;  %v9590_v60 = vadd.f32 %v9583_v58, %v9582_v46  ;;  %v19626_v52 = vadd.f32 %v12356_v12, %v9534_v32  ;;  %v9537_v35 = vadd.f32 %v14244_v50, %v9408_v17  ;;  %v14823_v46 = vld [vmem:[%s20499_s12 + $0x40] sm:$0xff]   ;;  %v19700_v58 = vld [vmem:[%s20499_s12 + $0xb8] sm:$0xff]  }
 0xabf   : > { %v9518_v3 = vpop.f32.mrf.mxu0  ;;  %v9588_v4 = vmul.f32 %v19631_v29, %v19631_v29  ;;  %v14824_v62 = vld [vmem:[%s20499_s12] sm:$0xff]   ;;  %v19705_v32 = vld [vmem:[%s20499_s12 + $0xf8] sm:$0xff]  }
 0xac0   : > { %v9591_v39 = vadd.f32 %v9590_v60, %v9584_v42  ;;  %v9571_v24 = vadd.f32 %v9570_v28, %v19615_v53  ;;  %v9535_v5 = vadd.f32 %v9518_v3, %v9406_v33  ;;  %v9586_v34 = vmul.f32 %v19626_v52, %v19626_v52 }
 0xac1   : > { %v19638_v47 = vadd.f32 %v12356_v12, %v9537_v35 }
 0xac2   : > { %v9572_v31 = vadd.f32 %v9571_v24, %v19626_v52  ;;  %v9592_v15 = vadd.f32 %v9591_v39, %v9585_v11  ;;  %v19636_v8 = vadd.f32 %v12356_v12, %v9535_v5  ;;  %v14811_v12 = vld [vmem:[%s20499_s12 + $0x70] sm:$0xff]   ;;  %v20900_v24 = vld [vmem:[#allocation12_spill] sm:$0xff] }
 0xac3   : > { %v9589_v38 = vmul.f32 %v19638_v47, %v19638_v47  ;;  %v9551_v5 = vld [vmem:[%s20501_s14 + $0x1] sm:$0x1] }
 0xac4   : > { %v9593_v54 = vadd.f32 %v9592_v15, %v9586_v34  ;;  %v9573_v21 = vadd.f32 %v9572_v31, %v19636_v8  ;;  %v9587_v63 = vmul.f32 %v19636_v8, %v19636_v8 }
 0xac6   : > { %v9574_v37 = vadd.f32 %v9573_v21, %v19631_v29  ;;  %v9594_v9 = vadd.f32 %v9593_v54, %v9587_v63 }
 0xac8   : > { %v9575_v19 = vadd.f32 %v9574_v37, %v19638_v47  ;;  %v9595_v1 = vadd.f32 %v9594_v9, %v9588_v4 }
 0xaca   : > { %v9576_v16 = vrot.slane %v9575_v19, 4  ;;  %v9596_v51 = vadd.f32 %v9595_v1, %v9589_v38 }
 0xacc   : > { %v9577_v59 = vadd.f32 %v9576_v16, %v9575_v19  ;;  %v9597_v44 = vrot.slane %v9596_v51, 4 }
 0xace   : > { %v9578_v30 = vrot.slane %v9577_v59, 2  ;;  %v9598_v26 = vadd.f32 %v9597_v44, %v9596_v51 }
 0xad0   : > { %v9579_v2 = vadd.f32 %v9578_v30, %v9577_v59  ;;  %v9599_v56 = vrot.slane %v9598_v26, 2 }
 0xad2   : > { %v9580_v23 = vrot.slane %v9579_v2, 1  ;;  %v9600_v36 = vadd.f32 %v9599_v56, %v9598_v26 }
 0xad4   : > { %v9581_v13 = vadd.f32 %v9580_v23, %v9579_v2  ;;  %v9601_v55 = vrot.slane %v9600_v36, 1 }
 0xad6   : > { %14278 = vmatmul.mubr.f32.vlgmr.msra.gmra.mxu1 %v9581_v13  ;;  %v9602_v45 = vadd.f32 %v9601_v55, %v9600_v36 }
 0xad7   : > { %14316 = vmatpush3.bf16.msra.mxu1 %v14809_v43 }
 0xad8   : > { %14313 = vmatmul.mubr.f32.vlgmr.msra.gmra.mxu0 %v9602_v45  ;;  %14317 = vmatprep.subr.bf16.mxu1 %v14811_v12 }
 0xad9   : > { %14340 = vmatpush3.bf16.msra.mxu0 %v14810_v22 }
 0xada   : > { %14341 = vmatprep.subr.bf16.mxu0 %v14812_v27 }
 0xadb   : > { %14318 = vmatpush3.bf16.msra.mxu1 %v14811_v12 }
 0xadc   : > { %14319 = vmatprep.subr.bf16.mxu1 %v14813_v0 }
 0xadd   : > { %14342 = vmatpush3.bf16.msra.mxu0 %v14812_v27 }
 0xade   : > { %14343 = vmatprep.subr.bf16.mxu0 %v14814_v40 }
 0xadf   : > { %14320 = vmatpush3.bf16.msra.mxu1 %v14813_v0 }
 0xae0   : > { %14321 = vmatprep.subr.bf16.mxu1 %v14815_v48 }
 0xae1   : > { %14344 = vmatpush3.bf16.msra.mxu0 %v14814_v40 }
 0xae2   : > { %14345 = vmatprep.subr.bf16.mxu0 %v14816_v18 }
 0xae3   : > { %14322 = vmatpush3.bf16.msra.mxu1 %v14815_v48 }
 0xae4   : > { %14323 = vmatprep.subr.bf16.mxu1 %v14817_v6 }
 0xae5   : > { %14346 = vmatpush3.bf16.msra.mxu0 %v14816_v18 }
 0xae6   : > { %14347 = vmatprep.subr.bf16.mxu0 %v14818_v7 }
 0xae7   : > { %14324 = vmatpush3.bf16.msra.mxu1 %v14817_v6 }
 0xae8   : > { %14325 = vmatprep.subr.bf16.mxu1 %v14819_v61 }
 0xae9   : > { %14348 = vmatpush3.bf16.msra.mxu0 %v14818_v7 }
 0xaea   : > { %14349 = vmatprep.subr.bf16.mxu0 %v14820_v25 }
 0xaeb   : > { %14326 = vmatpush3.bf16.msra.mxu1 %v14819_v61 }
 0xaec   : > { %14327 = vmatprep.subr.bf16.mxu1 %v14821_v57 }
 0xaed   : > { %14350 = vmatpush3.bf16.msra.mxu0 %v14820_v25 }
 0xaee   : > { %14351 = vmatprep.subr.bf16.mxu0 %v14822_v14 }
 0xaef   : > { %14328 = vmatpush3.bf16.msra.mxu1 %v14821_v57 }
 0xaf0   : > { %14329 = vmatprep.subr.bf16.mxu1 %v14823_v46 }
 0xaf1   : > { %14352 = vmatpush3.bf16.msra.mxu0 %v14822_v14 }
 0xaf2   : > { %14353 = vmatprep.subr.bf16.mxu0 %v14824_v62 }
 0xaf3   : > { %14330 = vmatpush3.bf16.msra.mxu1 %v14823_v46 }
 0xaf4   : > { %14363 = vmatprep.subr.bf16.mxu1 %v19700_v58 }
 0xaf5   : > { %14354 = vmatpush3.bf16.msra.mxu0 %v14824_v62 }
 0xaf6   : > { %14387 = vmatprep.subr.bf16.mxu0 %v19705_v32 }
 0xb96   : > { %v9669_v17 = vpop.f32.mrf.mxu1 }
 0xb97   : > { %v9673_v33 = vmul.f32 0.0009765625, %v9669_v17 }
 0xb98   : > { %v14279_v41 = vpop.f32.mrf.mxu1  ;;  %v9740_v50 = vpop.f32.mrf.mxu0 }
 0xb99   : > { %v9745_v42 = vmul.f32 %v9673_v33, %v9673_v33  ;;  %v9744_v28 = vmul.f32 0.0009765625, %v9740_v50  ;;  %v9753_v35 = vrot.slane %v9673_v33, %v20900_v24 }
 0xb9a   : > { %v14314_v60 = vpop.f32.mrf.mxu0 }
 0xb9b   : > { %v9746_v11 = vsub.f32 %v9744_v28, %v9745_v42  ;;  %v9754_v15 = vsub.f32 %v19609_v20, %v9753_v35  ;;  %v9755_v54 = vsub.f32 %v19613_v49, %v9753_v35  ;;  %v9756_v21 = vsub.f32 %v19611_v10, %v9753_v35  ;;  %v12357_v20 = vld [vmem:[%s20501_s14 + $0x2] ss:$0 sm:$0xff] }
 0xb9c   : > { %v9757_v63 = vsub.f32 %v19615_v53, %v9753_v35  ;;  %v9758_v37 = vsub.f32 %v19626_v52, %v9753_v35  ;;  %v9759_v9 = vsub.f32 %v19636_v8, %v9753_v35  ;;  %v9760_v38 = vsub.f32 %v19631_v29, %v9753_v35  ;;  %v9901_v42 = vld [vmem:[#allocation5 + $0x1] sm:$0xff] }
 0xb9d   : > { %v9747_v3 = vmax.f32 %v9746_v11, 0.0  ;;  %v9761_v19 = vsub.f32 %v19638_v47, %v9753_v35 }
 0xb9f   : > { %v9748_v39 = vadd.f32 1e-05, %v9747_v3 }
 0xba1   : > { %15059 = vrsqrt.f32 %v9748_v39 }
 0xbae   : > { %v15060_v31 = vpop.eup %15059 }
 0xbaf   : > { %v9762_v34 = vmul.f32 %v15060_v31, %v9551_v5 }
 0xbb1   : > { %v9766_v4 = vrot.slane %v9762_v34, %v20900_v24 }
 0xbb3   : > { %v9767_v1 = vmul.f32 %v9766_v4, %v9754_v15  ;;  %v9768_v49 = vmul.f32 %v9766_v4, %v9755_v54  ;;  %v9769_v16 = vmul.f32 %v9766_v4, %v9756_v21  ;;  %v9770_v10 = vmul.f32 %v9766_v4, %v9757_v63  ;;  %v14827_v63 = vld [vmem:[%s20499_s12 + $0xb0] sm:$0xff]  }
 0xbb4   : > { %v9771_v51 = vmul.f32 %v9766_v4, %v9758_v37  ;;  %v9772_v53 = vmul.f32 %v9766_v4, %v9759_v9  ;;  %v9773_v59 = vmul.f32 %v9766_v4, %v9760_v38  ;;  %v9774_v44 = vmul.f32 %v9766_v4, %v9761_v19 }
 0xbb5   : > { %v9779_v30 = vadd.f32 %v12357_v20, %v9767_v1  ;;  %v9780_v52 = vadd.f32 %v12357_v20, %v9768_v49  ;;  %v9781_v26 = vadd.f32 %v12357_v20, %v9769_v16  ;;  %v9782_v8 = vadd.f32 %v12357_v20, %v9770_v10  ;;  %v14829_v16 = vld [vmem:[%s20499_s12 + $0xa8] sm:$0xff]  }
 0xbb6   : > { %v9783_v2 = vadd.f32 %v12357_v20, %v9771_v51  ;;  %v19725_v29 = vadd.f32 %v12357_v20, %v9772_v53  ;;  %v19727_v36 = vadd.f32 %v12357_v20, %v9773_v59  ;;  %v19729_v55 = vadd.f32 %v12357_v20, %v9774_v44  ;;  %v20901_v51 = vld [vmem:[#allocation43_spill] sm:$0xff] }
 0xbb7   : > { %v12358_v47 = vmul.f32 -1.442695, %v9779_v30  ;;  %v12359_v56 = vmul.f32 -1.442695, %v9780_v52  ;;  %v12360_v23 = vmul.f32 -1.442695, %v9781_v26 }
 0xbb8   : > { %v12361_v13 = vmul.f32 -1.442695, %v9782_v8  ;;  %v12362_v45 = vmul.f32 -1.442695, %v9783_v2  ;;  %v12363_v43 = vmul.f32 -1.442695, %v19725_v29 }
 0xbb9   : > { %15061 = vpow2.f32 %v12358_v47  ;;  %v12364_v22 = vmul.f32 -1.442695, %v19727_v36  ;;  %v12365_v12 = vmul.f32 -1.442695, %v19729_v55 }
 0xbba   : > { %15063 = vpow2.f32 %v12359_v56  ;;  %v14831_v56 = vld [vmem:[%s20499_s12 + $0xa0] sm:$0xff]  }
 0xbbb   : > { %15065 = vpow2.f32 %v12360_v23 }
 0xbbc   : > { %15067 = vpow2.f32 %v12361_v13  ;;  %v14830_v13 = vld [vmem:[%s20499_s12 + $0xe8] sm:$0xff]  }
 0xbbd   : > { %15069 = vpow2.f32 %v12362_v45 }
 0xbbe   : > { %15071 = vpow2.f32 %v12363_v43 }
 0xbbf   : > { %15073 = vpow2.f32 %v12364_v22  ;;  %v14832_v22 = vld [vmem:[%s20499_s12 + $0xe0] sm:$0xff]  }
 0xbc0   : > { %15075 = vpow2.f32 %v12365_v12 }
 0xbc6   : > { %v15062_v27 = vpop.eup %15061 }
 0xbc7   : > { %v15064_v0 = vpop.eup %15063  ;;  %v9811_v40 = vadd.f32 1.0, %v15062_v27  ;;  %v14835_v27 = vld [vmem:[%s20499_s12 + $0x90] sm:$0xff]  }
 0xbc8   : > { %v15066_v48 = vpop.eup %15065  ;;  %v9812_v18 = vadd.f32 1.0, %v15064_v0  ;;  %v14834_v0 = vld [vmem:[%s20499_s12 + $0xd8] sm:$0xff]  }
 0xbc9   : > { %v15068_v6 = vpop.eup %15067  ;;  %15077 = vrcp.f32 %v9811_v40  ;;  %v9813_v7 = vadd.f32 1.0, %v15066_v48  ;;  %v14837_v40 = vld [vmem:[%s20499_s12 + $0x88] sm:$0xff]   ;;  %v14836_v48 = vld [vmem:[%s20499_s12 + $0xd0] sm:$0xff]  }
 0xbca   : > { %v15070_v61 = vpop.eup %15069  ;;  %15079 = vrcp.f32 %v9812_v18  ;;  %v9814_v25 = vadd.f32 1.0, %v15068_v6  ;;  %v14839_v18 = vld [vmem:[%s20499_s12 + $0x80] sm:$0xff]   ;;  %v14838_v6 = vld [vmem:[%s20499_s12 + $0xc8] sm:$0xff]  }
 0xbcb   : > { %v15072_v57 = vpop.eup %15071  ;;  %15081 = vrcp.f32 %v9813_v7  ;;  %v9815_v14 = vadd.f32 1.0, %v15070_v61  ;;  %v14841_v7 = vld [vmem:[%s20499_s12 + $0x138] sm:$0xff]  }
 0xbcc   : > { %v15074_v46 = vpop.eup %15073  ;;  %15083 = vrcp.f32 %v9814_v25  ;;  %v9816_v62 = vadd.f32 1.0, %v15072_v57 }
 0xbcd   : > { %v15076_v17 = vpop.eup %15075  ;;  %15085 = vrcp.f32 %v9815_v14  ;;  %v9817_v33 = vadd.f32 1.0, %v15074_v46  ;;  %v14840_v46 = vld [vmem:[%s20499_s12 + $0xc0] sm:$0xff]  }
 0xbce   : > { %15087 = vrcp.f32 %v9816_v62  ;;  %v9818_v41 = vadd.f32 1.0, %v15076_v17 }
 0xbcf   : > { %15089 = vrcp.f32 %v9817_v33  ;;  %v14843_v33 = vld [vmem:[%s20499_s12 + $0x130] sm:$0xff]  }
 0xbd0   : > { %15091 = vrcp.f32 %v9818_v41  ;;  %v14842_v41 = vld [vmem:[%s20499_s12 + $0x178] sm:$0xff]  }
 0xbd6   : > { %v15078_v50 = vpop.eup %15077 }
 0xbd7   : > { %v15080_v28 = vpop.eup %15079  ;;  %v19734_v60 = vmul.f32 %v15078_v50, %v9779_v30  ;;  %v14828_v30 = vld [vmem:[%s20499_s12 + $0xf0] sm:$0xff]   ;;  %v14845_v50 = vld [vmem:[%s20499_s12 + $0x128] sm:$0xff]  }
 0xbd8   : > { %v15082_v11 = vpop.eup %15081  ;;  %v19736_v3 = vmul.f32 %v15080_v28, %v9780_v52 }
 0xbd9   : > { %v15084_v39 = vpop.eup %15083  ;;  %9844 = vst [vmem:[#allocation5 + $0x11] sm:$0xff] %v19734_v60  ;;  %v9909_v35 = vpack.c.bf16 %v19734_v60, %v9901_v42  ;;  %v19740_v5 = vmul.f32 %v15082_v11, %v9781_v26 }
 0xbda   : > { %v15086_v31 = vpop.eup %15085  ;;  %9845 = vst [vmem:[#allocation5 + $0x21] sm:$0xff] %v19736_v3  ;;  %v19743_v34 = vmul.f32 %v15084_v39, %v9782_v8  ;;  %v14844_v39 = vld [vmem:[%s20499_s12 + $0x170] sm:$0xff]  }
 0xbdb   : > { %v15088_v15 = vpop.eup %15087  ;;  %14331 = vmatprep.mubr.bf16.mxu1 %v9909_v35  ;;  %9846 = vst [vmem:[#allocation5 + $0x31] sm:$0xff] %v19740_v5  ;;  %v19748_v54 = vpack.c.bf16 %v19740_v5, %v19736_v3  ;;  %v19750_v21 = vmul.f32 %v15086_v31, %v9783_v2  ;;  %v10155_v2 = vld [vmem:[#allocation5 + $0x2] sm:$0xff] }
 0xbdc   : > { %v15090_v4 = vpop.eup %15089  ;;  %9847 = vst [vmem:[#allocation5 + $0x41] sm:$0xff] %v19743_v34  ;;  %v19757_v37 = vmul.f32 %v15088_v15, %v19725_v29  ;;  %v10462_v9 = vpack.c.bf16 %v19743_v34, %v19740_v5  ;;  %v14847_v15 = vld [vmem:[%s20499_s12 + $0x120] sm:$0xff]   ;;  %v14860_v5 = vld [vmem:[%s20499_s12 + $0x1f0] sm:$0xff]  }
 0xbdd   : > { %v15092_v38 = vpop.eup %15091  ;;  %14332 = vmatmul.mubr.bf16.vlgmr.msra.gmra.mxu1 %v19748_v54  ;;  %9848 = vst [vmem:[#allocation5 + $0x51] sm:$0xff] %v19750_v21  ;;  %v19765_v19 = vpack.c.bf16 %v19750_v21, %v19743_v34  ;;  %v19768_v20 = vmul.f32 %v15090_v4, %v19727_v36  ;;  %v14846_v4 = vld [vmem:[%s20499_s12 + $0x168] sm:$0xff]  }
 0xbde   : > { %14364 = vmatpush3.bf16.msra.mxu1 %v19700_v58  ;;  %9849 = vst [vmem:[#allocation5 + $0x61] sm:$0xff] %v19757_v37  ;;  %v19773_v1 = vmul.f32 %v15092_v38, %v19729_v55  ;;  %v10463_v49 = vpack.c.bf16 %v19757_v37, %v19750_v21  ;;  %v14833_v55 = vld [vmem:[%s20499_s12 + $0x98] sm:$0xff]   ;;  %v14863_v21 = vld [vmem:[%s20499_s12 + $0x1a0] sm:$0xff]  }
 0xbdf   : > { %14335 = vmatprep.mubr.bf16.mxu1 %v19765_v19  ;;  %14365 = vmatprep.subr.bf16.mxu1 %v14827_v63  ;;  %9850 = vst [vmem:[#allocation5 + $0x71] sm:$0xff] %v19768_v20  ;;  %v19798_v8 = vpack.c.bf16 %v19768_v20, %v19757_v37  ;;  %v14862_v37 = vld [vmem:[%s20499_s12 + $0x1e8] sm:$0xff]  }
 0xbe0   : > { %v9874_v10 = vld [vmem:[#allocation5 + $0x10] sm:$0xff]  ;;  %9851 = vst [vmem:[#allocation5 + $0x81] sm:$0xff] %v19773_v1  ;;  %v10464_v58 = vpack.c.bf16 %v19773_v1, %v19768_v20  ;;  %v14864_v20 = vld [vmem:[%s20499_s12 + $0x1e0] sm:$0xff]  }
 0xbe1   : > { %v9881_v53 = vpack.c.bf16 %v9874_v10, %v20901_v51  ;;  %v9875_v59 = vld [vmem:[#allocation5 + $0x20] sm:$0xff]  ;;  %v19800_v29 = vld [vmem:[#allocation5 + $0x12] sm:$0xff] }
 0xbe2   : > { %v19786_v44 = vld [vmem:[#allocation5 + $0x30] sm:$0xff]  ;;  %14366 = vmatpush3.bf16.msra.mxu1 %v14827_v63  ;;  %v10163_v36 = vpack.c.bf16 %v19800_v29, %v10155_v2  ;;  %v10312_v12 = vpack.c.bf16 %v9875_v59, %v9874_v10  ;;  %v10157_v61 = vld [vmem:[#allocation5 + $0x22] sm:$0xff]  ;;  %v10461_v63 = vpack.c.bf16 %v19736_v3, %v19734_v60  ;;  %v14857_v2 = vld [vmem:[%s20499_s12 + $0x1b8] sm:$0xff]  }
 0xbe3   : > { %14355 = vmatprep.mubr.bf16.mxu0 %v9881_v53  ;;  %v19792_v52 = vpack.c.bf16 %v19786_v44, %v9875_v59  ;;  %v19794_v26 = vld [vmem:[#allocation5 + $0x40] sm:$0xff]  ;;  %14367 = vmatprep.subr.bf16.mxu1 %v14829_v16  ;;  %v19855_v25 = vld [vmem:[#allocation5 + $0x32] sm:$0xff]  ;;  %v10610_v10 = vpack.c.bf16 %v10157_v61, %v19800_v29  ;;  %v14853_v59 = vld [vmem:[%s20499_s12 + $0x108] sm:$0xff]  }
 0xbe4   : > { %v19802_v47 = vld [vmem:[#allocation5 + $0x50] sm:$0xff]  ;;  %v19857_v57 = vld [vmem:[#allocation5 + $0x42] sm:$0xff]  ;;  %v19865_v62 = vpack.c.bf16 %v19855_v25, %v10157_v61  ;;  %v10313_v11 = vpack.c.bf16 %v19794_v26, %v19786_v44  ;;  %v14850_v53 = vld [vmem:[%s20499_s12 + $0x158] sm:$0xff]  }
 0xbe5   : > { %14356 = vmatmul.mubr.bf16.vlgmr.msra.gmra.mxu0 %v19792_v52  ;;  %v19810_v23 = vpack.c.bf16 %v19802_v47, %v19794_v26  ;;  %14336 = vmatmul.mubr.bf16.gmra.mxu1 %v19798_v8  ;;  %v19822_v45 = vld [vmem:[#allocation5 + $0x60] sm:$0xff]  ;;  %v19859_v14 = vld [vmem:[#allocation5 + $0x52] sm:$0xff]  ;;  %v14854_v26 = vld [vmem:[%s20499_s12 + $0x148] sm:$0xff]  }
 0xbe6   : > { %14388 = vmatpush3.bf16.msra.mxu0 %v19705_v32  ;;  %14368 = vmatpush3.bf16.msra.mxu1 %v14829_v16  ;;  %v19824_v43 = vld [vmem:[#allocation5 + $0x70] sm:$0xff]  ;;  %v19869_v17 = vpack.c.bf16 %v19859_v14, %v19857_v57  ;;  %v19882_v42 = vld [vmem:[#allocation5 + $0x62] sm:$0xff]  ;;  %v10314_v35 = vpack.c.bf16 %v19822_v45, %v19802_v47  ;;  %v14849_v16 = vld [vmem:[%s20499_s12 + $0x118] sm:$0xff]  }
 0xbe7   : > { %14359 = vmatprep.mubr.bf16.mxu0 %v19810_v23  ;;  %14389 = vmatprep.subr.bf16.mxu0 %v14828_v30  ;;  %v19828_v32 = vpack.c.bf16 %v19824_v43, %v19822_v45  ;;  %v19884_v28 = vld [vmem:[#allocation5 + $0x72] sm:$0xff]  ;;  %v19906_v38 = vld [vmem:[#allocation5 + $0x80] sm:$0xff]  ;;  %v10612_v34 = vpack.c.bf16 %v19882_v42, %v19859_v14  ;;  %v14869_v45 = vld [vmem:[%s20499_s12 + $0x188] sm:$0xff]  }
 0xbe8   : > { %14379 = vmatprep.mubr.bf16.mxu1 %v10163_v36  ;;  %14369 = vmatprep.subr.bf16.mxu1 %v14831_v56  ;;  %v19895_v31 = vpack.c.bf16 %v19884_v28, %v19882_v42  ;;  %v10315_v60 = vpack.c.bf16 %v19906_v38, %v19824_v43  ;;  %v14848_v3 = vld [vmem:[%s20499_s12 + $0x160] sm:$0xff]   ;;  %v14851_v51 = vld [vmem:[%s20499_s12 + $0x110] sm:$0xff]   ;;  %v14861_v36 = vld [vmem:[%s20499_s12 + $0x1a8] sm:$0xff]  }
 0xbe9   : > { %v14852_v44 = vld [vmem:[%s20499_s12 + $0x150] sm:$0xff]   ;;  %v14856_v29 = vld [vmem:[%s20499_s12 + $0x140] sm:$0xff]  }
 0xbea   : > { %14390 = vmatpush3.bf16.msra.mxu0 %v14828_v30  ;;  %14370 = vmatpush3.bf16.msra.mxu1 %v14831_v56  ;;  %v14855_v30 = vld [vmem:[%s20499_s12 + $0x100] sm:$0xff]   ;;  %v14859_v47 = vld [vmem:[%s20499_s12 + $0x1b0] sm:$0xff]   ;;  %v14858_v56 = vld [vmem:[%s20499_s12 + $0x1f8] sm:$0xff]  }
 0xbeb   : > { %14391 = vmatprep.subr.bf16.mxu0 %v14830_v13  ;;  %14371 = vmatprep.subr.bf16.mxu1 %v14833_v55  ;;  %v14868_v43 = vld [vmem:[%s20499_s12 + $0x1d0] sm:$0xff]   ;;  %v14880_v61 = vld [vmem:[%s20499_s12 + $0x200] sm:$0xff]  }
 0xbed   : > { %14360 = vmatmul.mubr.bf16.gmra.mxu0 %v19828_v32 }
 0xbee   : > { %14392 = vmatpush3.bf16.msra.mxu0 %v14830_v13  ;;  %14403 = vmatprep.mubr.bf16.mxu0 %v10312_v12  ;;  %v10611_v13 = vpack.c.bf16 %v19857_v57, %v19855_v25  ;;  %v14873_v12 = vld [vmem:[%s20499_s12 + $0x238] sm:$0xff]  }
 0xbef   : > { %14393 = vmatprep.subr.bf16.mxu0 %v14832_v22  ;;  %14372 = vmatpush3.bf16.msra.mxu1 %v14833_v55 }
 0xbf0   : > { %14373 = vmatprep.subr.bf16.mxu1 %v14835_v27 }
 0xbf2   : > { %14394 = vmatpush3.bf16.msra.mxu0 %v14832_v22  ;;  %v14870_v22 = vld [vmem:[%s20499_s12 + $0x1c8] sm:$0xff]  }
 0xbf3   : > { %14395 = vmatprep.subr.bf16.mxu0 %v14834_v0  ;;  %14374 = vmatpush3.bf16.msra.mxu1 %v14835_v27  ;;  %v14872_v27 = vld [vmem:[%s20499_s12 + $0x1c0] sm:$0xff]  }
 0xbf4   : > { %14375 = vmatprep.subr.bf16.mxu1 %v14837_v40 }
 0xbf6   : > { %14396 = vmatpush3.bf16.msra.mxu0 %v14834_v0  ;;  %v14874_v0 = vld [vmem:[%s20499_s12 + $0x230] sm:$0xff]  }
 0xbf7   : > { %14397 = vmatprep.subr.bf16.mxu0 %v14836_v48  ;;  %14376 = vmatpush3.bf16.msra.mxu1 %v14837_v40  ;;  %v14875_v40 = vld [vmem:[%s20499_s12 + $0x228] sm:$0xff]  }
 0xbf8   : > { %14377 = vmatprep.subr.bf16.mxu1 %v14839_v18 }
 0xbfa   : > { %14398 = vmatpush3.bf16.msra.mxu0 %v14836_v48  ;;  %v20017_v48 = vld [vmem:[#allocation5] sm:$0xff] }
 0xbfb   : > { %14399 = vmatprep.subr.bf16.mxu0 %v14838_v6  ;;  %14378 = vmatpush3.bf16.msra.mxu1 %v14839_v18  ;;  %20902 = vst [vmem:[#allocation40_spill] sm:$0xff] %v20017_v48  ;;  %v10763_v18 = vpack.c.bf16 %v20017_v48, %v19906_v38 }
 0xbfc   : > { %14411 = vmatprep.subr.bf16.mxu1 %v14841_v7 }
 0xbfe   : > { %14400 = vmatpush3.bf16.msra.mxu0 %v14838_v6  ;;  %14380 = vmatmul.mubr.bf16.vlgmr.msra.gmra.mxu1 %v19865_v62 }
 0xbff   : > { %14401 = vmatprep.subr.bf16.mxu0 %v14840_v46  ;;  %14383 = vmatprep.mubr.bf16.mxu1 %v19869_v17 }
 0xc00   : > { %14412 = vmatpush3.bf16.msra.mxu1 %v14841_v7  ;;  %v14878_v7 = vld [vmem:[%s20499_s12 + $0x210] sm:$0xff]  }
 0xc01   : > { %14413 = vmatprep.subr.bf16.mxu1 %v14843_v33 }
 0xc02   : > { %14402 = vmatpush3.bf16.msra.mxu0 %v14840_v46 }
 0xc03   : > { %14435 = vmatprep.subr.bf16.mxu0 %v14842_v41 }
 0xc04   : > { %14414 = vmatpush3.bf16.msra.mxu1 %v14843_v33 }
 0xc05   : > { %14404 = vmatmul.mubr.bf16.vlgmr.msra.gmra.mxu0 %v10313_v11  ;;  %14415 = vmatprep.subr.bf16.mxu1 %v14845_v50  ;;  %v20070_v11 = vld [vmem:[%s20504_s17 + $0x78] sm:$0xff] }
 0xc06   : > { %14407 = vmatprep.mubr.bf16.mxu0 %v10314_v35  ;;  %14436 = vmatpush3.bf16.msra.mxu0 %v14842_v41  ;;  %20903 = vst [vmem:[#allocation24_spill] sm:$0xff] %v20070_v11  ;;  %v20078_v35 = vld [vmem:[%s20504_s17 + $0x70] sm:$0xff] }
 0xc07   : > { %14437 = vmatprep.subr.bf16.mxu0 %v14844_v39  ;;  %14384 = vmatmul.mubr.bf16.gmra.mxu1 %v19895_v31  ;;  %20904 = vst [vmem:[#allocation39_spill] sm:$0xff] %v20078_v35 }
 0xc08   : > { %14416 = vmatpush3.bf16.msra.mxu1 %v14845_v50  ;;  %14427 = vmatprep.mubr.bf16.mxu1 %v10461_v63 }
 0xc09   : > { %14417 = vmatprep.subr.bf16.mxu1 %v14847_v15 }
 0xc0a   : > { %14438 = vmatpush3.bf16.msra.mxu0 %v14844_v39 }
 0xc0b   : > { %14439 = vmatprep.subr.bf16.mxu0 %v14846_v4 }
 0xc0c   : > { %14418 = vmatpush3.bf16.msra.mxu1 %v14847_v15  ;;  %v20087_v15 = vld [vmem:[%s20504_s17 + $0x68] sm:$0xff] }
 0xc0d   : > { %14408 = vmatmul.mubr.bf16.gmra.mxu0 %v10315_v60  ;;  %14419 = vmatprep.subr.bf16.mxu1 %v14849_v16  ;;  %20905 = vst [vmem:[#allocation23_spill] sm:$0xff] %v20087_v15  ;;  %v20107_v60 = vld [vmem:[%s20504_s17 + $0x58] sm:$0xff] }
 0xc0e   : > { %14440 = vmatpush3.bf16.msra.mxu0 %v14846_v4  ;;  %14451 = vmatprep.mubr.bf16.mxu0 %v10610_v10  ;;  %v20096_v4 = vld [vmem:[%s20504_s17 + $0x60] sm:$0xff]  ;;  %20907 = vst [vmem:[#allocation22_spill] sm:$0xff] %v20107_v60 }
 0xc0f   : > { %14441 = vmatprep.subr.bf16.mxu0 %v14848_v3  ;;  %20906 = vst [vmem:[#allocation38_spill] sm:$0xff] %v20096_v4 }
 0xc10   : > { %14420 = vmatpush3.bf16.msra.mxu1 %v14849_v16 }
 0xc11   : > { %14421 = vmatprep.subr.bf16.mxu1 %v14851_v51 }
 0xc12   : > { %14442 = vmatpush3.bf16.msra.mxu0 %v14848_v3  ;;  %v20114_v3 = vld [vmem:[%s20504_s17 + $0x50] sm:$0xff] }
 0xc13   : > { %14443 = vmatprep.subr.bf16.mxu0 %v14850_v53  ;;  %20908 = vst [vmem:[#allocation37_spill] sm:$0xff] %v20114_v3 }
 0xc14   : > { %14422 = vmatpush3.bf16.msra.mxu1 %v14851_v51 }
 0xc15   : > { %14423 = vmatprep.subr.bf16.mxu1 %v14853_v59 }
 0xc16   : > { %14444 = vmatpush3.bf16.msra.mxu0 %v14850_v53  ;;  %v20125_v53 = vld [vmem:[%s20504_s17 + $0x48] sm:$0xff] }
 0xc17   : > { %14445 = vmatprep.subr.bf16.mxu0 %v14852_v44  ;;  %20909 = vst [vmem:[#allocation21_spill] sm:$0xff] %v20125_v53 }
 0xc18   : > { %14424 = vmatpush3.bf16.msra.mxu1 %v14853_v59  ;;  %v20132_v59 = vld [vmem:[%s20504_s17 + $0x40] sm:$0xff] }
 0xc19   : > { %14425 = vmatprep.subr.bf16.mxu1 %v14855_v30  ;;  %20910 = vst [vmem:[#allocation36_spill] sm:$0xff] %v20132_v59 }
 0xc1a   : > { %14446 = vmatpush3.bf16.msra.mxu0 %v14852_v44 }
 0xc1b   : > { %14447 = vmatprep.subr.bf16.mxu0 %v14854_v26 }
 0xc1c   : > { %14426 = vmatpush3.bf16.msra.mxu1 %v14855_v30 }
 0xc1d   : > { %14459 = vmatprep.subr.bf16.mxu1 %v14857_v2 }
 0xc1e   : > { %14448 = vmatpush3.bf16.msra.mxu0 %v14854_v26  ;;  %v20143_v26 = vld [vmem:[%s20504_s17 + $0x38] sm:$0xff] }
 0xc1f   : > { %14449 = vmatprep.subr.bf16.mxu0 %v14856_v29  ;;  %14428 = vmatmul.mubr.bf16.vlgmr.msra.gmra.mxu1 %v10462_v9  ;;  %v19972_v9 = vld [vmem:[#allocation5 + $0x82] sm:$0xff]  ;;  %20911 = vst [vmem:[#allocation20_spill] sm:$0xff] %v20143_v26 }
 0xc20   : > { %14431 = vmatprep.mubr.bf16.mxu1 %v10463_v49  ;;  %14460 = vmatpush3.bf16.msra.mxu1 %v14857_v2  ;;  %v14865_v49 = vld [vmem:[%s20499_s12 + $0x198] sm:$0xff]   ;;  %v10613_v55 = vpack.c.bf16 %v19972_v9, %v19884_v28  ;;  %v11199_v28 = vld [vmem:[%s20502_s15] sm:$0xff]  ;;  %v20150_v2 = vld [vmem:[%s20504_s17 + $0x30] sm:$0xff] }
 0xc21   : > { %14461 = vmatprep.subr.bf16.mxu1 %v14859_v47  ;;  %20912 = vst [vmem:[#allocation35_spill] sm:$0xff] %v20150_v2 }
 0xc22   : > { %14450 = vmatpush3.bf16.msra.mxu0 %v14856_v29 }
 0xc23   : > { %14483 = vmatprep.subr.bf16.mxu0 %v14858_v56 }
 0xc24   : > { %14462 = vmatpush3.bf16.msra.mxu1 %v14859_v47 }
 0xc25   : > { %14452 = vmatmul.mubr.bf16.vlgmr.msra.gmra.mxu0 %v10611_v13  ;;  %14463 = vmatprep.subr.bf16.mxu1 %v14861_v36  ;;  %v20170_v13 = vld [vmem:[%s20504_s17 + $0x20] sm:$0xff] }
 0xc26   : > { %14455 = vmatprep.mubr.bf16.mxu0 %v10612_v34  ;;  %14484 = vmatpush3.bf16.msra.mxu0 %v14858_v56  ;;  %v20161_v56 = vld [vmem:[%s20504_s17 + $0x28] sm:$0xff]  ;;  %20914 = vst [vmem:[#allocation34_spill] sm:$0xff] %v20170_v13  ;;  %v20177_v34 = vld [vmem:[%s20504_s17 + $0x18] sm:$0xff] }
 0xc27   : > { %14485 = vmatprep.subr.bf16.mxu0 %v14860_v5  ;;  %14432 = vmatmul.mubr.bf16.gmra.mxu1 %v10464_v58  ;;  %v14867_v58 = vld [vmem:[%s20499_s12 + $0x190] sm:$0xff]   ;;  %20913 = vst [vmem:[#allocation19_spill] sm:$0xff] %v20161_v56  ;;  %20915 = vst [vmem:[#allocation18_spill] sm:$0xff] %v20177_v34 }
 0xc28   : > { %14464 = vmatpush3.bf16.msra.mxu1 %v14861_v36  ;;  %14475 = vmatprep.mubr.bf16.mxu1 %v19792_v52  ;;  %v14866_v52 = vld [vmem:[%s20499_s12 + $0x1d8] sm:$0xff]  }
 0xc29   : > { %14465 = vmatprep.subr.bf16.mxu1 %v14863_v21 }
 0xc2a   : > { %14486 = vmatpush3.bf16.msra.mxu0 %v14860_v5 }
 0xc2b   : > { %14487 = vmatprep.subr.bf16.mxu0 %v14862_v37 }
 0xc2c   : > { %14466 = vmatpush3.bf16.msra.mxu1 %v14863_v21 }
 0xc2d   : > { %14456 = vmatmul.mubr.bf16.gmra.mxu0 %v10613_v55  ;;  %14467 = vmatprep.subr.bf16.mxu1 %v14865_v49 }
 0xc2e   : > { %14488 = vmatpush3.bf16.msra.mxu0 %v14862_v37  ;;  %14499 = vmatprep.mubr.bf16.mxu0 %v19748_v54  ;;  %v14871_v54 = vld [vmem:[%s20499_s12 + $0x180] sm:$0xff]   ;;  %v20186_v37 = vld [vmem:[%s20504_s17 + $0x10] sm:$0xff] }
 0xc2f   : > { %14489 = vmatprep.subr.bf16.mxu0 %v14864_v20  ;;  %20916 = vst [vmem:[#allocation33_spill] sm:$0xff] %v20186_v37 }
 0xc30   : > { %14468 = vmatpush3.bf16.msra.mxu1 %v14865_v49  ;;  %v20193_v49 = vld [vmem:[%s20504_s17 + $0x8] sm:$0xff] }
 0xc31   : > { %14469 = vmatprep.subr.bf16.mxu1 %v14867_v58  ;;  %20917 = vst [vmem:[#allocation17_spill] sm:$0xff] %v20193_v49 }
 0xc32   : > { %14490 = vmatpush3.bf16.msra.mxu0 %v14864_v20  ;;  %v20202_v20 = vld [vmem:[%s20504_s17] sm:$0xff] }
 0xc33   : > { %14491 = vmatprep.subr.bf16.mxu0 %v14866_v52  ;;  %20918 = vst [vmem:[#allocation32_spill] sm:$0xff] %v20202_v20 }
 0xc34   : > { %14470 = vmatpush3.bf16.msra.mxu1 %v14867_v58 }
 0xc35   : > { %14471 = vmatprep.subr.bf16.mxu1 %v14869_v45 }
 0xc36   : > { %14492 = vmatpush3.bf16.msra.mxu0 %v14866_v52 }
 0xc37   : > { %14493 = vmatprep.subr.bf16.mxu0 %v14868_v43 }
 0xc38   : > { %14472 = vmatpush3.bf16.msra.mxu1 %v14869_v45 }
 0xc39   : > { %14473 = vmatprep.subr.bf16.mxu1 %v14871_v54 }
 0xc3a   : > { %14494 = vmatpush3.bf16.msra.mxu0 %v14868_v43 }
 0xc3b   : > { %14495 = vmatprep.subr.bf16.mxu0 %v14870_v22 }
 0xc3c   : > { %14474 = vmatpush3.bf16.msra.mxu1 %v14871_v54 }
 0xc3d   : > { %14507 = vmatprep.subr.bf16.mxu1 %v14873_v12 }
 0xc3e   : > { %14496 = vmatpush3.bf16.msra.mxu0 %v14870_v22 }
 0xc3f   : > { %14497 = vmatprep.subr.bf16.mxu0 %v14872_v27  ;;  %14476 = vmatmul.mubr.bf16.vlgmr.msra.gmra.mxu1 %v19810_v23  ;;  %v14876_v23 = vld [vmem:[%s20499_s12 + $0x220] sm:$0xff]  }
 0xc40   : > { %14479 = vmatprep.mubr.bf16.mxu1 %v19828_v32  ;;  %14508 = vmatpush3.bf16.msra.mxu1 %v14873_v12  ;;  %v10908_v32 = vld [vmem:[#allocation5 + $0x91] sm:$0xff] }
 0xc41   : > { %14509 = vmatprep.subr.bf16.mxu1 %v14874_v0  ;;  %v10912_v6 = vpack.c.bf16 %v10908_v32, %v19773_v1  ;;  %v11057_v1 = vld [vmem:[#allocation5 + $0x92] sm:$0xff] }
 0xc42   : > { %14498 = vmatpush3.bf16.msra.mxu0 %v14872_v27  ;;  %v11061_v25 = vpack.c.bf16 %v11057_v1, %v19972_v9 }
 0xc44   : > { %14510 = vmatpush3.bf16.msra.mxu1 %v14874_v0 }
 0xc45   : > { %14500 = vmatmul.mubr.bf16.vlgmr.msra.gmra.mxu0 %v19765_v19  ;;  %14511 = vmatprep.subr.bf16.mxu1 %v14875_v40  ;;  %v14877_v19 = vld [vmem:[%s20499_s12 + $0x218] sm:$0xff]  }
 0xc46   : > { %14503 = vmatprep.mubr.bf16.mxu0 %v19798_v8  ;;  %v14879_v8 = vld [vmem:[%s20499_s12 + $0x208] sm:$0xff]  }
 0xc47   : > { %14480 = vmatmul.mubr.bf16.gmra.mxu1 %v10763_v18 }
 0xc48   : > { %14512 = vmatpush3.bf16.msra.mxu1 %v14875_v40  ;;  %14523 = vmatprep.mubr.bf16.mxu1 %v19865_v62 }
 0xc49   : > { %14513 = vmatprep.subr.bf16.mxu1 %v14876_v23 }
 0xc4c   : > { %14514 = vmatpush3.bf16.msra.mxu1 %v14876_v23 }
 0xc4d   : > { %14504 = vmatmul.mubr.bf16.gmra.mxu0 %v10912_v6  ;;  %14515 = vmatprep.subr.bf16.mxu1 %v14877_v19 }
 0xc4e   : > { %14547 = vmatprep.mubr.msk.f32.mxu0 %vm4142_vm5, %v11199_v28 }
 0xc50   : > { %14516 = vmatpush3.bf16.msra.mxu1 %v14877_v19 }
 0xc51   : > { %14517 = vmatprep.subr.bf16.mxu1 %v14878_v7 }
 0xc54   : > { %14518 = vmatpush3.bf16.msra.mxu1 %v14878_v7 }
 0xc55   : > { %14519 = vmatprep.subr.bf16.mxu1 %v14879_v8 }
 0xc58   : > { %14520 = vmatpush3.bf16.msra.mxu1 %v14879_v8 }
 0xc59   : > { %14521 = vmatprep.subr.bf16.mxu1 %v14880_v61 }
 0xc5c   : > { %14522 = vmatpush3.bf16.msra.mxu1 %v14880_v61 }
 0xc5d   : > { %14585 = vmatprep.subr.mxu1 %v20017_v48 }
 0xc5f   : > { %14524 = vmatmul.mubr.bf16.vlgmr.msra.gmra.mxu1 %v19869_v17 }
 0xc60   : > { %14527 = vmatprep.mubr.bf16.mxu1 %v19895_v31  ;;  %14586 = vmatpush3.msra.mxu1 %v20070_v11 }
 0xc61   : > { %14587 = vmatprep.subr.mxu1 %v20017_v48 }
 0xc62   : > { %14588 = vmatpush3.msra.mxu1 %v20078_v35 }
 0xc63   : > { %14589 = vmatprep.subr.mxu1 %v20017_v48 }
 0xc64   : > { %14590 = vmatpush3.msra.mxu1 %v20087_v15 }
 0xc65   : > { %14591 = vmatprep.subr.mxu1 %v20017_v48 }
 0xc66   : > { %14592 = vmatpush3.msra.mxu1 %v20096_v4 }
 0xc67   : > { %14528 = vmatmul.mubr.bf16.gmra.mxu1 %v11061_v25  ;;  %14593 = vmatprep.subr.mxu1 %v20017_v48 }
 0xc68   : > { %14617 = vmatprep.mubr.msk.f32.mxu1 %vm15171_vm2, %v20017_v48  ;;  %14594 = vmatpush3.msra.mxu1 %v20107_v60 }
 0xc69   : > { %14595 = vmatprep.subr.mxu1 %v20017_v48 }
 0xc6a   : > { %14596 = vmatpush3.msra.mxu1 %v20114_v3 }
 0xc6b   : > { %14597 = vmatprep.subr.mxu1 %v20017_v48 }
 0xc6c   : > { %14598 = vmatpush3.msra.mxu1 %v20125_v53 }
 0xc6d   : > { %14599 = vmatprep.subr.mxu1 %v20017_v48 }
 0xc6e   : > { %14600 = vmatpush3.msra.mxu1 %v20132_v59 }
 0xc6f   : > { %14601 = vmatprep.subr.mxu1 %v20017_v48 }
 0xc70   : > { %14602 = vmatpush3.msra.mxu1 %v20143_v26 }
 0xc71   : > { %14603 = vmatprep.subr.mxu1 %v20017_v48 }
 0xc72   : > { %14604 = vmatpush3.msra.mxu1 %v20150_v2 }
 0xc73   : > { %14605 = vmatprep.subr.mxu1 %v20017_v48 }
 0xc74   : > { %14606 = vmatpush3.msra.mxu1 %v20161_v56 }
 0xc75   : > { %14607 = vmatprep.subr.mxu1 %v20017_v48 }
 0xc76   : > { %14608 = vmatpush3.msra.mxu1 %v20170_v13 }
 0xc77   : > { %14609 = vmatprep.subr.mxu1 %v20017_v48 }
 0xc78   : > { %14610 = vmatpush3.msra.mxu1 %v20177_v34 }
 0xc79   : > { %14611 = vmatprep.subr.mxu1 %v20017_v48 }
 0xc7a   : > { %14612 = vmatpush3.msra.mxu1 %v20186_v37 }
 0xc7b   : > { %14613 = vmatprep.subr.mxu1 %v20017_v48 }
 0xc7c   : > { %14614 = vmatpush3.msra.mxu1 %v20193_v49 }
 0xc7d   : > { %14615 = vmatprep.subr.mxu1 %v20017_v48 }
 0xc7e   : > { %14616 = vmatpush3.msra.mxu1 %v20202_v20 }
 0xc7f   : > { %14639 = vmatprep.subr.bf16.mxu1 %v20017_v48 }
 0xc9d   : > { %v20045_v57 = vpop.f32.mrf.mxu1 }
 0xc9f   : > { %v20047_v14 = vpop.f32.mrf.mxu1 }
 0xca1   : > { %v20049_v46 = vpop.f32.mrf.mxu1 }
 0xca3   : > { %v20051_v62 = vpop.f32.mrf.mxu1 }
 0xca5   : > { %v20053_v33 = vpop.f32.mrf.mxu0  ;;  %v20055_v17 = vpop.f32.mrf.mxu1 }
 0xca7   : > { %v20057_v41 = vpop.f32.mrf.mxu0  ;;  %v20059_v50 = vpop.f32.mrf.mxu1 }
 0xca9   : > { %v20061_v42 = vpop.f32.mrf.mxu0  ;;  %v20072_v39 = vpop.f32.mrf.mxu1 }
 0xcab   : > { %v20081_v31 = vpop.f32.mrf.mxu0  ;;  %v20090_v63 = vpop.f32.mrf.mxu1 }
 0xcad   : > { %v20099_v38 = vpop.f32.mrf.mxu0 }
 0xcae   : > { %v10149_v48 = vadd.f32 %v20099_v38, %v20055_v17  ;;  %v10136_v17 = vadd.f32 %v20061_v42, %v20049_v46  ;;  %v10128_v46 = vadd.f32 %v20081_v31, %v20051_v62 }
 0xcaf   : > { %v20117_v10 = vpop.f32.mrf.mxu0 }
 0xcb1   : > { %v20135_v44 = vpop.f32.mrf.mxu0 }
 0xcb2   : > { %v10152_v15 = vadd.f32 %v20135_v44, %v20072_v39  ;;  %v10141_v39 = vadd.f32 %v20117_v10, %v20059_v50 }
 0xcb3   : > { %v20153_v29 = vpop.f32.mrf.mxu0 }
 0xcbe   : > { %v20101_v16 = vpop.f32.mrf.mxu1 }
 0xcc0   : > { %v20119_v51 = vpop.f32.mrf.mxu1 }
 0xcc2   : > { %v20137_v30 = vpop.f32.mrf.mxu1 }
 0xcc4   : > { %v20155_v47 = vpop.f32.mrf.mxu1 }
 0xcc5   : > { %v20164_v36 = vpop.f32.mrf.mxu0 }
 0xcc7   : > { %v14385_v5 = vpop.f32.mrf.mxu1  ;;  %v20180_v21 = vpop.f32.mrf.mxu0 }
 0xcc9   : > { %v10281_v9 = vpop.f32.mrf.mxu1  ;;  %v20196_v55 = vpop.f32.mrf.mxu0 }
 0xcca   : > { %v10300_v38 = vadd.f32 %v10281_v9, %v10141_v39 }
 0xccb   : > { %v14386_v58 = vpop.f32.mrf.mxu1  ;;  %v20207_v52 = vpop.f32.mrf.mxu0 }
 0xccd   : > { %v10284_v45 = vpop.f32.mrf.mxu1  ;;  %v14409_v43 = vpop.f32.mrf.mxu0 }
 0xccf   : > { %v10430_v22 = vpop.f32.mrf.mxu0 }
 0xcd0   : > { %v10449_v50 = vadd.f32 %v10430_v22, %v10300_v38 }
 0xcd1   : > { %v14410_v27 = vpop.f32.mrf.mxu0 }
 0xcd3   : > { %v10433_v40 = vpop.f32.mrf.mxu0 }
 0xcdf   : > { %v20209_v54 = vpop.f32.mrf.mxu1 }
 0xce1   : > { %v20211_v12 = vpop.f32.mrf.mxu1 }
 0xce3   : > { %v20213_v0 = vpop.f32.mrf.mxu1 }
 0xce5   : > { %v20215_v18 = vpop.f32.mrf.mxu1  ;;  %v20217_v23 = vpop.f32.mrf.mxu0 }
 0xce7   : > { %v14433_v32 = vpop.f32.mrf.mxu1  ;;  %v20219_v19 = vpop.f32.mrf.mxu0 }
 0xce8   : > { %20919 = vst [vmem:[#allocation16_spill] sm:$0xff] %v20219_v19 }
 0xce9   : > { %v10579_v6 = vpop.f32.mrf.mxu1  ;;  %v20221_v7 = vpop.f32.mrf.mxu0 }
 0xceb   : > { %v14434_v8 = vpop.f32.mrf.mxu1  ;;  %v20223_v61 = vpop.f32.mrf.mxu0 }
 0xced   : > { %v10582_v1 = vpop.f32.mrf.mxu1  ;;  %v14457_v25 = vpop.f32.mrf.mxu0 }
 0xcef   : > { %v10728_v24 = vpop.f32.mrf.mxu0 }
 0xcf1   : > { %v14458_v49 = vpop.f32.mrf.mxu0 }
 0xcf3   : > { %v10731_v34 = vpop.f32.mrf.mxu0 }
 0xcff   : > { %v20225_v28 = vpop.f32.mrf.mxu1 }
 0xd00   : > { %20920 = vst [vmem:[#allocation31_spill] sm:$0xff] %v20225_v28 }
 0xd01   : > { %v20227_v20 = vpop.f32.mrf.mxu1 }
 0xd02   : > { %20921 = vst [vmem:[#allocation15_spill] sm:$0xff] %v20227_v20  ;;  %v10303_v20 = vadd.f32 %v14386_v58, %v10152_v15 }
 0xd03   : > { %v20229_v37 = vpop.f32.mrf.mxu1 }
 0xd04   : > { %v10452_v19 = vadd.f32 %v14410_v27, %v10303_v20 }
 0xd05   : > { %v20231_v13 = vpop.f32.mrf.mxu1  ;;  %v20233_v56 = vpop.f32.mrf.mxu0 }
 0xd06   : > { %20922 = vst [vmem:[#allocation30_spill] sm:$0xff] %v20231_v13  ;;  %20923 = vst [vmem:[#allocation14_spill] sm:$0xff] %v20233_v56  ;;  %v10302_v56 = vadd.f32 %v14385_v5, %v10149_v48  ;;  %v10133_v48 = vadd.f32 %v20053_v33, %v20045_v57  ;;  %v10125_v33 = vadd.f32 %v20057_v41, %v20047_v14 }
 0xd07   : > { %v14481_v2 = vpop.f32.mrf.mxu1  ;;  %v20235_v26 = vpop.f32.mrf.mxu0 }
 0xd08   : > { %20924 = vst [vmem:[#allocation29_spill] sm:$0xff] %v20235_v26  ;;  %v10144_v26 = vadd.f32 %v20153_v29, %v20090_v63  ;;  %v10451_v44 = vadd.f32 %v14409_v43, %v10302_v56  ;;  %v10299_v29 = vadd.f32 %v20137_v30, %v10136_v17  ;;  %v10298_v42 = vadd.f32 %v20101_v16, %v10133_v48 }
 0xd09   : > { %v10878_v59 = vpop.f32.mrf.mxu1  ;;  %v20237_v53 = vpop.f32.mrf.mxu0 }
 0xd0a   : > { %20925 = vst [vmem:[#allocation13_spill] sm:$0xff] %v20237_v53  ;;  %v10301_v28 = vadd.f32 %v10284_v45, %v10144_v26  ;;  %v10448_v9 = vadd.f32 %v20196_v55, %v10299_v29  ;;  %v10447_v30 = vadd.f32 %v20164_v36, %v10298_v42  ;;  %v20946_v42 = vld [vmem:[#allocation21_spill] sm:$0xff] }
 0xd0b   : > { %v14482_v3 = vpop.f32.mrf.mxu1  ;;  %v20239_v60 = vpop.f32.mrf.mxu0 }
 0xd0c   : > { %20926 = vst [vmem:[#allocation48_spill] sm:$0xff] %v20239_v60  ;;  %v10450_v58 = vadd.f32 %v10433_v40, %v10301_v28  ;;  %v10296_v40 = vadd.f32 %v20119_v51, %v10125_v33  ;;  %v20953_v33 = vld [vmem:[#allocation33_spill] sm:$0xff] }
 0xd0d   : > { %v10881_v4 = vpop.f32.mrf.mxu1  ;;  %v14505_v35 = vpop.f32.mrf.mxu0 }
 0xd0e   : > { %v10599_v26 = vadd.f32 %v10582_v1, %v10450_v58 }
 0xd0f   : > { %v11027_v53 = vpop.f32.mrf.mxu0  ;;  %v20937_v58 = vld [vmem:[#allocation29_spill] sm:$0xff] }
 0xd11   : > { %v14506_v5 = vpop.f32.mrf.mxu0 }
 0xd13   : > { %v11030_v22 = vpop.f32.mrf.mxu0 }
 0xd1f   : > { %v20243_v11 = vpop.f32.mrf.mxu1 }
 0xd20   : > { %20927 = vst [vmem:[#allocation49_spill] sm:$0xff] %v20243_v11  ;;  %v10601_v11 = vadd.f32 %v14434_v8, %v10452_v19  ;;  %v20929_v19 = vld [vmem:[#allocation31_spill] sm:$0xff] }
 0xd21   : > { %v20247_v13 = vpop.f32.mrf.mxu1 }
 0xd22   : > { %20928 = vst [vmem:[#allocation50_spill] sm:$0xff] %v20247_v13  ;;  %v10600_v13 = vadd.f32 %v14433_v32, %v10451_v44  ;;  %v10750_v63 = vadd.f32 %v14458_v49, %v10601_v11  ;;  %v10598_v11 = vadd.f32 %v10579_v6, %v10449_v50  ;;  %v10748_v49 = vadd.f32 %v10731_v34, %v10599_v26  ;;  %v20940_v50 = vld [vmem:[#allocation24_spill] sm:$0xff]  ;;  %v20943_v26 = vld [vmem:[#allocation38_spill] sm:$0xff] }
 0xd23   : > { %v20251_v60 = vpop.f32.mrf.mxu1  ;;  %v10596_v34 = vadd.f32 %v20209_v54, %v10447_v30  ;;  %v20954_v30 = vld [vmem:[#allocation17_spill] sm:$0xff] }
 0xd24   : > { %v10749_v10 = vadd.f32 %v14457_v25, %v10600_v13  ;;  %v10900_v56 = vadd.f32 %v14482_v3, %v10750_v63  ;;  %v10297_v13 = vadd.f32 %v20155_v47, %v10128_v46  ;;  %v10597_v3 = vadd.f32 %v20213_v0, %v10448_v9  ;;  %v20945_v46 = vld [vmem:[#allocation37_spill] sm:$0xff]  ;;  %v20947_v9 = vld [vmem:[#allocation36_spill] sm:$0xff] }
 0xd25   : > { %v20257_v15 = vpop.f32.mrf.mxu1  ;;  %v10747_v31 = vadd.f32 %v10728_v24, %v10598_v11  ;;  %v10898_v27 = vadd.f32 %v10881_v4, %v10748_v49  ;;  %v10445_v0 = vadd.f32 %v20180_v21, %v10296_v40  ;;  %v10745_v24 = vadd.f32 %v20217_v23, %v10596_v34  ;;  %v20931_v23 = vld [vmem:[#allocation16_spill] sm:$0xff]  ;;  %v20949_v11 = vld [vmem:[#allocation35_spill] sm:$0xff] }
 0xd26   : > { %v10899_v43 = vadd.f32 %v14481_v2, %v10749_v10  ;;  %v11049_v57 = vadd.f32 %v14506_v5, %v10900_v56  ;;  %v10446_v2 = vadd.f32 %v20207_v52, %v10297_v13  ;;  %v10746_v14 = vadd.f32 %v20221_v7, %v10597_v3  ;;  %v20930_v7 = vld [vmem:[#allocation13_spill] sm:$0xff]  ;;  %v20942_v10 = vld [vmem:[#allocation23_spill] sm:$0xff]  ;;  %v20944_v56 = vld [vmem:[#allocation22_spill] sm:$0xff] }
 0xd27   : > { %v14529_v20 = vpop.f32.mrf.mxu1  ;;  %v10897_v41 = vadd.f32 %v10878_v59, %v10747_v31  ;;  %v11047_v36 = vadd.f32 %v11030_v22, %v10898_v27  ;;  %v10594_v54 = vadd.f32 %v20211_v12, %v10445_v0  ;;  %v10895_v6 = vadd.f32 %v20929_v19, %v10745_v24  ;;  %v20934_v12 = vld [vmem:[#allocation15_spill] sm:$0xff]  ;;  %v20936_v17 = vld [vmem:[#allocation49_spill] sm:$0xff]  ;;  %v20955_v13 = vld [vmem:[#allocation32_spill] sm:$0xff] }
 0xd28   : > { %v11048_v16 = vadd.f32 %v14505_v35, %v10899_v43  ;;  %v10595_v35 = vadd.f32 %v20215_v18, %v10446_v2  ;;  %v10896_v4 = vadd.f32 %v20229_v37, %v10746_v14  ;;  %v20932_v18 = vld [vmem:[#allocation14_spill] sm:$0xff]  ;;  %v20950_v49 = vld [vmem:[#allocation19_spill] sm:$0xff]  ;;  %v20956_v3 = vld [vmem:[#allocation44_spill] sm:$0xff] }
 0xd29   : > { %v11176_v45 = vpop.f32.mrf.mxu1  ;;  %v11046_v51 = vadd.f32 %v11027_v53, %v10897_v41  ;;  %v10743_v1 = vadd.f32 %v20931_v23, %v10594_v54  ;;  %v11044_v25 = vadd.f32 %v20932_v18, %v10895_v6  ;;  %v20933_v37 = vld [vmem:[#allocation30_spill] sm:$0xff]  ;;  %v12438_v22 = vld [vmem:[%s20501_s14 + $0x3] ss:$0 sm:$0xff]  ;;  %v20962_v23 = vld [vmem:[#allocation45_spill] sm:$0xff] }
 0xd2a   : > { %v11197_v47 = vadd.f32 %v14529_v20, %v11048_v16  ;;  %v10744_v59 = vadd.f32 %v20223_v61, %v10595_v35  ;;  %v11045_v8 = vadd.f32 %v20930_v7, %v10896_v4  ;;  %v20935_v61 = vld [vmem:[#allocation48_spill] sm:$0xff]  ;;  %v20938_v29 = vld [vmem:[#allocation50_spill] sm:$0xff]  ;;  %v20959_v7 = vld [vmem:[#allocation47_spill] sm:$0xff] }
 0xd2b   : > { %v14530_v62 = vpop.f32.mrf.mxu1  ;;  %v11195_v21 = vadd.f32 %v11176_v45, %v11046_v51  ;;  %v10893_v39 = vadd.f32 %v20934_v12, %v10743_v1  ;;  %v11193_v38 = vadd.f32 %v20936_v17, %v11044_v25  ;;  %v20939_v20 = vld [vmem:[#allocation40_spill] sm:$0xff]  ;;  %v20951_v43 = vld [vmem:[#allocation34_spill] sm:$0xff]  ;;  %v11502_v1 = vld [vmem:[%s20503_s16 + $0x8] sm:$0xff] }
 0xd2c   : > { %v11198_v55 = vadd.f32 %v14530_v62, %v11049_v57  ;;  %v10894_v53 = vadd.f32 %v20933_v37, %v10744_v59  ;;  %v11194_v28 = vadd.f32 %v20251_v60, %v11045_v8  ;;  %v11200_v60 = vld [vmem:[%s20502_s15 + $0x8] sm:$0xff]  ;;  %v20948_v45 = vld [vmem:[#allocation20_spill] sm:$0xff]  ;;  %v20952_v57 = vld [vmem:[#allocation18_spill] sm:$0xff] }
 0xd2d   : > { %v11179_v32 = vpop.f32.mrf.mxu1  ;;  %v11042_v63 = vadd.f32 %v20937_v58, %v10893_v39  ;;  %v11501_v54 = vld [vmem:[%s20503_s16] sm:$0xff]  ;;  %v20957_v19 = vld [vmem:[#allocation46_spill] sm:$0xff]  ;;  %v20960_v8 = vld [vmem:[#allocation85_spill] sm:$0xff] }
 0xd2e   : > { %14531 = vmatprep.subr.mxu0 %v11198_v55  ;;  %v11196_v52 = vadd.f32 %v11179_v32, %v11047_v36  ;;  %v11043_v44 = vadd.f32 %v20935_v61, %v10894_v53  ;;  %v20958_v6 = vld [vmem:[#allocation28_spill] sm:$0xff]  ;;  %v20963_v18 = vld [vmem:[#allocation83_spill] sm:$0xff]  ;;  %v14882_v37 = vld [vmem:[%s20500_s13 + $0x10] sm:$0xff]  }
 0xd2f   : > { %14532 = vmatpush3.msra.mxu0 %v11198_v55  ;;  %v11191_v5 = vadd.f32 %v20938_v29, %v11042_v63  ;;  %v14881_v25 = vld [vmem:[%s20500_s13 + $0x18] sm:$0xff]   ;;  %v14883_v53 = vld [vmem:[%s20500_s13 + $0x8] sm:$0xff]   ;;  %v14886_v39 = vld [vmem:[%s20505_s18 + $0x30] sm:$0xff]  }
 0xd30   : > { %14533 = vmatprep.subr.mxu0 %v11197_v47  ;;  %v11192_v48 = vadd.f32 %v20257_v15, %v11043_v44  ;;  %v20941_v15 = vld [vmem:[#allocation39_spill] sm:$0xff]  ;;  %v14887_v61 = vld [vmem:[%s20505_s18 + $0x28] sm:$0xff]   ;;  %v14888_v44 = vld [vmem:[%s20505_s18 + $0x20] sm:$0xff]  }
 0xd31   : > { %14534 = vmatpush3.msra.mxu0 %v11197_v47  ;;  %v14885_v12 = vld [vmem:[%s20505_s18 + $0x38] sm:$0xff]  }
 0xd32   : > { %14535 = vmatprep.subr.mxu0 %v11196_v52  ;;  %v14889_v17 = vld [vmem:[%s20505_s18 + $0x18] sm:$0xff]  }
 0xd33   : > { %14536 = vmatpush3.msra.mxu0 %v11196_v52 }
 0xd34   : > { %14537 = vmatprep.subr.mxu0 %v11195_v21 }
 0xd35   : > { %14538 = vmatpush3.msra.mxu0 %v11195_v21  ;;  %v20961_v21 = vld [vmem:[#allocation80_spill] sm:$0xff] }
 0xd36   : > { %14539 = vmatprep.subr.mxu0 %v11194_v28 }
 0xd37   : > { %14540 = vmatpush3.msra.mxu0 %v11194_v28  ;;  %v14884_v28 = vld [vmem:[%s20500_s13] sm:$0xff]  }
 0xd38   : > { %14541 = vmatprep.subr.mxu0 %v11193_v38 }
 0xd39   : > { %14542 = vmatpush3.msra.mxu0 %v11193_v38 }
 0xd3a   : > { %14543 = vmatprep.subr.mxu0 %v11192_v48 }
 0xd3b   : > { %14544 = vmatpush3.msra.mxu0 %v11192_v48 }
 0xd3c   : > { %14545 = vmatprep.subr.mxu0 %v11191_v5 }
 0xd3d   : > { %14546 = vmatpush3.msra.mxu0 %v11191_v5 }
 0xd3e   : > { %14548 = vmatmul.mubr.msk.f32.vlgmr.msra.gmra.mxu0 %vm4142_vm5, %v11200_v60  ;;  %14550 = vmatprep.subr.mxu0 %v20939_v20 }
 0xd3f   : > { %14551 = vmatpush3.msra.mxu0 %v20940_v50  ;;  %14582 = vmatprep.mubr.msk.f32.mxu0 %vm15171_vm2, %v20939_v20 }
 0xd40   : > { %14552 = vmatprep.subr.mxu0 %v20939_v20 }
 0xd41   : > { %14553 = vmatpush3.msra.mxu0 %v20941_v15 }
 0xd42   : > { %14554 = vmatprep.subr.mxu0 %v20939_v20 }
 0xd43   : > { %14555 = vmatpush3.msra.mxu0 %v20942_v10 }
 0xd44   : > { %14556 = vmatprep.subr.mxu0 %v20939_v20 }
 0xd45   : > { %14557 = vmatpush3.msra.mxu0 %v20943_v26 }
 0xd46   : > { %14558 = vmatprep.subr.mxu0 %v20939_v20 }
 0xd47   : > { %14559 = vmatpush3.msra.mxu0 %v20944_v56 }
 0xd48   : > { %14560 = vmatprep.subr.mxu0 %v20939_v20 }
 0xd49   : > { %14561 = vmatpush3.msra.mxu0 %v20945_v46 }
 0xd4a   : > { %14562 = vmatprep.subr.mxu0 %v20939_v20 }
 0xd4b   : > { %14563 = vmatpush3.msra.mxu0 %v20946_v42  ;;  %v11287_v42 = vld [vmem:[%s20501_s14 + $0x4] sm:$0x1] }
 0xd4c   : > { %14564 = vmatprep.subr.mxu0 %v20939_v20 }
 0xd4d   : > { %14565 = vmatpush3.msra.mxu0 %v20947_v9  ;;  %v20964_v9 = vld [vmem:[#allocation12_spill] sm:$0xff] }
 0xd4e   : > { %14566 = vmatprep.subr.mxu0 %v20939_v20 }
 0xd4f   : > { %14567 = vmatpush3.msra.mxu0 %v20948_v45 }
 0xd50   : > { %14568 = vmatprep.subr.mxu0 %v20939_v20 }
 0xd51   : > { %14569 = vmatpush3.msra.mxu0 %v20949_v11 }
 0xd52   : > { %14570 = vmatprep.subr.mxu0 %v20939_v20 }
 0xd53   : > { %14571 = vmatpush3.msra.mxu0 %v20950_v49 }
 0xd54   : > { %14572 = vmatprep.subr.mxu0 %v20939_v20 }
 0xd55   : > { %14573 = vmatpush3.msra.mxu0 %v20951_v43 }
 0xd56   : > { %14574 = vmatprep.subr.mxu0 %v20939_v20 }
 0xd57   : > { %14575 = vmatpush3.msra.mxu0 %v20952_v57 }
 0xd58   : > { %14576 = vmatprep.subr.mxu0 %v20939_v20 }
 0xd59   : > { %14577 = vmatpush3.msra.mxu0 %v20953_v33 }
 0xd5a   : > { %14578 = vmatprep.subr.mxu0 %v20939_v20 }
 0xd5b   : > { %14579 = vmatpush3.msra.mxu0 %v20954_v30 }
 0xd5c   : > { %14580 = vmatprep.subr.mxu0 %v20939_v20 }
 0xd5d   : > { %14581 = vmatpush3.msra.mxu0 %v20955_v13 }
 0xd5e   : > { %14620 = vmatprep.subr.mxu0 %v20956_v3 }
 0xdfe   : > { %v14549_v62 = vpop.f32.mrf.mxu0 }
 0xdff   : > { %v20335_v31 = vadd.f32 %v14549_v62, %v12438_v22  ;;  %v14892_v62 = vld [vmem:[%s20505_s18] sm:$0xff]  }
 0xe00   : > { %v11278_v16 = vpop.f32.mrf.mxu0 }
 0xe01   : > { %v20337_v27 = vadd.f32 %v12438_v22, %v11278_v16  ;;  %v11313_v55 = vmul.f32 %v20335_v31, %v20335_v31  ;;  %v14891_v22 = vld [vmem:[%s20505_s18 + $0x8] sm:$0xff]  }
 0xe03   : > { %v11305_v40 = vadd.f32 %v20335_v31, %v20337_v27  ;;  %v11312_v2 = vmul.f32 %v20337_v27, %v20337_v27 }
 0xe05   : > { %v11306_v34 = vrot.slane %v11305_v40, 4  ;;  %v11314_v32 = vadd.f32 %v11313_v55, %v11312_v2 }
 0xe07   : > { %v11307_v14 = vadd.f32 %v11306_v34, %v11305_v40  ;;  %v11315_v41 = vrot.slane %v11314_v32, 4 }
 0xe09   : > { %v11308_v36 = vrot.slane %v11307_v14, 2  ;;  %v11316_v47 = vadd.f32 %v11315_v41, %v11314_v32 }
 0xe0b   : > { %v11309_v0 = vadd.f32 %v11308_v36, %v11307_v14  ;;  %v11317_v24 = vrot.slane %v11316_v47, 2 }
 0xe0d   : > { %v11310_v35 = vrot.slane %v11309_v0, 1  ;;  %v11318_v4 = vadd.f32 %v11317_v24, %v11316_v47 }
 0xe0f   : > { %v11311_v51 = vadd.f32 %v11310_v35, %v11309_v0  ;;  %v11319_v52 = vrot.slane %v11318_v4, 1 }
 0xe11   : > { %v11320_v59 = vadd.f32 %v11319_v52, %v11318_v4  ;;  %14583 = vmatmul.mubr.f32.vlgmr.msra.gmra.mxu0 %v11311_v51 }
 0xe12   : > { %14621 = vmatpush3.msra.mxu0 %v20956_v3  ;;  %14636 = vmatprep.mubr.msk.f32.mxu0 %vm4142_vm5, %v11501_v54  ;;  %v14890_v3 = vld [vmem:[%s20505_s18 + $0x10] sm:$0xff]  }
 0xe13   : > { %14622 = vmatprep.subr.mxu0 %v20957_v19  ;;  %14618 = vmatmul.mubr.f32.vlgmr.msra.gmra.mxu1 %v11320_v59 }
 0xe14   : > { %14623 = vmatpush3.msra.mxu0 %v20957_v19  ;;  %14647 = vmatprep.mubr.msk.bf16.mxu1 %vm15171_vm2, %v20939_v20 }
 0xe15   : > { %14624 = vmatprep.subr.mxu0 %v20958_v6  ;;  %14640 = vmatpush3.bf16.msra.mxu1 %v14881_v25 }
 0xe16   : > { %14625 = vmatpush3.msra.mxu0 %v20958_v6  ;;  %14641 = vmatprep.subr.bf16.mxu1 %v20939_v20 }
 0xe17   : > { %14626 = vmatprep.subr.mxu0 %v20959_v7 }
 0xe18   : > { %14627 = vmatpush3.msra.mxu0 %v20959_v7  ;;  %v12452_v7 = vld [vmem:[%s20506_s19] ss:$0 sm:$0xff] }
 0xe19   : > { %14628 = vmatprep.subr.mxu0 %v20960_v8  ;;  %14642 = vmatpush3.bf16.msra.mxu1 %v14882_v37 }
 0xe1a   : > { %14629 = vmatpush3.msra.mxu0 %v20960_v8  ;;  %14643 = vmatprep.subr.bf16.mxu1 %v20939_v20 }
 0xe1b   : > { %14630 = vmatprep.subr.mxu0 %v20961_v21 }
 0xe1c   : > { %14631 = vmatpush3.msra.mxu0 %v20961_v21 }
 0xe1d   : > { %14632 = vmatprep.subr.mxu0 %v20962_v23  ;;  %14644 = vmatpush3.bf16.msra.mxu1 %v14883_v53 }
 0xe1e   : > { %14633 = vmatpush3.msra.mxu0 %v20962_v23  ;;  %14645 = vmatprep.subr.bf16.mxu1 %v20939_v20 }
 0xe1f   : > { %14634 = vmatprep.subr.mxu0 %v20963_v18 }
 0xe20   : > { %14635 = vmatpush3.msra.mxu0 %v20963_v18 }
 0xe21   : > { %14637 = vmatmul.mubr.msk.f32.vlgmr.msra.gmra.mxu0 %vm4142_vm5, %v11502_v1  ;;  %14651 = vmatprep.subr.bf16.mxu0 %v20939_v20 }
 0xe22   : > { %14667 = vmatprep.mubr.msk.bf16.mxu0 %vm15171_vm2, %v20939_v20  ;;  %14652 = vmatpush3.bf16.msra.mxu0 %v14885_v12 }
 0xe23   : > { %14653 = vmatprep.subr.bf16.mxu0 %v20939_v20  ;;  %14646 = vmatpush3.bf16.msra.mxu1 %v14884_v28 }
 0xe26   : > { %14654 = vmatpush3.bf16.msra.mxu0 %v14886_v39 }
 0xe27   : > { %14655 = vmatprep.subr.bf16.mxu0 %v20939_v20 }
 0xe2a   : > { %14656 = vmatpush3.bf16.msra.mxu0 %v14887_v61 }
 0xe2b   : > { %14657 = vmatprep.subr.bf16.mxu0 %v20939_v20 }
 0xe2e   : > { %14658 = vmatpush3.bf16.msra.mxu0 %v14888_v44 }
 0xe2f   : > { %14659 = vmatprep.subr.bf16.mxu0 %v20939_v20 }
 0xe32   : > { %14660 = vmatpush3.bf16.msra.mxu0 %v14889_v17 }
 0xe33   : > { %14661 = vmatprep.subr.bf16.mxu0 %v20939_v20 }
 0xe36   : > { %14662 = vmatpush3.bf16.msra.mxu0 %v14890_v3 }
 0xe37   : > { %14663 = vmatprep.subr.bf16.mxu0 %v20939_v20 }
 0xe3a   : > { %14664 = vmatpush3.bf16.msra.mxu0 %v14891_v22 }
 0xe3b   : > { %14665 = vmatprep.subr.bf16.mxu0 %v20939_v20  ;;  %v12446_v20 = vld [vmem:[%s20501_s14 + $0x6] ss:$0 sm:$0xff] }
 0xe3e   : > { %14666 = vmatpush3.bf16.msra.mxu0 %v14892_v62 }
 0xed1   : > { %v11387_v38 = vpop.f32.mrf.mxu0 }
 0xed2   : > { %v11391_v58 = vmul.f32 0.00390625, %v11387_v38 }
 0xed3   : > { %v11458_v63 = vpop.f32.mrf.mxu1  ;;  %v14584_v48 = vpop.f32.mrf.mxu0 }
 0xed4   : > { %v11463_v29 = vmul.f32 %v11391_v58, %v11391_v58  ;;  %v11462_v5 = vmul.f32 0.00390625, %v11458_v63  ;;  %v11471_v45 = vrot.slane %v11391_v58, %v20964_v9 }
 0xed5   : > { %v14619_v60 = vpop.f32.mrf.mxu1 }
 0xed6   : > { %v11464_v50 = vsub.f32 %v11462_v5, %v11463_v29  ;;  %v11472_v43 = vsub.f32 %v20337_v27, %v11471_v45  ;;  %v11473_v57 = vsub.f32 %v20335_v31, %v11471_v45  ;;  %v12441_v31 = vld [vmem:[%s20501_s14 + $0x5] ss:$0 sm:$0xff] }
 0xed8   : > { %v11465_v15 = vmax.f32 %v11464_v50, 0.0 }
 0xeda   : > { %v11466_v10 = vadd.f32 1e-05, %v11465_v15 }
 0xedc   : > { %15093 = vrsqrt.f32 %v11466_v10 }
 0xee1   : > { %v14638_v26 = vpop.f32.mrf.mxu0 }
 0xee3   : > { %v11575_v56 = vpop.f32.mrf.mxu0 }
 0xee4   : > { %v11584_v46 = vpack.c.bf16 %v14638_v26, %v11575_v56 }
 0xee6   : > { %14648 = vmatmul.mubr.msk.bf16.vlgmr.msra.gmra.mxu1 %vm4142_vm5, %v11584_v46 }
 0xee9   : > { %v15094_v11 = vpop.eup %15093 }
 0xeea   : > { %v11474_v49 = vmul.f32 %v15094_v11, %v11287_v42 }
 0xeec   : > { %v11478_v33 = vrot.slane %v11474_v49, %v20964_v9 }
 0xeee   : > { %v11479_v30 = vmul.f32 %v11478_v33, %v11472_v43  ;;  %v11480_v13 = vmul.f32 %v11478_v33, %v11473_v57 }
 0xef0   : > { %v11485_v16 = vadd.f32 %v12441_v31, %v11479_v30  ;;  %v11486_v27 = vadd.f32 %v12441_v31, %v11480_v13 }
 0xef2   : > { %v12442_v55 = vmul.f32 -1.442695, %v11485_v16  ;;  %v12443_v40 = vmul.f32 -1.442695, %v11486_v27 }
 0xef4   : > { %15095 = vpow2.f32 %v12442_v55 }
 0xef5   : > { %15097 = vpow2.f32 %v12443_v40 }
 0xf01   : > { %v15096_v2 = vpop.eup %15095 }
 0xf02   : > { %v15098_v34 = vpop.eup %15097  ;;  %v11493_v32 = vadd.f32 1.0, %v15096_v2 }
 0xf03   : > { %v11494_v14 = vadd.f32 1.0, %v15098_v34 }
 0xf04   : > { %15099 = vrcp.f32 %v11493_v32 }
 0xf05   : > { %15101 = vrcp.f32 %v11494_v14 }
 0xf11   : > { %v15100_v36 = vpop.eup %15099 }
 0xf12   : > { %v15102_v47 = vpop.eup %15101  ;;  %v11499_v4 = vmul.f32 %v15100_v36, %v11485_v16 }
 0xf13   : > { %v11500_v51 = vmul.f32 %v15102_v47, %v11486_v27 }
 0xfa6   : > { %v11659_v41 = vpop.f32.mrf.mxu1 }
 0xfa7   : > { %v11660_v24 = vadd.f32 %v12446_v20, %v11659_v41 }
 0xfa8   : > { %v14649_v0 = vpop.f32.mrf.mxu1 }
 0xfa9   : > { %v11666_v59 = vadd.f32 %v11660_v24, %v11499_v4 }
 0xfaa   : > { %v11662_v35 = vpop.f32.mrf.mxu1 }
 0xfab   : > { %v11663_v52 = vadd.f32 %v12446_v20, %v11662_v35 }
 0xfac   : > { %v14650_v54 = vpop.f32.mrf.mxu1 }
 0xfad   : > { %v11667_v19 = vadd.f32 %v11663_v52, %v11500_v51 }
 0xfaf   : > { %v11668_v6 = vpack.c.bf16 %v11667_v19, %v11666_v59 }
 0xfb1   : > { %14668 = vmatmul.mubr.bf16.vlgmr.msra.gmra.mxu0 %v11668_v6 }
0x1071   : > { %v11774_v8 = vpop.f32.mrf.mxu0 }
0x1072   : > { %v11775_v21 = vadd.f32 %v12452_v7, %v11774_v8 }
0x1073   : > { %v14669_v23 = vpop.f32.mrf.mxu0 }
0x1074   : > { %11781 = vst.msk [vmem:[%s622_s28] sm:$0xff] %vm906_vm1, %v11775_v21 }
0x1075   : > { %v11777_v1 = vpop.f32.mrf.mxu0 }
0x1076   : > { %v11778_v18 = vadd.f32 %v12452_v7, %v11777_v1 }
0x1077   : > { %v14670_v25 = vpop.f32.mrf.mxu0 }
0x1078   : > { %11782 = vst.msk [vmem:[%s622_s28 + $0x8] sm:$0xff] %vm906_vm1, %v11778_v18 }
0x1079   : > { %15121 = shalt.err (!%p15118_p3)
}
0x107a   : > { %s15122_s0 = scalar_lea.hbm %s20444_s9, 256  ;;  %s15126_s3 = scalar_lea.hbm %s20507_s20, 512 }
0x107b   : > { %p15123_p4 = scmp.ne.s32.totalorder %s20444_s9, %s15122_s0  ;;  %p15127_p9 = scmp.lt.s32.totalorder %s20444_s9, %s20507_s20 }
0x107c   : > { %p15128_p10 = scmp.lt.s32.totalorder %s15126_s3, %s15122_s0 }
0x107d   : > { %p15124_p7 = pnand %p15123_p4, %p15318_p5 }
0x107e   : > { %p15129_p11 = por %p15128_p10, %p15127_p9 }
0x107f   : > { %p15125_p8 = pneg %p15124_p7 }
0x1081   : > { %p15130_p12 = pnand %p15129_p11, %p15125_p8 }
0x1083   : > { %15133 = shalt.err (!%p15130_p12)
}
0x1084   : > { %s15173_s6 = smov 128   ;;  %s15174_s2 = smov 8  }
0x1085   : > { %14673 = dma.vmem_to_hbm [thread:$0]  (%p15318_p5), %s20439_s25, 256, %s20444_s9, %s20447_s21, %s15173_s6, %s15173_s6, %s15174_s2  }
0x1086 PF: > { %p14679_p13 = scmp.ge.s32.totalorder %s15168_s24, 2  ;;  %s11812_s27 = sand.u32 1, %s15156_s1  }
0x1087   : > { %s11813_s0 = scalar_lea.sflag [#allocation7], %s11812_s27 }
0x1088   : > { %p14676_p0 = pnand %p14679_p13, %p15322_p6 }
0x108a   : > { %p14677_p1 = pneg %p14676_p0 }
0x108c   : > { %15151 = dma.done.wait (%p14677_p1), %s11813_s0, 256  }
0x108d   : > { %15153 = vsyncadd (%p14677_p1), %s11813_s0, 4294967040  ;;  %s20965_s24 = sld [smem:[#allocation10_spill]]  ;;  %s20968_s1 = smov %s15160_s22 }
0x108e   : > { %s20966_s28 = sld [smem:[#allocation9_spill]] }
0x108f   : > { %s20967_s23 = sld [smem:[#allocation11_spill]] }
0x1093   : > { %p30_p2 = scmp.ge.s32.totalorder %s20965_s24, 4  }
0x1094   : > { %s20969_s22 = smov %s20966_s28 }
0x1095   :  { %32 = sbr.rel (!%p30_p2) target bundleno = 12 (0xc), region = 147 }
0x109a   :  { %11818 = vsyncpa [#allocation7], 1 }
0x109b   :  { %11820 = vsyncpa [#allocation7 + $0x1], 1 }

</bundles_post_ra>
